<compile_context>
chip_gen: v5e
topology: v5e:2x2
jax: 0.10.0
libtpu: 0.0.40
codegen_flags: <defaults>
</compile_context>

<pallas_src>
import functools

import numpy as np
import jax
import jax.numpy as jnp
from jax import lax
from jax.experimental import pallas as pl
from jax.experimental.pallas import tpu as pltpu


K1, S1 = 8, 4        # conv1 kernel / stride (fixed by the DQN architecture)
S2 = 2               # conv2 stride
S3 = 1               # conv3 stride
TILE_N = 8           # images per grid step (row tile for all matmuls)
OUT_LANES = 128      # fc2 output features padded to one full lane tile


def _round_up(x, m):
    return -(-x // m) * m


# ---------------------------------------------------------------------------
# Fused forward kernel: conv1 -> conv2 -> conv3 -> fc1 -> fc2 for one tile of
# TILE_N images, everything VMEM-resident.
# ---------------------------------------------------------------------------
def _dqn_fused_kernel(patches_ref, w1_ref, b1_ref,
                      s2_ref, w2_ref, b2_ref,
                      s3_ref, w3_ref, b3_ref,
                      wfc1_ref, bfc1_ref, wfc2_ref, bfc2_ref,
                      out_ref, p2_ref, p3_ref, *fc_scratch,
                      overlap_fc):
    f32 = jnp.float32
    wd = w1_ref.dtype                      # weight dtype (f32 or bf16)
    tile = out_ref.shape[0]                # images per step (8)
    c1 = w1_ref.shape[1]                   # conv1 out channels (32)
    c2 = w2_ref.shape[1]                   # conv2 out channels (64)
    c3 = w3_ref.shape[1]                   # conv3 out channels (64)
    kk2 = w2_ref.shape[0] // c1            # conv2 kernel positions (16)
    kk3 = w3_ref.shape[0] // c2            # conv3 kernel positions (9)
    m1p = s2_ref.shape[1]                  # padded conv1 rows per image (104)
    m2 = s2_ref.shape[0] // kk2            # conv2 output positions per image (16)
    m3 = p3_ref.shape[0] // tile           # conv3 output positions per image (4)

    def mm(a, w):
        # MXU matmul: cast the activation operand to the weight dtype (bf16 in
        # mixed mode -> native bf16 MXU), always accumulate in f32.
        return jnp.dot(a.astype(wd), w, preferred_element_type=f32)

    if overlap_fc:
        # Single grid step: start the big FC-weight DMAs now, hide them behind
        # the conv stack, wait right before fc1.
        wfc1_vmem, wfc2_vmem, fc_sem = fc_scratch
        cp1 = pltpu.make_async_copy(wfc1_ref, wfc1_vmem, fc_sem.at[0])
        cp2 = pltpu.make_async_copy(wfc2_ref, wfc2_vmem, fc_sem.at[1])
        cp1.start()
        cp2.start()

    # ---- conv1 + ReLU: all tile images in one (tile*m1p, 256)@(256, 32) ----
    a1 = mm(patches_ref[...], w1_ref[...])
    a1 = jnp.maximum(a1 + b1_ref[...], 0.0)                 # (tile*m1p, c1) f32

    # ---- conv2: per-image exact 0/1 selection matmul writes 32-lane column
    # blocks of the im2col scratch, then ONE wide-K matmul -------------------
    s2 = s2_ref[...].astype(f32)
    for b in range(tile):
        t2 = jnp.dot(s2, a1[b * m1p:(b + 1) * m1p, :],
                     preferred_element_type=f32)            # (kk2*m2, c1)
        for k in range(kk2):
            p2_ref[b * m2:(b + 1) * m2, k * c1:(k + 1) * c1] = \
                t2[k * m2:(k + 1) * m2, :]
    a2 = mm(p2_ref[...], w2_ref[...])                       # (tile*m2, c2)
    a2 = jnp.maximum(a2 + b2_ref[...], 0.0)                 # rows = b*m2 + m

    # ---- conv3: one whole-tile selection matmul + 9 column-block writes,
    # then ONE wide-K matmul.  p3 rows are spatial-major (m*tile + b) so the
    # fc1 contraction below uses aligned row-block slices --------------------
    t3 = jnp.dot(s3_ref[...].astype(f32), a2,
                 preferred_element_type=f32)                # (kk3*m3*tile, c2)
    blk = m3 * tile
    for k in range(kk3):
        p3_ref[:, k * c2:(k + 1) * c2] = t3[k * blk:(k + 1) * blk, :]
    a3 = mm(p3_ref[...], w3_ref[...])                       # (m3*tile, c3)
    a3 = jnp.maximum(a3 + b3_ref[...], 0.0)                 # rows = m*tile + b

    # ---- FC weights (possibly from the overlapped DMA) ---------------------
    if overlap_fc:
        cp1.wait()
        cp2.wait()
        wfc1 = wfc1_vmem[...]
        wfc2 = wfc2_vmem[...]
    else:
        wfc1 = wfc1_ref[...]
        wfc2 = wfc2_ref[...]

    # ---- fc1 + ReLU: m3 independent (tile, c3)@(c3, hidden) matmuls, tree-
    # summed (torch channel-major flatten folded into wfc1 row order) --------
    parts = [mm(a3[m * tile:(m + 1) * tile, :],
                wfc1[m * c3:(m + 1) * c3, :]) for m in range(m3)]
    while len(parts) > 1:
        nxt = [parts[i] + parts[i + 1] for i in range(0, len(parts) - 1, 2)]
        if len(parts) % 2:
            nxt.append(parts[-1])
        parts = nxt
    h = jnp.maximum(parts[0] + bfc1_ref[...], 0.0)          # (tile, hidden) f32

    # ---- fc2: lane-dense (tile, 128) store ----------------------------------
    out_ref[...] = mm(h, wfc2) + bfc2_ref[...]


# ---------------------------------------------------------------------------
# conv1 im2col (plain JAX; fuses into ~1 XLA fusion on the raw HBM input).
# Column order (kh, kw, c) matches _conv_weight_matrix below.
# ---------------------------------------------------------------------------
def _im2col_conv1(x_nchw, kh, kw, stride):
    N, C, H, W = x_nchw.shape
    oh = (H - kh) // stride + 1
    ow = (W - kw) // stride + 1
    x = jnp.transpose(x_nchw, (0, 2, 3, 1))                  # NHWC
    if (H % stride == 0 and W % stride == 0
            and kh % stride == 0 and kw % stride == 0):
        # Stride decomposition: ka*kb (=4) unit-stride slices instead of 64.
        ka, kb = kh // stride, kw // stride
        x6 = x.reshape(N, H // stride, stride, W // stride, stride, C)
        blocks = jnp.stack(
            [x6[:, a:a + oh, :, b:b + ow, :, :]
             for a in range(ka) for b in range(kb)], axis=1)
        blocks = blocks.reshape(N, ka, kb, oh, stride, ow, stride, C)
        patches = jnp.transpose(blocks, (0, 3, 5, 1, 4, 2, 6, 7))
        return patches.reshape(N * oh * ow, kh * kw * C)
    cols = [x[:, i:i + stride * oh:stride, j:j + stride * ow:stride, :]
            for i in range(kh) for j in range(kw)]
    return jnp.stack(cols, axis=3).reshape(N * oh * ow, kh * kw * C)


# ---------------------------------------------------------------------------
# One-time parameter preparation (torch layout -> kernel-ready matrices).
# Batch-size independent (fixes the review's batch-baking concern).
# ---------------------------------------------------------------------------
def _conv_weight_matrix(w_oihw):
    oc, ic, kh, kw = w_oihw.shape
    return jnp.transpose(w_oihw, (2, 3, 1, 0)).reshape(kh * kw * ic, oc)


def prepare_params(raw, input_hw, param_dtype=jnp.float32):
    H, W = input_hw
    oc1, _, k1, _ = raw["w1"].shape
    oc2, _, k2, _ = raw["w2"].shape
    oc3, _, k3, _ = raw["w3"].shape
    oh1, ow1 = (H - k1) // S1 + 1, (W - k1) // S1 + 1
    oh2, ow2 = (oh1 - k2) // S2 + 1, (ow1 - k2) // S2 + 1
    oh3, ow3 = (oh2 - k3) // S3 + 1, (ow2 - k3) // S3 + 1
    m1, m2, m3 = oh1 * ow1, oh2 * ow2, oh3 * ow3
    m1p = _round_up(m1, 8)
    hidden = raw["wfc1"].shape[0]
    nact = raw["wfc2"].shape[0]
    assert raw["wfc1"].shape[1] == oc3 * m3

    # conv2 gather: per-image 0/1 selection, row = k*m2 + m, col = conv1 row.
    s2 = np.zeros((k2 * k2 * m2, m1p), np.float32)
    for i in range(k2):
        for j in range(k2):
            k = i * k2 + j
            for t in range(oh2):
                for u in range(ow2):
                    m = t * ow2 + u
                    src = (S2 * t + i) * ow1 + (S2 * u + j)
                    s2[k * m2 + m, src] = 1.0

    # conv3 gather: per-8-image-tile 0/1 selection,
    # row = k*(m3*TILE) + m*TILE + b, col = b*m2 + conv2 spatial index.
    s3 = np.zeros((k3 * k3 * m3 * TILE_N, m2 * TILE_N), np.float32)
    for i in range(k3):
        for j in range(k3):
            k = i * k3 + j
            for t in range(oh3):
                for u in range(ow3):
                    m = t * ow3 + u
                    src = (S3 * t + i) * ow2 + (S3 * u + j)
                    for b in range(TILE_N):
                        s3[k * (m3 * TILE_N) + m * TILE_N + b, b * m2 + src] = 1.0

    # fc1: torch flatten is flat = c*m3 + m (channel-major); reorder rows to the
    # kernel's spatial-major a3 layout: wfc1s row = m*oc3 + c.
    wfc1s = (jnp.transpose(raw["wfc1"], (1, 0))
             .reshape(oc3, m3, hidden)
             .transpose(1, 0, 2)
             .reshape(m3 * oc3, hidden))

    wfc2p = jnp.pad(jnp.transpose(raw["wfc2"], (1, 0)),
                    ((0, 0), (0, OUT_LANES - nact)))
    bfc2p = jnp.pad(raw["bfc2"], (0, OUT_LANES - nact)).reshape(1, OUT_LANES)

    wdt = param_dtype
    return {
        "w1mat": _conv_weight_matrix(raw["w1"]).astype(wdt),
        "b1": raw["b1"].reshape(1, oc1).astype(jnp.float32),
        "s2sel": jnp.asarray(s2).astype(wdt),
        "w2mat": _conv_weight_matrix(raw["w2"]).astype(wdt),
        "b2": raw["b2"].reshape(1, oc2).astype(jnp.float32),
        "s3sel": jnp.asarray(s3).astype(wdt),
        "w3mat": _conv_weight_matrix(raw["w3"]).astype(wdt),
        "b3": raw["b3"].reshape(1, oc3).astype(jnp.float32),
        "wfc1s": wfc1s.astype(wdt),
        "bfc1": raw["bfc1"].reshape(1, hidden).astype(jnp.float32),
        "wfc2p": wfc2p.astype(wdt),
        "bfc2p": bfc2p.astype(jnp.float32),
    }


# ---------------------------------------------------------------------------
# Forward pass: one fused pallas_call with a parallel grid over batch tiles.
# ---------------------------------------------------------------------------
@functools.partial(jax.jit, static_argnums=(2,))
def dqn_forward(kp, x_nchw, n_actions):
    N = x_nchw.shape[0]
    kdim, c1 = kp["w1mat"].shape
    kk2c1, c2 = kp["w2mat"].shape
    kk3c2, c3 = kp["w3mat"].shape
    hidden = kp["wfc1s"].shape[1]
    kk2 = kk2c1 // c1
    kk3 = kk3c2 // c2
    m1p = kp["s2sel"].shape[1]
    m2 = kp["s2sel"].shape[0] // kk2
    m3 = kp["wfc1s"].shape[0] // c3

    npad = _round_up(max(N, 1), TILE_N)
    steps = npad // TILE_N
    overlap_fc = (steps == 1)   # hide FC-weight DMA behind conv when gridless

    patches = _im2col_conv1(x_nchw, K1, K1, S1)              # (N*m1, kdim)
    assert patches.shape[1] == kdim, "prepared params do not match input shape"
    m1 = patches.shape[0] // N
    assert m1 <= m1p
    patches = patches.reshape(N, m1, kdim)
    patches = jnp.pad(patches, ((0, npad - N), (0, m1p - m1), (0, 0)))
    patches = patches.reshape(npad * m1p, kdim)

    if overlap_fc:
        fc1_spec = pl.BlockSpec(memory_space=pl.ANY)
        fc2_spec = pl.BlockSpec(memory_space=pl.ANY)
        extra_scratch = [
            pltpu.VMEM(kp["wfc1s"].shape, kp["wfc1s"].dtype),
            pltpu.VMEM(kp["wfc2p"].shape, kp["wfc2p"].dtype),
            pltpu.SemaphoreType.DMA((2,)),
        ]
    else:
        fc1_spec = pl.BlockSpec(kp["wfc1s"].shape, lambda i: (0, 0))
        fc2_spec = pl.BlockSpec(kp["wfc2p"].shape, lambda i: (0, 0))
        extra_scratch = []

    def rep(arr):  # weight / bias replicated across the batch grid (resident)
        return pl.BlockSpec(arr.shape, lambda i: (0, 0))

    in_specs = [
        pl.BlockSpec((TILE_N * m1p, kdim), lambda i: (i, 0)),   # conv1 patches
        rep(kp["w1mat"]), rep(kp["b1"]),
        rep(kp["s2sel"]), rep(kp["w2mat"]), rep(kp["b2"]),
        rep(kp["s3sel"]), rep(kp["w3mat"]), rep(kp["b3"]),
        fc1_spec, rep(kp["bfc1"]),
        fc2_spec, rep(kp["bfc2p"]),
    ]
    out_spec = pl.BlockSpec((TILE_N, OUT_LANES), lambda i: (i, 0))

    scratch_shapes = [
        pltpu.VMEM((TILE_N * m2, kk2c1), jnp.float32),   # conv2 im2col block
        pltpu.VMEM((m3 * TILE_N, kk3c2), jnp.float32),   # conv3 im2col block
    ] + extra_scratch

    inputs = (patches,
              kp["w1mat"], kp["b1"],
              kp["s2sel"], kp["w2mat"], kp["b2"],
              kp["s3sel"], kp["w3mat"], kp["b3"],
              kp["wfc1s"], kp["bfc1"],
              kp["wfc2p"], kp["bfc2p"])

    flops = 2 * steps * (
        TILE_N * m1p * kdim * c1                       # conv1
        + TILE_N * (kk2 * m2) * m1p * c1               # conv2 gather
        + (TILE_N * m2) * kk2c1 * c2                   # conv2
        + (kk3 * m3 * TILE_N) * (m2 * TILE_N) * c2     # conv3 gather
        + (m3 * TILE_N) * kk3c2 * c3                   # conv3
        + (m3 * TILE_N) * c3 * hidden                  # fc1
        + TILE_N * hidden * OUT_LANES)                 # fc2
    bytes_accessed = int(sum(int(a.size) * a.dtype.itemsize for a in inputs)
                         + npad * OUT_LANES * 4)

    q_pad = pl.pallas_call(
        functools.partial(_dqn_fused_kernel, overlap_fc=overlap_fc),
        out_shape=jax.ShapeDtypeStruct((npad, OUT_LANES), jnp.float32),
        grid=(steps,),
        in_specs=in_specs,
        out_specs=out_spec,
        scratch_shapes=scratch_shapes,
        compiler_params=pltpu.CompilerParams(
            dimension_semantics=("parallel",)),
        cost_estimate=pl.CostEstimate(flops=flops, transcendentals=0,
                                      bytes_accessed=bytes_accessed),
    )(*inputs)
    return q_pad[:N, :n_actions]


# ---------------------------------------------------------------------------
# Deterministic synthetic parameters (torch-layout, mirroring the nn.Module).
# ---------------------------------------------------------------------------
def init_params(key, in_channels, conv_out_size, n_actions):
    keys = jax.random.split(key, 10)
    scale = 0.05

    def u(k, shape):
        return jax.random.uniform(k, shape, jnp.float32, -scale, scale)

    return {
        "w1": u(keys[0], (32, in_channels, 8, 8)), "b1": u(keys[1], (32,)),
        "w2": u(keys[2], (64, 32, 4, 4)), "b2": u(keys[3], (64,)),
        "w3": u(keys[4], (64, 64, 3, 3)), "b3": u(keys[5], (64,)),
        "wfc1": u(keys[6], (512, conv_out_size)), "bfc1": u(keys[7], (512,)),
        "wfc2": u(keys[8], (n_actions, 512)), "bfc2": u(keys[9], (n_actions,)),
    }


# ---------------------------------------------------------------------------
# Pure-JAX reference (lax.conv) for correctness checks.
# ---------------------------------------------------------------------------
def dqn_forward_ref(raw, x):
    def conv(x, w, b, s):
        y = lax.conv_general_dilated(
            x, w, window_strides=(s, s), padding="VALID",
            dimension_numbers=("NCHW", "OIHW", "NCHW"))
        return jnp.maximum(y + b[None, :, None, None], 0.0)

    x = conv(x, raw["w1"], raw["b1"], S1)
    x = conv(x, raw["w2"], raw["b2"], S2)
    x = conv(x, raw["w3"], raw["b3"], S3)
    flat = x.reshape(x.shape[0], -1)                 # torch .view (channel-major)
    h = jnp.maximum(flat @ raw["wfc1"].T + raw["bfc1"], 0.0)
    return h @ raw["wfc2"].T + raw["bfc2"]


if __name__ == "__main__":
    # Shapes consistent with the module:
    #   input (N, 4, 44, 44) -> conv1 10x10 -> conv2 4x4 -> conv3 2x2
    #   conv_out_size = 64*2*2 = 256 ; n_actions = 3 (Freeway)
    N, C, H, W = 2, 4, 44, 44
    n_actions = 3

    oh1 = (H - 8) // 4 + 1
    oh2 = (oh1 - 4) // 2 + 1
    oh3 = (oh2 - 3) // 1 + 1
    conv_out_size = 64 * oh3 * oh3

    key = jax.random.PRNGKey(0)
    k_x, k_p, k_x2 = jax.random.split(key, 3)
    x = jax.random.normal(k_x, (N, C, H, W), jnp.float32)
    raw = init_params(k_p, C, conv_out_size, n_actions)

    # --- f32 weights, single grid step (overlapped FC-weight DMA path) -------
    kp32 = prepare_params(raw, (H, W), param_dtype=jnp.float32)
    q = jax.block_until_ready(dqn_forward(kp32, x, n_actions))
    q_ref = jax.block_until_ready(dqn_forward_ref(raw, x))
    assert q.shape == (N, n_actions), q.shape
    assert jnp.allclose(q, q_ref, atol=1e-3, rtol=1e-3), (
        float(jnp.max(jnp.abs(q - q_ref))))

    # --- bf16 weights + multi-step parallel batch grid (v6e/v7x path) --------
    N2 = 10                                  # -> npad=16, grid=(2,)
    x2 = jax.random.normal(k_x2, (N2, C, H, W), jnp.float32)
    kpbf = prepare_params(raw, (H, W), param_dtype=jnp.bfloat16)
    q_bf = jax.block_until_ready(dqn_forward(kpbf, x2, n_actions))
    q2_ref = jax.block_until_ready(dqn_forward_ref(raw, x2))
    assert q_bf.shape == (N2, n_actions), q_bf.shape
    assert jnp.allclose(q_bf, q2_ref, atol=1e-2, rtol=5e-2), (
        float(jnp.max(jnp.abs(q_bf - q2_ref))))

    print("KERNEL_OK")
</pallas_src>

<mosaic_0001>
module attributes {stable_mosaic.version = 11 : i64} {
  func.func @_dqn_fused_kernel(%arg0: i32, %arg1: memref<832x256xf32, #tpu.memory_space<vmem>>, %arg2: memref<256x32xf32, #tpu.memory_space<vmem>>, %arg3: memref<1x32xf32, #tpu.memory_space<vmem>>, %arg4: memref<256x104xf32, #tpu.memory_space<vmem>>, %arg5: memref<512x64xf32, #tpu.memory_space<vmem>>, %arg6: memref<1x64xf32, #tpu.memory_space<vmem>>, %arg7: memref<288x128xf32, #tpu.memory_space<vmem>>, %arg8: memref<576x64xf32, #tpu.memory_space<vmem>>, %arg9: memref<1x64xf32, #tpu.memory_space<vmem>>, %arg10: memref<256x512xf32, #tpu.memory_space<any>>, %arg11: memref<1x512xf32, #tpu.memory_space<vmem>>, %arg12: memref<512x128xf32, #tpu.memory_space<any>>, %arg13: memref<1x128xf32, #tpu.memory_space<vmem>>, %arg14: memref<8x128xf32, #tpu.memory_space<vmem>>, %arg15: memref<128x512xf32, #tpu.memory_space<vmem>>, %arg16: memref<32x576xf32, #tpu.memory_space<vmem>>, %arg17: memref<256x512xf32, #tpu.memory_space<vmem>>, %arg18: memref<512x128xf32, #tpu.memory_space<vmem>>, %arg19: memref<2x!tpu.dma_semaphore, #tpu.memory_space<semaphore_mem>>) attributes {dimension_semantics = [#tpu.dimension_semantics<parallel>], iteration_bounds = array<i64: 1>, scalar_prefetch = 0 : i64, scratch_operands = 5 : i64, tpu.core_type = #tpu.core_type<tc>, window_params = [{transform_indices = @transform_0, window_bounds = array<i64: 832, 256>}, {pipeline_mode = #tpu.pipeline_mode<synchronous>, transform_indices = @transform_1, window_bounds = array<i64: 256, 32>}, {pipeline_mode = #tpu.pipeline_mode<synchronous>, transform_indices = @transform_2, window_bounds = array<i64: 1, 32>}, {pipeline_mode = #tpu.pipeline_mode<synchronous>, transform_indices = @transform_3, window_bounds = array<i64: 256, 104>}, {pipeline_mode = #tpu.pipeline_mode<synchronous>, transform_indices = @transform_4, window_bounds = array<i64: 512, 64>}, {pipeline_mode = #tpu.pipeline_mode<synchronous>, transform_indices = @transform_5, window_bounds = array<i64: 1, 64>}, {pipeline_mode = #tpu.pipeline_mode<synchronous>, transform_indices = @transform_6, window_bounds = array<i64: 288, 128>}, {pipeline_mode = #tpu.pipeline_mode<synchronous>, transform_indices = @transform_7, window_bounds = array<i64: 576, 64>}, {pipeline_mode = #tpu.pipeline_mode<synchronous>, transform_indices = @transform_8, window_bounds = array<i64: 1, 64>}, {}, {pipeline_mode = #tpu.pipeline_mode<synchronous>, transform_indices = @transform_10, window_bounds = array<i64: 1, 512>}, {}, {pipeline_mode = #tpu.pipeline_mode<synchronous>, transform_indices = @transform_12, window_bounds = array<i64: 1, 128>}, {transform_indices = @transform_13, window_bounds = array<i64: 8, 128>}]} {
    %c0_i32 = arith.constant 0 : i32
    %0 = tpu.memref_slice %arg19[%c0_i32] : memref<2x!tpu.dma_semaphore, #tpu.memory_space<semaphore_mem>> -> memref<1x!tpu.dma_semaphore, #tpu.memory_space<semaphore_mem>>
    %1 = tpu.memref_squeeze %0 : memref<1x!tpu.dma_semaphore, #tpu.memory_space<semaphore_mem>> -> memref<!tpu.dma_semaphore, #tpu.memory_space<semaphore_mem>>
    tpu.enqueue_dma source(%arg10 : memref<256x512xf32, #tpu.memory_space<any>>) target(%arg17 : memref<256x512xf32, #tpu.memory_space<vmem>>) target_semaphore(%1 : memref<!tpu.dma_semaphore, #tpu.memory_space<semaphore_mem>>)
    %c1_i32 = arith.constant 1 : i32
    %2 = tpu.memref_slice %arg19[%c1_i32] : memref<2x!tpu.dma_semaphore, #tpu.memory_space<semaphore_mem>> -> memref<1x!tpu.dma_semaphore, #tpu.memory_space<semaphore_mem>>
    %3 = tpu.memref_squeeze %2 : memref<1x!tpu.dma_semaphore, #tpu.memory_space<semaphore_mem>> -> memref<!tpu.dma_semaphore, #tpu.memory_space<semaphore_mem>>
    tpu.enqueue_dma source(%arg12 : memref<512x128xf32, #tpu.memory_space<any>>) target(%arg18 : memref<512x128xf32, #tpu.memory_space<vmem>>) target_semaphore(%3 : memref<!tpu.dma_semaphore, #tpu.memory_space<semaphore_mem>>)
    %c0 = arith.constant 0 : index
    %c0_0 = arith.constant 0 : index
    %4 = vector.load %arg1[%c0, %c0_0] : memref<832x256xf32, #tpu.memory_space<vmem>>, vector<832x256xf32>
    %c0_1 = arith.constant 0 : index
    %c0_2 = arith.constant 0 : index
    %5 = vector.load %arg2[%c0_1, %c0_2] : memref<256x32xf32, #tpu.memory_space<vmem>>, vector<256x32xf32>
    %cst = arith.constant dense<0.000000e+00> : vector<832x32xf32>
    %6 = tpu.matmul %4, %5, %cst {dimension_numbers = #tpu.dot_dimension_numbers<[1], [0], [0], [1], [0, 0, 1, 1], [], []>} : vector<832x256xf32>, vector<256x32xf32>, vector<832x32xf32> -> vector<832x32xf32>
    %c0_3 = arith.constant 0 : index
    %c0_4 = arith.constant 0 : index
    %7 = vector.load %arg3[%c0_3, %c0_4] : memref<1x32xf32, #tpu.memory_space<vmem>>, vector<1x32xf32>
    %8 = vector.broadcast %7 : vector<1x32xf32> to vector<832x32xf32>
    %9 = arith.addf %6, %8 : vector<832x32xf32>
    %cst_5 = arith.constant 0.000000e+00 : f32
    %10 = vector.broadcast %cst_5 : f32 to vector<832x32xf32>
    %11 = arith.maximumf %9, %10 : vector<832x32xf32>
    %c0_6 = arith.constant 0 : index
    %c0_7 = arith.constant 0 : index
    %12 = vector.load %arg4[%c0_6, %c0_7] : memref<256x104xf32, #tpu.memory_space<vmem>>, vector<256x104xf32>
    %13 = vector.extract_strided_slice %11 {offsets = [0, 0], sizes = [104, 32], strides = [1, 1]} : vector<832x32xf32> to vector<104x32xf32>
    %cst_8 = arith.constant dense<0.000000e+00> : vector<256x32xf32>
    %14 = tpu.matmul %12, %13, %cst_8 {dimension_numbers = #tpu.dot_dimension_numbers<[1], [0], [0], [1], [0, 0, 1, 1], [], []>} : vector<256x104xf32>, vector<104x32xf32>, vector<256x32xf32> -> vector<256x32xf32>
    %15 = vector.extract_strided_slice %14 {offsets = [0, 0], sizes = [16, 32], strides = [1, 1]} : vector<256x32xf32> to vector<16x32xf32>
    %c0_9 = arith.constant 0 : index
    %c0_10 = arith.constant 0 : index
    %16 = vector.load %arg15[%c0_9, %c0_10] : memref<128x512xf32, #tpu.memory_space<vmem>>, vector<16x32xf32>
    tpu.vector_store %arg15[%c0_9, %c0_10], %15 {strides = array<i32>} : memref<128x512xf32, #tpu.memory_space<vmem>>, vector<16x32xf32>,
    %17 = vector.extract_strided_slice %14 {offsets = [16, 0], sizes = [16, 32], strides = [1, 1]} : vector<256x32xf32> to vector<16x32xf32>
    %c0_11 = arith.constant 0 : index
    %c32 = arith.constant 32 : index
    %18 = vector.load %arg15[%c0_11, %c32] : memref<128x512xf32, #tpu.memory_space<vmem>>, vector<16x32xf32>
    tpu.vector_store %arg15[%c0_11, %c32], %17 {strides = array<i32>} : memref<128x512xf32, #tpu.memory_space<vmem>>, vector<16x32xf32>,
    %19 = vector.extract_strided_slice %14 {offsets = [32, 0], sizes = [16, 32], strides = [1, 1]} : vector<256x32xf32> to vector<16x32xf32>
    %c0_12 = arith.constant 0 : index
    %c64 = arith.constant 64 : index
    %20 = vector.load %arg15[%c0_12, %c64] : memref<128x512xf32, #tpu.memory_space<vmem>>, vector<16x32xf32>
    tpu.vector_store %arg15[%c0_12, %c64], %19 {strides = array<i32>} : memref<128x512xf32, #tpu.memory_space<vmem>>, vector<16x32xf32>,
    %21 = vector.extract_strided_slice %14 {offsets = [48, 0], sizes = [16, 32], strides = [1, 1]} : vector<256x32xf32> to vector<16x32xf32>
    %c0_13 = arith.constant 0 : index
    %c96 = arith.constant 96 : index
    %22 = vector.load %arg15[%c0_13, %c96] : memref<128x512xf32, #tpu.memory_space<vmem>>, vector<16x32xf32>
    tpu.vector_store %arg15[%c0_13, %c96], %21 {strides = array<i32>} : memref<128x512xf32, #tpu.memory_space<vmem>>, vector<16x32xf32>,
    %23 = vector.extract_strided_slice %14 {offsets = [64, 0], sizes = [16, 32], strides = [1, 1]} : vector<256x32xf32> to vector<16x32xf32>
    %c0_14 = arith.constant 0 : index
    %c128 = arith.constant 128 : index
    %24 = vector.load %arg15[%c0_14, %c128] : memref<128x512xf32, #tpu.memory_space<vmem>>, vector<16x32xf32>
    tpu.vector_store %arg15[%c0_14, %c128], %23 {strides = array<i32>} : memref<128x512xf32, #tpu.memory_space<vmem>>, vector<16x32xf32>,
    %25 = vector.extract_strided_slice %14 {offsets = [80, 0], sizes = [16, 32], strides = [1, 1]} : vector<256x32xf32> to vector<16x32xf32>
    %c0_15 = arith.constant 0 : index
    %c160 = arith.constant 160 : index
    %26 = vector.load %arg15[%c0_15, %c160] : memref<128x512xf32, #tpu.memory_space<vmem>>, vector<16x32xf32>
    tpu.vector_store %arg15[%c0_15, %c160], %25 {strides = array<i32>} : memref<128x512xf32, #tpu.memory_space<vmem>>, vector<16x32xf32>,
    %27 = vector.extract_strided_slice %14 {offsets = [96, 0], sizes = [16, 32], strides = [1, 1]} : vector<256x32xf32> to vector<16x32xf32>
    %c0_16 = arith.constant 0 : index
    %c192 = arith.constant 192 : index
    %28 = vector.load %arg15[%c0_16, %c192] : memref<128x512xf32, #tpu.memory_space<vmem>>, vector<16x32xf32>
    tpu.vector_store %arg15[%c0_16, %c192], %27 {strides = array<i32>} : memref<128x512xf32, #tpu.memory_space<vmem>>, vector<16x32xf32>,
    %29 = vector.extract_strided_slice %14 {offsets = [112, 0], sizes = [16, 32], strides = [1, 1]} : vector<256x32xf32> to vector<16x32xf32>
    %c0_17 = arith.constant 0 : index
    %c224 = arith.constant 224 : index
    %30 = vector.load %arg15[%c0_17, %c224] : memref<128x512xf32, #tpu.memory_space<vmem>>, vector<16x32xf32>
    tpu.vector_store %arg15[%c0_17, %c224], %29 {strides = array<i32>} : memref<128x512xf32, #tpu.memory_space<vmem>>, vector<16x32xf32>,
    %31 = vector.extract_strided_slice %14 {offsets = [128, 0], sizes = [16, 32], strides = [1, 1]} : vector<256x32xf32> to vector<16x32xf32>
    %c0_18 = arith.constant 0 : index
    %c256 = arith.constant 256 : index
    %32 = vector.load %arg15[%c0_18, %c256] : memref<128x512xf32, #tpu.memory_space<vmem>>, vector<16x32xf32>
    tpu.vector_store %arg15[%c0_18, %c256], %31 {strides = array<i32>} : memref<128x512xf32, #tpu.memory_space<vmem>>, vector<16x32xf32>,
    %33 = vector.extract_strided_slice %14 {offsets = [144, 0], sizes = [16, 32], strides = [1, 1]} : vector<256x32xf32> to vector<16x32xf32>
    %c0_19 = arith.constant 0 : index
    %c288 = arith.constant 288 : index
    %34 = vector.load %arg15[%c0_19, %c288] : memref<128x512xf32, #tpu.memory_space<vmem>>, vector<16x32xf32>
    tpu.vector_store %arg15[%c0_19, %c288], %33 {strides = array<i32>} : memref<128x512xf32, #tpu.memory_space<vmem>>, vector<16x32xf32>,
    %35 = vector.extract_strided_slice %14 {offsets = [160, 0], sizes = [16, 32], strides = [1, 1]} : vector<256x32xf32> to vector<16x32xf32>
    %c0_20 = arith.constant 0 : index
    %c320 = arith.constant 320 : index
    %36 = vector.load %arg15[%c0_20, %c320] : memref<128x512xf32, #tpu.memory_space<vmem>>, vector<16x32xf32>
    tpu.vector_store %arg15[%c0_20, %c320], %35 {strides = array<i32>} : memref<128x512xf32, #tpu.memory_space<vmem>>, vector<16x32xf32>,
    %37 = vector.extract_strided_slice %14 {offsets = [176, 0], sizes = [16, 32], strides = [1, 1]} : vector<256x32xf32> to vector<16x32xf32>
    %c0_21 = arith.constant 0 : index
    %c352 = arith.constant 352 : index
    %38 = vector.load %arg15[%c0_21, %c352] : memref<128x512xf32, #tpu.memory_space<vmem>>, vector<16x32xf32>
    tpu.vector_store %arg15[%c0_21, %c352], %37 {strides = array<i32>} : memref<128x512xf32, #tpu.memory_space<vmem>>, vector<16x32xf32>,
    %39 = vector.extract_strided_slice %14 {offsets = [192, 0], sizes = [16, 32], strides = [1, 1]} : vector<256x32xf32> to vector<16x32xf32>
    %c0_22 = arith.constant 0 : index
    %c384 = arith.constant 384 : index
    %40 = vector.load %arg15[%c0_22, %c384] : memref<128x512xf32, #tpu.memory_space<vmem>>, vector<16x32xf32>
    tpu.vector_store %arg15[%c0_22, %c384], %39 {strides = array<i32>} : memref<128x512xf32, #tpu.memory_space<vmem>>, vector<16x32xf32>,
    %41 = vector.extract_strided_slice %14 {offsets = [208, 0], sizes = [16, 32], strides = [1, 1]} : vector<256x32xf32> to vector<16x32xf32>
    %c0_23 = arith.constant 0 : index
    %c416 = arith.constant 416 : index
    %42 = vector.load %arg15[%c0_23, %c416] : memref<128x512xf32, #tpu.memory_space<vmem>>, vector<16x32xf32>
    tpu.vector_store %arg15[%c0_23, %c416], %41 {strides = array<i32>} : memref<128x512xf32, #tpu.memory_space<vmem>>, vector<16x32xf32>,
    %43 = vector.extract_strided_slice %14 {offsets = [224, 0], sizes = [16, 32], strides = [1, 1]} : vector<256x32xf32> to vector<16x32xf32>
    %c0_24 = arith.constant 0 : index
    %c448 = arith.constant 448 : index
    %44 = vector.load %arg15[%c0_24, %c448] : memref<128x512xf32, #tpu.memory_space<vmem>>, vector<16x32xf32>
    tpu.vector_store %arg15[%c0_24, %c448], %43 {strides = array<i32>} : memref<128x512xf32, #tpu.memory_space<vmem>>, vector<16x32xf32>,
    %45 = vector.extract_strided_slice %14 {offsets = [240, 0], sizes = [16, 32], strides = [1, 1]} : vector<256x32xf32> to vector<16x32xf32>
    %c0_25 = arith.constant 0 : index
    %c480 = arith.constant 480 : index
    %46 = vector.load %arg15[%c0_25, %c480] : memref<128x512xf32, #tpu.memory_space<vmem>>, vector<16x32xf32>
    tpu.vector_store %arg15[%c0_25, %c480], %45 {strides = array<i32>} : memref<128x512xf32, #tpu.memory_space<vmem>>, vector<16x32xf32>,
    %47 = vector.extract_strided_slice %11 {offsets = [104, 0], sizes = [104, 32], strides = [1, 1]} : vector<832x32xf32> to vector<104x32xf32>
    %cst_26 = arith.constant dense<0.000000e+00> : vector<256x32xf32>
    %48 = tpu.matmul %12, %47, %cst_26 {dimension_numbers = #tpu.dot_dimension_numbers<[1], [0], [0], [1], [0, 0, 1, 1], [], []>} : vector<256x104xf32>, vector<104x32xf32>, vector<256x32xf32> -> vector<256x32xf32>
    %49 = vector.extract_strided_slice %48 {offsets = [0, 0], sizes = [16, 32], strides = [1, 1]} : vector<256x32xf32> to vector<16x32xf32>
    %c16 = arith.constant 16 : index
    %c0_27 = arith.constant 0 : index
    %50 = vector.load %arg15[%c16, %c0_27] : memref<128x512xf32, #tpu.memory_space<vmem>>, vector<16x32xf32>
    tpu.vector_store %arg15[%c16, %c0_27], %49 {strides = array<i32>} : memref<128x512xf32, #tpu.memory_space<vmem>>, vector<16x32xf32>,
    %51 = vector.extract_strided_slice %48 {offsets = [16, 0], sizes = [16, 32], strides = [1, 1]} : vector<256x32xf32> to vector<16x32xf32>
    %c16_28 = arith.constant 16 : index
    %c32_29 = arith.constant 32 : index
    %52 = vector.load %arg15[%c16_28, %c32_29] : memref<128x512xf32, #tpu.memory_space<vmem>>, vector<16x32xf32>
    tpu.vector_store %arg15[%c16_28, %c32_29], %51 {strides = array<i32>} : memref<128x512xf32, #tpu.memory_space<vmem>>, vector<16x32xf32>,
    %53 = vector.extract_strided_slice %48 {offsets = [32, 0], sizes = [16, 32], strides = [1, 1]} : vector<256x32xf32> to vector<16x32xf32>
    %c16_30 = arith.constant 16 : index
    %c64_31 = arith.constant 64 : index
    %54 = vector.load %arg15[%c16_30, %c64_31] : memref<128x512xf32, #tpu.memory_space<vmem>>, vector<16x32xf32>
    tpu.vector_store %arg15[%c16_30, %c64_31], %53 {strides = array<i32>} : memref<128x512xf32, #tpu.memory_space<vmem>>, vector<16x32xf32>,
    %55 = vector.extract_strided_slice %48 {offsets = [48, 0], sizes = [16, 32], strides = [1, 1]} : vector<256x32xf32> to vector<16x32xf32>
    %c16_32 = arith.constant 16 : index
    %c96_33 = arith.constant 96 : index
    %56 = vector.load %arg15[%c16_32, %c96_33] : memref<128x512xf32, #tpu.memory_space<vmem>>, vector<16x32xf32>
    tpu.vector_store %arg15[%c16_32, %c96_33], %55 {strides = array<i32>} : memref<128x512xf32, #tpu.memory_space<vmem>>, vector<16x32xf32>,
    %57 = vector.extract_strided_slice %48 {offsets = [64, 0], sizes = [16, 32], strides = [1, 1]} : vector<256x32xf32> to vector<16x32xf32>
    %c16_34 = arith.constant 16 : index
    %c128_35 = arith.constant 128 : index
    %58 = vector.load %arg15[%c16_34, %c128_35] : memref<128x512xf32, #tpu.memory_space<vmem>>, vector<16x32xf32>
    tpu.vector_store %arg15[%c16_34, %c128_35], %57 {strides = array<i32>} : memref<128x512xf32, #tpu.memory_space<vmem>>, vector<16x32xf32>,
    %59 = vector.extract_strided_slice %48 {offsets = [80, 0], sizes = [16, 32], strides = [1, 1]} : vector<256x32xf32> to vector<16x32xf32>
    %c16_36 = arith.constant 16 : index
    %c160_37 = arith.constant 160 : index
    %60 = vector.load %arg15[%c16_36, %c160_37] : memref<128x512xf32, #tpu.memory_space<vmem>>, vector<16x32xf32>
    tpu.vector_store %arg15[%c16_36, %c160_37], %59 {strides = array<i32>} : memref<128x512xf32, #tpu.memory_space<vmem>>, vector<16x32xf32>,
    %61 = vector.extract_strided_slice %48 {offsets = [96, 0], sizes = [16, 32], strides = [1, 1]} : vector<256x32xf32> to vector<16x32xf32>
    %c16_38 = arith.constant 16 : index
    %c192_39 = arith.constant 192 : index
    %62 = vector.load %arg15[%c16_38, %c192_39] : memref<128x512xf32, #tpu.memory_space<vmem>>, vector<16x32xf32>
    tpu.vector_store %arg15[%c16_38, %c192_39], %61 {strides = array<i32>} : memref<128x512xf32, #tpu.memory_space<vmem>>, vector<16x32xf32>,
    %63 = vector.extract_strided_slice %48 {offsets = [112, 0], sizes = [16, 32], strides = [1, 1]} : vector<256x32xf32> to vector<16x32xf32>
    %c16_40 = arith.constant 16 : index
    %c224_41 = arith.constant 224 : index
    %64 = vector.load %arg15[%c16_40, %c224_41] : memref<128x512xf32, #tpu.memory_space<vmem>>, vector<16x32xf32>
    tpu.vector_store %arg15[%c16_40, %c224_41], %63 {strides = array<i32>} : memref<128x512xf32, #tpu.memory_space<vmem>>, vector<16x32xf32>,
    %65 = vector.extract_strided_slice %48 {offsets = [128, 0], sizes = [16, 32], strides = [1, 1]} : vector<256x32xf32> to vector<16x32xf32>
    %c16_42 = arith.constant 16 : index
    %c256_43 = arith.constant 256 : index
    %66 = vector.load %arg15[%c16_42, %c256_43] : memref<128x512xf32, #tpu.memory_space<vmem>>, vector<16x32xf32>
    tpu.vector_store %arg15[%c16_42, %c256_43], %65 {strides = array<i32>} : memref<128x512xf32, #tpu.memory_space<vmem>>, vector<16x32xf32>,
    %67 = vector.extract_strided_slice %48 {offsets = [144, 0], sizes = [16, 32], strides = [1, 1]} : vector<256x32xf32> to vector<16x32xf32>
    %c16_44 = arith.constant 16 : index
    %c288_45 = arith.constant 288 : index
    %68 = vector.load %arg15[%c16_44, %c288_45] : memref<128x512xf32, #tpu.memory_space<vmem>>, vector<16x32xf32>
    tpu.vector_store %arg15[%c16_44, %c288_45], %67 {strides = array<i32>} : memref<128x512xf32, #tpu.memory_space<vmem>>, vector<16x32xf32>,
    %69 = vector.extract_strided_slice %48 {offsets = [160, 0], sizes = [16, 32], strides = [1, 1]} : vector<256x32xf32> to vector<16x32xf32>
    %c16_46 = arith.constant 16 : index
    %c320_47 = arith.constant 320 : index
    %70 = vector.load %arg15[%c16_46, %c320_47] : memref<128x512xf32, #tpu.memory_space<vmem>>, vector<16x32xf32>
    tpu.vector_store %arg15[%c16_46, %c320_47], %69 {strides = array<i32>} : memref<128x512xf32, #tpu.memory_space<vmem>>, vector<16x32xf32>,
    %71 = vector.extract_strided_slice %48 {offsets = [176, 0], sizes = [16, 32], strides = [1, 1]} : vector<256x32xf32> to vector<16x32xf32>
    %c16_48 = arith.constant 16 : index
    %c352_49 = arith.constant 352 : index
    %72 = vector.load %arg15[%c16_48, %c352_49] : memref<128x512xf32, #tpu.memory_space<vmem>>, vector<16x32xf32>
    tpu.vector_store %arg15[%c16_48, %c352_49], %71 {strides = array<i32>} : memref<128x512xf32, #tpu.memory_space<vmem>>, vector<16x32xf32>,
    %73 = vector.extract_strided_slice %48 {offsets = [192, 0], sizes = [16, 32], strides = [1, 1]} : vector<256x32xf32> to vector<16x32xf32>
    %c16_50 = arith.constant 16 : index
    %c384_51 = arith.constant 384 : index
    %74 = vector.load %arg15[%c16_50, %c384_51] : memref<128x512xf32, #tpu.memory_space<vmem>>, vector<16x32xf32>
    tpu.vector_store %arg15[%c16_50, %c384_51], %73 {strides = array<i32>} : memref<128x512xf32, #tpu.memory_space<vmem>>, vector<16x32xf32>,
    %75 = vector.extract_strided_slice %48 {offsets = [208, 0], sizes = [16, 32], strides = [1, 1]} : vector<256x32xf32> to vector<16x32xf32>
    %c16_52 = arith.constant 16 : index
    %c416_53 = arith.constant 416 : index
    %76 = vector.load %arg15[%c16_52, %c416_53] : memref<128x512xf32, #tpu.memory_space<vmem>>, vector<16x32xf32>
    tpu.vector_store %arg15[%c16_52, %c416_53], %75 {strides = array<i32>} : memref<128x512xf32, #tpu.memory_space<vmem>>, vector<16x32xf32>,
    %77 = vector.extract_strided_slice %48 {offsets = [224, 0], sizes = [16, 32], strides = [1, 1]} : vector<256x32xf32> to vector<16x32xf32>
    %c16_54 = arith.constant 16 : index
    %c448_55 = arith.constant 448 : index
    %78 = vector.load %arg15[%c16_54, %c448_55] : memref<128x512xf32, #tpu.memory_space<vmem>>, vector<16x32xf32>
    tpu.vector_store %arg15[%c16_54, %c448_55], %77 {strides = array<i32>} : memref<128x512xf32, #tpu.memory_space<vmem>>, vector<16x32xf32>,
    %79 = vector.extract_strided_slice %48 {offsets = [240, 0], sizes = [16, 32], strides = [1, 1]} : vector<256x32xf32> to vector<16x32xf32>
    %c16_56 = arith.constant 16 : index
    %c480_57 = arith.constant 480 : index
    %80 = vector.load %arg15[%c16_56, %c480_57] : memref<128x512xf32, #tpu.memory_space<vmem>>, vector<16x32xf32>
    tpu.vector_store %arg15[%c16_56, %c480_57], %79 {strides = array<i32>} : memref<128x512xf32, #tpu.memory_space<vmem>>, vector<16x32xf32>,
    %81 = vector.extract_strided_slice %11 {offsets = [208, 0], sizes = [104, 32], strides = [1, 1]} : vector<832x32xf32> to vector<104x32xf32>
    %cst_58 = arith.constant dense<0.000000e+00> : vector<256x32xf32>
    %82 = tpu.matmul %12, %81, %cst_58 {dimension_numbers = #tpu.dot_dimension_numbers<[1], [0], [0], [1], [0, 0, 1, 1], [], []>} : vector<256x104xf32>, vector<104x32xf32>, vector<256x32xf32> -> vector<256x32xf32>
    %83 = vector.extract_strided_slice %82 {offsets = [0, 0], sizes = [16, 32], strides = [1, 1]} : vector<256x32xf32> to vector<16x32xf32>
    %c32_59 = arith.constant 32 : index
    %c0_60 = arith.constant 0 : index
    %84 = vector.load %arg15[%c32_59, %c0_60] : memref<128x512xf32, #tpu.memory_space<vmem>>, vector<16x32xf32>
    tpu.vector_store %arg15[%c32_59, %c0_60], %83 {strides = array<i32>} : memref<128x512xf32, #tpu.memory_space<vmem>>, vector<16x32xf32>,
    %85 = vector.extract_strided_slice %82 {offsets = [16, 0], sizes = [16, 32], strides = [1, 1]} : vector<256x32xf32> to vector<16x32xf32>
    %c32_61 = arith.constant 32 : index
    %c32_62 = arith.constant 32 : index
    %86 = vector.load %arg15[%c32_61, %c32_62] : memref<128x512xf32, #tpu.memory_space<vmem>>, vector<16x32xf32>
    tpu.vector_store %arg15[%c32_61, %c32_62], %85 {strides = array<i32>} : memref<128x512xf32, #tpu.memory_space<vmem>>, vector<16x32xf32>,
    %87 = vector.extract_strided_slice %82 {offsets = [32, 0], sizes = [16, 32], strides = [1, 1]} : vector<256x32xf32> to vector<16x32xf32>
    %c32_63 = arith.constant 32 : index
    %c64_64 = arith.constant 64 : index
    %88 = vector.load %arg15[%c32_63, %c64_64] : memref<128x512xf32, #tpu.memory_space<vmem>>, vector<16x32xf32>
    tpu.vector_store %arg15[%c32_63, %c64_64], %87 {strides = array<i32>} : memref<128x512xf32, #tpu.memory_space<vmem>>, vector<16x32xf32>,
    %89 = vector.extract_strided_slice %82 {offsets = [48, 0], sizes = [16, 32], strides = [1, 1]} : vector<256x32xf32> to vector<16x32xf32>
    %c32_65 = arith.constant 32 : index
    %c96_66 = arith.constant 96 : index
    %90 = vector.load %arg15[%c32_65, %c96_66] : memref<128x512xf32, #tpu.memory_space<vmem>>, vector<16x32xf32>
    tpu.vector_store %arg15[%c32_65, %c96_66], %89 {strides = array<i32>} : memref<128x512xf32, #tpu.memory_space<vmem>>, vector<16x32xf32>,
    %91 = vector.extract_strided_slice %82 {offsets = [64, 0], sizes = [16, 32], strides = [1, 1]} : vector<256x32xf32> to vector<16x32xf32>
    %c32_67 = arith.constant 32 : index
    %c128_68 = arith.constant 128 : index
    %92 = vector.load %arg15[%c32_67, %c128_68] : memref<128x512xf32, #tpu.memory_space<vmem>>, vector<16x32xf32>
    tpu.vector_store %arg15[%c32_67, %c128_68], %91 {strides = array<i32>} : memref<128x512xf32, #tpu.memory_space<vmem>>, vector<16x32xf32>,
    %93 = vector.extract_strided_slice %82 {offsets = [80, 0], sizes = [16, 32], strides = [1, 1]} : vector<256x32xf32> to vector<16x32xf32>
    %c32_69 = arith.constant 32 : index
    %c160_70 = arith.constant 160 : index
    %94 = vector.load %arg15[%c32_69, %c160_70] : memref<128x512xf32, #tpu.memory_space<vmem>>, vector<16x32xf32>
    tpu.vector_store %arg15[%c32_69, %c160_70], %93 {strides = array<i32>} : memref<128x512xf32, #tpu.memory_space<vmem>>, vector<16x32xf32>,
    %95 = vector.extract_strided_slice %82 {offsets = [96, 0], sizes = [16, 32], strides = [1, 1]} : vector<256x32xf32> to vector<16x32xf32>
    %c32_71 = arith.constant 32 : index
    %c192_72 = arith.constant 192 : index
    %96 = vector.load %arg15[%c32_71, %c192_72] : memref<128x512xf32, #tpu.memory_space<vmem>>, vector<16x32xf32>
    tpu.vector_store %arg15[%c32_71, %c192_72], %95 {strides = array<i32>} : memref<128x512xf32, #tpu.memory_space<vmem>>, vector<16x32xf32>,
    %97 = vector.extract_strided_slice %82 {offsets = [112, 0], sizes = [16, 32], strides = [1, 1]} : vector<256x32xf32> to vector<16x32xf32>
    %c32_73 = arith.constant 32 : index
    %c224_74 = arith.constant 224 : index
    %98 = vector.load %arg15[%c32_73, %c224_74] : memref<128x512xf32, #tpu.memory_space<vmem>>, vector<16x32xf32>
    tpu.vector_store %arg15[%c32_73, %c224_74], %97 {strides = array<i32>} : memref<128x512xf32, #tpu.memory_space<vmem>>, vector<16x32xf32>,
    %99 = vector.extract_strided_slice %82 {offsets = [128, 0], sizes = [16, 32], strides = [1, 1]} : vector<256x32xf32> to vector<16x32xf32>
    %c32_75 = arith.constant 32 : index
    %c256_76 = arith.constant 256 : index
    %100 = vector.load %arg15[%c32_75, %c256_76] : memref<128x512xf32, #tpu.memory_space<vmem>>, vector<16x32xf32>
    tpu.vector_store %arg15[%c32_75, %c256_76], %99 {strides = array<i32>} : memref<128x512xf32, #tpu.memory_space<vmem>>, vector<16x32xf32>,
    %101 = vector.extract_strided_slice %82 {offsets = [144, 0], sizes = [16, 32], strides = [1, 1]} : vector<256x32xf32> to vector<16x32xf32>
    %c32_77 = arith.constant 32 : index
    %c288_78 = arith.constant 288 : index
    %102 = vector.load %arg15[%c32_77, %c288_78] : memref<128x512xf32, #tpu.memory_space<vmem>>, vector<16x32xf32>
    tpu.vector_store %arg15[%c32_77, %c288_78], %101 {strides = array<i32>} : memref<128x512xf32, #tpu.memory_space<vmem>>, vector<16x32xf32>,
    %103 = vector.extract_strided_slice %82 {offsets = [160, 0], sizes = [16, 32], strides = [1, 1]} : vector<256x32xf32> to vector<16x32xf32>
    %c32_79 = arith.constant 32 : index
    %c320_80 = arith.constant 320 : index
    %104 = vector.load %arg15[%c32_79, %c320_80] : memref<128x512xf32, #tpu.memory_space<vmem>>, vector<16x32xf32>
    tpu.vector_store %arg15[%c32_79, %c320_80], %103 {strides = array<i32>} : memref<128x512xf32, #tpu.memory_space<vmem>>, vector<16x32xf32>,
    %105 = vector.extract_strided_slice %82 {offsets = [176, 0], sizes = [16, 32], strides = [1, 1]} : vector<256x32xf32> to vector<16x32xf32>
    %c32_81 = arith.constant 32 : index
    %c352_82 = arith.constant 352 : index
    %106 = vector.load %arg15[%c32_81, %c352_82] : memref<128x512xf32, #tpu.memory_space<vmem>>, vector<16x32xf32>
    tpu.vector_store %arg15[%c32_81, %c352_82], %105 {strides = array<i32>} : memref<128x512xf32, #tpu.memory_space<vmem>>, vector<16x32xf32>,
    %107 = vector.extract_strided_slice %82 {offsets = [192, 0], sizes = [16, 32], strides = [1, 1]} : vector<256x32xf32> to vector<16x32xf32>
    %c32_83 = arith.constant 32 : index
    %c384_84 = arith.constant 384 : index
    %108 = vector.load %arg15[%c32_83, %c384_84] : memref<128x512xf32, #tpu.memory_space<vmem>>, vector<16x32xf32>
    tpu.vector_store %arg15[%c32_83, %c384_84], %107 {strides = array<i32>} : memref<128x512xf32, #tpu.memory_space<vmem>>, vector<16x32xf32>,
    %109 = vector.extract_strided_slice %82 {offsets = [208, 0], sizes = [16, 32], strides = [1, 1]} : vector<256x32xf32> to vector<16x32xf32>
    %c32_85 = arith.constant 32 : index
    %c416_86 = arith.constant 416 : index
    %110 = vector.load %arg15[%c32_85, %c416_86] : memref<128x512xf32, #tpu.memory_space<vmem>>, vector<16x32xf32>
    tpu.vector_store %arg15[%c32_85, %c416_86], %109 {strides = array<i32>} : memref<128x512xf32, #tpu.memory_space<vmem>>, vector<16x32xf32>,
    %111 = vector.extract_strided_slice %82 {offsets = [224, 0], sizes = [16, 32], strides = [1, 1]} : vector<256x32xf32> to vector<16x32xf32>
    %c32_87 = arith.constant 32 : index
    %c448_88 = arith.constant 448 : index
    %112 = vector.load %arg15[%c32_87, %c448_88] : memref<128x512xf32, #tpu.memory_space<vmem>>, vector<16x32xf32>
    tpu.vector_store %arg15[%c32_87, %c448_88], %111 {strides = array<i32>} : memref<128x512xf32, #tpu.memory_space<vmem>>, vector<16x32xf32>,
    %113 = vector.extract_strided_slice %82 {offsets = [240, 0], sizes = [16, 32], strides = [1, 1]} : vector<256x32xf32> to vector<16x32xf32>
    %c32_89 = arith.constant 32 : index
    %c480_90 = arith.constant 480 : index
    %114 = vector.load %arg15[%c32_89, %c480_90] : memref<128x512xf32, #tpu.memory_space<vmem>>, vector<16x32xf32>
    tpu.vector_store %arg15[%c32_89, %c480_90], %113 {strides = array<i32>} : memref<128x512xf32, #tpu.memory_space<vmem>>, vector<16x32xf32>,
    %115 = vector.extract_strided_slice %11 {offsets = [312, 0], sizes = [104, 32], strides = [1, 1]} : vector<832x32xf32> to vector<104x32xf32>
    %cst_91 = arith.constant dense<0.000000e+00> : vector<256x32xf32>
    %116 = tpu.matmul %12, %115, %cst_91 {dimension_numbers = #tpu.dot_dimension_numbers<[1], [0], [0], [1], [0, 0, 1, 1], [], []>} : vector<256x104xf32>, vector<104x32xf32>, vector<256x32xf32> -> vector<256x32xf32>
    %117 = vector.extract_strided_slice %116 {offsets = [0, 0], sizes = [16, 32], strides = [1, 1]} : vector<256x32xf32> to vector<16x32xf32>
    %c48 = arith.constant 48 : index
    %c0_92 = arith.constant 0 : index
    %118 = vector.load %arg15[%c48, %c0_92] : memref<128x512xf32, #tpu.memory_space<vmem>>, vector<16x32xf32>
    tpu.vector_store %arg15[%c48, %c0_92], %117 {strides = array<i32>} : memref<128x512xf32, #tpu.memory_space<vmem>>, vector<16x32xf32>,
    %119 = vector.extract_strided_slice %116 {offsets = [16, 0], sizes = [16, 32], strides = [1, 1]} : vector<256x32xf32> to vector<16x32xf32>
    %c48_93 = arith.constant 48 : index
    %c32_94 = arith.constant 32 : index
    %120 = vector.load %arg15[%c48_93, %c32_94] : memref<128x512xf32, #tpu.memory_space<vmem>>, vector<16x32xf32>
    tpu.vector_store %arg15[%c48_93, %c32_94], %119 {strides = array<i32>} : memref<128x512xf32, #tpu.memory_space<vmem>>, vector<16x32xf32>,
    %121 = vector.extract_strided_slice %116 {offsets = [32, 0], sizes = [16, 32], strides = [1, 1]} : vector<256x32xf32> to vector<16x32xf32>
    %c48_95 = arith.constant 48 : index
    %c64_96 = arith.constant 64 : index
    %122 = vector.load %arg15[%c48_95, %c64_96] : memref<128x512xf32, #tpu.memory_space<vmem>>, vector<16x32xf32>
    tpu.vector_store %arg15[%c48_95, %c64_96], %121 {strides = array<i32>} : memref<128x512xf32, #tpu.memory_space<vmem>>, vector<16x32xf32>,
    %123 = vector.extract_strided_slice %116 {offsets = [48, 0], sizes = [16, 32], strides = [1, 1]} : vector<256x32xf32> to vector<16x32xf32>
    %c48_97 = arith.constant 48 : index
    %c96_98 = arith.constant 96 : index
    %124 = vector.load %arg15[%c48_97, %c96_98] : memref<128x512xf32, #tpu.memory_space<vmem>>, vector<16x32xf32>
    tpu.vector_store %arg15[%c48_97, %c96_98], %123 {strides = array<i32>} : memref<128x512xf32, #tpu.memory_space<vmem>>, vector<16x32xf32>,
    %125 = vector.extract_strided_slice %116 {offsets = [64, 0], sizes = [16, 32], strides = [1, 1]} : vector<256x32xf32> to vector<16x32xf32>
    %c48_99 = arith.constant 48 : index
    %c128_100 = arith.constant 128 : index
    %126 = vector.load %arg15[%c48_99, %c128_100] : memref<128x512xf32, #tpu.memory_space<vmem>>, vector<16x32xf32>
    tpu.vector_store %arg15[%c48_99, %c128_100], %125 {strides = array<i32>} : memref<128x512xf32, #tpu.memory_space<vmem>>, vector<16x32xf32>,
    %127 = vector.extract_strided_slice %116 {offsets = [80, 0], sizes = [16, 32], strides = [1, 1]} : vector<256x32xf32> to vector<16x32xf32>
    %c48_101 = arith.constant 48 : index
    %c160_102 = arith.constant 160 : index
    %128 = vector.load %arg15[%c48_101, %c160_102] : memref<128x512xf32, #tpu.memory_space<vmem>>, vector<16x32xf32>
    tpu.vector_store %arg15[%c48_101, %c160_102], %127 {strides = array<i32>} : memref<128x512xf32, #tpu.memory_space<vmem>>, vector<16x32xf32>,
    %129 = vector.extract_strided_slice %116 {offsets = [96, 0], sizes = [16, 32], strides = [1, 1]} : vector<256x32xf32> to vector<16x32xf32>
    %c48_103 = arith.constant 48 : index
    %c192_104 = arith.constant 192 : index
    %130 = vector.load %arg15[%c48_103, %c192_104] : memref<128x512xf32, #tpu.memory_space<vmem>>, vector<16x32xf32>
    tpu.vector_store %arg15[%c48_103, %c192_104], %129 {strides = array<i32>} : memref<128x512xf32, #tpu.memory_space<vmem>>, vector<16x32xf32>,
    %131 = vector.extract_strided_slice %116 {offsets = [112, 0], sizes = [16, 32], strides = [1, 1]} : vector<256x32xf32> to vector<16x32xf32>
    %c48_105 = arith.constant 48 : index
    %c224_106 = arith.constant 224 : index
    %132 = vector.load %arg15[%c48_105, %c224_106] : memref<128x512xf32, #tpu.memory_space<vmem>>, vector<16x32xf32>
    tpu.vector_store %arg15[%c48_105, %c224_106], %131 {strides = array<i32>} : memref<128x512xf32, #tpu.memory_space<vmem>>, vector<16x32xf32>,
    %133 = vector.extract_strided_slice %116 {offsets = [128, 0], sizes = [16, 32], strides = [1, 1]} : vector<256x32xf32> to vector<16x32xf32>
    %c48_107 = arith.constant 48 : index
    %c256_108 = arith.constant 256 : index
    %134 = vector.load %arg15[%c48_107, %c256_108] : memref<128x512xf32, #tpu.memory_space<vmem>>, vector<16x32xf32>
    tpu.vector_store %arg15[%c48_107, %c256_108], %133 {strides = array<i32>} : memref<128x512xf32, #tpu.memory_space<vmem>>, vector<16x32xf32>,
    %135 = vector.extract_strided_slice %116 {offsets = [144, 0], sizes = [16, 32], strides = [1, 1]} : vector<256x32xf32> to vector<16x32xf32>
    %c48_109 = arith.constant 48 : index
    %c288_110 = arith.constant 288 : index
    %136 = vector.load %arg15[%c48_109, %c288_110] : memref<128x512xf32, #tpu.memory_space<vmem>>, vector<16x32xf32>
    tpu.vector_store %arg15[%c48_109, %c288_110], %135 {strides = array<i32>} : memref<128x512xf32, #tpu.memory_space<vmem>>, vector<16x32xf32>,
    %137 = vector.extract_strided_slice %116 {offsets = [160, 0], sizes = [16, 32], strides = [1, 1]} : vector<256x32xf32> to vector<16x32xf32>
    %c48_111 = arith.constant 48 : index
    %c320_112 = arith.constant 320 : index
    %138 = vector.load %arg15[%c48_111, %c320_112] : memref<128x512xf32, #tpu.memory_space<vmem>>, vector<16x32xf32>
    tpu.vector_store %arg15[%c48_111, %c320_112], %137 {strides = array<i32>} : memref<128x512xf32, #tpu.memory_space<vmem>>, vector<16x32xf32>,
    %139 = vector.extract_strided_slice %116 {offsets = [176, 0], sizes = [16, 32], strides = [1, 1]} : vector<256x32xf32> to vector<16x32xf32>
    %c48_113 = arith.constant 48 : index
    %c352_114 = arith.constant 352 : index
    %140 = vector.load %arg15[%c48_113, %c352_114] : memref<128x512xf32, #tpu.memory_space<vmem>>, vector<16x32xf32>
    tpu.vector_store %arg15[%c48_113, %c352_114], %139 {strides = array<i32>} : memref<128x512xf32, #tpu.memory_space<vmem>>, vector<16x32xf32>,
    %141 = vector.extract_strided_slice %116 {offsets = [192, 0], sizes = [16, 32], strides = [1, 1]} : vector<256x32xf32> to vector<16x32xf32>
    %c48_115 = arith.constant 48 : index
    %c384_116 = arith.constant 384 : index
    %142 = vector.load %arg15[%c48_115, %c384_116] : memref<128x512xf32, #tpu.memory_space<vmem>>, vector<16x32xf32>
    tpu.vector_store %arg15[%c48_115, %c384_116], %141 {strides = array<i32>} : memref<128x512xf32, #tpu.memory_space<vmem>>, vector<16x32xf32>,
    %143 = vector.extract_strided_slice %116 {offsets = [208, 0], sizes = [16, 32], strides = [1, 1]} : vector<256x32xf32> to vector<16x32xf32>
    %c48_117 = arith.constant 48 : index
    %c416_118 = arith.constant 416 : index
    %144 = vector.load %arg15[%c48_117, %c416_118] : memref<128x512xf32, #tpu.memory_space<vmem>>, vector<16x32xf32>
    tpu.vector_store %arg15[%c48_117, %c416_118], %143 {strides = array<i32>} : memref<128x512xf32, #tpu.memory_space<vmem>>, vector<16x32xf32>,
    %145 = vector.extract_strided_slice %116 {offsets = [224, 0], sizes = [16, 32], strides = [1, 1]} : vector<256x32xf32> to vector<16x32xf32>
    %c48_119 = arith.constant 48 : index
    %c448_120 = arith.constant 448 : index
    %146 = vector.load %arg15[%c48_119, %c448_120] : memref<128x512xf32, #tpu.memory_space<vmem>>, vector<16x32xf32>
    tpu.vector_store %arg15[%c48_119, %c448_120], %145 {strides = array<i32>} : memref<128x512xf32, #tpu.memory_space<vmem>>, vector<16x32xf32>,
    %147 = vector.extract_strided_slice %116 {offsets = [240, 0], sizes = [16, 32], strides = [1, 1]} : vector<256x32xf32> to vector<16x32xf32>
    %c48_121 = arith.constant 48 : index
    %c480_122 = arith.constant 480 : index
    %148 = vector.load %arg15[%c48_121, %c480_122] : memref<128x512xf32, #tpu.memory_space<vmem>>, vector<16x32xf32>
    tpu.vector_store %arg15[%c48_121, %c480_122], %147 {strides = array<i32>} : memref<128x512xf32, #tpu.memory_space<vmem>>, vector<16x32xf32>,
    %149 = vector.extract_strided_slice %11 {offsets = [416, 0], sizes = [104, 32], strides = [1, 1]} : vector<832x32xf32> to vector<104x32xf32>
    %cst_123 = arith.constant dense<0.000000e+00> : vector<256x32xf32>
    %150 = tpu.matmul %12, %149, %cst_123 {dimension_numbers = #tpu.dot_dimension_numbers<[1], [0], [0], [1], [0, 0, 1, 1], [], []>} : vector<256x104xf32>, vector<104x32xf32>, vector<256x32xf32> -> vector<256x32xf32>
    %151 = vector.extract_strided_slice %150 {offsets = [0, 0], sizes = [16, 32], strides = [1, 1]} : vector<256x32xf32> to vector<16x32xf32>
    %c64_124 = arith.constant 64 : index
    %c0_125 = arith.constant 0 : index
    %152 = vector.load %arg15[%c64_124, %c0_125] : memref<128x512xf32, #tpu.memory_space<vmem>>, vector<16x32xf32>
    tpu.vector_store %arg15[%c64_124, %c0_125], %151 {strides = array<i32>} : memref<128x512xf32, #tpu.memory_space<vmem>>, vector<16x32xf32>,
    %153 = vector.extract_strided_slice %150 {offsets = [16, 0], sizes = [16, 32], strides = [1, 1]} : vector<256x32xf32> to vector<16x32xf32>
    %c64_126 = arith.constant 64 : index
    %c32_127 = arith.constant 32 : index
    %154 = vector.load %arg15[%c64_126, %c32_127] : memref<128x512xf32, #tpu.memory_space<vmem>>, vector<16x32xf32>
    tpu.vector_store %arg15[%c64_126, %c32_127], %153 {strides = array<i32>} : memref<128x512xf32, #tpu.memory_space<vmem>>, vector<16x32xf32>,
    %155 = vector.extract_strided_slice %150 {offsets = [32, 0], sizes = [16, 32], strides = [1, 1]} : vector<256x32xf32> to vector<16x32xf32>
    %c64_128 = arith.constant 64 : index
    %c64_129 = arith.constant 64 : index
    %156 = vector.load %arg15[%c64_128, %c64_129] : memref<128x512xf32, #tpu.memory_space<vmem>>, vector<16x32xf32>
    tpu.vector_store %arg15[%c64_128, %c64_129], %155 {strides = array<i32>} : memref<128x512xf32, #tpu.memory_space<vmem>>, vector<16x32xf32>,
    %157 = vector.extract_strided_slice %150 {offsets = [48, 0], sizes = [16, 32], strides = [1, 1]} : vector<256x32xf32> to vector<16x32xf32>
    %c64_130 = arith.constant 64 : index
    %c96_131 = arith.constant 96 : index
    %158 = vector.load %arg15[%c64_130, %c96_131] : memref<128x512xf32, #tpu.memory_space<vmem>>, vector<16x32xf32>
    tpu.vector_store %arg15[%c64_130, %c96_131], %157 {strides = array<i32>} : memref<128x512xf32, #tpu.memory_space<vmem>>, vector<16x32xf32>,
    %159 = vector.extract_strided_slice %150 {offsets = [64, 0], sizes = [16, 32], strides = [1, 1]} : vector<256x32xf32> to vector<16x32xf32>
    %c64_132 = arith.constant 64 : index
    %c128_133 = arith.constant 128 : index
    %160 = vector.load %arg15[%c64_132, %c128_133] : memref<128x512xf32, #tpu.memory_space<vmem>>, vector<16x32xf32>
    tpu.vector_store %arg15[%c64_132, %c128_133], %159 {strides = array<i32>} : memref<128x512xf32, #tpu.memory_space<vmem>>, vector<16x32xf32>,
    %161 = vector.extract_strided_slice %150 {offsets = [80, 0], sizes = [16, 32], strides = [1, 1]} : vector<256x32xf32> to vector<16x32xf32>
    %c64_134 = arith.constant 64 : index
    %c160_135 = arith.constant 160 : index
    %162 = vector.load %arg15[%c64_134, %c160_135] : memref<128x512xf32, #tpu.memory_space<vmem>>, vector<16x32xf32>
    tpu.vector_store %arg15[%c64_134, %c160_135], %161 {strides = array<i32>} : memref<128x512xf32, #tpu.memory_space<vmem>>, vector<16x32xf32>,
    %163 = vector.extract_strided_slice %150 {offsets = [96, 0], sizes = [16, 32], strides = [1, 1]} : vector<256x32xf32> to vector<16x32xf32>
    %c64_136 = arith.constant 64 : index
    %c192_137 = arith.constant 192 : index
    %164 = vector.load %arg15[%c64_136, %c192_137] : memref<128x512xf32, #tpu.memory_space<vmem>>, vector<16x32xf32>
    tpu.vector_store %arg15[%c64_136, %c192_137], %163 {strides = array<i32>} : memref<128x512xf32, #tpu.memory_space<vmem>>, vector<16x32xf32>,
    %165 = vector.extract_strided_slice %150 {offsets = [112, 0], sizes = [16, 32], strides = [1, 1]} : vector<256x32xf32> to vector<16x32xf32>
    %c64_138 = arith.constant 64 : index
    %c224_139 = arith.constant 224 : index
    %166 = vector.load %arg15[%c64_138, %c224_139] : memref<128x512xf32, #tpu.memory_space<vmem>>, vector<16x32xf32>
    tpu.vector_store %arg15[%c64_138, %c224_139], %165 {strides = array<i32>} : memref<128x512xf32, #tpu.memory_space<vmem>>, vector<16x32xf32>,
    %167 = vector.extract_strided_slice %150 {offsets = [128, 0], sizes = [16, 32], strides = [1, 1]} : vector<256x32xf32> to vector<16x32xf32>
    %c64_140 = arith.constant 64 : index
    %c256_141 = arith.constant 256 : index
    %168 = vector.load %arg15[%c64_140, %c256_141] : memref<128x512xf32, #tpu.memory_space<vmem>>, vector<16x32xf32>
    tpu.vector_store %arg15[%c64_140, %c256_141], %167 {strides = array<i32>} : memref<128x512xf32, #tpu.memory_space<vmem>>, vector<16x32xf32>,
    %169 = vector.extract_strided_slice %150 {offsets = [144, 0], sizes = [16, 32], strides = [1, 1]} : vector<256x32xf32> to vector<16x32xf32>
    %c64_142 = arith.constant 64 : index
    %c288_143 = arith.constant 288 : index
    %170 = vector.load %arg15[%c64_142, %c288_143] : memref<128x512xf32, #tpu.memory_space<vmem>>, vector<16x32xf32>
    tpu.vector_store %arg15[%c64_142, %c288_143], %169 {strides = array<i32>} : memref<128x512xf32, #tpu.memory_space<vmem>>, vector<16x32xf32>,
    %171 = vector.extract_strided_slice %150 {offsets = [160, 0], sizes = [16, 32], strides = [1, 1]} : vector<256x32xf32> to vector<16x32xf32>
    %c64_144 = arith.constant 64 : index
    %c320_145 = arith.constant 320 : index
    %172 = vector.load %arg15[%c64_144, %c320_145] : memref<128x512xf32, #tpu.memory_space<vmem>>, vector<16x32xf32>
    tpu.vector_store %arg15[%c64_144, %c320_145], %171 {strides = array<i32>} : memref<128x512xf32, #tpu.memory_space<vmem>>, vector<16x32xf32>,
    %173 = vector.extract_strided_slice %150 {offsets = [176, 0], sizes = [16, 32], strides = [1, 1]} : vector<256x32xf32> to vector<16x32xf32>
    %c64_146 = arith.constant 64 : index
    %c352_147 = arith.constant 352 : index
    %174 = vector.load %arg15[%c64_146, %c352_147] : memref<128x512xf32, #tpu.memory_space<vmem>>, vector<16x32xf32>
    tpu.vector_store %arg15[%c64_146, %c352_147], %173 {strides = array<i32>} : memref<128x512xf32, #tpu.memory_space<vmem>>, vector<16x32xf32>,
    %175 = vector.extract_strided_slice %150 {offsets = [192, 0], sizes = [16, 32], strides = [1, 1]} : vector<256x32xf32> to vector<16x32xf32>
    %c64_148 = arith.constant 64 : index
    %c384_149 = arith.constant 384 : index
    %176 = vector.load %arg15[%c64_148, %c384_149] : memref<128x512xf32, #tpu.memory_space<vmem>>, vector<16x32xf32>
    tpu.vector_store %arg15[%c64_148, %c384_149], %175 {strides = array<i32>} : memref<128x512xf32, #tpu.memory_space<vmem>>, vector<16x32xf32>,
    %177 = vector.extract_strided_slice %150 {offsets = [208, 0], sizes = [16, 32], strides = [1, 1]} : vector<256x32xf32> to vector<16x32xf32>
    %c64_150 = arith.constant 64 : index
    %c416_151 = arith.constant 416 : index
    %178 = vector.load %arg15[%c64_150, %c416_151] : memref<128x512xf32, #tpu.memory_space<vmem>>, vector<16x32xf32>
    tpu.vector_store %arg15[%c64_150, %c416_151], %177 {strides = array<i32>} : memref<128x512xf32, #tpu.memory_space<vmem>>, vector<16x32xf32>,
    %179 = vector.extract_strided_slice %150 {offsets = [224, 0], sizes = [16, 32], strides = [1, 1]} : vector<256x32xf32> to vector<16x32xf32>
    %c64_152 = arith.constant 64 : index
    %c448_153 = arith.constant 448 : index
    %180 = vector.load %arg15[%c64_152, %c448_153] : memref<128x512xf32, #tpu.memory_space<vmem>>, vector<16x32xf32>
    tpu.vector_store %arg15[%c64_152, %c448_153], %179 {strides = array<i32>} : memref<128x512xf32, #tpu.memory_space<vmem>>, vector<16x32xf32>,
    %181 = vector.extract_strided_slice %150 {offsets = [240, 0], sizes = [16, 32], strides = [1, 1]} : vector<256x32xf32> to vector<16x32xf32>
    %c64_154 = arith.constant 64 : index
    %c480_155 = arith.constant 480 : index
    %182 = vector.load %arg15[%c64_154, %c480_155] : memref<128x512xf32, #tpu.memory_space<vmem>>, vector<16x32xf32>
    tpu.vector_store %arg15[%c64_154, %c480_155], %181 {strides = array<i32>} : memref<128x512xf32, #tpu.memory_space<vmem>>, vector<16x32xf32>,
    %183 = vector.extract_strided_slice %11 {offsets = [520, 0], sizes = [104, 32], strides = [1, 1]} : vector<832x32xf32> to vector<104x32xf32>
    %cst_156 = arith.constant dense<0.000000e+00> : vector<256x32xf32>
    %184 = tpu.matmul %12, %183, %cst_156 {dimension_numbers = #tpu.dot_dimension_numbers<[1], [0], [0], [1], [0, 0, 1, 1], [], []>} : vector<256x104xf32>, vector<104x32xf32>, vector<256x32xf32> -> vector<256x32xf32>
    %185 = vector.extract_strided_slice %184 {offsets = [0, 0], sizes = [16, 32], strides = [1, 1]} : vector<256x32xf32> to vector<16x32xf32>
    %c80 = arith.constant 80 : index
    %c0_157 = arith.constant 0 : index
    %186 = vector.load %arg15[%c80, %c0_157] : memref<128x512xf32, #tpu.memory_space<vmem>>, vector<16x32xf32>
    tpu.vector_store %arg15[%c80, %c0_157], %185 {strides = array<i32>} : memref<128x512xf32, #tpu.memory_space<vmem>>, vector<16x32xf32>,
    %187 = vector.extract_strided_slice %184 {offsets = [16, 0], sizes = [16, 32], strides = [1, 1]} : vector<256x32xf32> to vector<16x32xf32>
    %c80_158 = arith.constant 80 : index
    %c32_159 = arith.constant 32 : index
    %188 = vector.load %arg15[%c80_158, %c32_159] : memref<128x512xf32, #tpu.memory_space<vmem>>, vector<16x32xf32>
    tpu.vector_store %arg15[%c80_158, %c32_159], %187 {strides = array<i32>} : memref<128x512xf32, #tpu.memory_space<vmem>>, vector<16x32xf32>,
    %189 = vector.extract_strided_slice %184 {offsets = [32, 0], sizes = [16, 32], strides = [1, 1]} : vector<256x32xf32> to vector<16x32xf32>
    %c80_160 = arith.constant 80 : index
    %c64_161 = arith.constant 64 : index
    %190 = vector.load %arg15[%c80_160, %c64_161] : memref<128x512xf32, #tpu.memory_space<vmem>>, vector<16x32xf32>
    tpu.vector_store %arg15[%c80_160, %c64_161], %189 {strides = array<i32>} : memref<128x512xf32, #tpu.memory_space<vmem>>, vector<16x32xf32>,
    %191 = vector.extract_strided_slice %184 {offsets = [48, 0], sizes = [16, 32], strides = [1, 1]} : vector<256x32xf32> to vector<16x32xf32>
    %c80_162 = arith.constant 80 : index
    %c96_163 = arith.constant 96 : index
    %192 = vector.load %arg15[%c80_162, %c96_163] : memref<128x512xf32, #tpu.memory_space<vmem>>, vector<16x32xf32>
    tpu.vector_store %arg15[%c80_162, %c96_163], %191 {strides = array<i32>} : memref<128x512xf32, #tpu.memory_space<vmem>>, vector<16x32xf32>,
    %193 = vector.extract_strided_slice %184 {offsets = [64, 0], sizes = [16, 32], strides = [1, 1]} : vector<256x32xf32> to vector<16x32xf32>
    %c80_164 = arith.constant 80 : index
    %c128_165 = arith.constant 128 : index
    %194 = vector.load %arg15[%c80_164, %c128_165] : memref<128x512xf32, #tpu.memory_space<vmem>>, vector<16x32xf32>
    tpu.vector_store %arg15[%c80_164, %c128_165], %193 {strides = array<i32>} : memref<128x512xf32, #tpu.memory_space<vmem>>, vector<16x32xf32>,
    %195 = vector.extract_strided_slice %184 {offsets = [80, 0], sizes = [16, 32], strides = [1, 1]} : vector<256x32xf32> to vector<16x32xf32>
    %c80_166 = arith.constant 80 : index
    %c160_167 = arith.constant 160 : index
    %196 = vector.load %arg15[%c80_166, %c160_167] : memref<128x512xf32, #tpu.memory_space<vmem>>, vector<16x32xf32>
    tpu.vector_store %arg15[%c80_166, %c160_167], %195 {strides = array<i32>} : memref<128x512xf32, #tpu.memory_space<vmem>>, vector<16x32xf32>,
    %197 = vector.extract_strided_slice %184 {offsets = [96, 0], sizes = [16, 32], strides = [1, 1]} : vector<256x32xf32> to vector<16x32xf32>
    %c80_168 = arith.constant 80 : index
    %c192_169 = arith.constant 192 : index
    %198 = vector.load %arg15[%c80_168, %c192_169] : memref<128x512xf32, #tpu.memory_space<vmem>>, vector<16x32xf32>
    tpu.vector_store %arg15[%c80_168, %c192_169], %197 {strides = array<i32>} : memref<128x512xf32, #tpu.memory_space<vmem>>, vector<16x32xf32>,
    %199 = vector.extract_strided_slice %184 {offsets = [112, 0], sizes = [16, 32], strides = [1, 1]} : vector<256x32xf32> to vector<16x32xf32>
    %c80_170 = arith.constant 80 : index
    %c224_171 = arith.constant 224 : index
    %200 = vector.load %arg15[%c80_170, %c224_171] : memref<128x512xf32, #tpu.memory_space<vmem>>, vector<16x32xf32>
    tpu.vector_store %arg15[%c80_170, %c224_171], %199 {strides = array<i32>} : memref<128x512xf32, #tpu.memory_space<vmem>>, vector<16x32xf32>,
    %201 = vector.extract_strided_slice %184 {offsets = [128, 0], sizes = [16, 32], strides = [1, 1]} : vector<256x32xf32> to vector<16x32xf32>
    %c80_172 = arith.constant 80 : index
    %c256_173 = arith.constant 256 : index
    %202 = vector.load %arg15[%c80_172, %c256_173] : memref<128x512xf32, #tpu.memory_space<vmem>>, vector<16x32xf32>
    tpu.vector_store %arg15[%c80_172, %c256_173], %201 {strides = array<i32>} : memref<128x512xf32, #tpu.memory_space<vmem>>, vector<16x32xf32>,
    %203 = vector.extract_strided_slice %184 {offsets = [144, 0], sizes = [16, 32], strides = [1, 1]} : vector<256x32xf32> to vector<16x32xf32>
    %c80_174 = arith.constant 80 : index
    %c288_175 = arith.constant 288 : index
    %204 = vector.load %arg15[%c80_174, %c288_175] : memref<128x512xf32, #tpu.memory_space<vmem>>, vector<16x32xf32>
    tpu.vector_store %arg15[%c80_174, %c288_175], %203 {strides = array<i32>} : memref<128x512xf32, #tpu.memory_space<vmem>>, vector<16x32xf32>,
    %205 = vector.extract_strided_slice %184 {offsets = [160, 0], sizes = [16, 32], strides = [1, 1]} : vector<256x32xf32> to vector<16x32xf32>
    %c80_176 = arith.constant 80 : index
    %c320_177 = arith.constant 320 : index
    %206 = vector.load %arg15[%c80_176, %c320_177] : memref<128x512xf32, #tpu.memory_space<vmem>>, vector<16x32xf32>
    tpu.vector_store %arg15[%c80_176, %c320_177], %205 {strides = array<i32>} : memref<128x512xf32, #tpu.memory_space<vmem>>, vector<16x32xf32>,
    %207 = vector.extract_strided_slice %184 {offsets = [176, 0], sizes = [16, 32], strides = [1, 1]} : vector<256x32xf32> to vector<16x32xf32>
    %c80_178 = arith.constant 80 : index
    %c352_179 = arith.constant 352 : index
    %208 = vector.load %arg15[%c80_178, %c352_179] : memref<128x512xf32, #tpu.memory_space<vmem>>, vector<16x32xf32>
    tpu.vector_store %arg15[%c80_178, %c352_179], %207 {strides = array<i32>} : memref<128x512xf32, #tpu.memory_space<vmem>>, vector<16x32xf32>,
    %209 = vector.extract_strided_slice %184 {offsets = [192, 0], sizes = [16, 32], strides = [1, 1]} : vector<256x32xf32> to vector<16x32xf32>
    %c80_180 = arith.constant 80 : index
    %c384_181 = arith.constant 384 : index
    %210 = vector.load %arg15[%c80_180, %c384_181] : memref<128x512xf32, #tpu.memory_space<vmem>>, vector<16x32xf32>
    tpu.vector_store %arg15[%c80_180, %c384_181], %209 {strides = array<i32>} : memref<128x512xf32, #tpu.memory_space<vmem>>, vector<16x32xf32>,
    %211 = vector.extract_strided_slice %184 {offsets = [208, 0], sizes = [16, 32], strides = [1, 1]} : vector<256x32xf32> to vector<16x32xf32>
    %c80_182 = arith.constant 80 : index
    %c416_183 = arith.constant 416 : index
    %212 = vector.load %arg15[%c80_182, %c416_183] : memref<128x512xf32, #tpu.memory_space<vmem>>, vector<16x32xf32>
    tpu.vector_store %arg15[%c80_182, %c416_183], %211 {strides = array<i32>} : memref<128x512xf32, #tpu.memory_space<vmem>>, vector<16x32xf32>,
    %213 = vector.extract_strided_slice %184 {offsets = [224, 0], sizes = [16, 32], strides = [1, 1]} : vector<256x32xf32> to vector<16x32xf32>
    %c80_184 = arith.constant 80 : index
    %c448_185 = arith.constant 448 : index
    %214 = vector.load %arg15[%c80_184, %c448_185] : memref<128x512xf32, #tpu.memory_space<vmem>>, vector<16x32xf32>
    tpu.vector_store %arg15[%c80_184, %c448_185], %213 {strides = array<i32>} : memref<128x512xf32, #tpu.memory_space<vmem>>, vector<16x32xf32>,
    %215 = vector.extract_strided_slice %184 {offsets = [240, 0], sizes = [16, 32], strides = [1, 1]} : vector<256x32xf32> to vector<16x32xf32>
    %c80_186 = arith.constant 80 : index
    %c480_187 = arith.constant 480 : index
    %216 = vector.load %arg15[%c80_186, %c480_187] : memref<128x512xf32, #tpu.memory_space<vmem>>, vector<16x32xf32>
    tpu.vector_store %arg15[%c80_186, %c480_187], %215 {strides = array<i32>} : memref<128x512xf32, #tpu.memory_space<vmem>>, vector<16x32xf32>,
    %217 = vector.extract_strided_slice %11 {offsets = [624, 0], sizes = [104, 32], strides = [1, 1]} : vector<832x32xf32> to vector<104x32xf32>
    %cst_188 = arith.constant dense<0.000000e+00> : vector<256x32xf32>
    %218 = tpu.matmul %12, %217, %cst_188 {dimension_numbers = #tpu.dot_dimension_numbers<[1], [0], [0], [1], [0, 0, 1, 1], [], []>} : vector<256x104xf32>, vector<104x32xf32>, vector<256x32xf32> -> vector<256x32xf32>
    %219 = vector.extract_strided_slice %218 {offsets = [0, 0], sizes = [16, 32], strides = [1, 1]} : vector<256x32xf32> to vector<16x32xf32>
    %c96_189 = arith.constant 96 : index
    %c0_190 = arith.constant 0 : index
    %220 = vector.load %arg15[%c96_189, %c0_190] : memref<128x512xf32, #tpu.memory_space<vmem>>, vector<16x32xf32>
    tpu.vector_store %arg15[%c96_189, %c0_190], %219 {strides = array<i32>} : memref<128x512xf32, #tpu.memory_space<vmem>>, vector<16x32xf32>,
    %221 = vector.extract_strided_slice %218 {offsets = [16, 0], sizes = [16, 32], strides = [1, 1]} : vector<256x32xf32> to vector<16x32xf32>
    %c96_191 = arith.constant 96 : index
    %c32_192 = arith.constant 32 : index
    %222 = vector.load %arg15[%c96_191, %c32_192] : memref<128x512xf32, #tpu.memory_space<vmem>>, vector<16x32xf32>
    tpu.vector_store %arg15[%c96_191, %c32_192], %221 {strides = array<i32>} : memref<128x512xf32, #tpu.memory_space<vmem>>, vector<16x32xf32>,
    %223 = vector.extract_strided_slice %218 {offsets = [32, 0], sizes = [16, 32], strides = [1, 1]} : vector<256x32xf32> to vector<16x32xf32>
    %c96_193 = arith.constant 96 : index
    %c64_194 = arith.constant 64 : index
    %224 = vector.load %arg15[%c96_193, %c64_194] : memref<128x512xf32, #tpu.memory_space<vmem>>, vector<16x32xf32>
    tpu.vector_store %arg15[%c96_193, %c64_194], %223 {strides = array<i32>} : memref<128x512xf32, #tpu.memory_space<vmem>>, vector<16x32xf32>,
    %225 = vector.extract_strided_slice %218 {offsets = [48, 0], sizes = [16, 32], strides = [1, 1]} : vector<256x32xf32> to vector<16x32xf32>
    %c96_195 = arith.constant 96 : index
    %c96_196 = arith.constant 96 : index
    %226 = vector.load %arg15[%c96_195, %c96_196] : memref<128x512xf32, #tpu.memory_space<vmem>>, vector<16x32xf32>
    tpu.vector_store %arg15[%c96_195, %c96_196], %225 {strides = array<i32>} : memref<128x512xf32, #tpu.memory_space<vmem>>, vector<16x32xf32>,
    %227 = vector.extract_strided_slice %218 {offsets = [64, 0], sizes = [16, 32], strides = [1, 1]} : vector<256x32xf32> to vector<16x32xf32>
    %c96_197 = arith.constant 96 : index
    %c128_198 = arith.constant 128 : index
    %228 = vector.load %arg15[%c96_197, %c128_198] : memref<128x512xf32, #tpu.memory_space<vmem>>, vector<16x32xf32>
    tpu.vector_store %arg15[%c96_197, %c128_198], %227 {strides = array<i32>} : memref<128x512xf32, #tpu.memory_space<vmem>>, vector<16x32xf32>,
    %229 = vector.extract_strided_slice %218 {offsets = [80, 0], sizes = [16, 32], strides = [1, 1]} : vector<256x32xf32> to vector<16x32xf32>
    %c96_199 = arith.constant 96 : index
    %c160_200 = arith.constant 160 : index
    %230 = vector.load %arg15[%c96_199, %c160_200] : memref<128x512xf32, #tpu.memory_space<vmem>>, vector<16x32xf32>
    tpu.vector_store %arg15[%c96_199, %c160_200], %229 {strides = array<i32>} : memref<128x512xf32, #tpu.memory_space<vmem>>, vector<16x32xf32>,
    %231 = vector.extract_strided_slice %218 {offsets = [96, 0], sizes = [16, 32], strides = [1, 1]} : vector<256x32xf32> to vector<16x32xf32>
    %c96_201 = arith.constant 96 : index
    %c192_202 = arith.constant 192 : index
    %232 = vector.load %arg15[%c96_201, %c192_202] : memref<128x512xf32, #tpu.memory_space<vmem>>, vector<16x32xf32>
    tpu.vector_store %arg15[%c96_201, %c192_202], %231 {strides = array<i32>} : memref<128x512xf32, #tpu.memory_space<vmem>>, vector<16x32xf32>,
    %233 = vector.extract_strided_slice %218 {offsets = [112, 0], sizes = [16, 32], strides = [1, 1]} : vector<256x32xf32> to vector<16x32xf32>
    %c96_203 = arith.constant 96 : index
    %c224_204 = arith.constant 224 : index
    %234 = vector.load %arg15[%c96_203, %c224_204] : memref<128x512xf32, #tpu.memory_space<vmem>>, vector<16x32xf32>
    tpu.vector_store %arg15[%c96_203, %c224_204], %233 {strides = array<i32>} : memref<128x512xf32, #tpu.memory_space<vmem>>, vector<16x32xf32>,
    %235 = vector.extract_strided_slice %218 {offsets = [128, 0], sizes = [16, 32], strides = [1, 1]} : vector<256x32xf32> to vector<16x32xf32>
    %c96_205 = arith.constant 96 : index
    %c256_206 = arith.constant 256 : index
    %236 = vector.load %arg15[%c96_205, %c256_206] : memref<128x512xf32, #tpu.memory_space<vmem>>, vector<16x32xf32>
    tpu.vector_store %arg15[%c96_205, %c256_206], %235 {strides = array<i32>} : memref<128x512xf32, #tpu.memory_space<vmem>>, vector<16x32xf32>,
    %237 = vector.extract_strided_slice %218 {offsets = [144, 0], sizes = [16, 32], strides = [1, 1]} : vector<256x32xf32> to vector<16x32xf32>
    %c96_207 = arith.constant 96 : index
    %c288_208 = arith.constant 288 : index
    %238 = vector.load %arg15[%c96_207, %c288_208] : memref<128x512xf32, #tpu.memory_space<vmem>>, vector<16x32xf32>
    tpu.vector_store %arg15[%c96_207, %c288_208], %237 {strides = array<i32>} : memref<128x512xf32, #tpu.memory_space<vmem>>, vector<16x32xf32>,
    %239 = vector.extract_strided_slice %218 {offsets = [160, 0], sizes = [16, 32], strides = [1, 1]} : vector<256x32xf32> to vector<16x32xf32>
    %c96_209 = arith.constant 96 : index
    %c320_210 = arith.constant 320 : index
    %240 = vector.load %arg15[%c96_209, %c320_210] : memref<128x512xf32, #tpu.memory_space<vmem>>, vector<16x32xf32>
    tpu.vector_store %arg15[%c96_209, %c320_210], %239 {strides = array<i32>} : memref<128x512xf32, #tpu.memory_space<vmem>>, vector<16x32xf32>,
    %241 = vector.extract_strided_slice %218 {offsets = [176, 0], sizes = [16, 32], strides = [1, 1]} : vector<256x32xf32> to vector<16x32xf32>
    %c96_211 = arith.constant 96 : index
    %c352_212 = arith.constant 352 : index
    %242 = vector.load %arg15[%c96_211, %c352_212] : memref<128x512xf32, #tpu.memory_space<vmem>>, vector<16x32xf32>
    tpu.vector_store %arg15[%c96_211, %c352_212], %241 {strides = array<i32>} : memref<128x512xf32, #tpu.memory_space<vmem>>, vector<16x32xf32>,
    %243 = vector.extract_strided_slice %218 {offsets = [192, 0], sizes = [16, 32], strides = [1, 1]} : vector<256x32xf32> to vector<16x32xf32>
    %c96_213 = arith.constant 96 : index
    %c384_214 = arith.constant 384 : index
    %244 = vector.load %arg15[%c96_213, %c384_214] : memref<128x512xf32, #tpu.memory_space<vmem>>, vector<16x32xf32>
    tpu.vector_store %arg15[%c96_213, %c384_214], %243 {strides = array<i32>} : memref<128x512xf32, #tpu.memory_space<vmem>>, vector<16x32xf32>,
    %245 = vector.extract_strided_slice %218 {offsets = [208, 0], sizes = [16, 32], strides = [1, 1]} : vector<256x32xf32> to vector<16x32xf32>
    %c96_215 = arith.constant 96 : index
    %c416_216 = arith.constant 416 : index
    %246 = vector.load %arg15[%c96_215, %c416_216] : memref<128x512xf32, #tpu.memory_space<vmem>>, vector<16x32xf32>
    tpu.vector_store %arg15[%c96_215, %c416_216], %245 {strides = array<i32>} : memref<128x512xf32, #tpu.memory_space<vmem>>, vector<16x32xf32>,
    %247 = vector.extract_strided_slice %218 {offsets = [224, 0], sizes = [16, 32], strides = [1, 1]} : vector<256x32xf32> to vector<16x32xf32>
    %c96_217 = arith.constant 96 : index
    %c448_218 = arith.constant 448 : index
    %248 = vector.load %arg15[%c96_217, %c448_218] : memref<128x512xf32, #tpu.memory_space<vmem>>, vector<16x32xf32>
    tpu.vector_store %arg15[%c96_217, %c448_218], %247 {strides = array<i32>} : memref<128x512xf32, #tpu.memory_space<vmem>>, vector<16x32xf32>,
    %249 = vector.extract_strided_slice %218 {offsets = [240, 0], sizes = [16, 32], strides = [1, 1]} : vector<256x32xf32> to vector<16x32xf32>
    %c96_219 = arith.constant 96 : index
    %c480_220 = arith.constant 480 : index
    %250 = vector.load %arg15[%c96_219, %c480_220] : memref<128x512xf32, #tpu.memory_space<vmem>>, vector<16x32xf32>
    tpu.vector_store %arg15[%c96_219, %c480_220], %249 {strides = array<i32>} : memref<128x512xf32, #tpu.memory_space<vmem>>, vector<16x32xf32>,
    %251 = vector.extract_strided_slice %11 {offsets = [728, 0], sizes = [104, 32], strides = [1, 1]} : vector<832x32xf32> to vector<104x32xf32>
    %cst_221 = arith.constant dense<0.000000e+00> : vector<256x32xf32>
    %252 = tpu.matmul %12, %251, %cst_221 {dimension_numbers = #tpu.dot_dimension_numbers<[1], [0], [0], [1], [0, 0, 1, 1], [], []>} : vector<256x104xf32>, vector<104x32xf32>, vector<256x32xf32> -> vector<256x32xf32>
    %253 = vector.extract_strided_slice %252 {offsets = [0, 0], sizes = [16, 32], strides = [1, 1]} : vector<256x32xf32> to vector<16x32xf32>
    %c112 = arith.constant 112 : index
    %c0_222 = arith.constant 0 : index
    %254 = vector.load %arg15[%c112, %c0_222] : memref<128x512xf32, #tpu.memory_space<vmem>>, vector<16x32xf32>
    tpu.vector_store %arg15[%c112, %c0_222], %253 {strides = array<i32>} : memref<128x512xf32, #tpu.memory_space<vmem>>, vector<16x32xf32>,
    %255 = vector.extract_strided_slice %252 {offsets = [16, 0], sizes = [16, 32], strides = [1, 1]} : vector<256x32xf32> to vector<16x32xf32>
    %c112_223 = arith.constant 112 : index
    %c32_224 = arith.constant 32 : index
    %256 = vector.load %arg15[%c112_223, %c32_224] : memref<128x512xf32, #tpu.memory_space<vmem>>, vector<16x32xf32>
    tpu.vector_store %arg15[%c112_223, %c32_224], %255 {strides = array<i32>} : memref<128x512xf32, #tpu.memory_space<vmem>>, vector<16x32xf32>,
    %257 = vector.extract_strided_slice %252 {offsets = [32, 0], sizes = [16, 32], strides = [1, 1]} : vector<256x32xf32> to vector<16x32xf32>
    %c112_225 = arith.constant 112 : index
    %c64_226 = arith.constant 64 : index
    %258 = vector.load %arg15[%c112_225, %c64_226] : memref<128x512xf32, #tpu.memory_space<vmem>>, vector<16x32xf32>
    tpu.vector_store %arg15[%c112_225, %c64_226], %257 {strides = array<i32>} : memref<128x512xf32, #tpu.memory_space<vmem>>, vector<16x32xf32>,
    %259 = vector.extract_strided_slice %252 {offsets = [48, 0], sizes = [16, 32], strides = [1, 1]} : vector<256x32xf32> to vector<16x32xf32>
    %c112_227 = arith.constant 112 : index
    %c96_228 = arith.constant 96 : index
    %260 = vector.load %arg15[%c112_227, %c96_228] : memref<128x512xf32, #tpu.memory_space<vmem>>, vector<16x32xf32>
    tpu.vector_store %arg15[%c112_227, %c96_228], %259 {strides = array<i32>} : memref<128x512xf32, #tpu.memory_space<vmem>>, vector<16x32xf32>,
    %261 = vector.extract_strided_slice %252 {offsets = [64, 0], sizes = [16, 32], strides = [1, 1]} : vector<256x32xf32> to vector<16x32xf32>
    %c112_229 = arith.constant 112 : index
    %c128_230 = arith.constant 128 : index
    %262 = vector.load %arg15[%c112_229, %c128_230] : memref<128x512xf32, #tpu.memory_space<vmem>>, vector<16x32xf32>
    tpu.vector_store %arg15[%c112_229, %c128_230], %261 {strides = array<i32>} : memref<128x512xf32, #tpu.memory_space<vmem>>, vector<16x32xf32>,
    %263 = vector.extract_strided_slice %252 {offsets = [80, 0], sizes = [16, 32], strides = [1, 1]} : vector<256x32xf32> to vector<16x32xf32>
    %c112_231 = arith.constant 112 : index
    %c160_232 = arith.constant 160 : index
    %264 = vector.load %arg15[%c112_231, %c160_232] : memref<128x512xf32, #tpu.memory_space<vmem>>, vector<16x32xf32>
    tpu.vector_store %arg15[%c112_231, %c160_232], %263 {strides = array<i32>} : memref<128x512xf32, #tpu.memory_space<vmem>>, vector<16x32xf32>,
    %265 = vector.extract_strided_slice %252 {offsets = [96, 0], sizes = [16, 32], strides = [1, 1]} : vector<256x32xf32> to vector<16x32xf32>
    %c112_233 = arith.constant 112 : index
    %c192_234 = arith.constant 192 : index
    %266 = vector.load %arg15[%c112_233, %c192_234] : memref<128x512xf32, #tpu.memory_space<vmem>>, vector<16x32xf32>
    tpu.vector_store %arg15[%c112_233, %c192_234], %265 {strides = array<i32>} : memref<128x512xf32, #tpu.memory_space<vmem>>, vector<16x32xf32>,
    %267 = vector.extract_strided_slice %252 {offsets = [112, 0], sizes = [16, 32], strides = [1, 1]} : vector<256x32xf32> to vector<16x32xf32>
    %c112_235 = arith.constant 112 : index
    %c224_236 = arith.constant 224 : index
    %268 = vector.load %arg15[%c112_235, %c224_236] : memref<128x512xf32, #tpu.memory_space<vmem>>, vector<16x32xf32>
    tpu.vector_store %arg15[%c112_235, %c224_236], %267 {strides = array<i32>} : memref<128x512xf32, #tpu.memory_space<vmem>>, vector<16x32xf32>,
    %269 = vector.extract_strided_slice %252 {offsets = [128, 0], sizes = [16, 32], strides = [1, 1]} : vector<256x32xf32> to vector<16x32xf32>
    %c112_237 = arith.constant 112 : index
    %c256_238 = arith.constant 256 : index
    %270 = vector.load %arg15[%c112_237, %c256_238] : memref<128x512xf32, #tpu.memory_space<vmem>>, vector<16x32xf32>
    tpu.vector_store %arg15[%c112_237, %c256_238], %269 {strides = array<i32>} : memref<128x512xf32, #tpu.memory_space<vmem>>, vector<16x32xf32>,
    %271 = vector.extract_strided_slice %252 {offsets = [144, 0], sizes = [16, 32], strides = [1, 1]} : vector<256x32xf32> to vector<16x32xf32>
    %c112_239 = arith.constant 112 : index
    %c288_240 = arith.constant 288 : index
    %272 = vector.load %arg15[%c112_239, %c288_240] : memref<128x512xf32, #tpu.memory_space<vmem>>, vector<16x32xf32>
    tpu.vector_store %arg15[%c112_239, %c288_240], %271 {strides = array<i32>} : memref<128x512xf32, #tpu.memory_space<vmem>>, vector<16x32xf32>,
    %273 = vector.extract_strided_slice %252 {offsets = [160, 0], sizes = [16, 32], strides = [1, 1]} : vector<256x32xf32> to vector<16x32xf32>
    %c112_241 = arith.constant 112 : index
    %c320_242 = arith.constant 320 : index
    %274 = vector.load %arg15[%c112_241, %c320_242] : memref<128x512xf32, #tpu.memory_space<vmem>>, vector<16x32xf32>
    tpu.vector_store %arg15[%c112_241, %c320_242], %273 {strides = array<i32>} : memref<128x512xf32, #tpu.memory_space<vmem>>, vector<16x32xf32>,
    %275 = vector.extract_strided_slice %252 {offsets = [176, 0], sizes = [16, 32], strides = [1, 1]} : vector<256x32xf32> to vector<16x32xf32>
    %c112_243 = arith.constant 112 : index
    %c352_244 = arith.constant 352 : index
    %276 = vector.load %arg15[%c112_243, %c352_244] : memref<128x512xf32, #tpu.memory_space<vmem>>, vector<16x32xf32>
    tpu.vector_store %arg15[%c112_243, %c352_244], %275 {strides = array<i32>} : memref<128x512xf32, #tpu.memory_space<vmem>>, vector<16x32xf32>,
    %277 = vector.extract_strided_slice %252 {offsets = [192, 0], sizes = [16, 32], strides = [1, 1]} : vector<256x32xf32> to vector<16x32xf32>
    %c112_245 = arith.constant 112 : index
    %c384_246 = arith.constant 384 : index
    %278 = vector.load %arg15[%c112_245, %c384_246] : memref<128x512xf32, #tpu.memory_space<vmem>>, vector<16x32xf32>
    tpu.vector_store %arg15[%c112_245, %c384_246], %277 {strides = array<i32>} : memref<128x512xf32, #tpu.memory_space<vmem>>, vector<16x32xf32>,
    %279 = vector.extract_strided_slice %252 {offsets = [208, 0], sizes = [16, 32], strides = [1, 1]} : vector<256x32xf32> to vector<16x32xf32>
    %c112_247 = arith.constant 112 : index
    %c416_248 = arith.constant 416 : index
    %280 = vector.load %arg15[%c112_247, %c416_248] : memref<128x512xf32, #tpu.memory_space<vmem>>, vector<16x32xf32>
    tpu.vector_store %arg15[%c112_247, %c416_248], %279 {strides = array<i32>} : memref<128x512xf32, #tpu.memory_space<vmem>>, vector<16x32xf32>,
    %281 = vector.extract_strided_slice %252 {offsets = [224, 0], sizes = [16, 32], strides = [1, 1]} : vector<256x32xf32> to vector<16x32xf32>
    %c112_249 = arith.constant 112 : index
    %c448_250 = arith.constant 448 : index
    %282 = vector.load %arg15[%c112_249, %c448_250] : memref<128x512xf32, #tpu.memory_space<vmem>>, vector<16x32xf32>
    tpu.vector_store %arg15[%c112_249, %c448_250], %281 {strides = array<i32>} : memref<128x512xf32, #tpu.memory_space<vmem>>, vector<16x32xf32>,
    %283 = vector.extract_strided_slice %252 {offsets = [240, 0], sizes = [16, 32], strides = [1, 1]} : vector<256x32xf32> to vector<16x32xf32>
    %c112_251 = arith.constant 112 : index
    %c480_252 = arith.constant 480 : index
    %284 = vector.load %arg15[%c112_251, %c480_252] : memref<128x512xf32, #tpu.memory_space<vmem>>, vector<16x32xf32>
    tpu.vector_store %arg15[%c112_251, %c480_252], %283 {strides = array<i32>} : memref<128x512xf32, #tpu.memory_space<vmem>>, vector<16x32xf32>,
    %c0_253 = arith.constant 0 : index
    %c0_254 = arith.constant 0 : index
    %285 = vector.load %arg15[%c0_253, %c0_254] : memref<128x512xf32, #tpu.memory_space<vmem>>, vector<128x512xf32>
    %c0_255 = arith.constant 0 : index
    %c0_256 = arith.constant 0 : index
    %286 = vector.load %arg5[%c0_255, %c0_256] : memref<512x64xf32, #tpu.memory_space<vmem>>, vector<512x64xf32>
    %cst_257 = arith.constant dense<0.000000e+00> : vector<128x64xf32>
    %287 = tpu.matmul %285, %286, %cst_257 {dimension_numbers = #tpu.dot_dimension_numbers<[1], [0], [0], [1], [0, 0, 1, 1], [], []>} : vector<128x512xf32>, vector<512x64xf32>, vector<128x64xf32> -> vector<128x64xf32>
    %c0_258 = arith.constant 0 : index
    %c0_259 = arith.constant 0 : index
    %288 = vector.load %arg6[%c0_258, %c0_259] : memref<1x64xf32, #tpu.memory_space<vmem>>, vector<1x64xf32>
    %289 = vector.broadcast %288 : vector<1x64xf32> to vector<128x64xf32>
    %290 = arith.addf %287, %289 : vector<128x64xf32>
    %cst_260 = arith.constant 0.000000e+00 : f32
    %291 = vector.broadcast %cst_260 : f32 to vector<128x64xf32>
    %292 = arith.maximumf %290, %291 : vector<128x64xf32>
    %c0_261 = arith.constant 0 : index
    %c0_262 = arith.constant 0 : index
    %293 = vector.load %arg7[%c0_261, %c0_262] : memref<288x128xf32, #tpu.memory_space<vmem>>, vector<288x128xf32>
    %cst_263 = arith.constant dense<0.000000e+00> : vector<288x64xf32>
    %294 = tpu.matmul %293, %292, %cst_263 {dimension_numbers = #tpu.dot_dimension_numbers<[1], [0], [0], [1], [0, 0, 1, 1], [], []>} : vector<288x128xf32>, vector<128x64xf32>, vector<288x64xf32> -> vector<288x64xf32>
    %295 = vector.extract_strided_slice %294 {offsets = [0, 0], sizes = [32, 64], strides = [1, 1]} : vector<288x64xf32> to vector<32x64xf32>
    %c0_264 = arith.constant 0 : index
    %c0_265 = arith.constant 0 : index
    %296 = vector.load %arg16[%c0_264, %c0_265] : memref<32x576xf32, #tpu.memory_space<vmem>>, vector<32x64xf32>
    tpu.vector_store %arg16[%c0_264, %c0_265], %295 {strides = array<i32>} : memref<32x576xf32, #tpu.memory_space<vmem>>, vector<32x64xf32>,
    %297 = vector.extract_strided_slice %294 {offsets = [32, 0], sizes = [32, 64], strides = [1, 1]} : vector<288x64xf32> to vector<32x64xf32>
    %c0_266 = arith.constant 0 : index
    %c64_267 = arith.constant 64 : index
    %298 = vector.load %arg16[%c0_266, %c64_267] : memref<32x576xf32, #tpu.memory_space<vmem>>, vector<32x64xf32>
    tpu.vector_store %arg16[%c0_266, %c64_267], %297 {strides = array<i32>} : memref<32x576xf32, #tpu.memory_space<vmem>>, vector<32x64xf32>,
    %299 = vector.extract_strided_slice %294 {offsets = [64, 0], sizes = [32, 64], strides = [1, 1]} : vector<288x64xf32> to vector<32x64xf32>
    %c0_268 = arith.constant 0 : index
    %c128_269 = arith.constant 128 : index
    %300 = vector.load %arg16[%c0_268, %c128_269] : memref<32x576xf32, #tpu.memory_space<vmem>>, vector<32x64xf32>
    tpu.vector_store %arg16[%c0_268, %c128_269], %299 {strides = array<i32>} : memref<32x576xf32, #tpu.memory_space<vmem>>, vector<32x64xf32>,
    %301 = vector.extract_strided_slice %294 {offsets = [96, 0], sizes = [32, 64], strides = [1, 1]} : vector<288x64xf32> to vector<32x64xf32>
    %c0_270 = arith.constant 0 : index
    %c192_271 = arith.constant 192 : index
    %302 = vector.load %arg16[%c0_270, %c192_271] : memref<32x576xf32, #tpu.memory_space<vmem>>, vector<32x64xf32>
    tpu.vector_store %arg16[%c0_270, %c192_271], %301 {strides = array<i32>} : memref<32x576xf32, #tpu.memory_space<vmem>>, vector<32x64xf32>,
    %303 = vector.extract_strided_slice %294 {offsets = [128, 0], sizes = [32, 64], strides = [1, 1]} : vector<288x64xf32> to vector<32x64xf32>
    %c0_272 = arith.constant 0 : index
    %c256_273 = arith.constant 256 : index
    %304 = vector.load %arg16[%c0_272, %c256_273] : memref<32x576xf32, #tpu.memory_space<vmem>>, vector<32x64xf32>
    tpu.vector_store %arg16[%c0_272, %c256_273], %303 {strides = array<i32>} : memref<32x576xf32, #tpu.memory_space<vmem>>, vector<32x64xf32>,
    %305 = vector.extract_strided_slice %294 {offsets = [160, 0], sizes = [32, 64], strides = [1, 1]} : vector<288x64xf32> to vector<32x64xf32>
    %c0_274 = arith.constant 0 : index
    %c320_275 = arith.constant 320 : index
    %306 = vector.load %arg16[%c0_274, %c320_275] : memref<32x576xf32, #tpu.memory_space<vmem>>, vector<32x64xf32>
    tpu.vector_store %arg16[%c0_274, %c320_275], %305 {strides = array<i32>} : memref<32x576xf32, #tpu.memory_space<vmem>>, vector<32x64xf32>,
    %307 = vector.extract_strided_slice %294 {offsets = [192, 0], sizes = [32, 64], strides = [1, 1]} : vector<288x64xf32> to vector<32x64xf32>
    %c0_276 = arith.constant 0 : index
    %c384_277 = arith.constant 384 : index
    %308 = vector.load %arg16[%c0_276, %c384_277] : memref<32x576xf32, #tpu.memory_space<vmem>>, vector<32x64xf32>
    tpu.vector_store %arg16[%c0_276, %c384_277], %307 {strides = array<i32>} : memref<32x576xf32, #tpu.memory_space<vmem>>, vector<32x64xf32>,
    %309 = vector.extract_strided_slice %294 {offsets = [224, 0], sizes = [32, 64], strides = [1, 1]} : vector<288x64xf32> to vector<32x64xf32>
    %c0_278 = arith.constant 0 : index
    %c448_279 = arith.constant 448 : index
    %310 = vector.load %arg16[%c0_278, %c448_279] : memref<32x576xf32, #tpu.memory_space<vmem>>, vector<32x64xf32>
    tpu.vector_store %arg16[%c0_278, %c448_279], %309 {strides = array<i32>} : memref<32x576xf32, #tpu.memory_space<vmem>>, vector<32x64xf32>,
    %311 = vector.extract_strided_slice %294 {offsets = [256, 0], sizes = [32, 64], strides = [1, 1]} : vector<288x64xf32> to vector<32x64xf32>
    %c0_280 = arith.constant 0 : index
    %c512 = arith.constant 512 : index
    %312 = vector.load %arg16[%c0_280, %c512] : memref<32x576xf32, #tpu.memory_space<vmem>>, vector<32x64xf32>
    tpu.vector_store %arg16[%c0_280, %c512], %311 {strides = array<i32>} : memref<32x576xf32, #tpu.memory_space<vmem>>, vector<32x64xf32>,
    %c0_281 = arith.constant 0 : index
    %c0_282 = arith.constant 0 : index
    %313 = vector.load %arg16[%c0_281, %c0_282] : memref<32x576xf32, #tpu.memory_space<vmem>>, vector<32x576xf32>
    %c0_283 = arith.constant 0 : index
    %c0_284 = arith.constant 0 : index
    %314 = vector.load %arg8[%c0_283, %c0_284] : memref<576x64xf32, #tpu.memory_space<vmem>>, vector<576x64xf32>
    %cst_285 = arith.constant dense<0.000000e+00> : vector<32x64xf32>
    %315 = tpu.matmul %313, %314, %cst_285 {dimension_numbers = #tpu.dot_dimension_numbers<[1], [0], [0], [1], [0, 0, 1, 1], [], []>} : vector<32x576xf32>, vector<576x64xf32>, vector<32x64xf32> -> vector<32x64xf32>
    %c0_286 = arith.constant 0 : index
    %c0_287 = arith.constant 0 : index
    %316 = vector.load %arg9[%c0_286, %c0_287] : memref<1x64xf32, #tpu.memory_space<vmem>>, vector<1x64xf32>
    %317 = vector.broadcast %316 : vector<1x64xf32> to vector<32x64xf32>
    %318 = arith.addf %315, %317 : vector<32x64xf32>
    %cst_288 = arith.constant 0.000000e+00 : f32
    %319 = vector.broadcast %cst_288 : f32 to vector<32x64xf32>
    %320 = arith.maximumf %318, %319 : vector<32x64xf32>
    %c0_i32_289 = arith.constant 0 : i32
    %321 = tpu.memref_slice %arg19[%c0_i32_289] : memref<2x!tpu.dma_semaphore, #tpu.memory_space<semaphore_mem>> -> memref<1x!tpu.dma_semaphore, #tpu.memory_space<semaphore_mem>>
    %322 = tpu.memref_squeeze %321 : memref<1x!tpu.dma_semaphore, #tpu.memory_space<semaphore_mem>> -> memref<!tpu.dma_semaphore, #tpu.memory_space<semaphore_mem>>
    tpu.wait_dma2 semaphore(%322 : memref<!tpu.dma_semaphore, #tpu.memory_space<semaphore_mem>>) src(%arg10 : memref<256x512xf32, #tpu.memory_space<any>>) dst(%arg17 : memref<256x512xf32, #tpu.memory_space<vmem>>)
    %c1_i32_290 = arith.constant 1 : i32
    %323 = tpu.memref_slice %arg19[%c1_i32_290] : memref<2x!tpu.dma_semaphore, #tpu.memory_space<semaphore_mem>> -> memref<1x!tpu.dma_semaphore, #tpu.memory_space<semaphore_mem>>
    %324 = tpu.memref_squeeze %323 : memref<1x!tpu.dma_semaphore, #tpu.memory_space<semaphore_mem>> -> memref<!tpu.dma_semaphore, #tpu.memory_space<semaphore_mem>>
    tpu.wait_dma2 semaphore(%324 : memref<!tpu.dma_semaphore, #tpu.memory_space<semaphore_mem>>) src(%arg12 : memref<512x128xf32, #tpu.memory_space<any>>) dst(%arg18 : memref<512x128xf32, #tpu.memory_space<vmem>>)
    %c0_291 = arith.constant 0 : index
    %c0_292 = arith.constant 0 : index
    %325 = vector.load %arg17[%c0_291, %c0_292] : memref<256x512xf32, #tpu.memory_space<vmem>>, vector<256x512xf32>
    %c0_293 = arith.constant 0 : index
    %c0_294 = arith.constant 0 : index
    %326 = vector.load %arg18[%c0_293, %c0_294] : memref<512x128xf32, #tpu.memory_space<vmem>>, vector<512x128xf32>
    %327 = vector.extract_strided_slice %320 {offsets = [0, 0], sizes = [8, 64], strides = [1, 1]} : vector<32x64xf32> to vector<8x64xf32>
    %328 = vector.extract_strided_slice %325 {offsets = [0, 0], sizes = [64, 512], strides = [1, 1]} : vector<256x512xf32> to vector<64x512xf32>
    %cst_295 = arith.constant dense<0.000000e+00> : vector<8x512xf32>
    %329 = tpu.matmul %327, %328, %cst_295 {dimension_numbers = #tpu.dot_dimension_numbers<[1], [0], [0], [1], [0, 0, 1, 1], [], []>} : vector<8x64xf32>, vector<64x512xf32>, vector<8x512xf32> -> vector<8x512xf32>
    %330 = vector.extract_strided_slice %320 {offsets = [8, 0], sizes = [8, 64], strides = [1, 1]} : vector<32x64xf32> to vector<8x64xf32>
    %331 = vector.extract_strided_slice %325 {offsets = [64, 0], sizes = [64, 512], strides = [1, 1]} : vector<256x512xf32> to vector<64x512xf32>
    %cst_296 = arith.constant dense<0.000000e+00> : vector<8x512xf32>
    %332 = tpu.matmul %330, %331, %cst_296 {dimension_numbers = #tpu.dot_dimension_numbers<[1], [0], [0], [1], [0, 0, 1, 1], [], []>} : vector<8x64xf32>, vector<64x512xf32>, vector<8x512xf32> -> vector<8x512xf32>
    %333 = vector.extract_strided_slice %320 {offsets = [16, 0], sizes = [8, 64], strides = [1, 1]} : vector<32x64xf32> to vector<8x64xf32>
    %334 = vector.extract_strided_slice %325 {offsets = [128, 0], sizes = [64, 512], strides = [1, 1]} : vector<256x512xf32> to vector<64x512xf32>
    %cst_297 = arith.constant dense<0.000000e+00> : vector<8x512xf32>
    %335 = tpu.matmul %333, %334, %cst_297 {dimension_numbers = #tpu.dot_dimension_numbers<[1], [0], [0], [1], [0, 0, 1, 1], [], []>} : vector<8x64xf32>, vector<64x512xf32>, vector<8x512xf32> -> vector<8x512xf32>
    %336 = vector.extract_strided_slice %320 {offsets = [24, 0], sizes = [8, 64], strides = [1, 1]} : vector<32x64xf32> to vector<8x64xf32>
    %337 = vector.extract_strided_slice %325 {offsets = [192, 0], sizes = [64, 512], strides = [1, 1]} : vector<256x512xf32> to vector<64x512xf32>
    %cst_298 = arith.constant dense<0.000000e+00> : vector<8x512xf32>
    %338 = tpu.matmul %336, %337, %cst_298 {dimension_numbers = #tpu.dot_dimension_numbers<[1], [0], [0], [1], [0, 0, 1, 1], [], []>} : vector<8x64xf32>, vector<64x512xf32>, vector<8x512xf32> -> vector<8x512xf32>
    %339 = arith.addf %329, %332 : vector<8x512xf32>
    %340 = arith.addf %335, %338 : vector<8x512xf32>
    %341 = arith.addf %339, %340 : vector<8x512xf32>
    %c0_299 = arith.constant 0 : index
    %c0_300 = arith.constant 0 : index
    %342 = vector.load %arg11[%c0_299, %c0_300] : memref<1x512xf32, #tpu.memory_space<vmem>>, vector<1x512xf32>
    %343 = vector.broadcast %342 : vector<1x512xf32> to vector<8x512xf32>
    %344 = arith.addf %341, %343 : vector<8x512xf32>
    %cst_301 = arith.constant 0.000000e+00 : f32
    %345 = vector.broadcast %cst_301 : f32 to vector<8x512xf32>
    %346 = arith.maximumf %344, %345 : vector<8x512xf32>
    %cst_302 = arith.constant dense<0.000000e+00> : vector<8x128xf32>
    %347 = tpu.matmul %346, %326, %cst_302 {dimension_numbers = #tpu.dot_dimension_numbers<[1], [0], [0], [1], [0, 0, 1, 1], [], []>} : vector<8x512xf32>, vector<512x128xf32>, vector<8x128xf32> -> vector<8x128xf32>
    %c0_303 = arith.constant 0 : index
    %c0_304 = arith.constant 0 : index
    %348 = vector.load %arg13[%c0_303, %c0_304] : memref<1x128xf32, #tpu.memory_space<vmem>>, vector<1x128xf32>
    %349 = vector.broadcast %348 : vector<1x128xf32> to vector<8x128xf32>
    %350 = arith.addf %347, %349 : vector<8x128xf32>
    %c0_305 = arith.constant 0 : index
    %c0_306 = arith.constant 0 : index
    %351 = vector.load %arg14[%c0_305, %c0_306] : memref<8x128xf32, #tpu.memory_space<vmem>>, vector<8x128xf32>
    tpu.vector_store %arg14[%c0_305, %c0_306], %350 {strides = array<i32>} : memref<8x128xf32, #tpu.memory_space<vmem>>, vector<8x128xf32>,
    return
  }
  func.func @transform_0(%arg0: i32) -> (i32, i32) {
    %c0_i32 = arith.constant 0 : i32
    %c0_i32_0 = arith.constant 0 : i32
    return %arg0, %c0_i32 : i32, i32
  }
  func.func @transform_1(%arg0: i32) -> (i32, i32) {
    %c0_i32 = arith.constant 0 : i32
    %c0_i32_0 = arith.constant 0 : i32
    %c0_i32_1 = arith.constant 0 : i32
    return %c0_i32, %c0_i32_0 : i32, i32
  }
  func.func @transform_2(%arg0: i32) -> (i32, i32) {
    %c0_i32 = arith.constant 0 : i32
    %c0_i32_0 = arith.constant 0 : i32
    %c0_i32_1 = arith.constant 0 : i32
    return %c0_i32, %c0_i32_0 : i32, i32
  }
  func.func @transform_3(%arg0: i32) -> (i32, i32) {
    %c0_i32 = arith.constant 0 : i32
    %c0_i32_0 = arith.constant 0 : i32
    %c0_i32_1 = arith.constant 0 : i32
    return %c0_i32, %c0_i32_0 : i32, i32
  }
  func.func @transform_4(%arg0: i32) -> (i32, i32) {
    %c0_i32 = arith.constant 0 : i32
    %c0_i32_0 = arith.constant 0 : i32
    %c0_i32_1 = arith.constant 0 : i32
    return %c0_i32, %c0_i32_0 : i32, i32
  }
  func.func @transform_5(%arg0: i32) -> (i32, i32) {
    %c0_i32 = arith.constant 0 : i32
    %c0_i32_0 = arith.constant 0 : i32
    %c0_i32_1 = arith.constant 0 : i32
    return %c0_i32, %c0_i32_0 : i32, i32
  }
  func.func @transform_6(%arg0: i32) -> (i32, i32) {
    %c0_i32 = arith.constant 0 : i32
    %c0_i32_0 = arith.constant 0 : i32
    %c0_i32_1 = arith.constant 0 : i32
    return %c0_i32, %c0_i32_0 : i32, i32
  }
  func.func @transform_7(%arg0: i32) -> (i32, i32) {
    %c0_i32 = arith.constant 0 : i32
    %c0_i32_0 = arith.constant 0 : i32
    %c0_i32_1 = arith.constant 0 : i32
    return %c0_i32, %c0_i32_0 : i32, i32
  }
  func.func @transform_8(%arg0: i32) -> (i32, i32) {
    %c0_i32 = arith.constant 0 : i32
    %c0_i32_0 = arith.constant 0 : i32
    %c0_i32_1 = arith.constant 0 : i32
    return %c0_i32, %c0_i32_0 : i32, i32
  }
  func.func @transform_10(%arg0: i32) -> (i32, i32) {
    %c0_i32 = arith.constant 0 : i32
    %c0_i32_0 = arith.constant 0 : i32
    %c0_i32_1 = arith.constant 0 : i32
    return %c0_i32, %c0_i32_0 : i32, i32
  }
  func.func @transform_12(%arg0: i32) -> (i32, i32) {
    %c0_i32 = arith.constant 0 : i32
    %c0_i32_0 = arith.constant 0 : i32
    %c0_i32_1 = arith.constant 0 : i32
    return %c0_i32, %c0_i32_0 : i32, i32
  }
  func.func @transform_13(%arg0: i32) -> (i32, i32) {
    %c0_i32 = arith.constant 0 : i32
    %c0_i32_0 = arith.constant 0 : i32
    return %arg0, %c0_i32 : i32, i32
  }
}

</mosaic_0001>

<bundles_post_ra>
// kernel: dqn_forward.1
= control target key start
LH: loop header
LB: loop body
LE: loop exit
PB: predicated region body
PF: predicated region fallthrough
CT: control target
= control target key end

     0   :  { %s10300_s0 = inlined_call_operand.vmem [shape: f32[832,256], index: 0, kind: input, shape index: {}]   ;;  %s10301_s1 = inlined_call_operand.vmem [shape: f32[256,32], index: 1, kind: input, shape index: {}]   ;;  %s10302_s2 = inlined_call_operand.vmem [shape: f32[1,32], index: 2, kind: input, shape index: {}]   ;;  %s10303_s3 = inlined_call_operand.vmem [shape: f32[256,104], index: 3, kind: input, shape index: {}]   ;;  %s10304_s4 = inlined_call_operand.vmem [shape: f32[512,64], index: 4, kind: input, shape index: {}]   ;;  %s10305_s5 = inlined_call_operand.vmem [shape: f32[1,64], index: 5, kind: input, shape index: {}]   ;;  %s10306_s6 = inlined_call_operand.vmem [shape: f32[288,128], index: 6, kind: input, shape index: {}]   ;;  %s10307_s7 = inlined_call_operand.vmem [shape: f32[576,64], index: 7, kind: input, shape index: {}]   ;;  %s10308_s8 = inlined_call_operand.vmem [shape: f32[1,64], index: 8, kind: input, shape index: {}]   ;;  %s10309_s9 = inlined_call_operand.vmem [shape: f32[256,512], index: 9, kind: input, shape index: {}]   ;;  %s10310_s10 = inlined_call_operand.vmem [shape: f32[1,512], index: 10, kind: input, shape index: {}]   ;;  %s10311_s11 = inlined_call_operand.vmem [shape: f32[512,128], index: 11, kind: input, shape index: {}]   ;;  %s10312_s12 = inlined_call_operand.vmem [shape: f32[1,128], index: 12, kind: input, shape index: {}]   ;;  %s10313_s13 = inlined_call_operand.vmem [shape: f32[8,128], index: 13, kind: output, shape index: {}]  }
   0x1   :  { %v5573_v0 = vld [vmem:[%s10309_s9] sm:$0xff]  ;;  %v5578_v1 = vld [vmem:[%s10309_s9 + $0x8] sm:$0xff]  ;;  %v5583_v2 = vld [vmem:[%s10309_s9 + $0x10] sm:$0xff] }
   0x2   :  { %10319 = vst [vmem:[#allocation11_spill] sm:$0xff] %v5573_v0  ;;  %v5588_v3 = vld [vmem:[%s10309_s9 + $0x18] sm:$0xff]  ;;  %v5593_v4 = vld [vmem:[%s10309_s9 + $0x20] sm:$0xff]  ;;  %v5598_v5 = vld [vmem:[%s10309_s9 + $0x28] sm:$0xff] }
   0x3   :  { %10320 = vst [vmem:[#allocation12_spill] sm:$0xff] %v5578_v1  ;;  %v5603_v6 = vld [vmem:[%s10309_s9 + $0x30] sm:$0xff]  ;;  %v5608_v7 = vld [vmem:[%s10309_s9 + $0x38] sm:$0xff]  ;;  %v5613_v8 = vld [vmem:[%s10309_s9 + $0x40] sm:$0xff] }
   0x4   :  { %10321 = vst [vmem:[#allocation13_spill] sm:$0xff] %v5583_v2  ;;  %v5618_v9 = vld [vmem:[%s10309_s9 + $0x48] sm:$0xff]  ;;  %v5623_v10 = vld [vmem:[%s10309_s9 + $0x50] sm:$0xff]  ;;  %v5628_v11 = vld [vmem:[%s10309_s9 + $0x58] sm:$0xff] }
   0x5   :  { %10322 = vst [vmem:[#allocation14_spill] sm:$0xff] %v5588_v3  ;;  %v5633_v12 = vld [vmem:[%s10309_s9 + $0x60] sm:$0xff]  ;;  %v5638_v13 = vld [vmem:[%s10309_s9 + $0x68] sm:$0xff]  ;;  %v5643_v14 = vld [vmem:[%s10309_s9 + $0x70] sm:$0xff] }
   0x6   :  { %10323 = vst [vmem:[#allocation15_spill] sm:$0xff] %v5593_v4  ;;  %v5648_v15 = vld [vmem:[%s10309_s9 + $0x78] sm:$0xff]  ;;  %v5653_v16 = vld [vmem:[%s10309_s9 + $0x80] sm:$0xff]  ;;  %v5658_v17 = vld [vmem:[%s10309_s9 + $0x88] sm:$0xff] }
   0x7   :  { %10324 = vst [vmem:[#allocation16_spill] sm:$0xff] %v5598_v5  ;;  %v5663_v18 = vld [vmem:[%s10309_s9 + $0x90] sm:$0xff]  ;;  %v5668_v19 = vld [vmem:[%s10309_s9 + $0x98] sm:$0xff]  ;;  %v5673_v20 = vld [vmem:[%s10309_s9 + $0xa0] sm:$0xff] }
   0x8   :  { %10325 = vst [vmem:[#allocation17_spill] sm:$0xff] %v5603_v6  ;;  %v5678_v21 = vld [vmem:[%s10309_s9 + $0xa8] sm:$0xff]  ;;  %v5683_v22 = vld [vmem:[%s10309_s9 + $0xb0] sm:$0xff]  ;;  %v5688_v23 = vld [vmem:[%s10309_s9 + $0xb8] sm:$0xff] }
   0x9   :  { %10326 = vst [vmem:[#allocation18_spill] sm:$0xff] %v5608_v7  ;;  %v5693_v24 = vld [vmem:[%s10309_s9 + $0xc0] sm:$0xff]  ;;  %v5698_v25 = vld [vmem:[%s10309_s9 + $0xc8] sm:$0xff]  ;;  %v5703_v26 = vld [vmem:[%s10309_s9 + $0xd0] sm:$0xff] }
   0xa   :  { %10327 = vst [vmem:[#allocation19_spill] sm:$0xff] %v5613_v8  ;;  %v5708_v27 = vld [vmem:[%s10309_s9 + $0xd8] sm:$0xff]  ;;  %v5713_v28 = vld [vmem:[%s10309_s9 + $0xe0] sm:$0xff]  ;;  %v5718_v29 = vld [vmem:[%s10309_s9 + $0xe8] sm:$0xff] }
   0xb   :  { %10328 = vst [vmem:[#allocation20_spill] sm:$0xff] %v5618_v9  ;;  %v5723_v30 = vld [vmem:[%s10309_s9 + $0xf0] sm:$0xff]  ;;  %v5728_v31 = vld [vmem:[%s10309_s9 + $0xf8] sm:$0xff]  ;;  %v5733_v32 = vld [vmem:[%s10309_s9 + $0x100] sm:$0xff] }
   0xc   :  { %10329 = vst [vmem:[#allocation21_spill] sm:$0xff] %v5623_v10  ;;  %v5738_v33 = vld [vmem:[%s10309_s9 + $0x108] sm:$0xff]  ;;  %v5743_v34 = vld [vmem:[%s10309_s9 + $0x110] sm:$0xff]  ;;  %v5748_v35 = vld [vmem:[%s10309_s9 + $0x118] sm:$0xff] }
   0xd   :  { %10330 = vst [vmem:[#allocation22_spill] sm:$0xff] %v5628_v11  ;;  %v5753_v36 = vld [vmem:[%s10309_s9 + $0x120] sm:$0xff]  ;;  %v5758_v37 = vld [vmem:[%s10309_s9 + $0x128] sm:$0xff]  ;;  %v5763_v38 = vld [vmem:[%s10309_s9 + $0x130] sm:$0xff] }
   0xe   :  { %10331 = vst [vmem:[#allocation23_spill] sm:$0xff] %v5633_v12  ;;  %v5768_v39 = vld [vmem:[%s10309_s9 + $0x138] sm:$0xff]  ;;  %v5773_v40 = vld [vmem:[%s10309_s9 + $0x140] sm:$0xff]  ;;  %v5778_v41 = vld [vmem:[%s10309_s9 + $0x148] sm:$0xff] }
   0xf   :  { %10332 = vst [vmem:[#allocation24_spill] sm:$0xff] %v5638_v13  ;;  %v5783_v42 = vld [vmem:[%s10309_s9 + $0x150] sm:$0xff]  ;;  %v5788_v43 = vld [vmem:[%s10309_s9 + $0x158] sm:$0xff]  ;;  %v5793_v44 = vld [vmem:[%s10309_s9 + $0x160] sm:$0xff] }
  0x10   :  { %10333 = vst [vmem:[#allocation25_spill] sm:$0xff] %v5643_v14  ;;  %v5798_v45 = vld [vmem:[%s10309_s9 + $0x168] sm:$0xff]  ;;  %v5803_v46 = vld [vmem:[%s10309_s9 + $0x170] sm:$0xff]  ;;  %v5808_v47 = vld [vmem:[%s10309_s9 + $0x178] sm:$0xff] }
  0x11   :  { %10334 = vst [vmem:[#allocation26_spill] sm:$0xff] %v5648_v15  ;;  %v5813_v48 = vld [vmem:[%s10309_s9 + $0x180] sm:$0xff]  ;;  %v5818_v49 = vld [vmem:[%s10309_s9 + $0x188] sm:$0xff]  ;;  %v5823_v50 = vld [vmem:[%s10309_s9 + $0x190] sm:$0xff] }
  0x12   :  { %10335 = vst [vmem:[#allocation27_spill] sm:$0xff] %v5653_v16  ;;  %v5828_v51 = vld [vmem:[%s10309_s9 + $0x198] sm:$0xff]  ;;  %v5833_v52 = vld [vmem:[%s10309_s9 + $0x1a0] sm:$0xff]  ;;  %v5838_v53 = vld [vmem:[%s10309_s9 + $0x1a8] sm:$0xff] }
  0x13   :  { %10336 = vst [vmem:[#allocation28_spill] sm:$0xff] %v5658_v17  ;;  %v5843_v54 = vld [vmem:[%s10309_s9 + $0x1b0] sm:$0xff]  ;;  %v5848_v55 = vld [vmem:[%s10309_s9 + $0x1b8] sm:$0xff]  ;;  %v5853_v56 = vld [vmem:[%s10309_s9 + $0x1c0] sm:$0xff] }
  0x14   :  { %10337 = vst [vmem:[#allocation29_spill] sm:$0xff] %v5663_v18  ;;  %v5858_v57 = vld [vmem:[%s10309_s9 + $0x1c8] sm:$0xff]  ;;  %v5863_v58 = vld [vmem:[%s10309_s9 + $0x1d0] sm:$0xff]  ;;  %v5868_v59 = vld [vmem:[%s10309_s9 + $0x1d8] sm:$0xff] }
  0x15   :  { %10338 = vst [vmem:[#allocation30_spill] sm:$0xff] %v5668_v19  ;;  %v5873_v60 = vld [vmem:[%s10309_s9 + $0x1e0] sm:$0xff]  ;;  %v5878_v61 = vld [vmem:[%s10309_s9 + $0x1e8] sm:$0xff]  ;;  %v5883_v62 = vld [vmem:[%s10309_s9 + $0x1f0] sm:$0xff] }
  0x16   :  { %10339 = vst [vmem:[#allocation31_spill] sm:$0xff] %v5673_v20  ;;  %v5888_v63 = vld [vmem:[%s10309_s9 + $0x1f8] sm:$0xff]  ;;  %v5893_v3 = vld [vmem:[%s10309_s9 + $0x200] sm:$0xff]  ;;  %v5898_v2 = vld [vmem:[%s10309_s9 + $0x208] sm:$0xff] }
  0x17   :  { %10340 = vst [vmem:[#allocation32_spill] sm:$0xff] %v5678_v21  ;;  %v5903_v1 = vld [vmem:[%s10309_s9 + $0x210] sm:$0xff]  ;;  %v5908_v7 = vld [vmem:[%s10309_s9 + $0x218] sm:$0xff]  ;;  %v5913_v6 = vld [vmem:[%s10309_s9 + $0x220] sm:$0xff] }
  0x18   :  { %10341 = vst [vmem:[#allocation33_spill] sm:$0xff] %v5683_v22  ;;  %v6078_v5 = vld [vmem:[%s10309_s9 + $0x328] sm:$0xff]  ;;  %v6083_v11 = vld [vmem:[%s10309_s9 + $0x330] sm:$0xff]  ;;  %v6088_v10 = vld [vmem:[%s10309_s9 + $0x338] sm:$0xff] }
  0x19   :  { %10342 = vst [vmem:[#allocation34_spill] sm:$0xff] %v5688_v23  ;;  %v6093_v9 = vld [vmem:[%s10309_s9 + $0x340] sm:$0xff]  ;;  %v6098_v15 = vld [vmem:[%s10309_s9 + $0x348] sm:$0xff]  ;;  %v6103_v14 = vld [vmem:[%s10309_s9 + $0x350] sm:$0xff] }
  0x1a   :  { %10343 = vst [vmem:[#allocation35_spill] sm:$0xff] %v5693_v24  ;;  %v6108_v13 = vld [vmem:[%s10309_s9 + $0x358] sm:$0xff]  ;;  %v6113_v19 = vld [vmem:[%s10309_s9 + $0x360] sm:$0xff]  ;;  %v6118_v18 = vld [vmem:[%s10309_s9 + $0x368] sm:$0xff] }
  0x1b   :  { %10344 = vst [vmem:[#allocation36_spill] sm:$0xff] %v5698_v25  ;;  %v6123_v17 = vld [vmem:[%s10309_s9 + $0x370] sm:$0xff]  ;;  %v6128_v23 = vld [vmem:[%s10309_s9 + $0x378] sm:$0xff]  ;;  %v6133_v22 = vld [vmem:[%s10309_s9 + $0x380] sm:$0xff] }
  0x1c   :  { %10345 = vst [vmem:[#allocation37_spill] sm:$0xff] %v5703_v26  ;;  %v6138_v21 = vld [vmem:[%s10309_s9 + $0x388] sm:$0xff]  ;;  %v6148_v26 = vld [vmem:[%s10309_s9 + $0x398] sm:$0xff]  ;;  %v6153_v25 = vld [vmem:[%s10309_s9 + $0x3a0] sm:$0xff] }
  0x1d   :  { %10346 = vst [vmem:[#allocation38_spill] sm:$0xff] %v5708_v27  ;;  %v6143_v27 = vld [vmem:[%s10309_s9 + $0x390] sm:$0xff]  ;;  %v6173_v0 = vld [vmem:[%s10309_s9 + $0x3c0] sm:$0xff]  ;;  %v6188_v4 = vld [vmem:[%s10309_s9 + $0x3d8] sm:$0xff] }
  0x1e   :  { %10347 = vst [vmem:[#allocation39_spill] sm:$0xff] %v5713_v28  ;;  %v6203_v8 = vld [vmem:[%s10309_s9 + $0x3f0] sm:$0xff] }
  0x1f   :  { %10348 = vst [vmem:[#allocation40_spill] sm:$0xff] %v5718_v29  ;;  %v6168_v29 = vld [vmem:[%s10309_s9 + $0x3b8] sm:$0xff] }
  0x20   :  { %10349 = vst [vmem:[#allocation41_spill] sm:$0xff] %v5723_v30  ;;  %v6163_v30 = vld [vmem:[%s10309_s9 + $0x3b0] sm:$0xff] }
  0x21   :  { %10350 = vst [vmem:[#allocation42_spill] sm:$0xff] %v5728_v31  ;;  %v6158_v31 = vld [vmem:[%s10309_s9 + $0x3a8] sm:$0xff] }
  0x22   :  { %10351 = vst [vmem:[#allocation43_spill] sm:$0xff] %v5733_v32 }
  0x23   :  { %10352 = vst [vmem:[#allocation44_spill] sm:$0xff] %v5738_v33 }
  0x24   :  { %10353 = vst [vmem:[#allocation45_spill] sm:$0xff] %v5743_v34 }
  0x25   :  { %10354 = vst [vmem:[#allocation46_spill] sm:$0xff] %v5748_v35 }
  0x26   :  { %10355 = vst [vmem:[#allocation47_spill] sm:$0xff] %v5753_v36 }
  0x27   :  { %10356 = vst [vmem:[#allocation48_spill] sm:$0xff] %v5758_v37 }
  0x28   :  { %10357 = vst [vmem:[#allocation49_spill] sm:$0xff] %v5763_v38 }
  0x29   :  { %10358 = vst [vmem:[#allocation50_spill] sm:$0xff] %v5768_v39 }
  0x2a   :  { %10359 = vst [vmem:[#allocation51_spill] sm:$0xff] %v5773_v40 }
  0x2b   :  { %10360 = vst [vmem:[#allocation52_spill] sm:$0xff] %v5778_v41 }
  0x2c   :  { %10361 = vst [vmem:[#allocation53_spill] sm:$0xff] %v5783_v42 }
  0x2d   :  { %10362 = vst [vmem:[#allocation54_spill] sm:$0xff] %v5788_v43 }
  0x2e   :  { %10363 = vst [vmem:[#allocation55_spill] sm:$0xff] %v5793_v44 }
  0x2f   :  { %10364 = vst [vmem:[#allocation56_spill] sm:$0xff] %v5798_v45 }
  0x30   :  { %10365 = vst [vmem:[#allocation57_spill] sm:$0xff] %v5803_v46 }
  0x31   :  { %10366 = vst [vmem:[#allocation58_spill] sm:$0xff] %v5808_v47 }
  0x32   :  { %10367 = vst [vmem:[#allocation59_spill] sm:$0xff] %v5813_v48 }
  0x33   :  { %10368 = vst [vmem:[#allocation60_spill] sm:$0xff] %v5818_v49 }
  0x34   :  { %10369 = vst [vmem:[#allocation61_spill] sm:$0xff] %v5823_v50 }
  0x35   :  { %10370 = vst [vmem:[#allocation62_spill] sm:$0xff] %v5828_v51 }
  0x36   :  { %10371 = vst [vmem:[#allocation63_spill] sm:$0xff] %v5833_v52 }
  0x37   :  { %10372 = vst [vmem:[#allocation64_spill] sm:$0xff] %v5838_v53 }
  0x38   :  { %10373 = vst [vmem:[#allocation65_spill] sm:$0xff] %v5843_v54 }
  0x39   :  { %10374 = vst [vmem:[#allocation66_spill] sm:$0xff] %v5848_v55 }
  0x3a   :  { %10375 = vst [vmem:[#allocation67_spill] sm:$0xff] %v5853_v56 }
  0x3b   :  { %10376 = vst [vmem:[#allocation68_spill] sm:$0xff] %v5858_v57 }
  0x3c   :  { %10377 = vst [vmem:[#allocation69_spill] sm:$0xff] %v5863_v58 }
  0x3d   :  { %10378 = vst [vmem:[#allocation70_spill] sm:$0xff] %v5868_v59 }
  0x3e   :  { %10379 = vst [vmem:[#allocation71_spill] sm:$0xff] %v5873_v60 }
  0x3f   :  { %10380 = vst [vmem:[#allocation72_spill] sm:$0xff] %v5878_v61 }
  0x40   :  { %10381 = vst [vmem:[#allocation73_spill] sm:$0xff] %v5883_v62 }
  0x41   :  { %10382 = vst [vmem:[#allocation74_spill] sm:$0xff] %v5888_v63 }
  0x42   :  { %10383 = vst [vmem:[#allocation75_spill] sm:$0xff] %v5893_v3  ;;  %v5918_v3 = vld [vmem:[%s10309_s9 + $0x228] sm:$0xff] }
  0x43   :  { %10384 = vst [vmem:[#allocation76_spill] sm:$0xff] %v5898_v2  ;;  %v5923_v2 = vld [vmem:[%s10309_s9 + $0x230] sm:$0xff] }
  0x44   :  { %10385 = vst [vmem:[#allocation77_spill] sm:$0xff] %v5903_v1  ;;  %v5928_v1 = vld [vmem:[%s10309_s9 + $0x238] sm:$0xff] }
  0x45   :  { %10386 = vst [vmem:[#allocation78_spill] sm:$0xff] %v5908_v7  ;;  %v5933_v7 = vld [vmem:[%s10309_s9 + $0x240] sm:$0xff] }
  0x46   :  { %10387 = vst [vmem:[#allocation79_spill] sm:$0xff] %v5913_v6  ;;  %v5938_v6 = vld [vmem:[%s10309_s9 + $0x248] sm:$0xff] }
  0x47   :  { %10388 = vst [vmem:[#allocation80_spill] sm:$0xff] %v5918_v3  ;;  %v5943_v3 = vld [vmem:[%s10309_s9 + $0x250] sm:$0xff] }
  0x48   :  { %10389 = vst [vmem:[#allocation81_spill] sm:$0xff] %v5923_v2  ;;  %v5948_v2 = vld [vmem:[%s10309_s9 + $0x258] sm:$0xff] }
  0x49   :  { %10390 = vst [vmem:[#allocation82_spill] sm:$0xff] %v5928_v1  ;;  %v5953_v1 = vld [vmem:[%s10309_s9 + $0x260] sm:$0xff] }
  0x4a   :  { %10391 = vst [vmem:[#allocation83_spill] sm:$0xff] %v5933_v7  ;;  %v5958_v7 = vld [vmem:[%s10309_s9 + $0x268] sm:$0xff] }
  0x4b   :  { %10392 = vst [vmem:[#allocation84_spill] sm:$0xff] %v5938_v6  ;;  %v5963_v6 = vld [vmem:[%s10309_s9 + $0x270] sm:$0xff] }
  0x4c   :  { %10393 = vst [vmem:[#allocation85_spill] sm:$0xff] %v5943_v3  ;;  %v5968_v3 = vld [vmem:[%s10309_s9 + $0x278] sm:$0xff] }
  0x4d   :  { %10394 = vst [vmem:[#allocation86_spill] sm:$0xff] %v5948_v2  ;;  %v5973_v2 = vld [vmem:[%s10309_s9 + $0x280] sm:$0xff] }
  0x4e   :  { %10395 = vst [vmem:[#allocation87_spill] sm:$0xff] %v5953_v1  ;;  %v5978_v1 = vld [vmem:[%s10309_s9 + $0x288] sm:$0xff] }
  0x4f   :  { %10396 = vst [vmem:[#allocation88_spill] sm:$0xff] %v5958_v7  ;;  %v5983_v7 = vld [vmem:[%s10309_s9 + $0x290] sm:$0xff] }
  0x50   :  { %10397 = vst [vmem:[#allocation89_spill] sm:$0xff] %v5963_v6  ;;  %v5988_v6 = vld [vmem:[%s10309_s9 + $0x298] sm:$0xff] }
  0x51   :  { %10398 = vst [vmem:[#allocation90_spill] sm:$0xff] %v5968_v3  ;;  %v5993_v3 = vld [vmem:[%s10309_s9 + $0x2a0] sm:$0xff] }
  0x52   :  { %10399 = vst [vmem:[#allocation91_spill] sm:$0xff] %v5973_v2  ;;  %v5998_v2 = vld [vmem:[%s10309_s9 + $0x2a8] sm:$0xff] }
  0x53   :  { %10400 = vst [vmem:[#allocation92_spill] sm:$0xff] %v5978_v1  ;;  %v6003_v1 = vld [vmem:[%s10309_s9 + $0x2b0] sm:$0xff] }
  0x54   :  { %10401 = vst [vmem:[#allocation93_spill] sm:$0xff] %v5983_v7  ;;  %v6008_v7 = vld [vmem:[%s10309_s9 + $0x2b8] sm:$0xff] }
  0x55   :  { %10402 = vst [vmem:[#allocation94_spill] sm:$0xff] %v5988_v6  ;;  %v6013_v6 = vld [vmem:[%s10309_s9 + $0x2c0] sm:$0xff] }
  0x56   :  { %10403 = vst [vmem:[#allocation95_spill] sm:$0xff] %v5993_v3  ;;  %v6018_v3 = vld [vmem:[%s10309_s9 + $0x2c8] sm:$0xff] }
  0x57   :  { %10404 = vst [vmem:[#allocation96_spill] sm:$0xff] %v5998_v2  ;;  %v6023_v2 = vld [vmem:[%s10309_s9 + $0x2d0] sm:$0xff] }
  0x58   :  { %10405 = vst [vmem:[#allocation97_spill] sm:$0xff] %v6003_v1  ;;  %v6028_v1 = vld [vmem:[%s10309_s9 + $0x2d8] sm:$0xff] }
  0x59   :  { %10406 = vst [vmem:[#allocation98_spill] sm:$0xff] %v6008_v7  ;;  %v6033_v7 = vld [vmem:[%s10309_s9 + $0x2e0] sm:$0xff] }
  0x5a   :  { %10407 = vst [vmem:[#allocation99_spill] sm:$0xff] %v6013_v6  ;;  %v6038_v6 = vld [vmem:[%s10309_s9 + $0x2e8] sm:$0xff] }
  0x5b   :  { %10408 = vst [vmem:[#allocation100_spill] sm:$0xff] %v6018_v3  ;;  %v6043_v3 = vld [vmem:[%s10309_s9 + $0x2f0] sm:$0xff] }
  0x5c   :  { %10409 = vst [vmem:[#allocation101_spill] sm:$0xff] %v6023_v2  ;;  %v6048_v2 = vld [vmem:[%s10309_s9 + $0x2f8] sm:$0xff] }
  0x5d   :  { %10410 = vst [vmem:[#allocation102_spill] sm:$0xff] %v6028_v1  ;;  %v6053_v1 = vld [vmem:[%s10309_s9 + $0x300] sm:$0xff] }
  0x5e   :  { %10411 = vst [vmem:[#allocation103_spill] sm:$0xff] %v6033_v7  ;;  %v6058_v7 = vld [vmem:[%s10309_s9 + $0x308] sm:$0xff] }
  0x5f   :  { %10412 = vst [vmem:[#allocation104_spill] sm:$0xff] %v6038_v6  ;;  %v6063_v6 = vld [vmem:[%s10309_s9 + $0x310] sm:$0xff] }
  0x60   :  { %10413 = vst [vmem:[#allocation105_spill] sm:$0xff] %v6043_v3  ;;  %v6068_v3 = vld [vmem:[%s10309_s9 + $0x318] sm:$0xff] }
  0x61   :  { %10414 = vst [vmem:[#allocation106_spill] sm:$0xff] %v6048_v2  ;;  %v6073_v2 = vld [vmem:[%s10309_s9 + $0x320] sm:$0xff] }
  0x62   :  { %10415 = vst [vmem:[#allocation107_spill] sm:$0xff] %v6053_v1 }
  0x63   :  { %10416 = vst [vmem:[#allocation108_spill] sm:$0xff] %v6058_v7 }
  0x64   :  { %10417 = vst [vmem:[#allocation109_spill] sm:$0xff] %v6063_v6  ;;  %v6183_v6 = vld [vmem:[%s10309_s9 + $0x3d0] sm:$0xff] }
  0x65   :  { %10418 = vst [vmem:[#allocation110_spill] sm:$0xff] %v6068_v3  ;;  %v6178_v3 = vld [vmem:[%s10309_s9 + $0x3c8] sm:$0xff] }
  0x66   :  { %10419 = vst [vmem:[#allocation111_spill] sm:$0xff] %v6073_v2 }
  0x67   :  { %10420 = vst [vmem:[#allocation112_spill] sm:$0xff] %v6078_v5 }
  0x68   :  { %10421 = vst [vmem:[#allocation113_spill] sm:$0xff] %v6083_v11  ;;  %v6193_v11 = vld [vmem:[%s10309_s9 + $0x3e0] sm:$0xff] }
  0x69   :  { %10422 = vst [vmem:[#allocation114_spill] sm:$0xff] %v6088_v10  ;;  %v6198_v10 = vld [vmem:[%s10309_s9 + $0x3e8] sm:$0xff] }
  0x6a   :  { %10423 = vst [vmem:[#allocation115_spill] sm:$0xff] %v6093_v9 }
  0x6b   :  { %10424 = vst [vmem:[#allocation116_spill] sm:$0xff] %v6098_v15 }
  0x6c   :  { %10425 = vst [vmem:[#allocation117_spill] sm:$0xff] %v6103_v14  ;;  %v6208_v14 = vld [vmem:[%s10309_s9 + $0x3f8] sm:$0xff] }
  0x6d   :  { %10426 = vst [vmem:[#allocation118_spill] sm:$0xff] %v6108_v13 }
  0x6e   :  { %10427 = vst [vmem:[#allocation119_spill] sm:$0xff] %v6113_v19 }
  0x6f   :  { %10428 = vst [vmem:[#allocation120_spill] sm:$0xff] %v6118_v18 }
  0x70   :  { %10429 = vst [vmem:[#allocation121_spill] sm:$0xff] %v6123_v17 }
  0x71   :  { %10430 = vst [vmem:[#allocation122_spill] sm:$0xff] %v6128_v23 }
  0x72   :  { %10431 = vst [vmem:[#allocation123_spill] sm:$0xff] %v6133_v22 }
  0x73   :  { %10432 = vst [vmem:[#allocation124_spill] sm:$0xff] %v6138_v21 }
  0x74   :  { %10433 = vst [vmem:[#allocation125_spill] sm:$0xff] %v6143_v27 }
  0x75   :  { %10434 = vst [vmem:[#allocation126_spill] sm:$0xff] %v6148_v26 }
  0x76   :  { %10435 = vst [vmem:[#allocation127_spill] sm:$0xff] %v6153_v25 }
  0x77   :  { %10436 = vst [vmem:[#allocation128_spill] sm:$0xff] %v6158_v31 }
  0x78   :  { %10437 = vst [vmem:[#allocation129_spill] sm:$0xff] %v6163_v30 }
  0x79   :  { %10438 = vst [vmem:[#allocation130_spill] sm:$0xff] %v6168_v29 }
  0x7a   :  { %10439 = vst [vmem:[#allocation131_spill] sm:$0xff] %v6173_v0 }
  0x7b   :  { %10440 = vst [vmem:[#allocation132_spill] sm:$0xff] %v6178_v3 }
  0x7c   :  { %10441 = vst [vmem:[#allocation133_spill] sm:$0xff] %v6183_v6 }
  0x7d   :  { %10442 = vst [vmem:[#allocation134_spill] sm:$0xff] %v6188_v4 }
  0x7e   :  { %10443 = vst [vmem:[#allocation135_spill] sm:$0xff] %v6193_v11 }
  0x7f   :  { %10444 = vst [vmem:[#allocation136_spill] sm:$0xff] %v6198_v10 }
  0x80   :  { %10445 = vst [vmem:[#allocation137_spill] sm:$0xff] %v6203_v8 }
  0x81   :  { %10446 = vst [vmem:[#allocation138_spill] sm:$0xff] %v6208_v14 }
  0x82   :  { %311 = vsyncadd [#allocation6], 16384  ;;  %v6213_v13 = vld [vmem:[%s10311_s11] sm:$0xff]  ;;  %v6218_v12 = vld [vmem:[%s10311_s11 + $0x8] sm:$0xff] }
  0x83   :  { %10447 = vst [vmem:[#allocation139_spill] sm:$0xff] %v6213_v13  ;;  %v6223_v17 = vld [vmem:[%s10311_s11 + $0x10] sm:$0xff]  ;;  %v6228_v23 = vld [vmem:[%s10311_s11 + $0x18] sm:$0xff]  ;;  %v6233_v16 = vld [vmem:[%s10311_s11 + $0x20] sm:$0xff] }
  0x84   :  { %10448 = vst [vmem:[#allocation140_spill] sm:$0xff] %v6218_v12  ;;  %v6238_v13 = vld [vmem:[%s10311_s11 + $0x28] sm:$0xff]  ;;  %v6243_v12 = vld [vmem:[%s10311_s11 + $0x30] sm:$0xff] }
  0x85   :  { %10449 = vst [vmem:[#allocation141_spill] sm:$0xff] %v6223_v17  ;;  %v6248_v17 = vld [vmem:[%s10311_s11 + $0x38] sm:$0xff] }
  0x86   :  { %10450 = vst [vmem:[#allocation142_spill] sm:$0xff] %v6228_v23  ;;  %v6253_v23 = vld [vmem:[%s10311_s11 + $0x40] sm:$0xff] }
  0x87   :  { %10451 = vst [vmem:[#allocation143_spill] sm:$0xff] %v6233_v16  ;;  %v6258_v16 = vld [vmem:[%s10311_s11 + $0x48] sm:$0xff] }
  0x88   :  { %10452 = vst [vmem:[#allocation144_spill] sm:$0xff] %v6238_v13  ;;  %v6263_v13 = vld [vmem:[%s10311_s11 + $0x50] sm:$0xff] }
  0x89   :  { %10453 = vst [vmem:[#allocation145_spill] sm:$0xff] %v6243_v12  ;;  %v6268_v12 = vld [vmem:[%s10311_s11 + $0x58] sm:$0xff] }
  0x8a   :  { %10454 = vst [vmem:[#allocation146_spill] sm:$0xff] %v6248_v17  ;;  %v6273_v17 = vld [vmem:[%s10311_s11 + $0x60] sm:$0xff] }
  0x8b   :  { %10455 = vst [vmem:[#allocation147_spill] sm:$0xff] %v6253_v23  ;;  %v6278_v23 = vld [vmem:[%s10311_s11 + $0x68] sm:$0xff] }
  0x8c   :  { %10456 = vst [vmem:[#allocation148_spill] sm:$0xff] %v6258_v16  ;;  %v6283_v16 = vld [vmem:[%s10311_s11 + $0x70] sm:$0xff] }
  0x8d   :  { %10457 = vst [vmem:[#allocation149_spill] sm:$0xff] %v6263_v13  ;;  %v6288_v13 = vld [vmem:[%s10311_s11 + $0x78] sm:$0xff] }
  0x8e   :  { %10458 = vst [vmem:[#allocation150_spill] sm:$0xff] %v6268_v12  ;;  %v6293_v12 = vld [vmem:[%s10311_s11 + $0x80] sm:$0xff] }
  0x8f   :  { %10459 = vst [vmem:[#allocation151_spill] sm:$0xff] %v6273_v17  ;;  %v6298_v17 = vld [vmem:[%s10311_s11 + $0x88] sm:$0xff] }
  0x90   :  { %10460 = vst [vmem:[#allocation152_spill] sm:$0xff] %v6278_v23  ;;  %v6303_v23 = vld [vmem:[%s10311_s11 + $0x90] sm:$0xff] }
  0x91   :  { %10461 = vst [vmem:[#allocation153_spill] sm:$0xff] %v6283_v16  ;;  %v6308_v16 = vld [vmem:[%s10311_s11 + $0x98] sm:$0xff] }
  0x92   :  { %10462 = vst [vmem:[#allocation154_spill] sm:$0xff] %v6288_v13  ;;  %v6313_v13 = vld [vmem:[%s10311_s11 + $0xa0] sm:$0xff] }
  0x93   :  { %10463 = vst [vmem:[#allocation155_spill] sm:$0xff] %v6293_v12  ;;  %v6318_v12 = vld [vmem:[%s10311_s11 + $0xa8] sm:$0xff] }
  0x94   :  { %10464 = vst [vmem:[#allocation156_spill] sm:$0xff] %v6298_v17  ;;  %v6323_v17 = vld [vmem:[%s10311_s11 + $0xb0] sm:$0xff] }
  0x95   :  { %10465 = vst [vmem:[#allocation157_spill] sm:$0xff] %v6303_v23  ;;  %v6328_v23 = vld [vmem:[%s10311_s11 + $0xb8] sm:$0xff] }
  0x96   :  { %10466 = vst [vmem:[#allocation158_spill] sm:$0xff] %v6308_v16  ;;  %v6333_v16 = vld [vmem:[%s10311_s11 + $0xc0] sm:$0xff] }
  0x97   :  { %10467 = vst [vmem:[#allocation159_spill] sm:$0xff] %v6313_v13  ;;  %v6338_v13 = vld [vmem:[%s10311_s11 + $0xc8] sm:$0xff] }
  0x98   :  { %10468 = vst [vmem:[#allocation160_spill] sm:$0xff] %v6318_v12  ;;  %v6343_v12 = vld [vmem:[%s10311_s11 + $0xd0] sm:$0xff] }
  0x99   :  { %10469 = vst [vmem:[#allocation161_spill] sm:$0xff] %v6323_v17  ;;  %v6348_v17 = vld [vmem:[%s10311_s11 + $0xd8] sm:$0xff] }
  0x9a   :  { %10470 = vst [vmem:[#allocation162_spill] sm:$0xff] %v6328_v23  ;;  %v6353_v23 = vld [vmem:[%s10311_s11 + $0xe0] sm:$0xff] }
  0x9b   :  { %10471 = vst [vmem:[#allocation163_spill] sm:$0xff] %v6333_v16  ;;  %v6358_v16 = vld [vmem:[%s10311_s11 + $0xe8] sm:$0xff] }
  0x9c   :  { %10472 = vst [vmem:[#allocation164_spill] sm:$0xff] %v6338_v13  ;;  %v6363_v13 = vld [vmem:[%s10311_s11 + $0xf0] sm:$0xff] }
  0x9d   :  { %10473 = vst [vmem:[#allocation165_spill] sm:$0xff] %v6343_v12  ;;  %v6368_v12 = vld [vmem:[%s10311_s11 + $0xf8] sm:$0xff] }
  0x9e   :  { %10474 = vst [vmem:[#allocation166_spill] sm:$0xff] %v6348_v17  ;;  %v6373_v17 = vld [vmem:[%s10311_s11 + $0x100] sm:$0xff] }
  0x9f   :  { %10475 = vst [vmem:[#allocation167_spill] sm:$0xff] %v6353_v23  ;;  %v6378_v23 = vld [vmem:[%s10311_s11 + $0x108] sm:$0xff] }
  0xa0   :  { %10476 = vst [vmem:[#allocation168_spill] sm:$0xff] %v6358_v16  ;;  %v6383_v16 = vld [vmem:[%s10311_s11 + $0x110] sm:$0xff] }
  0xa1   :  { %10477 = vst [vmem:[#allocation169_spill] sm:$0xff] %v6363_v13  ;;  %v6388_v13 = vld [vmem:[%s10311_s11 + $0x118] sm:$0xff] }
  0xa2   :  { %10478 = vst [vmem:[#allocation170_spill] sm:$0xff] %v6368_v12  ;;  %v6393_v12 = vld [vmem:[%s10311_s11 + $0x120] sm:$0xff] }
  0xa3   :  { %10479 = vst [vmem:[#allocation171_spill] sm:$0xff] %v6373_v17  ;;  %v6398_v17 = vld [vmem:[%s10311_s11 + $0x128] sm:$0xff] }
  0xa4   :  { %10480 = vst [vmem:[#allocation172_spill] sm:$0xff] %v6378_v23  ;;  %v6403_v23 = vld [vmem:[%s10311_s11 + $0x130] sm:$0xff] }
  0xa5   :  { %10481 = vst [vmem:[#allocation173_spill] sm:$0xff] %v6383_v16  ;;  %v6408_v16 = vld [vmem:[%s10311_s11 + $0x138] sm:$0xff] }
  0xa6   :  { %10482 = vst [vmem:[#allocation174_spill] sm:$0xff] %v6388_v13  ;;  %v6413_v13 = vld [vmem:[%s10311_s11 + $0x140] sm:$0xff] }
  0xa7   :  { %10483 = vst [vmem:[#allocation175_spill] sm:$0xff] %v6393_v12  ;;  %v6418_v12 = vld [vmem:[%s10311_s11 + $0x148] sm:$0xff] }
  0xa8   :  { %10484 = vst [vmem:[#allocation176_spill] sm:$0xff] %v6398_v17  ;;  %v6423_v17 = vld [vmem:[%s10311_s11 + $0x150] sm:$0xff] }
  0xa9   :  { %10485 = vst [vmem:[#allocation177_spill] sm:$0xff] %v6403_v23  ;;  %v6428_v23 = vld [vmem:[%s10311_s11 + $0x158] sm:$0xff] }
  0xaa   :  { %10486 = vst [vmem:[#allocation178_spill] sm:$0xff] %v6408_v16  ;;  %v6433_v16 = vld [vmem:[%s10311_s11 + $0x160] sm:$0xff] }
  0xab   :  { %10487 = vst [vmem:[#allocation179_spill] sm:$0xff] %v6413_v13  ;;  %v6438_v13 = vld [vmem:[%s10311_s11 + $0x168] sm:$0xff] }
  0xac   :  { %10488 = vst [vmem:[#allocation180_spill] sm:$0xff] %v6418_v12  ;;  %v6443_v12 = vld [vmem:[%s10311_s11 + $0x170] sm:$0xff] }
  0xad   :  { %10489 = vst [vmem:[#allocation181_spill] sm:$0xff] %v6423_v17  ;;  %v6448_v17 = vld [vmem:[%s10311_s11 + $0x178] sm:$0xff] }
  0xae   :  { %10490 = vst [vmem:[#allocation182_spill] sm:$0xff] %v6428_v23  ;;  %v6453_v23 = vld [vmem:[%s10311_s11 + $0x180] sm:$0xff] }
  0xaf   :  { %10491 = vst [vmem:[#allocation183_spill] sm:$0xff] %v6433_v16  ;;  %v6458_v16 = vld [vmem:[%s10311_s11 + $0x188] sm:$0xff] }
  0xb0   :  { %10492 = vst [vmem:[#allocation184_spill] sm:$0xff] %v6438_v13  ;;  %v6463_v13 = vld [vmem:[%s10311_s11 + $0x190] sm:$0xff] }
  0xb1   :  { %10493 = vst [vmem:[#allocation185_spill] sm:$0xff] %v6443_v12  ;;  %v6468_v12 = vld [vmem:[%s10311_s11 + $0x198] sm:$0xff] }
  0xb2   :  { %10494 = vst [vmem:[#allocation186_spill] sm:$0xff] %v6448_v17  ;;  %v6473_v17 = vld [vmem:[%s10311_s11 + $0x1a0] sm:$0xff] }
  0xb3   :  { %10495 = vst [vmem:[#allocation187_spill] sm:$0xff] %v6453_v23  ;;  %v6478_v23 = vld [vmem:[%s10311_s11 + $0x1a8] sm:$0xff] }
  0xb4   :  { %10496 = vst [vmem:[#allocation188_spill] sm:$0xff] %v6458_v16  ;;  %v6483_v16 = vld [vmem:[%s10311_s11 + $0x1b0] sm:$0xff] }
  0xb5   :  { %10497 = vst [vmem:[#allocation189_spill] sm:$0xff] %v6463_v13  ;;  %v6488_v13 = vld [vmem:[%s10311_s11 + $0x1b8] sm:$0xff] }
  0xb6   :  { %10498 = vst [vmem:[#allocation190_spill] sm:$0xff] %v6468_v12  ;;  %v6493_v12 = vld [vmem:[%s10311_s11 + $0x1c0] sm:$0xff] }
  0xb7   :  { %10499 = vst [vmem:[#allocation191_spill] sm:$0xff] %v6473_v17  ;;  %v6498_v17 = vld [vmem:[%s10311_s11 + $0x1c8] sm:$0xff] }
  0xb8   :  { %10500 = vst [vmem:[#allocation192_spill] sm:$0xff] %v6478_v23  ;;  %v6503_v23 = vld [vmem:[%s10311_s11 + $0x1d0] sm:$0xff] }
  0xb9   :  { %10501 = vst [vmem:[#allocation193_spill] sm:$0xff] %v6483_v16  ;;  %v6508_v16 = vld [vmem:[%s10311_s11 + $0x1d8] sm:$0xff] }
  0xba   :  { %10502 = vst [vmem:[#allocation194_spill] sm:$0xff] %v6488_v13  ;;  %v6513_v13 = vld [vmem:[%s10311_s11 + $0x1e0] sm:$0xff] }
  0xbb   :  { %10503 = vst [vmem:[#allocation195_spill] sm:$0xff] %v6493_v12  ;;  %v6518_v12 = vld [vmem:[%s10311_s11 + $0x1e8] sm:$0xff] }
  0xbc   :  { %10504 = vst [vmem:[#allocation196_spill] sm:$0xff] %v6498_v17  ;;  %v6523_v17 = vld [vmem:[%s10311_s11 + $0x1f0] sm:$0xff] }
  0xbd   :  { %10505 = vst [vmem:[#allocation197_spill] sm:$0xff] %v6503_v23  ;;  %v6528_v23 = vld [vmem:[%s10311_s11 + $0x1f8] sm:$0xff] }
  0xbe   :  { %10506 = vst [vmem:[#allocation198_spill] sm:$0xff] %v6508_v16 }
  0xbf   :  { %10507 = vst [vmem:[#allocation199_spill] sm:$0xff] %v6513_v13 }
  0xc0   :  { %10508 = vst [vmem:[#allocation200_spill] sm:$0xff] %v6518_v12 }
  0xc1   :  { %10509 = vst [vmem:[#allocation201_spill] sm:$0xff] %v6523_v17 }
  0xc2   :  { %10510 = vst [vmem:[#allocation202_spill] sm:$0xff] %v6528_v23 }
  0xc3   :  { %456 = vsyncadd [#allocation6 + $0x1], 8192  ;;  %v680_v16 = vld [vmem:[%s10301_s1 + $0x78] sm:$0xff]  ;;  %v679_v12 = vld [vmem:[%s10301_s1 + $0x70] sm:$0xff]  ;;  %vm1495_vm0 = vcmask 850944   ;;  %s5497_s17 = smov 96  }
  0xc4   :  { %v696_v13 = vld [vmem:[%s10301_s1 + $0xf8] sm:$0xff]  ;;  %701 = vmatpush.msra.mxu0 %v680_v16  ;;  %v695_v17 = vld [vmem:[%s10301_s1 + $0xf0] sm:$0xff]  ;;  %v678_v23 = vld [vmem:[%s10301_s1 + $0x68] sm:$0xff]  ;;  %vm1705_vm1 = vcmask 261120   ;;  %s5498_s25 = smov 32   ;;  %s5499_s20 = smov 64  }
  0xc5   :  { %1030 = vmatpush.msra.mxu1 %v696_v13  ;;  %v694_v27 = vld [vmem:[%s10301_s1 + $0xe8] sm:$0xff]  ;;  %v677_v13 = vld [vmem:[%s10301_s1 + $0x60] sm:$0xff]  ;;  %v676_v26 = vld [vmem:[%s10301_s1 + $0x58] sm:$0xff]  ;;  %vm1716_vm2 = vcmask 523520   ;;  %vm1727_vm3 = vcmask 785920   ;;  %vm1738_vm4 = vcmask 1048320  }
  0xc6   :  { %702 = vmatpush.msra.mxu0 %v679_v12  ;;  %v693_v16 = vld [vmem:[%s10301_s1 + $0xe0] sm:$0xff]  ;;  %v692_v20 = vld [vmem:[%s10301_s1 + $0xd8] sm:$0xff]  ;;  %v675_v12 = vld [vmem:[%s10301_s1 + $0x50] sm:$0xff]  ;;  %vm4093_vm5 = vcmask 523264   ;;  %vm4114_vm6 = vcmask 1048064  }
  0xc7   :  { %1031 = vmatpush.msra.mxu1 %v695_v17  ;;  %v691_v17 = vld [vmem:[%s10301_s1 + $0xd0] sm:$0xff]  ;;  %v6775_v8 = vld [vmem:[%s10302_s2] ss:$0 sm:$0xff]  ;;  %v500_v7 = vld [vmem:[%s10300_s0 + $0x158] sm:$0xff] }
  0xc8   :  { %703 = vmatpush.msra.mxu0 %v678_v23  ;;  %v674_v23 = vld [vmem:[%s10301_s1 + $0x48] sm:$0xff]  ;;  %v499_v14 = vld [vmem:[%s10300_s0 + $0x150] sm:$0xff]  ;;  %v501_v5 = vld [vmem:[%s10300_s0 + $0x160] sm:$0xff] }
  0xc9   :  { %1032 = vmatpush.msra.mxu1 %v694_v27  ;;  %v690_v27 = vld [vmem:[%s10301_s1 + $0xc8] sm:$0xff]  ;;  %v507_v43 = vld [vmem:[%s10300_s0 + $0x190] sm:$0xff]  ;;  %v509_v19 = vld [vmem:[%s10300_s0 + $0x1a0] sm:$0xff] }
  0xca   :  { %704 = vmatpush.msra.mxu0 %v677_v13  ;;  %v673_v13 = vld [vmem:[%s10301_s1 + $0x40] sm:$0xff]  ;;  %v502_v2 = vld [vmem:[%s10300_s0 + $0x168] sm:$0xff]  ;;  %v511_v21 = vld [vmem:[%s10300_s0 + $0x1b0] sm:$0xff] }
  0xcb   :  { %1033 = vmatpush.msra.mxu1 %v693_v16  ;;  %v689_v16 = vld [vmem:[%s10301_s1 + $0xc0] sm:$0xff]  ;;  %v540_v34 = vld [vmem:[%s10300_s0 + $0x298] sm:$0xff]  ;;  %v559_v46 = vld [vmem:[%s10300_s0 + $0x330] sm:$0xff] }
  0xcc   :  { %705 = vmatpush.msra.mxu0 %v676_v26  ;;  %v688_v26 = vld [vmem:[%s10301_s1 + $0xb8] sm:$0xff]  ;;  %v7039_v42 = vld [vmem:[%s10303_s3 + $0x80] sm:$0xff]  ;;  %v562_v49 = vld [vmem:[%s10300_s0 + $0x348] sm:$0xff] }
  0xcd   :  { %1034 = vmatpush.msra.mxu1 %v692_v20  ;;  %v672_v20 = vld [vmem:[%s10301_s1 + $0x38] sm:$0xff]  ;;  %v561_v50 = vld [vmem:[%s10300_s0 + $0x340] sm:$0xff]  ;;  %v563_v54 = vld [vmem:[%s10300_s0 + $0x350] sm:$0xff] }
  0xce   :  { %706 = vmatpush.msra.mxu0 %v675_v12  ;;  %v671_v12 = vld [vmem:[%s10301_s1 + $0x30] sm:$0xff]  ;;  %v7304_v53 = vld [vmem:[%s10303_s3 + $0xe0] sm:$0xff] }
  0xcf   :  { %1035 = vmatpush.msra.mxu1 %v691_v17  ;;  %v687_v17 = vld [vmem:[%s10301_s1 + $0xb0] sm:$0xff]  ;;  %10513 = vst [vmem:[#allocation205_spill] sm:$0xff] %v7304_v53  ;;  %v565_v56 = vld [vmem:[%s10300_s0 + $0x360] sm:$0xff] }
  0xd0   :  { %707 = vmatpush.msra.mxu0 %v674_v23  ;;  %v670_v23 = vld [vmem:[%s10301_s1 + $0x28] sm:$0xff] }
  0xd1   :  { %1036 = vmatpush.msra.mxu1 %v690_v27  ;;  %v686_v27 = vld [vmem:[%s10301_s1 + $0xa8] sm:$0xff] }
  0xd2   :  { %708 = vmatpush.msra.mxu0 %v673_v13  ;;  %v669_v13 = vld [vmem:[%s10301_s1 + $0x20] sm:$0xff] }
  0xd3   :  { %1037 = vmatpush.msra.mxu1 %v689_v16  ;;  %v685_v16 = vld [vmem:[%s10301_s1 + $0xa0] sm:$0xff] }
  0xd4   :  { %709 = vmatpush.msra.mxu0 %v672_v20  ;;  %v668_v20 = vld [vmem:[%s10301_s1 + $0x18] sm:$0xff] }
  0xd5   :  { %1038 = vmatpush.msra.mxu1 %v688_v26  ;;  %v684_v26 = vld [vmem:[%s10301_s1 + $0x98] sm:$0xff] }
  0xd6   :  { %710 = vmatpush.msra.mxu0 %v671_v12  ;;  %v667_v12 = vld [vmem:[%s10301_s1 + $0x10] sm:$0xff] }
  0xd7   :  { %1039 = vmatpush.msra.mxu1 %v687_v17  ;;  %v683_v17 = vld [vmem:[%s10301_s1 + $0x90] sm:$0xff] }
  0xd8   :  { %711 = vmatpush.msra.mxu0 %v670_v23  ;;  %v666_v23 = vld [vmem:[%s10301_s1 + $0x8] sm:$0xff] }
  0xd9   :  { %1040 = vmatpush.msra.mxu1 %v686_v27  ;;  %v682_v27 = vld [vmem:[%s10301_s1 + $0x88] sm:$0xff] }
  0xda   :  { %712 = vmatpush.msra.mxu0 %v669_v13  ;;  %v665_v13 = vld [vmem:[%s10301_s1] sm:$0xff] }
  0xdb   :  { %1041 = vmatpush.msra.mxu1 %v685_v16  ;;  %v681_v16 = vld [vmem:[%s10301_s1 + $0x80] sm:$0xff] }
  0xdc   :  { %713 = vmatpush.msra.mxu0 %v668_v20  ;;  %v457_v20 = vld [vmem:[%s10300_s0] sm:$0xff] }
  0xdd   :  { %1042 = vmatpush.msra.mxu1 %v684_v26  ;;  %v458_v26 = vld [vmem:[%s10300_s0 + $0x8] sm:$0xff] }
  0xde   :  { %714 = vmatpush.msra.mxu0 %v667_v12  ;;  %v459_v12 = vld [vmem:[%s10300_s0 + $0x10] sm:$0xff] }
  0xdf   :  { %1043 = vmatpush.msra.mxu1 %v683_v17  ;;  %v460_v17 = vld [vmem:[%s10300_s0 + $0x18] sm:$0xff] }
  0xe0   :  { %715 = vmatpush.msra.mxu0 %v666_v23  ;;  %v461_v23 = vld [vmem:[%s10300_s0 + $0x20] sm:$0xff] }
  0xe1   :  { %1044 = vmatpush.msra.mxu1 %v682_v27  ;;  %v462_v27 = vld [vmem:[%s10300_s0 + $0x28] sm:$0xff] }
  0xe2   :  { %716 = vmatpush.msra.mxu0 %v665_v13  ;;  %v463_v13 = vld [vmem:[%s10300_s0 + $0x30] sm:$0xff] }
  0xe3   :  { %1045 = vmatpush.msra.mxu1 %v681_v16  ;;  %717 = vmatmul.f32.vlgmr.msra.gmra.mxu0 %v457_v20  ;;  %v464_v16 = vld [vmem:[%s10300_s0 + $0x38] sm:$0xff]  ;;  %v465_v20 = vld [vmem:[%s10300_s0 + $0x40] sm:$0xff] }
  0xe4   :  { %1046 = vmatmul.f32.vlgmr.msra.gmra.mxu1 %v458_v26  ;;  %v466_v26 = vld [vmem:[%s10300_s0 + $0x48] sm:$0xff] }
  0xeb   :  { %720 = vmatmul.f32.gmra.mxu0 %v459_v12  ;;  %v467_v12 = vld [vmem:[%s10300_s0 + $0x50] sm:$0xff] }
  0xec   :  { %1049 = vmatmul.f32.gmra.mxu1 %v460_v17  ;;  %v468_v17 = vld [vmem:[%s10300_s0 + $0x58] sm:$0xff] }
  0xf3   :  { %723 = vmatmul.f32.gmra.mxu0 %v461_v23  ;;  %v469_v23 = vld [vmem:[%s10300_s0 + $0x60] sm:$0xff] }
  0xf4   :  { %1052 = vmatmul.f32.gmra.mxu1 %v462_v27  ;;  %v470_v27 = vld [vmem:[%s10300_s0 + $0x68] sm:$0xff] }
  0xfb   :  { %726 = vmatmul.f32.gmra.mxu0 %v463_v13  ;;  %v471_v13 = vld [vmem:[%s10300_s0 + $0x70] sm:$0xff] }
  0xfc   :  { %1055 = vmatmul.f32.gmra.mxu1 %v464_v16  ;;  %v472_v16 = vld [vmem:[%s10300_s0 + $0x78] sm:$0xff] }
 0x103   :  { %729 = vmatmul.f32.gmra.mxu0 %v465_v20  ;;  %v473_v20 = vld [vmem:[%s10300_s0 + $0x80] sm:$0xff] }
 0x104   :  { %1058 = vmatmul.f32.gmra.mxu1 %v466_v26  ;;  %v474_v26 = vld [vmem:[%s10300_s0 + $0x88] sm:$0xff] }
 0x10b   :  { %732 = vmatmul.f32.gmra.mxu0 %v467_v12  ;;  %v475_v12 = vld [vmem:[%s10300_s0 + $0x90] sm:$0xff] }
 0x10c   :  { %1061 = vmatmul.f32.gmra.mxu1 %v468_v17  ;;  %v476_v17 = vld [vmem:[%s10300_s0 + $0x98] sm:$0xff] }
 0x113   :  { %735 = vmatmul.f32.gmra.mxu0 %v469_v23  ;;  %v477_v23 = vld [vmem:[%s10300_s0 + $0xa0] sm:$0xff] }
 0x114   :  { %1064 = vmatmul.f32.gmra.mxu1 %v470_v27  ;;  %v478_v27 = vld [vmem:[%s10300_s0 + $0xa8] sm:$0xff] }
 0x11b   :  { %738 = vmatmul.f32.gmra.mxu0 %v471_v13  ;;  %v479_v13 = vld [vmem:[%s10300_s0 + $0xb0] sm:$0xff] }
 0x11c   :  { %1067 = vmatmul.f32.gmra.mxu1 %v472_v16  ;;  %v480_v16 = vld [vmem:[%s10300_s0 + $0xb8] sm:$0xff] }
 0x123   :  { %741 = vmatmul.f32.gmra.mxu0 %v473_v20  ;;  %v481_v20 = vld [vmem:[%s10300_s0 + $0xc0] sm:$0xff] }
 0x124   :  { %1070 = vmatmul.f32.gmra.mxu1 %v474_v26  ;;  %v482_v26 = vld [vmem:[%s10300_s0 + $0xc8] sm:$0xff] }
 0x12b   :  { %744 = vmatmul.f32.gmra.mxu0 %v475_v12  ;;  %v483_v12 = vld [vmem:[%s10300_s0 + $0xd0] sm:$0xff] }
 0x12c   :  { %1073 = vmatmul.f32.gmra.mxu1 %v476_v17  ;;  %v484_v17 = vld [vmem:[%s10300_s0 + $0xd8] sm:$0xff] }
 0x133   :  { %747 = vmatmul.f32.gmra.mxu0 %v477_v23  ;;  %v485_v23 = vld [vmem:[%s10300_s0 + $0xe0] sm:$0xff] }
 0x134   :  { %1076 = vmatmul.f32.gmra.mxu1 %v478_v27  ;;  %v486_v27 = vld [vmem:[%s10300_s0 + $0xe8] sm:$0xff] }
 0x13b   :  { %750 = vmatmul.f32.gmra.mxu0 %v479_v13  ;;  %v487_v13 = vld [vmem:[%s10300_s0 + $0xf0] sm:$0xff] }
 0x13c   :  { %1079 = vmatmul.f32.gmra.mxu1 %v480_v16  ;;  %v488_v16 = vld [vmem:[%s10300_s0 + $0xf8] sm:$0xff] }
 0x143   :  { %753 = vmatmul.f32.gmra.mxu0 %v481_v20 }
 0x144   :  { %1082 = vmatmul.f32.gmra.mxu1 %v482_v26 }
 0x14b   :  { %756 = vmatmul.f32.gmra.mxu0 %v483_v12  ;;  %v489_v12 = vld [vmem:[%s10300_s0 + $0x100] sm:$0xff] }
 0x14c   :  { %1085 = vmatmul.f32.gmra.mxu1 %v484_v17  ;;  %v490_v17 = vld [vmem:[%s10300_s0 + $0x108] sm:$0xff] }
 0x153   :  { %759 = vmatmul.f32.gmra.mxu0 %v485_v23 }
 0x154   :  { %1088 = vmatmul.f32.gmra.mxu1 %v486_v27 }
 0x15b   :  { %762 = vmatmul.f32.gmra.mxu0 %v487_v13  ;;  %v491_v13 = vld [vmem:[%s10300_s0 + $0x110] sm:$0xff] }
 0x15c   :  { %1091 = vmatmul.f32.gmra.mxu1 %v488_v16  ;;  %v492_v16 = vld [vmem:[%s10300_s0 + $0x118] sm:$0xff] }
 0x160   :  { %v6722_v20 = vpop.f32.mrf.mxu0 }
 0x161   :  { %v6724_v26 = vpop.f32.mrf.mxu1 }
 0x163   :  { %765 = vmatmul.f32.gmra.mxu0 %v489_v12  ;;  %v493_v12 = vld [vmem:[%s10300_s0 + $0x120] sm:$0xff] }
 0x164   :  { %1094 = vmatmul.f32.gmra.mxu1 %v490_v17  ;;  %v494_v17 = vld [vmem:[%s10300_s0 + $0x128] sm:$0xff] }
 0x168   :  { %v6732_v23 = vpop.f32.mrf.mxu0 }
 0x169   :  { %v6734_v27 = vpop.f32.mrf.mxu1 }
 0x16b   :  { %768 = vmatmul.f32.gmra.mxu0 %v491_v13  ;;  %v495_v13 = vld [vmem:[%s10300_s0 + $0x130] sm:$0xff] }
 0x16c   :  { %1097 = vmatmul.f32.gmra.mxu1 %v492_v16  ;;  %v496_v16 = vld [vmem:[%s10300_s0 + $0x138] sm:$0xff] }
 0x170   :  { %v6742_v30 = vpop.f32.mrf.mxu0 }
 0x171   :  { %v6744_v29 = vpop.f32.mrf.mxu1 }
 0x173   :  { %771 = vmatmul.f32.gmra.mxu0 %v493_v12  ;;  %v497_v12 = vld [vmem:[%s10300_s0 + $0x140] sm:$0xff] }
 0x174   :  { %1100 = vmatmul.f32.gmra.mxu1 %v494_v17  ;;  %v498_v17 = vld [vmem:[%s10300_s0 + $0x148] sm:$0xff] }
 0x178   :  { %v6752_v24 = vpop.f32.mrf.mxu0 }
 0x179   :  { %v6754_v6 = vpop.f32.mrf.mxu1 }
 0x17b   :  { %774 = vmatmul.f32.gmra.mxu0 %v495_v13 }
 0x17c   :  { %1103 = vmatmul.f32.gmra.mxu1 %v496_v16 }
 0x180   :  { %v6762_v4 = vpop.f32.mrf.mxu0 }
 0x181   :  { %v6764_v28 = vpop.f32.mrf.mxu1 }
 0x183   :  { %777 = vmatmul.f32.gmra.mxu0 %v497_v12 }
 0x184   :  { %1106 = vmatmul.f32.gmra.mxu1 %v498_v17 }
 0x188   :  { %v733_v13 = vpop.f32.mrf.mxu0 }
 0x189   :  { %v1062_v16 = vpop.f32.mrf.mxu1  ;;  %v734_v1 = vadd.f32 %v6775_v8, %v733_v13 }
 0x18b   :  { %v6784_v35 = vadd.f32 %v1062_v16, %v734_v1  ;;  %780 = vmatmul.f32.gmra.mxu0 %v499_v14  ;;  %v503_v1 = vld [vmem:[%s10300_s0 + $0x170] sm:$0xff]  ;;  %v505_v16 = vld [vmem:[%s10300_s0 + $0x180] sm:$0xff] }
 0x18c   :  { %1109 = vmatmul.f32.gmra.mxu1 %v500_v7  ;;  %v504_v7 = vld [vmem:[%s10300_s0 + $0x178] sm:$0xff] }
 0x190   :  { %v736_v12 = vpop.f32.mrf.mxu0 }
 0x191   :  { %v6786_v17 = vpop.f32.mrf.mxu1 }
 0x193   :  { %783 = vmatmul.f32.gmra.mxu0 %v501_v5 }
 0x194   :  { %1112 = vmatmul.f32.gmra.mxu1 %v502_v2  ;;  %v506_v2 = vld [vmem:[%s10300_s0 + $0x188] sm:$0xff] }
 0x198   :  { %v739_v39 = vpop.f32.mrf.mxu0 }
 0x199   :  { %v1068_v15 = vpop.f32.mrf.mxu1  ;;  %v740_v10 = vadd.f32 %v6775_v8, %v739_v39 }
 0x19b   :  { %786 = vmatmul.f32.gmra.mxu0 %v503_v1  ;;  %v508_v1 = vld [vmem:[%s10300_s0 + $0x198] sm:$0xff] }
 0x19c   :  { %1115 = vmatmul.f32.gmra.mxu1 %v504_v7 }
 0x1a0   :  { %v742_v14 = vpop.f32.mrf.mxu0 }
 0x1a1   :  { %v1071_v13 = vpop.f32.mrf.mxu1 }
 0x1a3   :  { %789 = vmatmul.f32.gmra.mxu0 %v505_v16  ;;  %v510_v16 = vld [vmem:[%s10300_s0 + $0x1a8] sm:$0xff] }
 0x1a4   :  { %1118 = vmatmul.f32.gmra.mxu1 %v506_v2 }
 0x1a8   :  { %v745_v5 = vpop.f32.mrf.mxu0 }
 0x1a9   :  { %v1074_v9 = vpop.f32.mrf.mxu1 }
 0x1ab   :  { %792 = vmatmul.f32.gmra.mxu0 %v507_v43  ;;  %v512_v43 = vld [vmem:[%s10300_s0 + $0x1b8] sm:$0xff] }
 0x1ac   :  { %1121 = vmatmul.f32.gmra.mxu1 %v508_v1 }
 0x1b0   :  { %v748_v7 = vpop.f32.mrf.mxu0 }
 0x1b1   :  { %v1077_v18 = vpop.f32.mrf.mxu1  ;;  %v749_v25 = vadd.f32 %v6775_v8, %v748_v7  ;;  %v1364_v7 = vmax.f32 %v6784_v35, 0.0  ;;  %v519_v35 = vld [vmem:[%s10300_s0 + $0x1f0] sm:$0xff] }
 0x1b3   :  { %795 = vmatmul.f32.gmra.mxu0 %v509_v19  ;;  %v513_v19 = vld [vmem:[%s10300_s0 + $0x1c0] sm:$0xff]  ;;  %v1078_v0 = vadd.f32 %v1077_v18, %v749_v25  ;;  %v737_v18 = vadd.f32 %v6775_v8, %v736_v12 }
 0x1b4   :  { %1124 = vmatmul.f32.gmra.mxu1 %v510_v16  ;;  %v514_v16 = vld [vmem:[%s10300_s0 + $0x1c8] sm:$0xff] }
 0x1b8   :  { %v751_v2 = vpop.f32.mrf.mxu0 }
 0x1b9   :  { %v1080_v47 = vpop.f32.mrf.mxu1  ;;  %v752_v1 = vadd.f32 %v6775_v8, %v751_v2 }
 0x1bb   :  { %798 = vmatmul.f32.gmra.mxu0 %v511_v21  ;;  %v1081_v55 = vadd.f32 %v1080_v47, %v752_v1  ;;  %v746_v21 = vadd.f32 %v6775_v8, %v745_v5  ;;  %v1369_v47 = vmax.f32 %v1078_v0, 0.0  ;;  %v719_v1 = vadd.f32 %v6775_v8, %v6722_v20 }
 0x1bc   :  { %1127 = vmatmul.f32.gmra.mxu1 %v512_v43  ;;  %v743_v43 = vadd.f32 %v6775_v8, %v742_v14 }
 0x1bd   :  { %v1370_v59 = vmax.f32 %v1081_v55, 0.0  ;;  %v1075_v11 = vadd.f32 %v1074_v9, %v746_v21  ;;  %v1069_v9 = vadd.f32 %v1068_v15, %v740_v10  ;;  %v1066_v55 = vadd.f32 %v6786_v17, %v737_v18  ;;  %v522_v18 = vld [vmem:[%s10300_s0 + $0x208] sm:$0xff] }
 0x1be   :  { %v1072_v25 = vadd.f32 %v1071_v13, %v743_v43  ;;  %v725_v15 = vadd.f32 %v6775_v8, %v6742_v30  ;;  %v722_v13 = vadd.f32 %v6775_v8, %v6732_v23  ;;  %v1048_v20 = vadd.f32 %v6724_v26, %v719_v1  ;;  %v6887_v43 = vld [vmem:[%s10303_s3 + $0x30] sm:$0xff] }
 0x1bf   :  { %v1368_v39 = vmax.f32 %v1075_v11, 0.0  ;;  %v1366_v10 = vmax.f32 %v1069_v9, 0.0  ;;  %v517_v11 = vld [vmem:[%s10300_s0 + $0x1e0] sm:$0xff]  ;;  %v1365_v17 = vmax.f32 %v1066_v55, 0.0  ;;  %v6954_v1 = vld [vmem:[%s10303_s3 + $0x50] sm:$0xff] }
 0x1c0   :  { %v754_v22 = vpop.f32.mrf.mxu0  ;;  %v1367_v14 = vmax.f32 %v1072_v25, 0.0  ;;  %v1054_v30 = vadd.f32 %v6744_v29, %v725_v15  ;;  %v520_v29 = vld [vmem:[%s10300_s0 + $0x1f8] sm:$0xff]  ;;  %v6921_v55 = vld [vmem:[%s10303_s3 + $0x40] sm:$0xff] }
 0x1c1   :  { %v1083_v51 = vpop.f32.mrf.mxu1  ;;  %v755_v31 = vadd.f32 %v6775_v8, %v754_v22  ;;  %v6904_v25 = vld [vmem:[%s10303_s3 + $0x38] sm:$0xff] }
 0x1c3   :  { %v1084_v3 = vadd.f32 %v1083_v51, %v755_v31  ;;  %801 = vmatmul.f32.gmra.mxu0 %v513_v19  ;;  %v515_v31 = vld [vmem:[%s10300_s0 + $0x1d0] sm:$0xff]  ;;  %v731_v51 = vadd.f32 %v6775_v8, %v6762_v4  ;;  %v518_v4 = vld [vmem:[%s10300_s0 + $0x1e8] sm:$0xff]  ;;  %v1051_v19 = vadd.f32 %v6734_v27, %v722_v13  ;;  %v1361_v27 = vmax.f32 %v1054_v30, 0.0 }
 0x1c4   :  { %1130 = vmatmul.f32.gmra.mxu1 %v514_v16 }
 0x1c5   :  { %v1371_v2 = vmax.f32 %v1084_v3, 0.0  ;;  %v516_v3 = vld [vmem:[%s10300_s0 + $0x1d8] sm:$0xff]  ;;  %v1360_v21 = vmax.f32 %v1051_v19, 0.0  ;;  %v529_v19 = vld [vmem:[%s10300_s0 + $0x240] sm:$0xff] }
 0x1c7   :  { %1595 = vmatpush.msrb.mxu1 %v1371_v2  ;;  %5393 = vmatpush.msra.mxu2 %v1371_v2  ;;  %v1359_v2 = vmax.f32 %v1048_v20, 0.0 }
 0x1c8   :  { %v6836_v63 = vpop.f32.mrf.mxu0 }
 0x1c9   :  { %v6838_v22 = vpop.f32.mrf.mxu1  ;;  %1596 = vmatpush.msrb.mxu1 %v1370_v59  ;;  %5394 = vmatpush.msra.mxu2 %v1370_v59  ;;  %v728_v59 = vadd.f32 %v6775_v8, %v6752_v24  ;;  %v1060_v24 = vadd.f32 %v6764_v28, %v731_v51  ;;  %v524_v51 = vld [vmem:[%s10300_s0 + $0x218] sm:$0xff] }
 0x1cb   :  { %804 = vmatmul.f32.gmra.mxu0 %v515_v31  ;;  %1597 = vmatpush.msrb.mxu1 %v1369_v47  ;;  %v1057_v5 = vadd.f32 %v6754_v6, %v728_v59  ;;  %v1363_v28 = vmax.f32 %v1060_v24, 0.0  ;;  %v6937_v24 = vld [vmem:[%s10303_s3 + $0x48] sm:$0xff] }
 0x1cc   :  { %1133 = vmatmul.f32.gmra.mxu1 %v516_v3  ;;  %5395 = vmatpush.msra.mxu2 %v1369_v47  ;;  %v521_v3 = vld [vmem:[%s10300_s0 + $0x200] sm:$0xff] }
 0x1cd   :  { %1598 = vmatpush.msrb.mxu1 %v1368_v39  ;;  %v1362_v6 = vmax.f32 %v1057_v5, 0.0  ;;  %v527_v5 = vld [vmem:[%s10300_s0 + $0x230] sm:$0xff] }
 0x1ce   :  { %5396 = vmatpush.msra.mxu2 %v1368_v39  ;;  %v523_v39 = vld [vmem:[%s10300_s0 + $0x210] sm:$0xff] }
 0x1cf   :  { %1599 = vmatpush.msrb.mxu1 %v1367_v14 }
 0x1d0   :  { %5397 = vmatpush.msra.mxu2 %v1367_v14  ;;  %v6852_v0 = vpop.f32.mrf.mxu0 }
 0x1d1   :  { %v6854_v12 = vpop.f32.mrf.mxu1  ;;  %1600 = vmatpush.msrb.mxu1 %v1366_v10 }
 0x1d2   :  { %5398 = vmatpush.msra.mxu2 %v1366_v10  ;;  %v525_v10 = vld [vmem:[%s10300_s0 + $0x220] sm:$0xff] }
 0x1d3   :  { %807 = vmatmul.f32.gmra.mxu0 %v517_v11  ;;  %1601 = vmatpush.msrb.mxu1 %v1365_v17  ;;  %v526_v11 = vld [vmem:[%s10300_s0 + $0x228] sm:$0xff] }
 0x1d4   :  { %1136 = vmatmul.f32.gmra.mxu1 %v518_v4  ;;  %5399 = vmatpush.msra.mxu2 %v1365_v17 }
 0x1d5   :  { %1602 = vmatpush.msrb.mxu1 %v1364_v7 }
 0x1d6   :  { %5400 = vmatpush.msra.mxu2 %v1364_v7  ;;  %v528_v7 = vld [vmem:[%s10300_s0 + $0x238] sm:$0xff] }
 0x1d7   :  { %1603 = vmatpush.msrb.mxu1 %v1363_v28 }
 0x1d8   :  { %5401 = vmatpush.msra.mxu2 %v1363_v28  ;;  %v6873_v16 = vpop.f32.mrf.mxu0 }
 0x1d9   :  { %v6875_v23 = vpop.f32.mrf.mxu1  ;;  %1604 = vmatpush.msrb.mxu1 %v1362_v6 }
 0x1da   :  { %5402 = vmatpush.msra.mxu2 %v1362_v6  ;;  %v530_v6 = vld [vmem:[%s10300_s0 + $0x248] sm:$0xff] }
 0x1db   :  { %810 = vmatmul.f32.gmra.mxu0 %v519_v35  ;;  %1605 = vmatpush.msrb.mxu1 %v1361_v27  ;;  %v6969_v35 = vld [vmem:[%s10303_s3 + $0x58] sm:$0xff] }
 0x1dc   :  { %1139 = vmatmul.f32.gmra.mxu1 %v520_v29  ;;  %5403 = vmatpush.msra.mxu2 %v1361_v27  ;;  %v531_v27 = vld [vmem:[%s10300_s0 + $0x250] sm:$0xff] }
 0x1dd   :  { %1606 = vmatpush.msrb.mxu1 %v1360_v21 }
 0x1de   :  { %5404 = vmatpush.msra.mxu2 %v1360_v21  ;;  %v532_v21 = vld [vmem:[%s10300_s0 + $0x258] sm:$0xff] }
 0x1df   :  { %1607 = vmatpush.msrb.mxu1 %v1359_v2 }
 0x1e0   :  { %5405 = vmatpush.msra.mxu2 %v1359_v2  ;;  %v6889_v26 = vpop.f32.mrf.mxu0  ;;  %v6982_v2 = vld [vmem:[%s10303_s3 + $0x60] sm:$0xff] }
 0x1e1   :  { %v6891_v31 = vpop.f32.mrf.mxu1  ;;  %5121 = vmatmul.msk.f32.vlgmr.msra.gmra.mxu2 %vm1495_vm0, %v6887_v43 }
 0x1e3   :  { %813 = vmatmul.f32.gmra.mxu0 %v521_v3 }
 0x1e4   :  { %1142 = vmatmul.f32.gmra.mxu1 %v522_v18 }
 0x1e8   :  { %v6906_v47 = vpop.f32.mrf.mxu0 }
 0x1e9   :  { %v6908_v9 = vpop.f32.mrf.mxu1  ;;  %5122 = vmatmul.msk.f32.gmra.mxu2 %vm1495_vm0, %v6904_v25 }
 0x1eb   :  { %816 = vmatmul.f32.gmra.mxu0 %v523_v39  ;;  %v533_v39 = vld [vmem:[%s10300_s0 + $0x260] sm:$0xff] }
 0x1ec   :  { %1145 = vmatmul.f32.gmra.mxu1 %v524_v51  ;;  %v534_v51 = vld [vmem:[%s10300_s0 + $0x268] sm:$0xff] }
 0x1f0   :  { %v772_v14 = vpop.f32.mrf.mxu0 }
 0x1f1   :  { %v1101_v59 = vpop.f32.mrf.mxu1  ;;  %v773_v4 = vadd.f32 %v6775_v8, %v772_v14  ;;  %5123 = vmatmul.msk.f32.gmra.mxu2 %vm1495_vm0, %v6921_v55  ;;  %v6995_v14 = vld [vmem:[%s10303_s3 + $0x68] sm:$0xff] }
 0x1f3   :  { %v6932_v15 = vadd.f32 %v1101_v59, %v773_v4  ;;  %819 = vmatmul.f32.gmra.mxu0 %v525_v10  ;;  %v536_v4 = vld [vmem:[%s10300_s0 + $0x278] sm:$0xff] }
 0x1f4   :  { %1148 = vmatmul.f32.gmra.mxu1 %v526_v11  ;;  %v535_v11 = vld [vmem:[%s10300_s0 + $0x270] sm:$0xff] }
 0x1f8   :  { %v6939_v17 = vpop.f32.mrf.mxu0 }
 0x1f9   :  { %v6941_v13 = vpop.f32.mrf.mxu1  ;;  %5124 = vmatmul.msk.f32.gmra.mxu2 %vm1495_vm0, %v6937_v24 }
 0x1fb   :  { %822 = vmatmul.f32.gmra.mxu0 %v527_v5  ;;  %v7008_v5 = vld [vmem:[%s10303_s3 + $0x70] sm:$0xff] }
 0x1fc   :  { %1151 = vmatmul.f32.gmra.mxu1 %v528_v7 }
 0x200   :  { %v778_v30 = vpop.f32.mrf.mxu0 }
 0x201   :  { %v6956_v28 = vpop.f32.mrf.mxu1  ;;  %5125 = vmatmul.msk.f32.gmra.mxu2 %vm1495_vm0, %v6954_v1  ;;  %v779_v41 = vadd.f32 %v6775_v8, %v778_v30 }
 0x203   :  { %825 = vmatmul.f32.gmra.mxu0 %v529_v19  ;;  %v1108_v30 = vadd.f32 %v6956_v28, %v779_v41 }
 0x204   :  { %1154 = vmatmul.f32.gmra.mxu1 %v530_v6  ;;  %v537_v6 = vld [vmem:[%s10300_s0 + $0x280] sm:$0xff] }
 0x208   :  { %v781_v29 = vpop.f32.mrf.mxu0 }
 0x209   :  { %v1110_v20 = vpop.f32.mrf.mxu1  ;;  %5126 = vmatmul.msk.f32.gmra.mxu2 %vm1495_vm0, %v6969_v35  ;;  %v782_v37 = vadd.f32 %v6775_v8, %v781_v29  ;;  %v542_v29 = vld [vmem:[%s10300_s0 + $0x2a8] sm:$0xff] }
 0x20b   :  { %828 = vmatmul.f32.gmra.mxu0 %v531_v27  ;;  %v538_v27 = vld [vmem:[%s10300_s0 + $0x288] sm:$0xff] }
 0x20c   :  { %1157 = vmatmul.f32.gmra.mxu1 %v532_v21  ;;  %v7021_v21 = vld [vmem:[%s10303_s3 + $0x78] sm:$0xff] }
 0x210   :  { %v784_v3 = vpop.f32.mrf.mxu0 }
 0x211   :  { %v1113_v18 = vpop.f32.mrf.mxu1  ;;  %5127 = vmatmul.msk.f32.gmra.mxu2 %vm1495_vm0, %v6982_v2  ;;  %v785_v32 = vadd.f32 %v6775_v8, %v784_v3  ;;  %v541_v3 = vld [vmem:[%s10300_s0 + $0x2a0] sm:$0xff] }
 0x213   :  { %831 = vmatmul.f32.gmra.mxu0 %v533_v39 }
 0x214   :  { %1160 = vmatmul.f32.gmra.mxu1 %v534_v51 }
 0x218   :  { %v787_v59 = vpop.f32.mrf.mxu0 }
 0x219   :  { %v1116_v10 = vpop.f32.mrf.mxu1  ;;  %5128 = vmatmul.msk.f32.gmra.mxu2 %vm1495_vm0, %v6995_v14 }
 0x21b   :  { %834 = vmatmul.f32.gmra.mxu0 %v535_v11 }
 0x21c   :  { %1163 = vmatmul.f32.gmra.mxu1 %v536_v4  ;;  %v539_v4 = vld [vmem:[%s10300_s0 + $0x290] sm:$0xff] }
 0x220   :  { %v790_v7 = vpop.f32.mrf.mxu0 }
 0x221   :  { %v1119_v19 = vpop.f32.mrf.mxu1  ;;  %5129 = vmatmul.msk.f32.gmra.mxu2 %vm1495_vm0, %v7008_v5  ;;  %v791_v39 = vadd.f32 %v6775_v8, %v790_v7 }
 0x223   :  { %837 = vmatmul.f32.gmra.mxu0 %v537_v6  ;;  %v1120_v33 = vadd.f32 %v1119_v19, %v791_v39 }
 0x224   :  { %1166 = vmatmul.f32.gmra.mxu1 %v538_v27  ;;  %v788_v27 = vadd.f32 %v6775_v8, %v787_v59  ;;  %v1114_v59 = vadd.f32 %v1113_v18, %v785_v32  ;;  %v1111_v32 = vadd.f32 %v1110_v20, %v782_v37 }
 0x226   :  { %v1117_v36 = vadd.f32 %v1116_v10, %v788_v27  ;;  %v1381_v18 = vmax.f32 %v1114_v59, 0.0  ;;  %v770_v10 = vadd.f32 %v6775_v8, %v6906_v47  ;;  %v543_v47 = vld [vmem:[%s10300_s0 + $0x2b0] sm:$0xff] }
 0x228   :  { %v793_v51 = vpop.f32.mrf.mxu0  ;;  %v1099_v28 = vadd.f32 %v6908_v9, %v770_v10  ;;  %v7092_v9 = vld [vmem:[%s10303_s3 + $0x90] sm:$0xff] }
 0x229   :  { %v1122_v11 = vpop.f32.mrf.mxu1  ;;  %v794_v6 = vadd.f32 %v6775_v8, %v793_v51  ;;  %5130 = vmatmul.msk.f32.gmra.mxu2 %vm1495_vm0, %v7021_v21  ;;  %v1383_v51 = vmax.f32 %v1120_v33, 0.0  ;;  %v776_v33 = vadd.f32 %v6775_v8, %v6939_v17  ;;  %v1379_v17 = vmax.f32 %v1108_v30, 0.0  ;;  %v7116_v30 = vld [vmem:[%s10303_s3] sm:$0xff]  ;;  %v547_v10 = vld [vmem:[%s10300_s0 + $0x2d0] sm:$0xff] }
 0x22b   :  { %840 = vmatmul.f32.gmra.mxu0 %v539_v4  ;;  %v1123_v7 = vadd.f32 %v1122_v11, %v794_v6  ;;  %v1105_v39 = vadd.f32 %v6941_v13, %v776_v33  ;;  %v1380_v11 = vmax.f32 %v1111_v32, 0.0  ;;  %v7063_v4 = vld [vmem:[%s10303_s3 + $0x88] sm:$0xff]  ;;  %v544_v13 = vld [vmem:[%s10300_s0 + $0x2b8] sm:$0xff]  ;;  %v761_v6 = vadd.f32 %v6775_v8, %v6852_v0 }
 0x22c   :  { %1169 = vmatmul.f32.gmra.mxu1 %v540_v34 }
 0x22d   :  { %v1384_v38 = vmax.f32 %v1123_v7, 0.0  ;;  %v1378_v20 = vmax.f32 %v1105_v39, 0.0  ;;  %v1377_v7 = vmax.f32 %v6932_v15, 0.0  ;;  %v548_v39 = vld [vmem:[%s10300_s0 + $0x2d8] sm:$0xff] }
 0x22f   :  { %1840 = vmatpush.msra.mxu3 %v1384_v38  ;;  %v1382_v38 = vmax.f32 %v1117_v36, 0.0  ;;  %v767_v36 = vadd.f32 %v6775_v8, %v6889_v26  ;;  %v764_v26 = vadd.f32 %v6775_v8, %v6873_v16  ;;  %v1376_v16 = vmax.f32 %v1099_v28, 0.0  ;;  %v7159_v28 = vld [vmem:[%s10303_s3 + $0xa8] sm:$0xff] }
 0x230   :  { %v7042_v19 = vpop.f32.mrf.mxu0 }
 0x231   :  { %v7044_v34 = vpop.f32.mrf.mxu1  ;;  %5131 = vmatmul.msk.f32.gmra.mxu2 %vm1495_vm0, %v7039_v42  ;;  %1841 = vmatpush.msra.mxu3 %v1383_v51  ;;  %v1096_v27 = vadd.f32 %v6891_v31, %v767_v36  ;;  %v758_v51 = vadd.f32 %v6775_v8, %v6836_v63  ;;  %v1093_v59 = vadd.f32 %v6875_v23, %v764_v26  ;;  %v545_v63 = vld [vmem:[%s10300_s0 + $0x2c0] sm:$0xff]  ;;  %v546_v23 = vld [vmem:[%s10300_s0 + $0x2c8] sm:$0xff] }
 0x232   :  { %v7140_v36 = vld [vmem:[%s10303_s3 + $0x8] sm:$0xff] }
 0x233   :  { %843 = vmatmul.f32.gmra.mxu0 %v541_v3  ;;  %1842 = vmatpush.msra.mxu3 %v1382_v38  ;;  %v1090_v3 = vadd.f32 %v6854_v12, %v761_v6  ;;  %v1375_v15 = vmax.f32 %v1096_v27, 0.0  ;;  %v1374_v12 = vmax.f32 %v1093_v59, 0.0  ;;  %v7111_v38 = vld [vmem:[%s10303_s3 + $0x98] sm:$0xff]  ;;  %v550_v26 = vld [vmem:[%s10300_s0 + $0x2e8] sm:$0xff] }
 0x234   :  { %1172 = vmatmul.f32.gmra.mxu1 %v542_v29  ;;  %v1087_v29 = vadd.f32 %v6838_v22, %v758_v51  ;;  %v552_v51 = vld [vmem:[%s10300_s0 + $0x2f8] sm:$0xff] }
 0x235   :  { %1843 = vmatpush.msra.mxu3 %v1381_v18  ;;  %v1373_v33 = vmax.f32 %v1090_v3, 0.0  ;;  %v7182_v3 = vld [vmem:[%s10303_s3 + $0xb0] sm:$0xff] }
 0x236   :  { %v1372_v32 = vmax.f32 %v1087_v29, 0.0  ;;  %v553_v29 = vld [vmem:[%s10300_s0 + $0x300] sm:$0xff] }
 0x237   :  { %1844 = vmatpush.msra.mxu3 %v1380_v11  ;;  %v7135_v11 = vld [vmem:[%s10303_s3 + $0xa0] sm:$0xff] }
 0x238   :  { %v7067_v37 = vpop.f32.mrf.mxu0 }
 0x239   :  { %v7069_v41 = vpop.f32.mrf.mxu1  ;;  %5132 = vmatmul.msk.f32.gmra.mxu2 %vm1495_vm0, %v7063_v4  ;;  %1845 = vmatpush.msra.mxu3 %v1379_v17 }
 0x23b   :  { %846 = vmatmul.f32.gmra.mxu0 %v543_v47  ;;  %1846 = vmatpush.msra.mxu3 %v1378_v20  ;;  %v7164_v20 = vld [vmem:[%s10303_s3 + $0x10] sm:$0xff] }
 0x23c   :  { %1175 = vmatmul.f32.gmra.mxu1 %v544_v13  ;;  %v549_v13 = vld [vmem:[%s10300_s0 + $0x2e0] sm:$0xff] }
 0x23d   :  { %1847 = vmatpush.msra.mxu3 %v1377_v7  ;;  %v551_v7 = vld [vmem:[%s10300_s0 + $0x2f0] sm:$0xff] }
 0x23f   :  { %1848 = vmatpush.msra.mxu3 %v1376_v16 }
 0x240   :  { %v7095_v0 = vpop.f32.mrf.mxu0 }
 0x241   :  { %v7097_v31 = vpop.f32.mrf.mxu1  ;;  %5133 = vmatmul.msk.f32.gmra.mxu2 %vm1495_vm0, %v7092_v9  ;;  %1849 = vmatpush.msra.mxu3 %v1375_v15  ;;  %v7187_v15 = vld [vmem:[%s10303_s3 + $0x18] sm:$0xff] }
 0x243   :  { %849 = vmatmul.f32.gmra.mxu0 %v545_v63  ;;  %1850 = vmatpush.msra.mxu3 %v1374_v12  ;;  %v554_v12 = vld [vmem:[%s10300_s0 + $0x308] sm:$0xff] }
 0x244   :  { %1178 = vmatmul.f32.gmra.mxu1 %v546_v23 }
 0x245   :  { %1851 = vmatpush.msra.mxu3 %v1373_v33 }
 0x247   :  { %1852 = vmatpush.msra.mxu3 %v1372_v32  ;;  %v7207_v32 = vld [vmem:[%s10303_s3 + $0xb8] sm:$0xff] }
 0x248   :  { %v7118_v22 = vpop.f32.mrf.mxu0  ;;  %5147 = vmatmul.msk.f32.vlgmr.msra.gmra.mxu3 %vm1495_vm0, %v7116_v30 }
 0x249   :  { %v7120_v18 = vpop.f32.mrf.mxu1  ;;  %5134 = vmatmul.msk.f32.gmra.mxu2 %vm1495_vm0, %v7111_v38 }
 0x24b   :  { %852 = vmatmul.f32.gmra.mxu0 %v547_v10  ;;  %v7212_v10 = vld [vmem:[%s10303_s3 + $0x20] sm:$0xff] }
 0x24c   :  { %1181 = vmatmul.f32.gmra.mxu1 %v548_v39 }
 0x250   :  { %v7142_v17 = vpop.f32.mrf.mxu0  ;;  %5148 = vmatmul.msk.f32.gmra.mxu3 %vm1495_vm0, %v7140_v36 }
 0x251   :  { %v7144_v47 = vpop.f32.mrf.mxu1  ;;  %5135 = vmatmul.msk.f32.gmra.mxu2 %vm1495_vm0, %v7135_v11 }
 0x253   :  { %855 = vmatmul.f32.gmra.mxu0 %v549_v13 }
 0x254   :  { %1184 = vmatmul.f32.gmra.mxu1 %v550_v26  ;;  %v555_v26 = vld [vmem:[%s10300_s0 + $0x310] sm:$0xff] }
 0x258   :  { %v811_v6 = vpop.f32.mrf.mxu0  ;;  %5149 = vmatmul.msk.f32.gmra.mxu3 %vm1495_vm0, %v7164_v20 }
 0x259   :  { %v1140_v27 = vpop.f32.mrf.mxu1  ;;  %v812_v59 = vadd.f32 %v6775_v8, %v811_v6  ;;  %5136 = vmatmul.msk.f32.gmra.mxu2 %vm1495_vm0, %v7159_v28  ;;  %v556_v6 = vld [vmem:[%s10300_s0 + $0x318] sm:$0xff] }
 0x25b   :  { %v7177_v16 = vadd.f32 %v1140_v27, %v812_v59  ;;  %858 = vmatmul.f32.gmra.mxu0 %v551_v7  ;;  %v7232_v7 = vld [vmem:[%s10303_s3 + $0xc0] sm:$0xff] }
 0x25c   :  { %1187 = vmatmul.f32.gmra.mxu1 %v552_v51  ;;  %v7237_v51 = vld [vmem:[%s10303_s3 + $0x28] sm:$0xff] }
 0x260   :  { %v7189_v63 = vpop.f32.mrf.mxu0  ;;  %5150 = vmatmul.msk.f32.gmra.mxu3 %vm1495_vm0, %v7187_v15 }
 0x261   :  { %v7191_v23 = vpop.f32.mrf.mxu1  ;;  %5137 = vmatmul.msk.f32.gmra.mxu2 %vm1495_vm0, %v7182_v3 }
 0x263   :  { %861 = vmatmul.f32.gmra.mxu0 %v553_v29 }
 0x264   :  { %1190 = vmatmul.f32.gmra.mxu1 %v554_v12  ;;  %v1627_v33 = vpop.f32.mrf.mxu2  ;;  %v557_v12 = vld [vmem:[%s10300_s0 + $0x320] sm:$0xff] }
 0x265   :  { %1732 = vrot.lane.b32.xlu1 %v1627_v33, %s5497_s17  ;;  %v558_v33 = vld [vmem:[%s10300_s0 + $0x328] sm:$0xff] }
 0x268   :  { %v7214_v39 = vpop.f32.mrf.mxu0  ;;  %5151 = vmatmul.msk.f32.gmra.mxu3 %vm1495_vm0, %v7212_v10 }
 0x269   :  { %v7216_v13 = vpop.f32.mrf.mxu1  ;;  %5138 = vmatmul.msk.f32.gmra.mxu2 %vm1495_vm0, %v7207_v32 }
 0x26b   :  { %864 = vmatmul.f32.gmra.mxu0 %v555_v26 }
 0x26c   :  { %1193 = vmatmul.f32.gmra.mxu1 %v556_v6  ;;  %v1630_v27 = vpop.f32.mrf.mxu2  ;;  %v7255_v6 = vld [vmem:[%s10303_s3 + $0xc8] sm:$0xff] }
 0x26d   :  { %1734 = vrot.lane.b32.xlu2 %v1630_v27, %s5497_s17 }
 0x270   :  { %v820_v59 = vpop.f32.mrf.mxu0  ;;  %5152 = vmatmul.msk.f32.gmra.mxu3 %vm1495_vm0, %v7237_v51 }
 0x271   :  { %v7239_v29 = vpop.f32.mrf.mxu1  ;;  %5139 = vmatmul.msk.f32.gmra.mxu2 %vm1495_vm0, %v7232_v7  ;;  %v821_v62 = vadd.f32 %v6775_v8, %v820_v59 }
 0x273   :  { %867 = vmatmul.f32.gmra.mxu0 %v557_v12  ;;  %v560_v12 = vld [vmem:[%s10300_s0 + $0x338] sm:$0xff] }
 0x274   :  { %1196 = vmatmul.f32.gmra.mxu1 %v558_v33  ;;  %v1633_v26 = vpop.f32.mrf.mxu2 }
 0x275   :  { %1741 = vst.msk [vmem:[#allocation2 + $0x8] sm:$0xff] %vm1705_vm1, %v1633_v26  ;;  %v7271_v26 = vld [vmem:[%s10303_s3 + $0xd0] sm:$0xff] }
 0x276   :  { %10511 = vst [vmem:[#allocation203_spill] sm:$0xff] %v7271_v26 }
 0x278   :  { %v823_v27 = vpop.f32.mrf.mxu0  ;;  %5153 = vmatmul.msk.f32.gmra.mxu3 %vm1495_vm0, %v6887_v43 }
 0x279   :  { %v1152_v40 = vpop.f32.mrf.mxu1  ;;  %5140 = vmatmul.msk.f32.gmra.mxu2 %vm1495_vm0, %v7255_v6 }
 0x27b   :  { %870 = vmatmul.f32.gmra.mxu0 %v559_v46 }
 0x27c   :  { %1199 = vmatmul.f32.gmra.mxu1 %v560_v12  ;;  %v1636_v33 = vpop.f32.mrf.mxu2  ;;  %v7287_v12 = vld [vmem:[%s10303_s3 + $0xd8] sm:$0xff] }
 0x27d   :  { %1742 = vst.msk [vmem:[#allocation2 + $0x28] sm:$0xff] %vm1705_vm1, %v1636_v33 }
 0x27e   :  { %10512 = vst [vmem:[#allocation204_spill] sm:$0xff] %v7287_v12 }
 0x280   :  { %v826_v45 = vpop.f32.mrf.mxu0  ;;  %5154 = vmatmul.msk.f32.gmra.mxu3 %vm1495_vm0, %v6904_v25 }
 0x281   :  { %v1155_v44 = vpop.f32.mrf.mxu1  ;;  %5141 = vmatmul.msk.f32.gmra.mxu2 %vm1495_vm0, %v7271_v26  ;;  %v827_v52 = vadd.f32 %v6775_v8, %v826_v45  ;;  %v824_v45 = vadd.f32 %v6775_v8, %v823_v27 }
 0x283   :  { %873 = vmatmul.f32.gmra.mxu0 %v561_v50  ;;  %v564_v50 = vld [vmem:[%s10300_s0 + $0x358] sm:$0xff]  ;;  %v1156_v61 = vadd.f32 %v1155_v44, %v827_v52 }
 0x284   :  { %1202 = vmatmul.f32.gmra.mxu1 %v562_v49  ;;  %v1639_v46 = vpop.f32.mrf.mxu2  ;;  %v568_v52 = vld [vmem:[%s10300_s0 + $0x378] sm:$0xff] }
 0x285   :  { %1745 = vrot.lane.b32.xlu1 %v1639_v46, %s5498_s25 }
 0x288   :  { %v829_v33 = vpop.f32.mrf.mxu0  ;;  %5155 = vmatmul.msk.f32.gmra.mxu3 %vm1495_vm0, %v6921_v55 }
 0x289   :  { %v1158_v48 = vpop.f32.mrf.mxu1  ;;  %5142 = vmatmul.msk.f32.gmra.mxu2 %vm1495_vm0, %v7287_v12  ;;  %v830_v46 = vadd.f32 %v6775_v8, %v829_v33 }
 0x28b   :  { %876 = vmatmul.f32.gmra.mxu0 %v563_v54  ;;  %v566_v54 = vld [vmem:[%s10300_s0 + $0x368] sm:$0xff]  ;;  %v1159_v33 = vadd.f32 %v1158_v48, %v830_v46  ;;  %v818_v48 = vadd.f32 %v6775_v8, %v7214_v39 }
 0x28c   :  { %1205 = vmatmul.f32.gmra.mxu1 %v564_v50  ;;  %v1642_v49 = vpop.f32.mrf.mxu2 }
 0x28d   :  { %1747 = vrot.lane.b32.xlu0 %v1642_v49, %s5498_s25  ;;  %v1396_v26 = vmax.f32 %v1159_v33, 0.0  ;;  %v1147_v59 = vadd.f32 %v7216_v13, %v818_v48  ;;  %v800_v33 = vadd.f32 %v6775_v8, %v7067_v37  ;;  %v1390_v48 = vmax.f32 %v7177_v16, 0.0 }
 0x28f   :  { %v1129_v37 = vadd.f32 %v7069_v41, %v800_v33  ;;  %v578_v33 = vld [vmem:[%s10300_s0 + $0x3c8] sm:$0xff] }
 0x290   :  { %v832_v58 = vpop.f32.mrf.mxu0  ;;  %5156 = vmatmul.msk.f32.gmra.mxu3 %vm1495_vm0, %v6937_v24 }
 0x291   :  { %v1161_v57 = vpop.f32.mrf.mxu1  ;;  %v833_v50 = vadd.f32 %v6775_v8, %v832_v58  ;;  %5143 = vmatmul.msk.f32.gmra.mxu2 %vm1495_vm0, %v7304_v53  ;;  %v1153_v58 = vadd.f32 %v1152_v40, %v824_v45  ;;  %v7324_v53 = vld [vmem:[%s10303_s3 + $0xe8] sm:$0xff]  ;;  %v567_v40 = vld [vmem:[%s10300_s0 + $0x370] sm:$0xff] }
 0x293   :  { %v1162_v49 = vadd.f32 %v1161_v57, %v833_v50  ;;  %879 = vmatmul.f32.gmra.mxu0 %v565_v56  ;;  %v1150_v56 = vadd.f32 %v7239_v29, %v821_v62  ;;  %v815_v62 = vadd.f32 %v6775_v8, %v7189_v63  ;;  %v1394_v39 = vmax.f32 %v1153_v58, 0.0  ;;  %v7353_v63 = vld [vmem:[%s10303_s3 + $0xf0] sm:$0xff] }
 0x294   :  { %1208 = vmatmul.f32.gmra.mxu1 %v566_v54  ;;  %v1645_v60 = vpop.f32.mrf.mxu2  ;;  %v1392_v54 = vmax.f32 %v1147_v59, 0.0 }
 0x295   :  { %v1397_v12 = vmax.f32 %v1162_v49, 0.0  ;;  %1755 = vrot.lane.b32.xlu2 %v1645_v60, %s5499_s20  ;;  %v1395_v60 = vmax.f32 %v1156_v61, 0.0  ;;  %v1393_v27 = vmax.f32 %v1150_v56, 0.0  ;;  %v809_v61 = vadd.f32 %v6775_v8, %v7142_v17  ;;  %v569_v17 = vld [vmem:[%s10300_s0 + $0x380] sm:$0xff] }
 0x297   :  { %2081 = vmatpush.msrb.mxu2 %v1397_v12  ;;  %v1144_v12 = vadd.f32 %v7191_v23, %v815_v62  ;;  %v570_v23 = vld [vmem:[%s10300_s0 + $0x388] sm:$0xff]  ;;  %v1138_v50 = vadd.f32 %v7144_v47, %v809_v61  ;;  %v1386_v62 = vmax.f32 %v1129_v37, 0.0 }
 0x298   :  { %v7329_v57 = vpop.f32.mrf.mxu0  ;;  %5157 = vmatmul.msk.f32.gmra.mxu3 %vm1495_vm0, %v6954_v1 }
 0x299   :  { %v7331_v44 = vpop.f32.mrf.mxu1  ;;  %5144 = vmatmul.msk.f32.gmra.mxu2 %vm1495_vm0, %v7324_v53  ;;  %v1391_v45 = vmax.f32 %v1144_v12, 0.0  ;;  %v1389_v56 = vmax.f32 %v1138_v50, 0.0 }
 0x29a   :  { %2082 = vmatpush.msrb.mxu2 %v1396_v26  ;;  %v806_v26 = vadd.f32 %v6775_v8, %v7118_v22  ;;  %v803_v22 = vadd.f32 %v6775_v8, %v7095_v0  ;;  %v797_v0 = vadd.f32 %v6775_v8, %v7042_v19  ;;  %v571_v8 = vld [vmem:[%s10300_s0 + $0x390] sm:$0xff]  ;;  %v572_v19 = vld [vmem:[%s10300_s0 + $0x398] sm:$0xff] }
 0x29b   :  { %882 = vmatmul.f32.gmra.mxu0 %v567_v40  ;;  %v7385_v40 = vld [vmem:[%s10303_s3 + $0xf8] sm:$0xff] }
 0x29c   :  { %1211 = vmatmul.f32.gmra.mxu1 %v568_v52  ;;  %v1648_v29 = vpop.f32.mrf.mxu2  ;;  %2083 = vmatpush.msrb.mxu2 %v1395_v60  ;;  %v1135_v49 = vadd.f32 %v7120_v18, %v806_v26  ;;  %v1132_v47 = vadd.f32 %v7097_v31, %v803_v22  ;;  %v1126_v41 = vadd.f32 %v7044_v34, %v797_v0  ;;  %v573_v34 = vld [vmem:[%s10300_s0 + $0x3a0] sm:$0xff] }
 0x29d   :  { %1757 = vrot.lane.b32.xlu1 %v1648_v29, %s5499_s20 }
 0x29e   :  { %2084 = vmatpush.msrb.mxu2 %v1394_v39  ;;  %v1388_v52 = vmax.f32 %v1135_v49, 0.0  ;;  %v1387_v31 = vmax.f32 %v1132_v47, 0.0  ;;  %v1385_v39 = vmax.f32 %v1126_v41, 0.0 }
 0x2a0   :  { %2085 = vmatpush.msrb.mxu2 %v1393_v27  ;;  %v7357_v13 = vpop.f32.mrf.mxu0  ;;  %5158 = vmatmul.msk.f32.gmra.mxu3 %vm1495_vm0, %v6969_v35  ;;  %v574_v27 = vld [vmem:[%s10300_s0 + $0x3a8] sm:$0xff] }
 0x2a1   :  { %v7359_v46 = vpop.f32.mrf.mxu1  ;;  %5145 = vmatmul.msk.f32.gmra.mxu2 %vm1495_vm0, %v7353_v63 }
 0x2a2   :  { %2086 = vmatpush.msrb.mxu2 %v1392_v54  ;;  %v575_v54 = vld [vmem:[%s10300_s0 + $0x3b0] sm:$0xff] }
 0x2a3   :  { %885 = vmatmul.f32.gmra.mxu0 %v569_v17  ;;  %v576_v17 = vld [vmem:[%s10300_s0 + $0x3b8] sm:$0xff] }
 0x2a4   :  { %1214 = vmatmul.f32.gmra.mxu1 %v570_v23  ;;  %v1651_v58 = vpop.f32.mrf.mxu2  ;;  %2087 = vmatpush.msrb.mxu2 %v1391_v45  ;;  %v577_v45 = vld [vmem:[%s10300_s0 + $0x3c0] sm:$0xff] }
 0x2a5   :  { %1765 = vrot.lane.b32.xlu2 %v1651_v58, %s5497_s17 }
 0x2a6   :  { %2088 = vmatpush.msrb.mxu2 %v1390_v48 }
 0x2a8   :  { %2089 = vmatpush.msrb.mxu2 %v1389_v56  ;;  %v7388_v18 = vpop.f32.mrf.mxu0  ;;  %5159 = vmatmul.msk.f32.gmra.mxu3 %vm1495_vm0, %v6982_v2  ;;  %v579_v56 = vld [vmem:[%s10300_s0 + $0x3d0] sm:$0xff] }
 0x2a9   :  { %v7390_v16 = vpop.f32.mrf.mxu1  ;;  %5146 = vmatmul.msk.f32.gmra.mxu2 %vm1495_vm0, %v7385_v40 }
 0x2aa   :  { %2090 = vmatpush.msrb.mxu2 %v1388_v52 }
 0x2ab   :  { %888 = vmatmul.f32.gmra.mxu0 %v571_v8 }
 0x2ac   :  { %1217 = vmatmul.f32.gmra.mxu1 %v572_v19  ;;  %v1654_v60 = vpop.f32.mrf.mxu2  ;;  %2091 = vmatpush.msrb.mxu2 %v1387_v31  ;;  %v581_v19 = vld [vmem:[%s10300_s0 + $0x3e0] sm:$0xff] }
 0x2ad   :  { %1767 = vrot.lane.b32.xlu2 %v1654_v60, %s5497_s17 }
 0x2ae   :  { %2092 = vmatpush.msrb.mxu2 %v1386_v62  ;;  %v583_v62 = vld [vmem:[%s10300_s0 + $0x3f0] sm:$0xff] }
 0x2b0   :  { %2093 = vmatpush.msrb.mxu2 %v1385_v39  ;;  %v7404_v59 = vpop.f32.mrf.mxu0  ;;  %5160 = vmatmul.msk.f32.gmra.mxu3 %vm1495_vm0, %v6995_v14 }
 0x2b1   :  { %v7406_v29 = vpop.f32.mrf.mxu1  ;;  %5179 = vmatmul.msk.f32.vlgmr.msrb.gmra.mxu2 %vm1495_vm0, %v7116_v30 }
 0x2b3   :  { %891 = vmatmul.f32.gmra.mxu0 %v573_v34 }
 0x2b4   :  { %1220 = vmatmul.f32.gmra.mxu1 %v574_v27  ;;  %v1657_v61 = vpop.f32.mrf.mxu2 }
 0x2b5   :  { %1773 = vst.msk [vmem:[#allocation2 + $0x10] sm:$0xff] %vm1705_vm1, %v1657_v61  ;;  %v585_v61 = vld [vmem:[%s10300_s0 + $0x400] sm:$0xff] }
 0x2b8   :  { %v7419_v12 = vpop.f32.mrf.mxu0  ;;  %5161 = vmatmul.msk.f32.gmra.mxu3 %vm1495_vm0, %v7008_v5  ;;  %v7443_v5 = vld [vmem:[%s10302_s2] ss:$0 sm:$0xff] }
 0x2b9   :  { %v7421_v26 = vpop.f32.mrf.mxu1  ;;  %5180 = vmatmul.msk.f32.gmra.mxu2 %vm1495_vm0, %v7140_v36 }
 0x2bb   :  { %894 = vmatmul.f32.gmra.mxu0 %v575_v54  ;;  %v586_v54 = vld [vmem:[%s10300_s0 + $0x408] sm:$0xff] }
 0x2bc   :  { %1223 = vmatmul.f32.gmra.mxu1 %v576_v17  ;;  %v1660_v23 = vpop.f32.mrf.mxu2 }
 0x2bd   :  { %1774 = vst.msk [vmem:[#allocation2 + $0x30] sm:$0xff] %vm1705_vm1, %v1660_v23 }
 0x2c0   :  { %v850_v22 = vpop.f32.mrf.mxu0  ;;  %5162 = vmatmul.msk.f32.gmra.mxu3 %vm1495_vm0, %v7021_v21  ;;  %v580_v21 = vld [vmem:[%s10300_s0 + $0x3d8] sm:$0xff] }
 0x2c1   :  { %v1179_v50 = vpop.f32.mrf.mxu1  ;;  %v851_v49 = vadd.f32 %v7443_v5, %v850_v22  ;;  %5181 = vmatmul.msk.f32.gmra.mxu2 %vm1495_vm0, %v7164_v20 }
 0x2c3   :  { %v7450_v58 = vadd.f32 %v1179_v50, %v851_v49  ;;  %897 = vmatmul.f32.gmra.mxu0 %v577_v45  ;;  %v587_v50 = vld [vmem:[%s10300_s0 + $0x410] sm:$0xff]  ;;  %v588_v45 = vld [vmem:[%s10300_s0 + $0x418] sm:$0xff] }
 0x2c4   :  { %1226 = vmatmul.f32.gmra.mxu1 %v578_v33  ;;  %v1663_v48 = vpop.f32.mrf.mxu2 }
 0x2c5   :  { %1777 = vrot.lane.b32.xlu0 %v1663_v48, %s5498_s25 }
 0x2c8   :  { %v7453_v0 = vpop.f32.mrf.mxu0  ;;  %5163 = vmatmul.msk.f32.gmra.mxu3 %vm1495_vm0, %v7039_v42  ;;  %v582_v42 = vld [vmem:[%s10300_s0 + $0x3e8] sm:$0xff] }
 0x2c9   :  { %v7455_v47 = vpop.f32.mrf.mxu1  ;;  %5182 = vmatmul.msk.f32.gmra.mxu2 %vm1495_vm0, %v7187_v15 }
 0x2cb   :  { %900 = vmatmul.f32.gmra.mxu0 %v579_v56  ;;  %v1854_v37 = vpop.f32.mrf.mxu3  ;;  %v589_v56 = vld [vmem:[%s10300_s0 + $0x420] sm:$0xff] }
 0x2cc   :  { %1229 = vmatmul.f32.gmra.mxu1 %v580_v21  ;;  %v1666_v20 = vpop.f32.mrf.mxu2  ;;  %1950 = vst.msk [vmem:[#allocation2 + $0x40] sm:$0xff] %vm1705_vm1, %v1854_v37  ;;  %v590_v21 = vld [vmem:[%s10300_s0 + $0x428] sm:$0xff] }
 0x2cd   :  { %1779 = vrot.lane.b32.xlu0 %v1666_v20, %s5498_s25 }
 0x2d0   :  { %v7469_v52 = vpop.f32.mrf.mxu0  ;;  %5164 = vmatmul.msk.f32.gmra.mxu3 %vm1495_vm0, %v7063_v4  ;;  %v584_v4 = vld [vmem:[%s10300_s0 + $0x3f8] sm:$0xff] }
 0x2d1   :  { %v7471_v8 = vpop.f32.mrf.mxu1  ;;  %5183 = vmatmul.msk.f32.gmra.mxu2 %vm1495_vm0, %v7212_v10 }
 0x2d3   :  { %903 = vmatmul.f32.gmra.mxu0 %v581_v19  ;;  %v1857_v41 = vpop.f32.mrf.mxu3 }
 0x2d4   :  { %1232 = vmatmul.f32.gmra.mxu1 %v582_v42  ;;  %v1669_v15 = vpop.f32.mrf.mxu2  ;;  %1951 = vst.msk [vmem:[#allocation2 + $0x60] sm:$0xff] %vm1705_vm1, %v1857_v41 }
 0x2d5   :  { %1787 = vrot.lane.b32.xlu1 %v1669_v15, %s5499_s20 }
 0x2d8   :  { %v859_v31 = vpop.f32.mrf.mxu0  ;;  %5165 = vmatmul.msk.f32.gmra.mxu3 %vm1495_vm0, %v7092_v9 }
 0x2d9   :  { %v7485_v60 = vpop.f32.mrf.mxu1  ;;  %5184 = vmatmul.msk.f32.gmra.mxu2 %vm1495_vm0, %v7237_v51 }
 0x2db   :  { %906 = vmatmul.f32.gmra.mxu0 %v583_v62  ;;  %v1860_v39 = vpop.f32.mrf.mxu3 }
 0x2dc   :  { %1235 = vmatmul.f32.gmra.mxu1 %v584_v4  ;;  %v1672_v10 = vpop.f32.mrf.mxu2  ;;  %1954 = vrot.lane.b32.xlu0 %v1860_v39, %s5498_s25  ;;  %v860_v39 = vadd.f32 %v7443_v5, %v859_v31  ;;  %v593_v31 = vld [vmem:[%s10300_s0 + $0x440] sm:$0xff] }
 0x2dd   :  { %1789 = vrot.lane.b32.xlu1 %v1672_v10, %s5499_s20 }
 0x2e0   :  { %v862_v34 = vpop.f32.mrf.mxu0  ;;  %5166 = vmatmul.msk.f32.gmra.mxu3 %vm1495_vm0, %v7111_v38 }
 0x2e1   :  { %v1191_v27 = vpop.f32.mrf.mxu1  ;;  %5185 = vmatmul.msk.f32.gmra.mxu2 %vm1495_vm0, %v6887_v43  ;;  %v863_v62 = vadd.f32 %v7443_v5, %v862_v34  ;;  %v1189_v34 = vadd.f32 %v7485_v60, %v860_v39 }
 0x2e3   :  { %909 = vmatmul.f32.gmra.mxu0 %v585_v61  ;;  %v1863_v17 = vpop.f32.mrf.mxu3 }
 0x2e4   :  { %1238 = vmatmul.f32.gmra.mxu1 %v586_v54  ;;  %v1675_v51 = vpop.f32.mrf.mxu2  ;;  %1956 = vrot.lane.b32.xlu0 %v1863_v17, %s5498_s25 }
 0x2e5   :  { %1797 = vrot.lane.b32.xlu2 %v1675_v51, %s5497_s17 }
 0x2e8   :  { %v865_v23 = vpop.f32.mrf.mxu0  ;;  %5167 = vmatmul.msk.f32.gmra.mxu3 %vm1495_vm0, %v7135_v11 }
 0x2e9   :  { %v1194_v22 = vpop.f32.mrf.mxu1  ;;  %5186 = vmatmul.msk.f32.gmra.mxu2 %vm1495_vm0, %v6904_v25  ;;  %v866_v19 = vadd.f32 %v7443_v5, %v865_v23 }
 0x2eb   :  { %912 = vmatmul.f32.gmra.mxu0 %v587_v50  ;;  %v1866_v33 = vpop.f32.mrf.mxu3  ;;  %v1195_v61 = vadd.f32 %v1194_v22, %v866_v19  ;;  %v594_v22 = vld [vmem:[%s10300_s0 + $0x448] sm:$0xff]  ;;  %v839_v19 = vadd.f32 %v7443_v5, %v7357_v13 }
 0x2ec   :  { %1241 = vmatmul.f32.gmra.mxu1 %v588_v45  ;;  %v1678_v43 = vpop.f32.mrf.mxu2  ;;  %1964 = vrot.lane.b32.xlu1 %v1866_v33, %s5499_s20 }
 0x2ed   :  { %1799 = vrot.lane.b32.xlu2 %v1678_v43, %s5497_s17  ;;  %v1168_v13 = vadd.f32 %v7359_v46, %v839_v19 }
 0x2ef   :  { %v1399_v39 = vmax.f32 %v1168_v13, 0.0 }
 0x2f0   :  { %v868_v49 = vpop.f32.mrf.mxu0  ;;  %5168 = vmatmul.msk.f32.gmra.mxu3 %vm1495_vm0, %v7159_v28  ;;  %v591_v28 = vld [vmem:[%s10300_s0 + $0x430] sm:$0xff] }
 0x2f1   :  { %v1197_v48 = vpop.f32.mrf.mxu1  ;;  %5187 = vmatmul.msk.f32.gmra.mxu2 %vm1495_vm0, %v6921_v55  ;;  %v869_v37 = vadd.f32 %v7443_v5, %v868_v49  ;;  %v592_v55 = vld [vmem:[%s10300_s0 + $0x438] sm:$0xff] }
 0x2f3   :  { %915 = vmatmul.f32.gmra.mxu0 %v589_v56  ;;  %v1869_v20 = vpop.f32.mrf.mxu3  ;;  %v1198_v4 = vadd.f32 %v1197_v48, %v869_v37  ;;  %v1406_v48 = vmax.f32 %v1189_v34, 0.0  ;;  %v845_v56 = vadd.f32 %v7443_v5, %v7404_v59  ;;  %v842_v59 = vadd.f32 %v7443_v5, %v7388_v18 }
 0x2f4   :  { %1244 = vmatmul.f32.gmra.mxu1 %v590_v21  ;;  %v1681_v25 = vpop.f32.mrf.mxu2  ;;  %1966 = vrot.lane.b32.xlu1 %v1869_v20, %s5499_s20  ;;  %v595_v20 = vld [vmem:[%s10300_s0 + $0x450] sm:$0xff] }
 0x2f5   :  { %1805 = vst.msk [vmem:[#allocation2 + $0x18] sm:$0xff] %vm1705_vm1, %v1681_v25  ;;  %v1409_v23 = vmax.f32 %v1198_v4, 0.0  ;;  %v1171_v18 = vadd.f32 %v7390_v16, %v842_v59  ;;  %v10518_v59 = vld [vmem:[#allocation205_spill] sm:$0xff] }
 0x2f8   :  { %v871_v42 = vpop.f32.mrf.mxu0  ;;  %5169 = vmatmul.msk.f32.gmra.mxu3 %vm1495_vm0, %v7182_v3  ;;  %v1192_v3 = vadd.f32 %v1191_v27, %v863_v62  ;;  %v1408_v27 = vmax.f32 %v1195_v61, 0.0  ;;  %v1400_v62 = vmax.f32 %v1171_v18, 0.0  ;;  %v7625_v61 = vpop.permute.xlu1 %1732  ;;  %v7705_v18 = vld [vmem:[%s10303_s3 + $0x80] sm:$0xff] }
 0x2f9   :  { %v1200_v15 = vpop.f32.mrf.mxu1  ;;  %v872_v41 = vadd.f32 %v7443_v5, %v871_v42  ;;  %5188 = vmatmul.msk.f32.gmra.mxu2 %vm1495_vm0, %v6937_v24  ;;  %v857_v24 = vadd.f32 %v7443_v5, %v7469_v52  ;;  %v854_v52 = vadd.f32 %v7443_v5, %v7453_v0  ;;  %v7577_v0 = vpop.permute.xlu2 %1734  ;;  %v1174_v42 = vadd.f32 %v7406_v29, %v845_v56 }
 0x2fa   :  { %v1407_v60 = vmax.f32 %v1192_v3, 0.0  ;;  %10514 = vst [vmem:[#allocation206_spill] sm:$0xff] %v7577_v0  ;;  %v10516_v3 = vld [vmem:[#allocation203_spill] sm:$0xff] }
 0x2fb   :  { %v1201_v10 = vadd.f32 %v1200_v15, %v872_v41  ;;  %918 = vmatmul.f32.gmra.mxu0 %v591_v28  ;;  %v1872_v51 = vpop.f32.mrf.mxu3  ;;  %v1186_v43 = vadd.f32 %v7471_v8, %v857_v24  ;;  %v1401_v41 = vmax.f32 %v1174_v42, 0.0  ;;  %10515 = vst [vmem:[#allocation207_spill] sm:$0xff] %v7625_v61 }
 0x2fc   :  { %1247 = vmatmul.f32.gmra.mxu1 %v592_v55  ;;  %v1684_v54 = vpop.f32.mrf.mxu2  ;;  %1974 = vrot.lane.b32.xlu2 %v1872_v51, %s5497_s17  ;;  %v599_v51 = vld [vmem:[%s10300_s0 + $0x470] sm:$0xff] }
 0x2fd   :  { %1806 = vst.msk [vmem:[#allocation2 + $0x38] sm:$0xff] %vm1705_vm1, %v1684_v54  ;;  %v1410_v17 = vmax.f32 %v1201_v10, 0.0  ;;  %v1405_v25 = vmax.f32 %v1186_v43, 0.0  ;;  %v7662_v43 = vld [vmem:[%s10303_s3 + $0x70] sm:$0xff] }
 0x2ff   :  { %2322 = vmatpush.msrb.mxu3 %v1410_v17  ;;  %v600_v17 = vld [vmem:[%s10300_s0 + $0x478] sm:$0xff] }
 0x300   :  { %v7555_v50 = vpop.f32.mrf.mxu0  ;;  %5170 = vmatmul.msk.f32.gmra.mxu3 %vm1495_vm0, %v7207_v32  ;;  %v1183_v32 = vadd.f32 %v7455_v47, %v854_v52  ;;  %v602_v52 = vld [vmem:[%s10300_s0 + $0x488] sm:$0xff] }
 0x301   :  { %v7557_v45 = vpop.f32.mrf.mxu1  ;;  %5189 = vmatmul.msk.f32.gmra.mxu2 %vm1495_vm0, %v6954_v1  ;;  %2323 = vmatpush.msrb.mxu3 %v1409_v23  ;;  %v848_v1 = vadd.f32 %v7443_v5, %v7419_v12  ;;  %v596_v12 = vld [vmem:[%s10300_s0 + $0x458] sm:$0xff]  ;;  %v1756_v46 = vpop.permute.xlu2 %1755 }
 0x302   :  { %v1404_v37 = vmax.f32 %v1183_v32, 0.0 }
 0x303   :  { %921 = vmatmul.f32.gmra.mxu0 %v593_v31  ;;  %v1875_v49 = vpop.f32.mrf.mxu3  ;;  %2324 = vmatpush.msrb.mxu3 %v1408_v27  ;;  %v1177_v47 = vadd.f32 %v7421_v26, %v848_v1  ;;  %v1746_v31 = vpop.permute.xlu1 %1745 }
 0x304   :  { %1250 = vmatmul.f32.gmra.mxu1 %v594_v22  ;;  %v1687_v33 = vpop.f32.mrf.mxu2  ;;  %1976 = vrot.lane.b32.xlu2 %v1875_v49, %s5497_s17  ;;  %1751 = vst.msk [vmem:[#allocation2 + $0x8] sm:$0xff] %vm1716_vm2, %v1746_v31 }
 0x305   :  { %1809 = vrot.lane.b32.xlu0 %v1687_v33, %s5498_s25  ;;  %2325 = vmatpush.msrb.mxu3 %v1407_v60  ;;  %v1402_v26 = vmax.f32 %v1177_v47, 0.0  ;;  %1761 = vst.msk [vmem:[#allocation2 + $0x8] sm:$0xff] %vm1727_vm3, %v1756_v46  ;;  %v10517_v60 = vld [vmem:[#allocation204_spill] sm:$0xff]  ;;  %v7682_v47 = vld [vmem:[%s10303_s3 + $0x78] sm:$0xff] }
 0x306   :  { %v608_v46 = vld [vmem:[%s10300_s0 + $0x4b8] sm:$0xff] }
 0x307   :  { %2326 = vmatpush.msrb.mxu3 %v1406_v48 }
 0x308   :  { %v7581_v8 = vpop.f32.mrf.mxu0  ;;  %5171 = vmatmul.msk.f32.gmra.mxu3 %vm1495_vm0, %v7232_v7  ;;  %v1403_v7 = vmax.f32 %v7450_v58, 0.0  ;;  %v597_v58 = vld [vmem:[%s10300_s0 + $0x460] sm:$0xff] }
 0x309   :  { %v7583_v21 = vpop.f32.mrf.mxu1  ;;  %5190 = vmatmul.msk.f32.gmra.mxu2 %vm1495_vm0, %v6969_v35  ;;  %2327 = vmatpush.msrb.mxu3 %v1405_v25  ;;  %v836_v35 = vadd.f32 %v7443_v5, %v7329_v57  ;;  %v598_v57 = vld [vmem:[%s10300_s0 + $0x468] sm:$0xff]  ;;  %v1766_v23 = vpop.permute.xlu2 %1765  ;;  %v603_v25 = vld [vmem:[%s10300_s0 + $0x490] sm:$0xff] }
 0x30a   :  { %1771 = vst.msk [vmem:[#allocation2 + $0x8] sm:$0xff] %vm1738_vm4, %v1766_v23 }
 0x30b   :  { %924 = vmatmul.f32.gmra.mxu0 %v595_v20  ;;  %v1878_v28 = vpop.f32.mrf.mxu3  ;;  %2328 = vmatpush.msrb.mxu3 %v1404_v37  ;;  %v1165_v16 = vadd.f32 %v7331_v44, %v836_v35  ;;  %v604_v20 = vld [vmem:[%s10300_s0 + $0x498] sm:$0xff]  ;;  %v606_v35 = vld [vmem:[%s10300_s0 + $0x4a8] sm:$0xff] }
 0x30c   :  { %1253 = vmatmul.f32.gmra.mxu1 %v596_v12  ;;  %v1690_v15 = vpop.f32.mrf.mxu2  ;;  %1982 = vst.msk [vmem:[#allocation2 + $0x48] sm:$0xff] %vm1705_vm1, %v1878_v28 }
 0x30d   :  { %1811 = vrot.lane.b32.xlu0 %v1690_v15, %s5498_s25  ;;  %2329 = vmatpush.msrb.mxu3 %v1403_v7  ;;  %v605_v7 = vld [vmem:[%s10300_s0 + $0x4a0] sm:$0xff] }
 0x30f   :  { %2330 = vmatpush.msrb.mxu3 %v1402_v26  ;;  %v1758_v48 = vpop.permute.xlu1 %1757 }
 0x310   :  { %v7608_v29 = vpop.f32.mrf.mxu0  ;;  %5172 = vmatmul.msk.f32.gmra.mxu3 %vm1495_vm0, %v7255_v6  ;;  %v1748_v6 = vpop.permute.xlu0 %1747 }
 0x311   :  { %v7610_v55 = vpop.f32.mrf.mxu1  ;;  %5191 = vmatmul.msk.f32.gmra.mxu2 %vm1495_vm0, %v6982_v2  ;;  %2331 = vmatpush.msrb.mxu3 %v1401_v41  ;;  %v1398_v2 = vmax.f32 %v1165_v16, 0.0  ;;  %1752 = vst.msk [vmem:[#allocation2 + $0x28] sm:$0xff] %vm1716_vm2, %v1748_v6  ;;  %v1768_v1 = vpop.permute.xlu2 %1767  ;;  %v7727_v16 = vld [vmem:[%s10303_s3 + $0x88] sm:$0xff]  ;;  %v609_v6 = vld [vmem:[%s10300_s0 + $0x4c0] sm:$0xff] }
 0x312   :  { %1762 = vst.msk [vmem:[#allocation2 + $0x28] sm:$0xff] %vm1727_vm3, %v1758_v48 }
 0x313   :  { %927 = vmatmul.f32.gmra.mxu0 %v597_v58  ;;  %v1881_v10 = vpop.f32.mrf.mxu3  ;;  %2332 = vmatpush.msrb.mxu3 %v1400_v62  ;;  %1772 = vst.msk [vmem:[#allocation2 + $0x28] sm:$0xff] %vm1738_vm4, %v1768_v1 }
 0x314   :  { %1256 = vmatmul.f32.gmra.mxu1 %v598_v57  ;;  %v1693_v4 = vpop.f32.mrf.mxu2  ;;  %1983 = vst.msk [vmem:[#allocation2 + $0x68] sm:$0xff] %vm1705_vm1, %v1881_v10  ;;  %v607_v57 = vld [vmem:[%s10300_s0 + $0x4b0] sm:$0xff] }
 0x315   :  { %1819 = vrot.lane.b32.xlu1 %v1693_v4, %s5499_s20  ;;  %2333 = vmatpush.msrb.mxu3 %v1399_v39 }
 0x317   :  { %2334 = vmatpush.msrb.mxu3 %v1398_v2  ;;  %v610_v2 = vld [vmem:[%s10300_s0 + $0x4c8] sm:$0xff] }
 0x318   :  { %v7628_v44 = vpop.f32.mrf.mxu0  ;;  %5173 = vmatmul.msk.f32.gmra.mxu3 %vm1495_vm0, %v10516_v3 }
 0x319   :  { %v7630_v54 = vpop.f32.mrf.mxu1  ;;  %5192 = vmatmul.msk.f32.gmra.mxu2 %vm1495_vm0, %v6995_v14  ;;  %v601_v14 = vld [vmem:[%s10300_s0 + $0x480] sm:$0xff] }
 0x31b   :  { %930 = vmatmul.f32.gmra.mxu0 %v599_v51  ;;  %v1884_v34 = vpop.f32.mrf.mxu3 }
 0x31c   :  { %1259 = vmatmul.f32.gmra.mxu1 %v600_v17  ;;  %v1696_v24 = vpop.f32.mrf.mxu2  ;;  %1986 = vrot.lane.b32.xlu0 %v1884_v34, %s5498_s25 }
 0x31d   :  { %1821 = vrot.lane.b32.xlu1 %v1696_v24, %s5499_s20 }
 0x320   :  { %v7646_v22 = vpop.f32.mrf.mxu0  ;;  %5174 = vmatmul.msk.f32.gmra.mxu3 %vm1495_vm0, %v10517_v60 }
 0x321   :  { %v7648_v27 = vpop.f32.mrf.mxu1  ;;  %5193 = vmatmul.msk.f32.gmra.mxu2 %vm1495_vm0, %v7662_v43 }
 0x323   :  { %933 = vmatmul.f32.gmra.mxu0 %v601_v14  ;;  %v1887_v49 = vpop.f32.mrf.mxu3 }
 0x324   :  { %1262 = vmatmul.f32.gmra.mxu1 %v602_v52  ;;  %v1699_v33 = vpop.f32.mrf.mxu2  ;;  %1988 = vrot.lane.b32.xlu0 %v1887_v49, %s5498_s25 }
 0x325   :  { %1829 = vrot.lane.b32.xlu2 %v1699_v33, %s5497_s17 }
 0x328   :  { %v889_v32 = vpop.f32.mrf.mxu0  ;;  %5175 = vmatmul.msk.f32.gmra.mxu3 %vm1495_vm0, %v10518_v59  ;;  %v7800_v59 = vld [vmem:[%s10303_s3 + $0x10] sm:$0xff] }
 0x329   :  { %v1218_v56 = vpop.f32.mrf.mxu1  ;;  %v890_v12 = vadd.f32 %v7443_v5, %v889_v32  ;;  %5194 = vmatmul.msk.f32.gmra.mxu2 %vm1495_vm0, %v7682_v47 }
 0x32b   :  { %v7686_v37 = vadd.f32 %v1218_v56, %v890_v12  ;;  %936 = vmatmul.f32.gmra.mxu0 %v603_v25  ;;  %v1890_v42 = vpop.f32.mrf.mxu3  ;;  %v7793_v12 = vld [vmem:[%s10303_s3 + $0xa8] sm:$0xff] }
 0x32c   :  { %1265 = vmatmul.f32.gmra.mxu1 %v604_v20  ;;  %v1702_v19 = vpop.f32.mrf.mxu2  ;;  %1996 = vrot.lane.b32.xlu1 %v1890_v42, %s5499_s20  ;;  %v615_v20 = vld [vmem:[%s10300_s0 + $0x4f0] sm:$0xff] }
 0x32d   :  { %1831 = vrot.lane.b32.xlu2 %v1702_v19, %s5497_s17 }
 0x330   :  { %v7690_v15 = vpop.f32.mrf.mxu0  ;;  %5176 = vmatmul.msk.f32.gmra.mxu3 %vm1495_vm0, %v7324_v53 }
 0x331   :  { %v7692_v28 = vpop.f32.mrf.mxu1  ;;  %5195 = vmatmul.msk.f32.gmra.mxu2 %vm1495_vm0, %v7705_v18 }
 0x333   :  { %939 = vmatmul.f32.gmra.mxu0 %v605_v7  ;;  %v1893_v26 = vpop.f32.mrf.mxu3 }
 0x334   :  { %1268 = vmatmul.f32.gmra.mxu1 %v606_v35  ;;  %v2095_v13 = vpop.f32.mrf.mxu2  ;;  %1998 = vrot.lane.b32.xlu1 %v1893_v26, %s5499_s20 }
 0x335   :  { %2191 = vst.msk [vmem:[#allocation2 + $0x80] sm:$0xff] %vm1705_vm1, %v2095_v13 }
 0x337   :  { %v1778_v41 = vpop.permute.xlu0 %1777 }
 0x338   :  { %v7711_v58 = vpop.f32.mrf.mxu0  ;;  %1783 = vst.msk [vmem:[#allocation2 + $0x10] sm:$0xff] %vm1716_vm2, %v1778_v41  ;;  %5177 = vmatmul.msk.f32.gmra.mxu3 %vm1495_vm0, %v7353_v63 }
 0x339   :  { %v7713_v53 = vpop.f32.mrf.mxu1  ;;  %5196 = vmatmul.msk.f32.gmra.mxu2 %vm1495_vm0, %v7727_v16 }
 0x33b   :  { %942 = vmatmul.f32.gmra.mxu0 %v607_v57  ;;  %v1896_v62 = vpop.f32.mrf.mxu3 }
 0x33c   :  { %1271 = vmatmul.f32.gmra.mxu1 %v608_v46  ;;  %v2098_v4 = vpop.f32.mrf.mxu2  ;;  %2006 = vrot.lane.b32.xlu2 %v1896_v62, %s5497_s17  ;;  %v618_v46 = vld [vmem:[%s10300_s0 + $0x508] sm:$0xff]  ;;  %v617_v62 = vld [vmem:[%s10300_s0 + $0x500] sm:$0xff] }
 0x33d   :  { %2192 = vst.msk [vmem:[#allocation2 + $0xa0] sm:$0xff] %vm1705_vm1, %v2098_v4 }
 0x33f   :  { %v1780_v10 = vpop.permute.xlu0 %1779  ;;  %v1798_v3 = vpop.permute.xlu2 %1797 }
 0x340   :  { %v7733_v39 = vpop.f32.mrf.mxu0  ;;  %1784 = vst.msk [vmem:[#allocation2 + $0x30] sm:$0xff] %vm1716_vm2, %v1780_v10  ;;  %5178 = vmatmul.msk.f32.gmra.mxu3 %vm1495_vm0, %v7385_v40  ;;  %v611_v40 = vld [vmem:[%s10300_s0 + $0x4d0] sm:$0xff] }
 0x341   :  { %v7735_v63 = vpop.f32.mrf.mxu1  ;;  %5197 = vmatmul.msk.f32.gmra.mxu2 %vm1495_vm0, %v7092_v9  ;;  %v612_v9 = vld [vmem:[%s10300_s0 + $0x4d8] sm:$0xff]  ;;  %v7820_v10 = vld [vmem:[%s10303_s3 + $0xb0] sm:$0xff] }
 0x343   :  { %945 = vmatmul.f32.gmra.mxu0 %v609_v6  ;;  %v1899_v51 = vpop.f32.mrf.mxu3  ;;  %v7827_v6 = vld [vmem:[%s10303_s3 + $0x18] sm:$0xff] }
 0x344   :  { %1274 = vmatmul.f32.gmra.mxu1 %v610_v2  ;;  %v2101_v17 = vpop.f32.mrf.mxu2  ;;  %2008 = vrot.lane.b32.xlu2 %v1899_v51, %s5497_s17 }
 0x345   :  { %2195 = vrot.lane.b32.xlu0 %v2101_v17, %s5498_s25 }
 0x347   :  { %v1788_v23 = vpop.permute.xlu1 %1787  ;;  %v1800_v48 = vpop.permute.xlu2 %1799 }
 0x348   :  { %v7750_v24 = vpop.f32.mrf.mxu0  ;;  %1793 = vst.msk [vmem:[#allocation2 + $0x10] sm:$0xff] %vm1727_vm3, %v1788_v23  ;;  %5211 = vmatmul.msk.f32.vlgmr.msrb.gmra.mxu3 %vm1495_vm0, %v7116_v30  ;;  %v613_v30 = vld [vmem:[%s10300_s0 + $0x4e0] sm:$0xff] }
 0x349   :  { %v7752_v34 = vpop.f32.mrf.mxu1  ;;  %5198 = vmatmul.msk.f32.gmra.mxu2 %vm1495_vm0, %v7111_v38  ;;  %1803 = vst.msk [vmem:[#allocation2 + $0x10] sm:$0xff] %vm1738_vm4, %v1798_v3  ;;  %v614_v38 = vld [vmem:[%s10300_s0 + $0x4e8] sm:$0xff]  ;;  %v902_v2 = vadd.f32 %v7443_v5, %v7750_v24  ;;  %v899_v3 = vadd.f32 %v7443_v5, %v7733_v39  ;;  %v893_v39 = vadd.f32 %v7443_v5, %v7690_v15  ;;  %v7858_v15 = vld [vmem:[%s10303_s3 + $0xb8] sm:$0xff] }
 0x34b   :  { %948 = vmatmul.f32.gmra.mxu0 %v611_v40  ;;  %v1902_v31 = vpop.f32.mrf.mxu3  ;;  %v1231_v24 = vadd.f32 %v7752_v34, %v902_v2  ;;  %v619_v34 = vld [vmem:[%s10300_s0 + $0x510] sm:$0xff] }
 0x34c   :  { %1277 = vmatmul.f32.gmra.mxu1 %v612_v9  ;;  %v2104_v14 = vpop.f32.mrf.mxu2  ;;  %2014 = vst.msk [vmem:[#allocation2 + $0x50] sm:$0xff] %vm1705_vm1, %v1902_v31 }
 0x34d   :  { %2197 = vrot.lane.b32.xlu0 %v2104_v14, %s5498_s25  ;;  %v896_v14 = vadd.f32 %v7443_v5, %v7711_v58  ;;  %v620_v58 = vld [vmem:[%s10300_s0 + $0x518] sm:$0xff] }
 0x34e   :  { %v1955_v52 = vpop.permute.xlu0 %1954 }
 0x34f   :  { %v1790_v60 = vpop.permute.xlu1 %1789  ;;  %1960 = vst.msk [vmem:[#allocation2 + $0x40] sm:$0xff] %vm1716_vm2, %v1955_v52 }
 0x350   :  { %v904_v33 = vpop.f32.mrf.mxu0  ;;  %5212 = vmatmul.msk.f32.gmra.mxu3 %vm1495_vm0, %v7140_v36  ;;  %1794 = vst.msk [vmem:[#allocation2 + $0x30] sm:$0xff] %vm1727_vm3, %v1790_v60  ;;  %v616_v36 = vld [vmem:[%s10300_s0 + $0x4f8] sm:$0xff] }
 0x351   :  { %v1233_v49 = vpop.f32.mrf.mxu1  ;;  %5199 = vmatmul.msk.f32.gmra.mxu2 %vm1495_vm0, %v7135_v11  ;;  %1804 = vst.msk [vmem:[#allocation2 + $0x30] sm:$0xff] %vm1738_vm4, %v1800_v48  ;;  %v905_v13 = vadd.f32 %v7443_v5, %v904_v33 }
 0x353   :  { %951 = vmatmul.f32.gmra.mxu0 %v613_v30  ;;  %v1905_v1 = vpop.f32.mrf.mxu3  ;;  %v1234_v23 = vadd.f32 %v1233_v49, %v905_v13  ;;  %v1228_v49 = vadd.f32 %v7735_v63, %v899_v3  ;;  %v7865_v63 = vld [vmem:[%s10303_s3 + $0x20] sm:$0xff]  ;;  %v881_v13 = vadd.f32 %v7443_v5, %v7608_v29  ;;  %v875_v29 = vadd.f32 %v7443_v5, %v7555_v50  ;;  %v623_v50 = vld [vmem:[%s10300_s0 + $0x530] sm:$0xff] }
 0x354   :  { %1280 = vmatmul.f32.gmra.mxu1 %v614_v38  ;;  %v2107_v32 = vpop.f32.mrf.mxu2  ;;  %2015 = vst.msk [vmem:[#allocation2 + $0x70] sm:$0xff] %vm1705_vm1, %v1905_v1  ;;  %v1225_v1 = vadd.f32 %v7713_v53, %v896_v14  ;;  %v884_v53 = vadd.f32 %v7443_v5, %v7628_v44  ;;  %v7891_v44 = vld [vmem:[%s10303_s3 + $0xc0] sm:$0xff] }
 0x355   :  { %2205 = vrot.lane.b32.xlu1 %v2107_v32, %s5499_s20  ;;  %v1421_v38 = vmax.f32 %v1234_v23, 0.0  ;;  %v1420_v32 = vmax.f32 %v1231_v24, 0.0  ;;  %v624_v23 = vld [vmem:[%s10300_s0 + $0x538] sm:$0xff] }
 0x356   :  { %v1957_v56 = vpop.permute.xlu0 %1956  ;;  %v1975_v7 = vpop.permute.xlu2 %1974 }
 0x357   :  { %1961 = vst.msk [vmem:[#allocation2 + $0x60] sm:$0xff] %vm1716_vm2, %v1957_v56  ;;  %v887_v56 = vadd.f32 %v7443_v5, %v7646_v22 }
 0x358   :  { %v907_v25 = vpop.f32.mrf.mxu0  ;;  %5213 = vmatmul.msk.f32.gmra.mxu3 %vm1495_vm0, %v7800_v59 }
 0x359   :  { %v1236_v11 = vpop.f32.mrf.mxu1  ;;  %5200 = vmatmul.msk.f32.gmra.mxu2 %vm1495_vm0, %v7793_v12  ;;  %v908_v35 = vadd.f32 %v7443_v5, %v907_v25  ;;  %v1222_v25 = vadd.f32 %v7692_v28, %v893_v39 }
 0x35b   :  { %954 = vmatmul.f32.gmra.mxu0 %v615_v20  ;;  %v1908_v19 = vpop.f32.mrf.mxu3  ;;  %v1237_v51 = vadd.f32 %v1236_v11, %v908_v35  ;;  %v1419_v11 = vmax.f32 %v1228_v49, 0.0  ;;  %v622_v35 = vld [vmem:[%s10300_s0 + $0x528] sm:$0xff]  ;;  %v625_v49 = vld [vmem:[%s10300_s0 + $0x540] sm:$0xff] }
 0x35c   :  { %1283 = vmatmul.f32.gmra.mxu1 %v616_v36  ;;  %v2110_v42 = vpop.f32.mrf.mxu2  ;;  %2018 = vrot.lane.b32.xlu0 %v1908_v19, %s5498_s25  ;;  %v1418_v19 = vmax.f32 %v1225_v1, 0.0 }
 0x35d   :  { %2207 = vrot.lane.b32.xlu1 %v2110_v42, %s5499_s20  ;;  %v1422_v52 = vmax.f32 %v1237_v51, 0.0  ;;  %v1216_v42 = vadd.f32 %v7648_v27, %v887_v56  ;;  %v7898_v27 = vld [vmem:[%s10303_s3 + $0x28] sm:$0xff] }
 0x35e   :  { %v1965_v26 = vpop.permute.xlu1 %1964  ;;  %v1977_v60 = vpop.permute.xlu2 %1976 }
 0x35f   :  { %1970 = vst.msk [vmem:[#allocation2 + $0x40] sm:$0xff] %vm1727_vm3, %v1965_v26  ;;  %v621_v26 = vld [vmem:[%s10300_s0 + $0x520] sm:$0xff] }
 0x360   :  { %v910_v41 = vpop.f32.mrf.mxu0  ;;  %1980 = vst.msk [vmem:[#allocation2 + $0x40] sm:$0xff] %vm1738_vm4, %v1975_v7  ;;  %5214 = vmatmul.msk.f32.gmra.mxu3 %vm1495_vm0, %v7827_v6  ;;  %v1417_v7 = vmax.f32 %v1222_v25, 0.0 }
 0x361   :  { %v1239_v57 = vpop.f32.mrf.mxu1  ;;  %v911_v4 = vadd.f32 %v7443_v5, %v910_v41  ;;  %5201 = vmatmul.msk.f32.gmra.mxu2 %vm1495_vm0, %v7820_v10  ;;  %v1213_v41 = vadd.f32 %v7630_v54, %v884_v53  ;;  %v1210_v54 = vadd.f32 %v7610_v55, %v881_v13  ;;  %v7928_v55 = vld [vmem:[%s10303_s3 + $0xc8] sm:$0xff]  ;;  %v7983_v53 = vld [vmem:[%s10303_s3 + $0xd8] sm:$0xff] }
 0x363   :  { %v1240_v17 = vadd.f32 %v1239_v57, %v911_v4  ;;  %957 = vmatmul.f32.gmra.mxu0 %v617_v62  ;;  %v1911_v40 = vpop.f32.mrf.mxu3  ;;  %v1416_v57 = vmax.f32 %v7686_v37, 0.0  ;;  %v1415_v62 = vmax.f32 %v1216_v42, 0.0  ;;  %v1414_v37 = vmax.f32 %v1213_v41, 0.0 }
 0x364   :  { %1286 = vmatmul.f32.gmra.mxu1 %v618_v46  ;;  %v2113_v9 = vpop.f32.mrf.mxu2  ;;  %2020 = vrot.lane.b32.xlu0 %v1911_v40, %s5498_s25  ;;  %v878_v46 = vadd.f32 %v7443_v5, %v7581_v8  ;;  %v1204_v40 = vadd.f32 %v7557_v45, %v875_v29  ;;  %v626_v45 = vld [vmem:[%s10300_s0 + $0x548] sm:$0xff] }
 0x365   :  { %v1423_v31 = vmax.f32 %v1240_v17, 0.0  ;;  %2215 = vrot.lane.b32.xlu2 %v2113_v9, %s5497_s17  ;;  %v1413_v9 = vmax.f32 %v1210_v54, 0.0  ;;  %v8015_v29 = vld [vmem:[%s10303_s3 + $0x48] sm:$0xff] }
 0x366   :  { %v1967_v33 = vpop.permute.xlu1 %1966  ;;  %v1207_v17 = vadd.f32 %v7583_v21, %v878_v46  ;;  %v7935_v21 = vld [vmem:[%s10303_s3 + $0x30] sm:$0xff]  ;;  %v629_v46 = vld [vmem:[%s10300_s0 + $0x560] sm:$0xff] }
 0x367   :  { %2563 = vmatpush.msra.mxu2 %v1423_v31  ;;  %1971 = vst.msk [vmem:[#allocation2 + $0x60] sm:$0xff] %vm1727_vm3, %v1967_v33 }
 0x368   :  { %v7844_v30 = vpop.f32.mrf.mxu0  ;;  %1981 = vst.msk [vmem:[#allocation2 + $0x60] sm:$0xff] %vm1738_vm4, %v1977_v60  ;;  %5215 = vmatmul.msk.f32.gmra.mxu3 %vm1495_vm0, %v7865_v63  ;;  %v1412_v31 = vmax.f32 %v1207_v17, 0.0 }
 0x369   :  { %v7846_v48 = vpop.f32.mrf.mxu1  ;;  %5202 = vmatmul.msk.f32.gmra.mxu2 %vm1495_vm0, %v7858_v15 }
 0x36a   :  { %2564 = vmatpush.msra.mxu2 %v1422_v52  ;;  %v1411_v52 = vmax.f32 %v1204_v40, 0.0  ;;  %v631_v40 = vld [vmem:[%s10300_s0 + $0x570] sm:$0xff] }
 0x36b   :  { %960 = vmatmul.f32.gmra.mxu0 %v619_v34  ;;  %v1914_v36 = vpop.f32.mrf.mxu3 }
 0x36c   :  { %1289 = vmatmul.f32.gmra.mxu1 %v620_v58  ;;  %v2116_v20 = vpop.f32.mrf.mxu2  ;;  %2565 = vmatpush.msra.mxu2 %v1421_v38  ;;  %v7956_v38 = vld [vmem:[%s10303_s3 + $0xd0] sm:$0xff]  ;;  %v7963_v58 = vld [vmem:[%s10303_s3 + $0x38] sm:$0xff] }
 0x36d   :  { %2028 = vrot.lane.b32.xlu1 %v1914_v36, %s5499_s20  ;;  %2217 = vrot.lane.b32.xlu2 %v2116_v20, %s5497_s17  ;;  %v628_v36 = vld [vmem:[%s10300_s0 + $0x558] sm:$0xff]  ;;  %v627_v20 = vld [vmem:[%s10300_s0 + $0x550] sm:$0xff] }
 0x36e   :  { %2566 = vmatpush.msra.mxu2 %v1420_v32 }
 0x370   :  { %2567 = vmatpush.msra.mxu2 %v1419_v11  ;;  %v7878_v22 = vpop.f32.mrf.mxu0  ;;  %5216 = vmatmul.msk.f32.gmra.mxu3 %vm1495_vm0, %v7898_v27 }
 0x371   :  { %v7880_v28 = vpop.f32.mrf.mxu1  ;;  %5203 = vmatmul.msk.f32.gmra.mxu2 %vm1495_vm0, %v7891_v44 }
 0x372   :  { %2568 = vmatpush.msra.mxu2 %v1418_v19  ;;  %v7990_v19 = vld [vmem:[%s10303_s3 + $0x40] sm:$0xff] }
 0x373   :  { %963 = vmatmul.f32.gmra.mxu0 %v621_v26  ;;  %v1917_v4 = vpop.f32.mrf.mxu3 }
 0x374   :  { %1292 = vmatmul.f32.gmra.mxu1 %v622_v35  ;;  %v2119_v2 = vpop.f32.mrf.mxu2  ;;  %2569 = vmatpush.msra.mxu2 %v1417_v7 }
 0x375   :  { %2223 = vst.msk [vmem:[#allocation2 + $0x88] sm:$0xff] %vm1705_vm1, %v2119_v2  ;;  %2030 = vrot.lane.b32.xlu1 %v1917_v4, %s5499_s20  ;;  %v8008_v2 = vld [vmem:[%s10303_s3 + $0xe0] sm:$0xff] }
 0x376   :  { %2570 = vmatpush.msra.mxu2 %v1416_v57  ;;  %v630_v57 = vld [vmem:[%s10300_s0 + $0x568] sm:$0xff] }
 0x377   :  { %v1810_v51 = vpop.permute.xlu0 %1809 }
 0x378   :  { %2571 = vmatpush.msra.mxu2 %v1415_v62  ;;  %v7914_v8 = vpop.f32.mrf.mxu0  ;;  %1815 = vst.msk [vmem:[#allocation2 + $0x18] sm:$0xff] %vm1716_vm2, %v1810_v51  ;;  %5217 = vmatmul.msk.f32.gmra.mxu3 %vm1495_vm0, %v7935_v21 }
 0x379   :  { %v7916_v3 = vpop.f32.mrf.mxu1  ;;  %5204 = vmatmul.msk.f32.gmra.mxu2 %vm1495_vm0, %v7928_v55 }
 0x37a   :  { %2572 = vmatpush.msra.mxu2 %v1414_v37 }
 0x37b   :  { %966 = vmatmul.f32.gmra.mxu0 %v623_v50  ;;  %v1920_v14 = vpop.f32.mrf.mxu3  ;;  %v632_v50 = vld [vmem:[%s10300_s0 + $0x578] sm:$0xff] }
 0x37c   :  { %1295 = vmatmul.f32.gmra.mxu1 %v624_v23  ;;  %v2122_v24 = vpop.f32.mrf.mxu2  ;;  %2573 = vmatpush.msra.mxu2 %v1413_v9  ;;  %v8039_v9 = vld [vmem:[%s10303_s3 + $0xe8] sm:$0xff] }
 0x37d   :  { %2224 = vst.msk [vmem:[#allocation2 + $0xa8] sm:$0xff] %vm1705_vm1, %v2122_v24  ;;  %2038 = vrot.lane.b32.xlu2 %v1920_v14, %s5497_s17 }
 0x37e   :  { %2574 = vmatpush.msra.mxu2 %v1412_v31  ;;  %v8046_v31 = vld [vmem:[%s10303_s3 + $0x50] sm:$0xff] }
 0x37f   :  { %v1812_v60 = vpop.permute.xlu0 %1811  ;;  %v1830_v32 = vpop.permute.xlu2 %1829 }
 0x380   :  { %2575 = vmatpush.msra.mxu2 %v1411_v52  ;;  %v7942_v33 = vpop.f32.mrf.mxu0  ;;  %1816 = vst.msk [vmem:[#allocation2 + $0x38] sm:$0xff] %vm1716_vm2, %v1812_v60  ;;  %5218 = vmatmul.msk.f32.gmra.mxu3 %vm1495_vm0, %v7963_v58 }
 0x381   :  { %v7944_v39 = vpop.f32.mrf.mxu1  ;;  %5205 = vmatmul.msk.f32.gmra.mxu2 %vm1495_vm0, %v7956_v38 }
 0x383   :  { %969 = vmatmul.f32.gmra.mxu0 %v625_v49  ;;  %v1923_v34 = vpop.f32.mrf.mxu3 }
 0x384   :  { %1298 = vmatmul.f32.gmra.mxu1 %v626_v45  ;;  %v2125_v1 = vpop.f32.mrf.mxu2 }
 0x385   :  { %2040 = vrot.lane.b32.xlu2 %v1923_v34, %s5497_s17  ;;  %2227 = vrot.lane.b32.xlu0 %v2125_v1, %s5498_s25  ;;  %v634_v34 = vld [vmem:[%s10300_s0 + $0x588] sm:$0xff]  ;;  %v633_v1 = vld [vmem:[%s10300_s0 + $0x580] sm:$0xff] }
 0x387   :  { %v1820_v56 = vpop.permute.xlu1 %1819  ;;  %v1832_v62 = vpop.permute.xlu2 %1831 }
 0x388   :  { %v7969_v25 = vpop.f32.mrf.mxu0  ;;  %1825 = vst.msk [vmem:[#allocation2 + $0x18] sm:$0xff] %vm1727_vm3, %v1820_v56  ;;  %5219 = vmatmul.msk.f32.gmra.mxu3 %vm1495_vm0, %v7990_v19  ;;  %v8074_v56 = vld [vmem:[%s10303_s3 + $0x58] sm:$0xff] }
 0x389   :  { %v7971_v11 = vpop.f32.mrf.mxu1  ;;  %5206 = vmatmul.msk.f32.gmra.mxu2 %vm1495_vm0, %v7983_v53  ;;  %1835 = vst.msk [vmem:[#allocation2 + $0x18] sm:$0xff] %vm1738_vm4, %v1830_v32  ;;  %v8067_v32 = vld [vmem:[%s10303_s3 + $0xf0] sm:$0xff] }
 0x38b   :  { %972 = vmatmul.f32.gmra.mxu0 %v627_v20  ;;  %v1926_v42 = vpop.f32.mrf.mxu3 }
 0x38c   :  { %1301 = vmatmul.f32.gmra.mxu1 %v628_v36  ;;  %v2128_v7 = vpop.f32.mrf.mxu2  ;;  %2046 = vst.msk [vmem:[#allocation2 + $0x58] sm:$0xff] %vm1705_vm1, %v1926_v42 }
 0x38d   :  { %2229 = vrot.lane.b32.xlu0 %v2128_v7, %s5498_s25 }
 0x38e   :  { %v1987_v35 = vpop.permute.xlu0 %1986 }
 0x38f   :  { %v1822_v26 = vpop.permute.xlu1 %1821  ;;  %1992 = vst.msk [vmem:[#allocation2 + $0x48] sm:$0xff] %vm1716_vm2, %v1987_v35 }
 0x390   :  { %v928_v13 = vpop.f32.mrf.mxu0  ;;  %5220 = vmatmul.msk.f32.gmra.mxu3 %vm1495_vm0, %v8015_v29  ;;  %1826 = vst.msk [vmem:[#allocation2 + $0x38] sm:$0xff] %vm1727_vm3, %v1822_v26 }
 0x391   :  { %v1257_v41 = vpop.f32.mrf.mxu1  ;;  %v929_v4 = vadd.f32 %v7443_v5, %v928_v13  ;;  %5207 = vmatmul.msk.f32.gmra.mxu2 %vm1495_vm0, %v8008_v2  ;;  %1836 = vst.msk [vmem:[#allocation2 + $0x38] sm:$0xff] %vm1738_vm4, %v1832_v62  ;;  %v636_v13 = vld [vmem:[%s10300_s0 + $0x598] sm:$0xff] }
 0x393   :  { %v8021_v5 = vadd.f32 %v1257_v41, %v929_v4  ;;  %975 = vmatmul.f32.gmra.mxu0 %v629_v46  ;;  %v1929_v54 = vpop.f32.mrf.mxu3  ;;  %v635_v41 = vld [vmem:[%s10300_s0 + $0x590] sm:$0xff]  ;;  %v8102_v46 = vld [vmem:[%s10303_s3 + $0x60] sm:$0xff] }
 0x394   :  { %1304 = vmatmul.f32.gmra.mxu1 %v630_v57  ;;  %v2131_v37 = vpop.f32.mrf.mxu2  ;;  %2047 = vst.msk [vmem:[#allocation2 + $0x78] sm:$0xff] %vm1705_vm1, %v1929_v54  ;;  %v8095_v57 = vld [vmem:[%s10303_s3 + $0xf8] sm:$0xff] }
 0x395   :  { %2237 = vrot.lane.b32.xlu1 %v2131_v37, %s5499_s20 }
 0x396   :  { %v1989_v51 = vpop.permute.xlu0 %1988  ;;  %v2007_v52 = vpop.permute.xlu2 %2006 }
 0x397   :  { %1993 = vst.msk [vmem:[#allocation2 + $0x68] sm:$0xff] %vm1716_vm2, %v1989_v51  ;;  %v638_v51 = vld [vmem:[%s10300_s0 + $0x5a8] sm:$0xff] }
 0x398   :  { %v8026_v17 = vpop.f32.mrf.mxu0  ;;  %5221 = vmatmul.msk.f32.gmra.mxu3 %vm1495_vm0, %v8046_v31 }
 0x399   :  { %v8028_v23 = vpop.f32.mrf.mxu1  ;;  %5208 = vmatmul.msk.f32.gmra.mxu2 %vm1495_vm0, %v8039_v9 }
 0x39b   :  { %978 = vmatmul.f32.gmra.mxu0 %v631_v40  ;;  %v1932_v14 = vpop.f32.mrf.mxu3  ;;  %v8119_v40 = vld [vmem:[%s10303_s3 + $0x68] sm:$0xff] }
 0x39c   :  { %1307 = vmatmul.f32.gmra.mxu1 %v632_v50  ;;  %v2134_v24 = vpop.f32.mrf.mxu2  ;;  %2050 = vrot.lane.b32.xlu0 %v1932_v14, %s5498_s25  ;;  %v637_v50 = vld [vmem:[%s10300_s0 + $0x5a0] sm:$0xff] }
 0x39d   :  { %2239 = vrot.lane.b32.xlu1 %v2134_v24, %s5499_s20  ;;  %v8126_v14 = vld [vmem:[%s10303_s3] sm:$0xff] }
 0x39e   :  { %v1997_v60 = vpop.permute.xlu1 %1996  ;;  %v2009_v42 = vpop.permute.xlu2 %2008 }
 0x39f   :  { %2002 = vst.msk [vmem:[#allocation2 + $0x48] sm:$0xff] %vm1727_vm3, %v1997_v60 }
 0x3a0   :  { %v8053_v45 = vpop.f32.mrf.mxu0  ;;  %2012 = vst.msk [vmem:[#allocation2 + $0x48] sm:$0xff] %vm1738_vm4, %v2007_v52  ;;  %5222 = vmatmul.msk.f32.gmra.mxu3 %vm1495_vm0, %v8074_v56 }
 0x3a1   :  { %v8055_v49 = vpop.f32.mrf.mxu1  ;;  %5209 = vmatmul.msk.f32.gmra.mxu2 %vm1495_vm0, %v8067_v32 }
 0x3a3   :  { %981 = vmatmul.f32.gmra.mxu0 %v633_v1  ;;  %v1935_v36 = vpop.f32.mrf.mxu3 }
 0x3a4   :  { %1310 = vmatmul.f32.gmra.mxu1 %v634_v34  ;;  %v2137_v20 = vpop.f32.mrf.mxu2  ;;  %2052 = vrot.lane.b32.xlu0 %v1935_v36, %s5498_s25  ;;  %v640_v36 = vld [vmem:[%s10300_s0 + $0x5b8] sm:$0xff] }
 0x3a5   :  { %2247 = vrot.lane.b32.xlu2 %v2137_v20, %s5497_s17  ;;  %v639_v20 = vld [vmem:[%s10300_s0 + $0x5b0] sm:$0xff] }
 0x3a6   :  { %v1999_v7 = vpop.permute.xlu1 %1998 }
 0x3a7   :  { %2003 = vst.msk [vmem:[#allocation2 + $0x68] sm:$0xff] %vm1727_vm3, %v1999_v7  ;;  %v8147_v7 = vld [vmem:[%s10303_s3 + $0x8] sm:$0xff] }
 0x3a8   :  { %v8081_v35 = vpop.f32.mrf.mxu0  ;;  %2013 = vst.msk [vmem:[#allocation2 + $0x68] sm:$0xff] %vm1738_vm4, %v2009_v42  ;;  %5223 = vmatmul.msk.f32.gmra.mxu3 %vm1495_vm0, %v8102_v46  ;;  %v3603_v42 = vld [vmem:[%s10304_s4 + $0x78] sm:$0xff] }
 0x3a9   :  { %v8083_v26 = vpop.f32.mrf.mxu1  ;;  %5210 = vmatmul.msk.f32.gmra.mxu2 %vm1495_vm0, %v8095_v57  ;;  %3656 = vmatpush.msrb.mxu0 %v3603_v42 }
 0x3ab   :  { %984 = vmatmul.f32.gmra.mxu0 %v635_v41  ;;  %v1938_v62 = vpop.f32.mrf.mxu3 }
 0x3ac   :  { %1313 = vmatmul.f32.gmra.mxu1 %v636_v13  ;;  %v2140_v4 = vpop.f32.mrf.mxu2  ;;  %2060 = vrot.lane.b32.xlu1 %v1938_v62, %s5499_s20 }
 0x3ad   :  { %2249 = vrot.lane.b32.xlu2 %v2140_v4, %s5497_s17 }
 0x3b0   :  { %v940_v54 = vpop.f32.mrf.mxu0  ;;  %5224 = vmatmul.msk.f32.gmra.mxu3 %vm1495_vm0, %v8119_v40 }
 0x3b1   :  { %v8108_v37 = vpop.f32.mrf.mxu1  ;;  %5243 = vmatmul.msk.f32.vlgmr.msra.gmra.mxu2 %vm1495_vm0, %v8126_v14 }
 0x3b3   :  { %987 = vmatmul.f32.gmra.mxu0 %v637_v50  ;;  %v1941_v24 = vpop.f32.mrf.mxu3  ;;  %v641_v50 = vld [vmem:[%s10300_s0 + $0x5c0] sm:$0xff] }
 0x3b4   :  { %1316 = vmatmul.f32.gmra.mxu1 %v638_v51  ;;  %v2143_v52 = vpop.f32.mrf.mxu2  ;;  %2062 = vrot.lane.b32.xlu1 %v1941_v24, %s5499_s20  ;;  %v642_v51 = vld [vmem:[%s10300_s0 + $0x5c8] sm:$0xff] }
 0x3b5   :  { %2255 = vst.msk [vmem:[#allocation2 + $0x90] sm:$0xff] %vm1705_vm1, %v2143_v52 }
 0x3b7   :  { %v2196_v60 = vpop.permute.xlu0 %2195 }
 0x3b8   :  { %v943_v34 = vpop.f32.mrf.mxu0  ;;  %2201 = vst.msk [vmem:[#allocation2 + $0x80] sm:$0xff] %vm1716_vm2, %v2196_v60  ;;  %5225 = vmatmul.msk.f32.gmra.mxu3 %vm1495_vm0, %v7662_v43  ;;  %v8169_v60 = vld [vmem:[%s10302_s2] ss:$0 sm:$0xff] }
 0x3b9   :  { %v1272_v1 = vpop.f32.mrf.mxu1  ;;  %5244 = vmatmul.msk.f32.gmra.mxu2 %vm1495_vm0, %v8147_v7  ;;  %v944_v42 = vadd.f32 %v8169_v60, %v943_v34  ;;  %v941_v34 = vadd.f32 %v8169_v60, %v940_v54 }
 0x3bb   :  { %990 = vmatmul.f32.gmra.mxu0 %v639_v20  ;;  %v1944_v13 = vpop.f32.mrf.mxu3 }
 0x3bc   :  { %1319 = vmatmul.f32.gmra.mxu1 %v640_v36  ;;  %v2146_v41 = vpop.f32.mrf.mxu2  ;;  %2070 = vrot.lane.b32.xlu2 %v1944_v13, %s5497_s17 }
 0x3bd   :  { %2256 = vst.msk [vmem:[#allocation2 + $0xb0] sm:$0xff] %vm1705_vm1, %v2146_v41  ;;  %v644_v41 = vld [vmem:[%s10300_s0 + $0x5d8] sm:$0xff] }
 0x3bf   :  { %v2198_v62 = vpop.permute.xlu0 %2197  ;;  %v2216_v20 = vpop.permute.xlu2 %2215 }
 0x3c0   :  { %v946_v4 = vpop.f32.mrf.mxu0  ;;  %2202 = vst.msk [vmem:[#allocation2 + $0xa0] sm:$0xff] %vm1716_vm2, %v2198_v62  ;;  %5226 = vmatmul.msk.f32.gmra.mxu3 %vm1495_vm0, %v7682_v47  ;;  %v643_v62 = vld [vmem:[%s10300_s0 + $0x5d0] sm:$0xff] }
 0x3c1   :  { %v1275_v43 = vpop.f32.mrf.mxu1  ;;  %5245 = vmatmul.msk.f32.gmra.mxu2 %vm1495_vm0, %v7800_v59  ;;  %v947_v36 = vadd.f32 %v8169_v60, %v946_v4 }
 0x3c3   :  { %993 = vmatmul.f32.gmra.mxu0 %v641_v50  ;;  %v1947_v24 = vpop.f32.mrf.mxu3  ;;  %v1276_v4 = vadd.f32 %v1275_v43, %v947_v36 }
 0x3c4   :  { %1322 = vmatmul.f32.gmra.mxu1 %v642_v51  ;;  %v2149_v52 = vpop.f32.mrf.mxu2  ;;  %2072 = vrot.lane.b32.xlu2 %v1947_v24, %s5497_s17  ;;  %v938_v24 = vadd.f32 %v8169_v60, %v8081_v35  ;;  %v932_v35 = vadd.f32 %v8169_v60, %v8026_v17 }
 0x3c5   :  { %2259 = vrot.lane.b32.xlu0 %v2149_v52, %s5498_s25  ;;  %v1273_v52 = vadd.f32 %v1272_v1, %v944_v42  ;;  %v1435_v54 = vmax.f32 %v1276_v4, 0.0 }
 0x3c6   :  { %v1267_v1 = vadd.f32 %v8083_v26, %v938_v24 }
 0x3c7   :  { %v2206_v47 = vpop.permute.xlu1 %2205 }
 0x3c8   :  { %v949_v59 = vpop.f32.mrf.mxu0  ;;  %2211 = vst.msk [vmem:[#allocation2 + $0x80] sm:$0xff] %vm1727_vm3, %v2206_v47  ;;  %5227 = vmatmul.msk.f32.gmra.mxu3 %vm1495_vm0, %v7705_v18  ;;  %v935_v18 = vadd.f32 %v8169_v60, %v8053_v45  ;;  %v646_v45 = vld [vmem:[%s10300_s0 + $0x5e8] sm:$0xff] }
 0x3c9   :  { %v1278_v13 = vpop.f32.mrf.mxu1  ;;  %v950_v51 = vadd.f32 %v8169_v60, %v949_v59  ;;  %5246 = vmatmul.msk.f32.gmra.mxu2 %vm1495_vm0, %v7827_v6  ;;  %2221 = vst.msk [vmem:[#allocation2 + $0x80] sm:$0xff] %vm1738_vm4, %v2216_v20  ;;  %v1270_v6 = vadd.f32 %v8108_v37, %v941_v34  ;;  %v1434_v20 = vmax.f32 %v1273_v52, 0.0  ;;  %v2218_v37 = vpop.permute.xlu2 %2217 }
 0x3ca   :  { %v1264_v17 = vadd.f32 %v8055_v49, %v935_v18  ;;  %v1429_v18 = vmax.f32 %v8021_v5, 0.0 }
 0x3cb   :  { %v1279_v50 = vadd.f32 %v1278_v13, %v950_v51  ;;  %996 = vmatmul.f32.gmra.mxu0 %v643_v62  ;;  %v2336_v59 = vpop.f32.mrf.mxu3  ;;  %v1433_v26 = vmax.f32 %v1270_v6, 0.0  ;;  %v1261_v62 = vadd.f32 %v8028_v23, %v932_v35  ;;  %v1432_v51 = vmax.f32 %v1267_v1, 0.0  ;;  %v648_v23 = vld [vmem:[%s10300_s0 + $0x5f8] sm:$0xff] }
 0x3cc   :  { %1325 = vmatmul.f32.gmra.mxu1 %v644_v41  ;;  %v2152_v47 = vpop.f32.mrf.mxu2  ;;  %2432 = vst.msk [vmem:[#allocation2 + $0xc0] sm:$0xff] %vm1705_vm1, %v2336_v59  ;;  %v926_v41 = vadd.f32 %v8169_v60, %v7969_v25  ;;  %v1431_v49 = vmax.f32 %v1264_v17, 0.0  ;;  %v917_v6 = vadd.f32 %v8169_v60, %v7878_v22 }
 0x3cd   :  { %v1436_v0 = vmax.f32 %v1279_v50, 0.0  ;;  %2261 = vrot.lane.b32.xlu0 %v2152_v47, %s5498_s25  ;;  %v1430_v24 = vmax.f32 %v1261_v62, 0.0  ;;  %v920_v47 = vadd.f32 %v8169_v60, %v7914_v8 }
 0x3ce   :  { %v2019_v43 = vpop.permute.xlu0 %2018  ;;  %v1255_v50 = vadd.f32 %v7971_v11, %v926_v41  ;;  %v8237_v11 = vld [vmem:[%s10303_s3 + $0x90] sm:$0xff]  ;;  %v1246_v1 = vadd.f32 %v7880_v28, %v917_v6  ;;  %v8270_v28 = vld [vmem:[%s10303_s3 + $0x98] sm:$0xff] }
 0x3cf   :  { %2804 = vmatpush.msra.mxu3 %v1436_v0  ;;  %v2208_v36 = vpop.permute.xlu1 %2207  ;;  %2024 = vst.msk [vmem:[#allocation2 + $0x50] sm:$0xff] %vm1716_vm2, %v2019_v43  ;;  %v645_v0 = vld [vmem:[%s10300_s0 + $0x5e0] sm:$0xff]  ;;  %v1249_v8 = vadd.f32 %v7916_v3, %v920_v47 }
 0x3d0   :  { %v8203_v13 = vpop.f32.mrf.mxu0  ;;  %5228 = vmatmul.msk.f32.gmra.mxu3 %vm1495_vm0, %v7727_v16  ;;  %2212 = vst.msk [vmem:[#allocation2 + $0xa0] sm:$0xff] %vm1727_vm3, %v2208_v36 }
 0x3d1   :  { %v8198_v42 = vpop.f32.mrf.mxu1  ;;  %5247 = vmatmul.msk.f32.gmra.mxu2 %vm1495_vm0, %v7865_v63  ;;  %2805 = vmatpush.msra.mxu3 %v1435_v54  ;;  %2222 = vst.msk [vmem:[#allocation2 + $0xa0] sm:$0xff] %vm1738_vm4, %v2218_v37  ;;  %v923_v63 = vadd.f32 %v8169_v60, %v7942_v33  ;;  %v647_v33 = vld [vmem:[%s10300_s0 + $0x5f0] sm:$0xff]  ;;  %v1428_v54 = vmax.f32 %v1255_v50, 0.0  ;;  %v1425_v37 = vmax.f32 %v1246_v1, 0.0 }
 0x3d2   :  { %v3602_v50 = vld [vmem:[%s10304_s4 + $0x70] sm:$0xff] }
 0x3d3   :  { %999 = vmatmul.f32.gmra.mxu0 %v645_v0  ;;  %v2339_v34 = vpop.f32.mrf.mxu3  ;;  %2806 = vmatpush.msra.mxu3 %v1434_v20  ;;  %v1252_v59 = vadd.f32 %v7944_v39, %v923_v63  ;;  %v650_v20 = vld [vmem:[%s10300_s0 + $0x608] sm:$0xff]  ;;  %v1426_v0 = vmax.f32 %v1249_v8, 0.0  ;;  %v8294_v63 = vld [vmem:[%s10303_s3 + $0xa0] sm:$0xff] }
 0x3d4   :  { %1328 = vmatmul.f32.gmra.mxu1 %v646_v45  ;;  %v2155_v16 = vpop.f32.mrf.mxu2  ;;  %2433 = vst.msk [vmem:[#allocation2 + $0xe0] sm:$0xff] %vm1705_vm1, %v2339_v34  ;;  %v651_v34 = vld [vmem:[%s10300_s0 + $0x610] sm:$0xff]  ;;  %3657 = vmatpush.msrb.mxu0 %v3602_v50  ;;  %v658_v8 = vld [vmem:[%s10300_s0 + $0x648] sm:$0xff]  ;;  %v664_v50 = vld [vmem:[%s10300_s0 + $0x678] sm:$0xff] }
 0x3d5   :  { %2269 = vrot.lane.b32.xlu1 %v2155_v16, %s5499_s20  ;;  %2807 = vmatpush.msra.mxu3 %v1433_v26  ;;  %v1427_v39 = vmax.f32 %v1252_v59, 0.0 }
 0x3d6   :  { %v2021_v4 = vpop.permute.xlu0 %2020 }
 0x3d7   :  { %2025 = vst.msk [vmem:[#allocation2 + $0x70] sm:$0xff] %vm1716_vm2, %v2021_v4  ;;  %2808 = vmatpush.msra.mxu3 %v1432_v51  ;;  %v2039_v35 = vpop.permute.xlu2 %2038 }
 0x3d8   :  { %v8229_v52 = vpop.f32.mrf.mxu0  ;;  %5229 = vmatmul.msk.f32.gmra.mxu3 %vm1495_vm0, %v8237_v11 }
 0x3d9   :  { %v8224_v25 = vpop.f32.mrf.mxu1  ;;  %5248 = vmatmul.msk.f32.gmra.mxu2 %vm1495_vm0, %v7898_v27  ;;  %2809 = vmatpush.msra.mxu3 %v1431_v49  ;;  %v914_v27 = vadd.f32 %v8169_v60, %v7844_v30  ;;  %v649_v30 = vld [vmem:[%s10300_s0 + $0x600] sm:$0xff] }
 0x3db   :  { %1002 = vmatmul.f32.gmra.mxu0 %v647_v33  ;;  %v2342_v36 = vpop.f32.mrf.mxu3  ;;  %2810 = vmatpush.msra.mxu3 %v1430_v24  ;;  %v1243_v3 = vadd.f32 %v7846_v48, %v914_v27  ;;  %v653_v33 = vld [vmem:[%s10300_s0 + $0x620] sm:$0xff] }
 0x3dc   :  { %1331 = vmatmul.f32.gmra.mxu1 %v648_v23  ;;  %v2158_v43 = vpop.f32.mrf.mxu2  ;;  %2436 = vrot.lane.b32.xlu0 %v2342_v36, %s5498_s25  ;;  %v654_v23 = vld [vmem:[%s10300_s0 + $0x628] sm:$0xff] }
 0x3dd   :  { %2271 = vrot.lane.b32.xlu1 %v2158_v43, %s5499_s20  ;;  %2811 = vmatpush.msra.mxu3 %v1429_v18  ;;  %v1424_v41 = vmax.f32 %v1243_v3, 0.0  ;;  %v660_v3 = vld [vmem:[%s10300_s0 + $0x658] sm:$0xff] }
 0x3df   :  { %v2029_v5 = vpop.permute.xlu1 %2028  ;;  %2812 = vmatpush.msra.mxu3 %v1428_v54  ;;  %v2041_v62 = vpop.permute.xlu2 %2040  ;;  %v656_v54 = vld [vmem:[%s10300_s0 + $0x638] sm:$0xff] }
 0x3e0   :  { %2034 = vst.msk [vmem:[#allocation2 + $0x50] sm:$0xff] %vm1727_vm3, %v2029_v5  ;;  %v8261_v45 = vpop.f32.mrf.mxu0  ;;  %5230 = vmatmul.msk.f32.gmra.mxu3 %vm1495_vm0, %v8270_v28 }
 0x3e1   :  { %v8256_v22 = vpop.f32.mrf.mxu1  ;;  %2044 = vst.msk [vmem:[#allocation2 + $0x50] sm:$0xff] %vm1738_vm4, %v2039_v35  ;;  %5249 = vmatmul.msk.f32.gmra.mxu2 %vm1495_vm0, %v7935_v21  ;;  %2813 = vmatpush.msra.mxu3 %v1427_v39  ;;  %v652_v21 = vld [vmem:[%s10300_s0 + $0x618] sm:$0xff] }
 0x3e3   :  { %1005 = vmatmul.f32.gmra.mxu0 %v649_v30  ;;  %v2345_v26 = vpop.f32.mrf.mxu3  ;;  %2814 = vmatpush.msra.mxu3 %v1426_v0 }
 0x3e4   :  { %1334 = vmatmul.f32.gmra.mxu1 %v650_v20  ;;  %v2161_v17 = vpop.f32.mrf.mxu2  ;;  %2438 = vrot.lane.b32.xlu0 %v2345_v26, %s5498_s25 }
 0x3e5   :  { %2279 = vrot.lane.b32.xlu2 %v2161_v17, %s5497_s17  ;;  %2815 = vmatpush.msra.mxu3 %v1425_v37 }
 0x3e7   :  { %v2031_v51 = vpop.permute.xlu1 %2030  ;;  %2816 = vmatpush.msra.mxu3 %v1424_v41 }
 0x3e8   :  { %2035 = vst.msk [vmem:[#allocation2 + $0x70] sm:$0xff] %vm1727_vm3, %v2031_v51  ;;  %v8285_v16 = vpop.f32.mrf.mxu0  ;;  %5231 = vmatmul.msk.f32.gmra.mxu3 %vm1495_vm0, %v8294_v63 }
 0x3e9   :  { %v8280_v48 = vpop.f32.mrf.mxu1  ;;  %2045 = vst.msk [vmem:[#allocation2 + $0x70] sm:$0xff] %vm1738_vm4, %v2041_v62  ;;  %5250 = vmatmul.msk.f32.gmra.mxu2 %vm1495_vm0, %v7963_v58  ;;  %v661_v62 = vld [vmem:[%s10300_s0 + $0x660] sm:$0xff] }
 0x3eb   :  { %1008 = vmatmul.f32.gmra.mxu0 %v651_v34  ;;  %v2348_v4 = vpop.f32.mrf.mxu3 }
 0x3ec   :  { %1337 = vmatmul.f32.gmra.mxu1 %v652_v21  ;;  %v2164_v49 = vpop.f32.mrf.mxu2  ;;  %2446 = vrot.lane.b32.xlu1 %v2348_v4, %s5499_s20 }
 0x3ed   :  { %2281 = vrot.lane.b32.xlu2 %v2164_v49, %s5497_s17  ;;  %v3619_v49 = vld [vmem:[%s10304_s4 + $0xf8] sm:$0xff] }
 0x3ee   :  { %3721 = vmatpush.msra.mxu1 %v3619_v49  ;;  %v3606_v49 = vld [vmem:[%s10304_s4 + $0x90] sm:$0xff] }
 0x3f0   :  { %v8310_v58 = vpop.f32.mrf.mxu0  ;;  %5232 = vmatmul.msk.f32.gmra.mxu3 %vm1495_vm0, %v7793_v12 }
 0x3f1   :  { %v8305_v24 = vpop.f32.mrf.mxu1  ;;  %5251 = vmatmul.msk.f32.gmra.mxu2 %vm1495_vm0, %v7990_v19  ;;  %v655_v19 = vld [vmem:[%s10300_s0 + $0x630] sm:$0xff] }
 0x3f3   :  { %1011 = vmatmul.f32.gmra.mxu0 %v653_v33  ;;  %v2351_v59 = vpop.f32.mrf.mxu3  ;;  %v663_v33 = vld [vmem:[%s10300_s0 + $0x670] sm:$0xff] }
 0x3f4   :  { %1340 = vmatmul.f32.gmra.mxu1 %v654_v23  ;;  %v2167_v47 = vpop.f32.mrf.mxu2  ;;  %2448 = vrot.lane.b32.xlu1 %v2351_v59, %s5499_s20  ;;  %v3616_v59 = vld [vmem:[%s10304_s4 + $0xe0] sm:$0xff] }
 0x3f5   :  { %2287 = vst.msk [vmem:[#allocation2 + $0x98] sm:$0xff] %vm1705_vm1, %v2167_v47  ;;  %v3617_v47 = vld [vmem:[%s10304_s4 + $0xe8] sm:$0xff] }
 0x3f7   :  { %v2228_v18 = vpop.permute.xlu0 %2227 }
 0x3f8   :  { %2233 = vst.msk [vmem:[#allocation2 + $0x88] sm:$0xff] %vm1716_vm2, %v2228_v18  ;;  %v8327_v12 = vpop.f32.mrf.mxu0  ;;  %5233 = vmatmul.msk.f32.gmra.mxu3 %vm1495_vm0, %v7820_v10 }
 0x3f9   :  { %v8321_v6 = vpop.f32.mrf.mxu1  ;;  %5252 = vmatmul.msk.f32.gmra.mxu2 %vm1495_vm0, %v8015_v29  ;;  %v657_v29 = vld [vmem:[%s10300_s0 + $0x640] sm:$0xff] }
 0x3fb   :  { %1014 = vmatmul.f32.gmra.mxu0 %v655_v19  ;;  %v2354_v36 = vpop.f32.mrf.mxu3  ;;  %v3615_v19 = vld [vmem:[%s10304_s4 + $0xd8] sm:$0xff] }
 0x3fc   :  { %1343 = vmatmul.f32.gmra.mxu1 %v656_v54  ;;  %v2170_v43 = vpop.f32.mrf.mxu2  ;;  %2456 = vrot.lane.b32.xlu2 %v2354_v36, %s5497_s17 }
 0x3fd   :  { %2288 = vst.msk [vmem:[#allocation2 + $0xb8] sm:$0xff] %vm1705_vm1, %v2170_v43 }
 0x3ff   :  { %v2230_v35 = vpop.permute.xlu0 %2229  ;;  %v2248_v1 = vpop.permute.xlu2 %2247 }
 0x400   :  { %2234 = vst.msk [vmem:[#allocation2 + $0xa8] sm:$0xff] %vm1716_vm2, %v2230_v35  ;;  %v8344_v10 = vpop.f32.mrf.mxu0  ;;  %5234 = vmatmul.msk.f32.gmra.mxu3 %vm1495_vm0, %v7858_v15 }
 0x401   :  { %v8338_v27 = vpop.f32.mrf.mxu1  ;;  %5253 = vmatmul.msk.f32.gmra.mxu2 %vm1495_vm0, %v8046_v31  ;;  %v659_v31 = vld [vmem:[%s10300_s0 + $0x650] sm:$0xff] }
 0x403   :  { %1017 = vmatmul.f32.gmra.mxu0 %v657_v29  ;;  %v2357_v5 = vpop.f32.mrf.mxu3  ;;  %v3613_v29 = vld [vmem:[%s10304_s4 + $0xc8] sm:$0xff] }
 0x404   :  { %1346 = vmatmul.f32.gmra.mxu1 %v658_v8  ;;  %v2173_v39 = vpop.f32.mrf.mxu2  ;;  %2458 = vrot.lane.b32.xlu2 %v2357_v5, %s5497_s17  ;;  %v3612_v5 = vld [vmem:[%s10304_s4 + $0xc0] sm:$0xff] }
 0x405   :  { %2291 = vrot.lane.b32.xlu0 %v2173_v39, %s5498_s25  ;;  %v8440_v39 = vld [vmem:[%s10303_s3 + $0x70] sm:$0xff] }
 0x407   :  { %v2238_v20 = vpop.permute.xlu1 %2237  ;;  %v2250_v51 = vpop.permute.xlu2 %2249 }
 0x408   :  { %2243 = vst.msk [vmem:[#allocation2 + $0x88] sm:$0xff] %vm1727_vm3, %v2238_v20  ;;  %v8361_v15 = vpop.f32.mrf.mxu0  ;;  %5235 = vmatmul.msk.f32.gmra.mxu3 %vm1495_vm0, %v7891_v44  ;;  %v662_v44 = vld [vmem:[%s10300_s0 + $0x668] sm:$0xff] }
 0x409   :  { %v8355_v30 = vpop.f32.mrf.mxu1  ;;  %5254 = vmatmul.msk.f32.gmra.mxu2 %vm1495_vm0, %v8074_v56  ;;  %2253 = vst.msk [vmem:[#allocation2 + $0x88] sm:$0xff] %vm1738_vm4, %v2248_v1 }
 0x40b   :  { %1020 = vmatmul.f32.gmra.mxu0 %v659_v31  ;;  %v2360_v37 = vpop.f32.mrf.mxu3 }
 0x40c   :  { %1349 = vmatmul.f32.gmra.mxu1 %v660_v3  ;;  %v2176_v0 = vpop.f32.mrf.mxu2  ;;  %2464 = vst.msk [vmem:[#allocation2 + $0xc8] sm:$0xff] %vm1705_vm1, %v2360_v37  ;;  %v3610_v3 = vld [vmem:[%s10304_s4 + $0xb0] sm:$0xff] }
 0x40d   :  { %2293 = vrot.lane.b32.xlu0 %v2176_v0, %s5498_s25 }
 0x40e   :  { %v2051_v17 = vpop.permute.xlu0 %2050 }
 0x40f   :  { %v2240_v26 = vpop.permute.xlu1 %2239  ;;  %2056 = vst.msk [vmem:[#allocation2 + $0x58] sm:$0xff] %vm1716_vm2, %v2051_v17 }
 0x410   :  { %v8379_v56 = vpop.f32.mrf.mxu0  ;;  %5236 = vmatmul.msk.f32.gmra.mxu3 %vm1495_vm0, %v7928_v55  ;;  %2244 = vst.msk [vmem:[#allocation2 + $0xa8] sm:$0xff] %vm1727_vm3, %v2240_v26  ;;  %v3618_v55 = vld [vmem:[%s10304_s4 + $0xf0] sm:$0xff]  ;;  %v3609_v26 = vld [vmem:[%s10304_s4 + $0xa8] sm:$0xff] }
 0x411   :  { %v8374_v41 = vpop.f32.mrf.mxu1  ;;  %5255 = vmatmul.msk.f32.gmra.mxu2 %vm1495_vm0, %v8102_v46  ;;  %2254 = vst.msk [vmem:[#allocation2 + $0xa8] sm:$0xff] %vm1738_vm4, %v2250_v51  ;;  %3722 = vmatpush.msra.mxu1 %v3618_v55 }
 0x413   :  { %1023 = vmatmul.f32.gmra.mxu0 %v661_v62  ;;  %v2363_v34 = vpop.f32.mrf.mxu3  ;;  %3723 = vmatpush.msra.mxu1 %v3617_v47  ;;  %v3608_v62 = vld [vmem:[%s10304_s4 + $0xa0] sm:$0xff] }
 0x414   :  { %1352 = vmatmul.f32.gmra.mxu1 %v662_v44  ;;  %v2179_v21 = vpop.f32.mrf.mxu2  ;;  %2465 = vst.msk [vmem:[#allocation2 + $0xe8] sm:$0xff] %vm1705_vm1, %v2363_v34  ;;  %v8467_v44 = vld [vmem:[%s10303_s3 + $0x78] sm:$0xff] }
 0x415   :  { %2301 = vrot.lane.b32.xlu1 %v2179_v21, %s5499_s20  ;;  %3724 = vmatpush.msra.mxu1 %v3616_v59 }
 0x416   :  { %v2053_v46 = vpop.permute.xlu0 %2052  ;;  %v2071_v43 = vpop.permute.xlu2 %2070 }
 0x417   :  { %2057 = vst.msk [vmem:[#allocation2 + $0x78] sm:$0xff] %vm1716_vm2, %v2053_v46  ;;  %3725 = vmatpush.msra.mxu1 %v3615_v19  ;;  %v8500_v19 = vld [vmem:[%s10303_s3 + $0x80] sm:$0xff] }
 0x418   :  { %v8404_v23 = vpop.f32.mrf.mxu0  ;;  %5237 = vmatmul.msk.f32.gmra.mxu3 %vm1495_vm0, %v7956_v38  ;;  %v3614_v38 = vld [vmem:[%s10304_s4 + $0xd0] sm:$0xff] }
 0x419   :  { %v8399_v4 = vpop.f32.mrf.mxu1  ;;  %5256 = vmatmul.msk.f32.gmra.mxu2 %vm1495_vm0, %v8119_v40  ;;  %v3601_v40 = vld [vmem:[%s10304_s4 + $0x68] sm:$0xff]  ;;  %3726 = vmatpush.msra.mxu1 %v3614_v38  ;;  %v980_v47 = vadd.f32 %v8169_v60, %v8404_v23  ;;  %v977_v23 = vadd.f32 %v8169_v60, %v8379_v56 }
 0x41a   :  { %3658 = vmatpush.msrb.mxu0 %v3601_v40 }
 0x41b   :  { %1026 = vmatmul.f32.gmra.mxu0 %v663_v33  ;;  %v2366_v54 = vpop.f32.mrf.mxu3  ;;  %3727 = vmatpush.msra.mxu1 %v3613_v29  ;;  %v3605_v33 = vld [vmem:[%s10304_s4 + $0x88] sm:$0xff]  ;;  %v1309_v29 = vadd.f32 %v8399_v4, %v980_v47  ;;  %v968_v4 = vadd.f32 %v8169_v60, %v8327_v12 }
 0x41c   :  { %1355 = vmatmul.f32.gmra.mxu1 %v664_v50  ;;  %v2182_v18 = vpop.f32.mrf.mxu2  ;;  %2468 = vrot.lane.b32.xlu0 %v2366_v54, %s5498_s25  ;;  %v3604_v54 = vld [vmem:[%s10304_s4 + $0x80] sm:$0xff] }
 0x41d   :  { %2303 = vrot.lane.b32.xlu1 %v2182_v18, %s5499_s20  ;;  %3728 = vmatpush.msra.mxu1 %v3612_v5  ;;  %v971_v5 = vadd.f32 %v8169_v60, %v8344_v10  ;;  %v1446_v10 = vmax.f32 %v1309_v29, 0.0 }
 0x41e   :  { %v2061_v36 = vpop.permute.xlu1 %2060  ;;  %v2073_v31 = vpop.permute.xlu2 %2072 }
 0x41f   :  { %2066 = vst.msk [vmem:[#allocation2 + $0x58] sm:$0xff] %vm1727_vm3, %v2061_v36  ;;  %v1300_v12 = vadd.f32 %v8338_v27, %v971_v5  ;;  %v959_v27 = vadd.f32 %v8169_v60, %v8261_v45 }
 0x420   :  { %v982_v8 = vpop.f32.mrf.mxu0  ;;  %2076 = vst.msk [vmem:[#allocation2 + $0x58] sm:$0xff] %vm1738_vm4, %v2071_v43  ;;  %5238 = vmatmul.msk.f32.gmra.mxu3 %vm1495_vm0, %v7983_v53  ;;  %v3611_v53 = vld [vmem:[%s10304_s4 + $0xb8] sm:$0xff]  ;;  %v8509_v43 = vld [vmem:[%s10303_s3 + $0x10] sm:$0xff] }
 0x421   :  { %v1311_v35 = vpop.f32.mrf.mxu1  ;;  %5257 = vmatmul.msk.f32.gmra.mxu2 %vm1495_vm0, %v8440_v39  ;;  %3729 = vmatpush.msra.mxu1 %v3611_v53  ;;  %v983_v55 = vadd.f32 %v8169_v60, %v982_v8  ;;  %v974_v8 = vadd.f32 %v8169_v60, %v8361_v15 }
 0x423   :  { %v2369_v20 = vpop.f32.mrf.mxu3  ;;  %3730 = vmatpush.msra.mxu1 %v3610_v3 }
 0x424   :  { %5115 = vmatmul.msk.f32.vlgmr.msrb.gmra.mxu1 %vm1495_vm0, %v8126_v14  ;;  %v2185_v1 = vpop.f32.mrf.mxu2  ;;  %2470 = vrot.lane.b32.xlu0 %v2369_v20, %s5498_s25 }
 0x425   :  { %2311 = vrot.lane.b32.xlu2 %v2185_v1, %s5497_s17  ;;  %3731 = vmatpush.msra.mxu1 %v3609_v26  ;;  %v1306_v1 = vadd.f32 %v8374_v41, %v977_v23  ;;  %v8534_v41 = vld [vmem:[%s10303_s3 + $0x88] sm:$0xff]  ;;  %v962_v26 = vadd.f32 %v8169_v60, %v8285_v16 }
 0x426   :  { %v2063_v0 = vpop.permute.xlu1 %2062 }
 0x427   :  { %2067 = vst.msk [vmem:[#allocation2 + $0x78] sm:$0xff] %vm1727_vm3, %v2063_v0  ;;  %3732 = vmatpush.msra.mxu1 %v3608_v62  ;;  %v965_v0 = vadd.f32 %v8169_v60, %v8310_v58  ;;  %v1297_v62 = vadd.f32 %v8321_v6, %v968_v4  ;;  %v956_v6 = vadd.f32 %v8169_v60, %v8229_v52 }
 0x428   :  { %v985_v17 = vpop.f32.mrf.mxu0  ;;  %2077 = vst.msk [vmem:[#allocation2 + $0x78] sm:$0xff] %vm1738_vm4, %v2073_v31  ;;  %5239 = vmatmul.msk.f32.gmra.mxu3 %vm1495_vm0, %v8008_v2  ;;  %v3607_v2 = vld [vmem:[%s10304_s4 + $0x98] sm:$0xff]  ;;  %v1303_v31 = vadd.f32 %v8355_v30, %v974_v8  ;;  %v3525_v8 = vld [vmem:[#allocation2 + $0x8] sm:$0xff] }
 0x429   :  { %v1314_v37 = vpop.f32.mrf.mxu1  ;;  %5258 = vmatmul.msk.f32.gmra.mxu2 %vm1495_vm0, %v8467_v44  ;;  %v986_v34 = vadd.f32 %v8169_v60, %v985_v17  ;;  %3733 = vmatpush.msra.mxu1 %v3607_v2  ;;  %v8544_v30 = vld [vmem:[%s10303_s3 + $0x18] sm:$0xff]  ;;  %v1443_v2 = vmax.f32 %v1300_v12, 0.0  ;;  %v1442_v45 = vmax.f32 %v1297_v62, 0.0 }
 0x42a   :  { %v1444_v58 = vmax.f32 %v1303_v31, 0.0 }
 0x42b   :  { %v2372_v21 = vpop.f32.mrf.mxu3  ;;  %3734 = vmatpush.msra.mxu1 %v3606_v49  ;;  %v1315_v59 = vadd.f32 %v1314_v37, %v986_v34  ;;  %v1291_v49 = vadd.f32 %v8280_v48, %v962_v26 }
 0x42c   :  { %5116 = vmatmul.msk.f32.gmra.mxu1 %vm1495_vm0, %v8147_v7  ;;  %v2188_v51 = vpop.f32.mrf.mxu2  ;;  %2478 = vrot.lane.b32.xlu1 %v2372_v21, %s5499_s20 }
 0x42d   :  { %2313 = vrot.lane.b32.xlu2 %v2188_v51, %s5497_s17  ;;  %3735 = vmatpush.msra.mxu1 %v3605_v33  ;;  %v1294_v51 = vadd.f32 %v8305_v24, %v965_v0  ;;  %v953_v24 = vadd.f32 %v8169_v60, %v8203_v13  ;;  %v1440_v13 = vmax.f32 %v1291_v49, 0.0 }
 0x42f   :  { %3736 = vmatpush.msra.mxu1 %v3604_v54 }
 0x430   :  { %v988_v50 = vpop.f32.mrf.mxu0  ;;  %5240 = vmatmul.msk.f32.gmra.mxu3 %vm1495_vm0, %v8039_v9  ;;  %v1312_v9 = vadd.f32 %v1311_v35, %v983_v55  ;;  %v1448_v35 = vmax.f32 %v1315_v59, 0.0  ;;  %v1288_v55 = vadd.f32 %v8256_v22, %v959_v27 }
 0x431   :  { %v1317_v46 = vpop.f32.mrf.mxu1  ;;  %v989_v18 = vadd.f32 %v8169_v60, %v988_v50  ;;  %5259 = vmatmul.msk.f32.gmra.mxu2 %vm1495_vm0, %v8500_v19  ;;  %v1285_v50 = vadd.f32 %v8224_v25, %v956_v6 }
 0x432   :  { %v1447_v53 = vmax.f32 %v1312_v9, 0.0  ;;  %v1439_v47 = vmax.f32 %v1288_v55, 0.0 }
 0x433   :  { %v1318_v38 = vadd.f32 %v1317_v46, %v989_v18  ;;  %v2375_v40 = vpop.f32.mrf.mxu3  ;;  %v8574_v46 = vld [vmem:[%s10303_s3 + $0x20] sm:$0xff]  ;;  %v1438_v25 = vmax.f32 %v1285_v50, 0.0 }
 0x434   :  { %5117 = vmatmul.msk.f32.gmra.mxu1 %vm1495_vm0, %v8509_v43  ;;  %v2577_v36 = vpop.f32.mrf.mxu2  ;;  %2480 = vrot.lane.b32.xlu1 %v2375_v40, %s5499_s20 }
 0x435   :  { %2673 = vst.msk [vmem:[#allocation2 + $0x100] sm:$0xff] %vm1705_vm1, %v2577_v36  ;;  %v1449_v56 = vmax.f32 %v1318_v38, 0.0 }
 0x437   :  { %v2260_v20 = vpop.permute.xlu0 %2259  ;;  %3045 = vmatpush.msrb.mxu2 %v1449_v56 }
 0x438   :  { %2265 = vst.msk [vmem:[#allocation2 + $0x90] sm:$0xff] %vm1716_vm2, %v2260_v20  ;;  %v8524_v15 = vpop.f32.mrf.mxu0  ;;  %5241 = vmatmul.msk.f32.gmra.mxu3 %vm1495_vm0, %v8067_v32  ;;  %v1445_v32 = vmax.f32 %v1306_v1, 0.0  ;;  %v8627_v20 = vld [vmem:[%s10303_s3 + $0xa8] sm:$0xff] }
 0x439   :  { %v8521_v3 = vpop.f32.mrf.mxu1  ;;  %3046 = vmatpush.msrb.mxu2 %v1448_v35  ;;  %v3600_v35 = vld [vmem:[%s10304_s4 + $0x60] sm:$0xff] }
 0x43a   :  { %5260 = vmatmul.msk.f32.gmra.mxu2 %vm1495_vm0, %v8534_v41  ;;  %3659 = vmatpush.msrb.mxu0 %v3600_v35 }
 0x43b   :  { %3047 = vmatpush.msrb.mxu2 %v1447_v53  ;;  %v2378_v37 = vpop.f32.mrf.mxu3 }
 0x43c   :  { %5118 = vmatmul.msk.f32.gmra.mxu1 %vm1495_vm0, %v8544_v30  ;;  %v2580_v17 = vpop.f32.mrf.mxu2  ;;  %2488 = vrot.lane.b32.xlu2 %v2378_v37, %s5497_s17  ;;  %v8645_v37 = vld [vmem:[%s10303_s3 + $0xb0] sm:$0xff] }
 0x43d   :  { %2674 = vst.msk [vmem:[#allocation2 + $0x120] sm:$0xff] %vm1705_vm1, %v2580_v17  ;;  %3048 = vmatpush.msrb.mxu2 %v1446_v10 }
 0x43f   :  { %v2262_v21 = vpop.permute.xlu0 %2261  ;;  %3049 = vmatpush.msrb.mxu2 %v1445_v32  ;;  %v2280_v22 = vpop.permute.xlu2 %2279  ;;  %v3533_v32 = vld [vmem:[#allocation2 + $0x48] sm:$0xff] }
 0x440   :  { %2266 = vst.msk [vmem:[#allocation2 + $0xb0] sm:$0xff] %vm1716_vm2, %v2262_v21  ;;  %v8559_v16 = vpop.f32.mrf.mxu0  ;;  %5242 = vmatmul.msk.f32.gmra.mxu3 %vm1495_vm0, %v8095_v57  ;;  %v1441_v57 = vmax.f32 %v1294_v51, 0.0  ;;  %v3537_v21 = vld [vmem:[#allocation2 + $0x68] sm:$0xff] }
 0x441   :  { %v8556_v34 = vpop.f32.mrf.mxu1  ;;  %3050 = vmatpush.msrb.mxu2 %v1444_v58 }
 0x442   :  { %5261 = vmatmul.msk.f32.gmra.mxu2 %vm1495_vm0, %v8237_v11  ;;  %v1282_v11 = vadd.f32 %v8198_v42, %v953_v24  ;;  %v8595_v42 = vld [vmem:[%s10303_s3 + $0x28] sm:$0xff] }
 0x443   :  { %3051 = vmatpush.msrb.mxu2 %v1443_v2  ;;  %v2381_v52 = vpop.f32.mrf.mxu3  ;;  %v8663_v2 = vld [vmem:[%s10303_s3 + $0xb8] sm:$0xff]  ;;  %v3541_v24 = vld [vmem:[#allocation2 + $0x88] sm:$0xff] }
 0x444   :  { %5119 = vmatmul.msk.f32.gmra.mxu1 %vm1495_vm0, %v8574_v46  ;;  %v2583_v48 = vpop.f32.mrf.mxu2  ;;  %2490 = vrot.lane.b32.xlu2 %v2381_v52, %s5497_s17  ;;  %v1437_v54 = vmax.f32 %v1282_v11, 0.0  ;;  %v3545_v11 = vld [vmem:[#allocation2 + $0xa8] sm:$0xff] }
 0x445   :  { %3052 = vmatpush.msrb.mxu2 %v1442_v45  ;;  %2677 = vrot.lane.b32.xlu0 %v2583_v48, %s5498_s25 }
 0x447   :  { %v2270_v33 = vpop.permute.xlu1 %2269  ;;  %3053 = vmatpush.msrb.mxu2 %v1441_v57  ;;  %v2282_v36 = vpop.permute.xlu2 %2281  ;;  %v8679_v57 = vld [vmem:[%s10303_s3 + $0xc0] sm:$0xff] }
 0x448   :  { %2275 = vst.msk [vmem:[#allocation2 + $0x90] sm:$0xff] %vm1727_vm3, %v2270_v33  ;;  %v8585_v18 = vpop.f32.mrf.mxu0  ;;  %5275 = vmatmul.msk.f32.vlgmr.msra.gmra.mxu3 %vm1495_vm0, %v8126_v14  ;;  %v8694_v33 = vld [vmem:[%s10303_s3 + $0x30] sm:$0xff] }
 0x449   :  { %v8582_v59 = vpop.f32.mrf.mxu1  ;;  %2285 = vst.msk [vmem:[#allocation2 + $0x90] sm:$0xff] %vm1738_vm4, %v2280_v22  ;;  %3054 = vmatpush.msrb.mxu2 %v1440_v13 }
 0x44a   :  { %5262 = vmatmul.msk.f32.gmra.mxu2 %vm1495_vm0, %v8270_v28 }
 0x44b   :  { %3055 = vmatpush.msrb.mxu2 %v1439_v47  ;;  %v2384_v23 = vpop.f32.mrf.mxu3  ;;  %v8701_v47 = vld [vmem:[%s10303_s3 + $0xc8] sm:$0xff] }
 0x44c   :  { %5120 = vmatmul.msk.f32.gmra.mxu1 %vm1495_vm0, %v8595_v42  ;;  %v2586_v9 = vpop.f32.mrf.mxu2  ;;  %2496 = vst.msk [vmem:[#allocation2 + $0xd0] sm:$0xff] %vm1705_vm1, %v2384_v23 }
 0x44d   :  { %3056 = vmatpush.msrb.mxu2 %v1438_v25  ;;  %2679 = vrot.lane.b32.xlu0 %v2586_v9, %s5498_s25 }
 0x44e   :  { %v2437_v14 = vpop.permute.xlu0 %2436 }
 0x44f   :  { %v2272_v38 = vpop.permute.xlu1 %2271  ;;  %3057 = vmatpush.msrb.mxu2 %v1437_v54  ;;  %2442 = vst.msk [vmem:[#allocation2 + $0xc0] sm:$0xff] %vm1716_vm2, %v2437_v14 }
 0x450   :  { %v8604_v40 = vpop.f32.mrf.mxu0  ;;  %5276 = vmatmul.msk.f32.gmra.mxu3 %vm1495_vm0, %v8147_v7  ;;  %2276 = vst.msk [vmem:[#allocation2 + $0xb0] sm:$0xff] %vm1727_vm3, %v2272_v38  ;;  %v8714_v38 = vld [vmem:[%s10303_s3 + $0x38] sm:$0xff] }
 0x451   :  { %v8602_v28 = vpop.f32.mrf.mxu1  ;;  %2286 = vst.msk [vmem:[#allocation2 + $0xb0] sm:$0xff] %vm1738_vm4, %v2282_v36  ;;  %v8721_v36 = vld [vmem:[%s10303_s3 + $0xd0] sm:$0xff] }
 0x452   :  { %5263 = vmatmul.msk.f32.gmra.mxu2 %vm1495_vm0, %v8294_v63  ;;  %v3529_v63 = vld [vmem:[#allocation2 + $0x28] sm:$0xff] }
 0x453   :  { %v2387_v29 = vpop.f32.mrf.mxu3 }
 0x454   :  { %3737 = vmatmul.f32.vlgmr.msra.gmra.mxu1 %v3525_v8  ;;  %v2589_v56 = vpop.f32.mrf.mxu2  ;;  %2497 = vst.msk [vmem:[#allocation2 + $0xf0] sm:$0xff] %vm1705_vm1, %v2387_v29 }
 0x455   :  { %2687 = vrot.lane.b32.xlu1 %v2589_v56, %s5499_s20 }
 0x456   :  { %v2439_v7 = vpop.permute.xlu0 %2438  ;;  %v2457_v31 = vpop.permute.xlu2 %2456 }
 0x457   :  { %2443 = vst.msk [vmem:[#allocation2 + $0xe0] sm:$0xff] %vm1716_vm2, %v2439_v7 }
 0x458   :  { %v8620_v1 = vpop.f32.mrf.mxu0  ;;  %5277 = vmatmul.msk.f32.gmra.mxu3 %vm1495_vm0, %v8509_v43 }
 0x459   :  { %v8618_v5 = vpop.f32.mrf.mxu1 }
 0x45a   :  { %5264 = vmatmul.msk.f32.gmra.mxu2 %vm1495_vm0, %v8627_v20 }
 0x45b   :  { %v8631_v53 = vpop.f32.mrf.mxu3 }
 0x45c   :  { %3740 = vmatmul.f32.gmra.mxu1 %v3529_v63  ;;  %v2592_v4 = vpop.f32.mrf.mxu2 }
 0x45d   :  { %2689 = vrot.lane.b32.xlu1 %v2592_v4, %s5499_s20  ;;  %v8732_v4 = vld [vmem:[%s10303_s3 + $0x40] sm:$0xff] }
 0x45e   :  { %v2447_v10 = vpop.permute.xlu1 %2446  ;;  %v2459_v62 = vpop.permute.xlu2 %2458 }
 0x45f   :  { %2452 = vst.msk [vmem:[#allocation2 + $0xc0] sm:$0xff] %vm1727_vm3, %v2447_v10  ;;  %v8743_v10 = vld [vmem:[%s10303_s3 + $0xd8] sm:$0xff] }
 0x460   :  { %v8637_v12 = vpop.f32.mrf.mxu0  ;;  %2462 = vst.msk [vmem:[#allocation2 + $0xc0] sm:$0xff] %vm1738_vm4, %v2457_v31  ;;  %5278 = vmatmul.msk.f32.gmra.mxu3 %vm1495_vm0, %v8544_v30  ;;  %v3599_v31 = vld [vmem:[%s10304_s4 + $0x58] sm:$0xff] }
 0x461   :  { %v8635_v0 = vpop.f32.mrf.mxu1  ;;  %3660 = vmatpush.msrb.mxu0 %v3599_v31 }
 0x462   :  { %5265 = vmatmul.msk.f32.gmra.mxu2 %vm1495_vm0, %v8645_v37 }
 0x463   :  { %v8649_v17 = vpop.f32.mrf.mxu3 }
 0x464   :  { %3743 = vmatmul.f32.gmra.mxu1 %v3533_v32  ;;  %v2595_v26 = vpop.f32.mrf.mxu2 }
 0x465   :  { %2697 = vrot.lane.b32.xlu2 %v2595_v26, %s5497_s17 }
 0x466   :  { %v2449_v58 = vpop.permute.xlu1 %2448 }
 0x467   :  { %2453 = vst.msk [vmem:[#allocation2 + $0xe0] sm:$0xff] %vm1727_vm3, %v2449_v58 }
 0x468   :  { %v8655_v51 = vpop.f32.mrf.mxu0  ;;  %2463 = vst.msk [vmem:[#allocation2 + $0xe0] sm:$0xff] %vm1738_vm4, %v2459_v62  ;;  %5279 = vmatmul.msk.f32.gmra.mxu3 %vm1495_vm0, %v8574_v46 }
 0x469   :  { %v8653_v27 = vpop.f32.mrf.mxu1 }
 0x46a   :  { %5266 = vmatmul.msk.f32.gmra.mxu2 %vm1495_vm0, %v8663_v2 }
 0x46b   :  { %v8667_v6 = vpop.f32.mrf.mxu3 }
 0x46c   :  { %3746 = vmatmul.f32.gmra.mxu1 %v3537_v21  ;;  %v2598_v49 = vpop.f32.mrf.mxu2 }
 0x46d   :  { %2699 = vrot.lane.b32.xlu2 %v2598_v49, %s5497_s17 }
 0x470   :  { %v8672_v55 = vpop.f32.mrf.mxu0  ;;  %5280 = vmatmul.msk.f32.gmra.mxu3 %vm1495_vm0, %v8595_v42 }
 0x471   :  { %v8670_v45 = vpop.f32.mrf.mxu1 }
 0x472   :  { %5267 = vmatmul.msk.f32.gmra.mxu2 %vm1495_vm0, %v8679_v57 }
 0x473   :  { %v8683_v52 = vpop.f32.mrf.mxu3 }
 0x474   :  { %3749 = vmatmul.f32.gmra.mxu1 %v3541_v24  ;;  %v2601_v48 = vpop.f32.mrf.mxu2 }
 0x475   :  { %2705 = vst.msk [vmem:[#allocation2 + $0x108] sm:$0xff] %vm1705_vm1, %v2601_v48  ;;  %v8753_v48 = vld [vmem:[%s10303_s3 + $0x48] sm:$0xff] }
 0x477   :  { %v2292_v50 = vpop.permute.xlu0 %2291 }
 0x478   :  { %2297 = vst.msk [vmem:[#allocation2 + $0x98] sm:$0xff] %vm1716_vm2, %v2292_v50  ;;  %v8689_v22 = vpop.f32.mrf.mxu0  ;;  %5281 = vmatmul.msk.f32.gmra.mxu3 %vm1495_vm0, %v8694_v33  ;;  %v8762_v50 = vld [vmem:[%s10303_s3 + $0xe0] sm:$0xff] }
 0x479   :  { %v8686_v13 = vpop.f32.mrf.mxu1  ;;  %10519 = vst [vmem:[#allocation203_spill] sm:$0xff] %v8762_v50 }
 0x47a   :  { %5268 = vmatmul.msk.f32.gmra.mxu2 %vm1495_vm0, %v8701_v47 }
 0x47b   :  { %v8705_v25 = vpop.f32.mrf.mxu3 }
 0x47c   :  { %3752 = vmatmul.f32.gmra.mxu1 %v3545_v11  ;;  %v2604_v54 = vpop.f32.mrf.mxu2 }
 0x47d   :  { %2706 = vst.msk [vmem:[#allocation2 + $0x128] sm:$0xff] %vm1705_vm1, %v2604_v54 }
 0x47f   :  { %v2294_v23 = vpop.permute.xlu0 %2293  ;;  %v2312_v56 = vpop.permute.xlu2 %2311 }
 0x480   :  { %2298 = vst.msk [vmem:[#allocation2 + $0xb8] sm:$0xff] %vm1716_vm2, %v2294_v23  ;;  %v1018_v14 = vpop.f32.mrf.mxu0  ;;  %5282 = vmatmul.msk.f32.gmra.mxu3 %vm1495_vm0, %v8714_v38 }
 0x481   :  { %v8708_v9 = vpop.f32.mrf.mxu1 }
 0x482   :  { %5269 = vmatmul.msk.f32.gmra.mxu2 %vm1495_vm0, %v8721_v36 }
 0x483   :  { %v8725_v8 = vpop.f32.mrf.mxu3 }
 0x484   :  { %v2607_v29 = vpop.f32.mrf.mxu2 }
 0x485   :  { %2709 = vrot.lane.b32.xlu0 %v2607_v29, %s5498_s25 }
 0x487   :  { %v2302_v35 = vpop.permute.xlu1 %2301  ;;  %v2314_v24 = vpop.permute.xlu2 %2313 }
 0x488   :  { %2307 = vst.msk [vmem:[#allocation2 + $0x98] sm:$0xff] %vm1727_vm3, %v2302_v35  ;;  %v1021_v63 = vpop.f32.mrf.mxu0  ;;  %5283 = vmatmul.msk.f32.gmra.mxu3 %vm1495_vm0, %v8732_v4 }
 0x489   :  { %v1350_v7 = vpop.f32.mrf.mxu1  ;;  %2317 = vst.msk [vmem:[#allocation2 + $0x98] sm:$0xff] %vm1738_vm4, %v2312_v56  ;;  %v1022_v35 = vadd.f32 %v8169_v60, %v1021_v63 }
 0x48a   :  { %5270 = vmatmul.msk.f32.gmra.mxu2 %vm1495_vm0, %v8743_v10 }
 0x48b   :  { %v2408_v32 = vpop.f32.mrf.mxu3 }
 0x48c   :  { %v2610_v26 = vpop.f32.mrf.mxu2  ;;  %2528 = vst.msk [vmem:[#allocation2 + $0xd8] sm:$0xff] %vm1705_vm1, %v2408_v32  ;;  %v8774_v32 = vld [vmem:[%s10303_s3 + $0x50] sm:$0xff] }
 0x48d   :  { %2711 = vrot.lane.b32.xlu0 %v2610_v26, %s5498_s25 }
 0x48e   :  { %v2469_v62 = vpop.permute.xlu0 %2468 }
 0x48f   :  { %v2304_v58 = vpop.permute.xlu1 %2303  ;;  %2474 = vst.msk [vmem:[#allocation2 + $0xc8] sm:$0xff] %vm1716_vm2, %v2469_v62  ;;  %v1019_v62 = vadd.f32 %v8169_v60, %v1018_v14 }
 0x490   :  { %v1024_v49 = vpop.f32.mrf.mxu0  ;;  %5284 = vmatmul.msk.f32.gmra.mxu3 %vm1495_vm0, %v8753_v48  ;;  %2308 = vst.msk [vmem:[#allocation2 + $0xb8] sm:$0xff] %vm1727_vm3, %v2304_v58 }
 0x491   :  { %v1353_v21 = vpop.f32.mrf.mxu1  ;;  %2318 = vst.msk [vmem:[#allocation2 + $0xb8] sm:$0xff] %vm1738_vm4, %v2314_v24  ;;  %v1025_v23 = vadd.f32 %v8169_v60, %v1024_v49  ;;  %v8783_v49 = vld [vmem:[%s10303_s3 + $0xe8] sm:$0xff]  ;;  %v1016_v24 = vadd.f32 %v8169_v60, %v8689_v22  ;;  %v5476_v22 = vld [vmem:[%s10302_s2] ss:$0 sm:$0xff] }
 0x492   :  { %5271 = vmatmul.msk.f32.gmra.mxu2 %vm1495_vm0, %v8762_v50 }
 0x493   :  { %v2411_v11 = vpop.f32.mrf.mxu3  ;;  %v1354_v58 = vadd.f32 %v1353_v21, %v1025_v23  ;;  %v1013_v21 = vadd.f32 %v8169_v60, %v8672_v55  ;;  %v1348_v23 = vadd.f32 %v8708_v9, %v1019_v62  ;;  %v1007_v55 = vadd.f32 %v5476_v22, %v8637_v12  ;;  %v8815_v9 = vld [vmem:[%s10303_s3 + $0xf0] sm:$0xff] }
 0x494   :  { %v2613_v54 = vpop.f32.mrf.mxu2  ;;  %2529 = vst.msk [vmem:[#allocation2 + $0xf8] sm:$0xff] %vm1705_vm1, %v2411_v11  ;;  %v1351_v11 = vadd.f32 %v1350_v7, %v1022_v35  ;;  %v1010_v7 = vadd.f32 %v5476_v22, %v8655_v51 }
 0x495   :  { %2719 = vrot.lane.b32.xlu1 %v2613_v54, %s5499_s20  ;;  %v1461_v61 = vmax.f32 %v1354_v58, 0.0  ;;  %v1342_v51 = vadd.f32 %v8670_v45, %v1013_v21 }
 0x496   :  { %v2471_v29 = vpop.permute.xlu0 %2470  ;;  %v1339_v62 = vadd.f32 %v8653_v27, %v1010_v7 }
 0x497   :  { %2475 = vst.msk [vmem:[#allocation2 + $0xe8] sm:$0xff] %vm1716_vm2, %v2471_v29 }
 0x498   :  { %v1027_v31 = vpop.f32.mrf.mxu0  ;;  %5285 = vmatmul.msk.f32.gmra.mxu3 %vm1495_vm0, %v8774_v32 }
 0x499   :  { %v1356_v56 = vpop.f32.mrf.mxu1  ;;  %v1028_v26 = vadd.f32 %v8169_v60, %v1027_v31  ;;  %v2489_v31 = vpop.permute.xlu2 %2488  ;;  %v8805_v60 = vld [vmem:[%s10303_s3 + $0x58] sm:$0xff] }
 0x49a   :  { %5272 = vmatmul.msk.f32.gmra.mxu2 %vm1495_vm0, %v8783_v49 }
 0x49b   :  { %v1357_v63 = vadd.f32 %v1356_v56, %v1028_v26  ;;  %v8789_v54 = vpop.f32.mrf.mxu3  ;;  %v1345_v56 = vadd.f32 %v8686_v13, %v1016_v24  ;;  %v1460_v26 = vmax.f32 %v1351_v11, 0.0  ;;  %v1459_v13 = vmax.f32 %v1348_v23, 0.0  ;;  %v8845_v23 = vld [vmem:[%s10303_s3 + $0xf8] sm:$0xff] }
 0x49c   :  { %v2616_v29 = vpop.f32.mrf.mxu2  ;;  %v1457_v24 = vmax.f32 %v1342_v51, 0.0 }
 0x49d   :  { %2721 = vrot.lane.b32.xlu1 %v2616_v29, %s5499_s20  ;;  %v1462_v14 = vmax.f32 %v1357_v63, 0.0  ;;  %v1458_v45 = vmax.f32 %v1345_v56, 0.0  ;;  %v1336_v63 = vadd.f32 %v8635_v0, %v1007_v55 }
 0x49e   :  { %v2479_v50 = vpop.permute.xlu1 %2478 }
 0x49f   :  { %3286 = vmatpush.msrb.mxu3 %v1462_v14  ;;  %2484 = vst.msk [vmem:[#allocation2 + $0xc8] sm:$0xff] %vm1727_vm3, %v2479_v50  ;;  %v1004_v50 = vadd.f32 %v5476_v22, %v8620_v1  ;;  %v998_v1 = vadd.f32 %v5476_v22, %v8585_v18  ;;  %v995_v18 = vadd.f32 %v5476_v22, %v8559_v16  ;;  %v1455_v0 = vmax.f32 %v1336_v63, 0.0 }
 0x4a0   :  { %2494 = vst.msk [vmem:[#allocation2 + $0xc8] sm:$0xff] %vm1738_vm4, %v2489_v31  ;;  %5286 = vmatmul.msk.f32.gmra.mxu3 %vm1495_vm0, %v8805_v60  ;;  %v992_v31 = vadd.f32 %v5476_v22, %v8524_v15  ;;  %v8857_v15 = vld [vmem:[%s10303_s3 + $0x68] sm:$0xff] }
 0x4a1   :  { %v1609_v35 = vpop.f32.mrf.mxu1  ;;  %3287 = vmatpush.msrb.mxu3 %v1461_v61  ;;  %v1001_v61 = vadd.f32 %v5476_v22, %v8604_v40  ;;  %v1333_v27 = vadd.f32 %v8618_v5, %v1004_v50  ;;  %v2491_v29 = vpop.permute.xlu2 %2490  ;;  %v8835_v40 = vld [vmem:[%s10303_s3 + $0x60] sm:$0xff]  ;;  %v1327_v7 = vadd.f32 %v8582_v59, %v998_v1 }
 0x4a2   :  { %1706 = vst.msk [vmem:[#allocation2] sm:$0xff] %vm1705_vm1, %v1609_v35  ;;  %5273 = vmatmul.msk.f32.gmra.mxu2 %vm1495_vm0, %v8815_v9  ;;  %v1324_v35 = vadd.f32 %v8556_v34, %v995_v18  ;;  %v1321_v55 = vadd.f32 %v8521_v3, %v992_v31  ;;  %v8865_v3 = vld [vmem:[%s10303_s3] sm:$0xff] }
 0x4a3   :  { %v8821_v58 = vpop.f32.mrf.mxu3  ;;  %3288 = vmatpush.msrb.mxu3 %v1460_v26  ;;  %v1330_v5 = vadd.f32 %v8602_v28, %v1001_v61  ;;  %v1454_v28 = vmax.f32 %v1333_v27, 0.0  ;;  %v1452_v50 = vmax.f32 %v1327_v7, 0.0  ;;  %v8950_v31 = vld [vmem:[%s10303_s3 + $0xa0] sm:$0xff] }
 0x4a4   :  { %v2619_v12 = vpop.f32.mrf.mxu2  ;;  %v1451_v34 = vmax.f32 %v1324_v35, 0.0  ;;  %v1450_v22 = vmax.f32 %v1321_v55, 0.0  ;;  %v3597_v35 = vld [vmem:[%s10304_s4 + $0x48] sm:$0xff] }
 0x4a5   :  { %2510 = vrot.lane.b32.xlu1 %v8667_v6, %s5499_s20  ;;  %2729 = vrot.lane.b32.xlu2 %v2619_v12, %s5497_s17  ;;  %v1456_v6 = vmax.f32 %v1339_v62, 0.0  ;;  %v1453_v26 = vmax.f32 %v1330_v5, 0.0  ;;  %v8877_v12 = vld [vmem:[%s10303_s3 + $0x8] sm:$0xff] }
 0x4a6   :  { %3289 = vmatpush.msrb.mxu3 %v1459_v13  ;;  %v2481_v11 = vpop.permute.xlu1 %2480 }
 0x4a7   :  { %2485 = vst.msk [vmem:[#allocation2 + $0xe8] sm:$0xff] %vm1727_vm3, %v2481_v11  ;;  %v3549_v21 = vld [vmem:[#allocation2 + $0xc8] sm:$0xff] }
 0x4a8   :  { %3290 = vmatpush.msrb.mxu3 %v1458_v45  ;;  %2495 = vst.msk [vmem:[#allocation2 + $0xe8] sm:$0xff] %vm1738_vm4, %v2491_v29  ;;  %3755 = vmatmul.f32.gmra.mxu1 %v3549_v21 }
 0x4a9   :  { %v1612_v14 = vpop.f32.mrf.mxu1  ;;  %5287 = vmatmul.msk.f32.gmra.mxu3 %vm1495_vm0, %v8835_v40 }
 0x4aa   :  { %1707 = vst.msk [vmem:[#allocation2 + $0x20] sm:$0xff] %vm1705_vm1, %v1612_v14  ;;  %3291 = vmatpush.msrb.mxu3 %v1457_v24  ;;  %5274 = vmatmul.msk.f32.gmra.mxu2 %vm1495_vm0, %v8845_v23  ;;  %v8918_v14 = vld [vmem:[%s10303_s3 + $0x90] sm:$0xff] }
 0x4ab   :  { %v2420_v56 = vpop.f32.mrf.mxu3 }
 0x4ac   :  { %v2622_v16 = vpop.f32.mrf.mxu2  ;;  %3292 = vmatpush.msrb.mxu3 %v1456_v6  ;;  %v8933_v6 = vld [vmem:[%s10303_s3 + $0x98] sm:$0xff] }
 0x4ad   :  { %2731 = vrot.lane.b32.xlu2 %v2622_v16, %s5497_s17 }
 0x4ae   :  { %3293 = vmatpush.msrb.mxu3 %v1455_v0 }
 0x4af   :  { %v3553_v13 = vld [vmem:[#allocation2 + $0xe8] sm:$0xff] }
 0x4b0   :  { %3294 = vmatpush.msrb.mxu3 %v1454_v28  ;;  %3758 = vmatmul.f32.gmra.mxu1 %v3553_v13 }
 0x4b1   :  { %v1615_v51 = vpop.f32.mrf.mxu1  ;;  %5288 = vmatmul.msk.f32.gmra.mxu3 %vm1495_vm0, %v8857_v15 }
 0x4b2   :  { %1710 = vrot.lane.b32.xlu0 %v1615_v51, %s5498_s25  ;;  %3295 = vmatpush.msrb.mxu3 %v1453_v26 }
 0x4b3   :  { %5307 = vmatmul.msk.f32.vlgmr.msrb.gmra.mxu2 %vm1495_vm0, %v8865_v3  ;;  %v2423_v59 = vpop.f32.mrf.mxu3 }
 0x4b4   :  { %3296 = vmatpush.msrb.mxu3 %v1452_v50  ;;  %v2625_v61 = vpop.f32.mrf.mxu2 }
 0x4b5   :  { %2520 = vrot.lane.b32.xlu2 %v8705_v25, %s5497_s17  ;;  %v3598_v25 = vld [vmem:[%s10304_s4 + $0x50] sm:$0xff]  ;;  %2737 = vst.msk [vmem:[#allocation2 + $0x110] sm:$0xff] %vm1705_vm1, %v2625_v61  ;;  %v3596_v61 = vld [vmem:[%s10304_s4 + $0x40] sm:$0xff] }
 0x4b6   :  { %3297 = vmatpush.msrb.mxu3 %v1451_v34  ;;  %3661 = vmatpush.msrb.mxu0 %v3598_v25 }
 0x4b7   :  { %v2678_v5 = vpop.permute.xlu0 %2677 }
 0x4b8   :  { %3298 = vmatpush.msrb.mxu3 %v1450_v22  ;;  %2683 = vst.msk [vmem:[#allocation2 + $0x100] sm:$0xff] %vm1716_vm2, %v2678_v5  ;;  %3662 = vmatpush.msrb.mxu0 %v3597_v35  ;;  %v3590_v5 = vld [vmem:[%s10304_s4 + $0x10] sm:$0xff] }
 0x4b9   :  { %v1618_v62 = vpop.f32.mrf.mxu1  ;;  %5289 = vmatmul.msk.f32.gmra.mxu3 %vm1495_vm0, %v8440_v39 }
 0x4ba   :  { %1712 = vrot.lane.b32.xlu0 %v1618_v62, %s5498_s25  ;;  %3663 = vmatpush.msrb.mxu0 %v3596_v61 }
 0x4bb   :  { %5308 = vmatmul.msk.f32.gmra.mxu2 %vm1495_vm0, %v8877_v12  ;;  %v2426_v45 = vpop.f32.mrf.mxu3 }
 0x4bd   :  { %2552 = vrot.lane.b32.xlu2 %v2426_v45, %s5497_s17  ;;  %v2628_v11 = vpop.f32.mrf.mxu2 }
 0x4be   :  { %2738 = vst.msk [vmem:[#allocation2 + $0x130] sm:$0xff] %vm1705_vm1, %v2628_v11 }
 0x4bf   :  { %v2680_v7 = vpop.permute.xlu0 %2679 }
 0x4c0   :  { %2684 = vst.msk [vmem:[#allocation2 + $0x120] sm:$0xff] %vm1716_vm2, %v2680_v7 }
 0x4c1   :  { %v1621_v63 = vpop.f32.mrf.mxu1  ;;  %5290 = vmatmul.msk.f32.gmra.mxu3 %vm1495_vm0, %v8467_v44 }
 0x4c2   :  { %1721 = vrot.lane.b32.xlu0 %v1621_v63, %s5499_s20 }
 0x4c3   :  { %5309 = vmatmul.msk.f32.gmra.mxu2 %vm1495_vm0, %v8509_v43  ;;  %v2429_v24 = vpop.f32.mrf.mxu3 }
 0x4c5   :  { %2522 = vrot.lane.b32.xlu2 %v8725_v8, %s5497_s17  ;;  %v8901_v29 = vpop.f32.mrf.mxu2 }
 0x4c9   :  { %v1624_v1 = vpop.f32.mrf.mxu1  ;;  %5291 = vmatmul.msk.f32.gmra.mxu3 %vm1495_vm0, %v8500_v19 }
 0x4ca   :  { %1723 = vrot.lane.b32.xlu1 %v1624_v1, %s5499_s20  ;;  %2500 = vrot.lane.b32.xlu0 %v8631_v53, %s5498_s25 }
 0x4cb   :  { %5310 = vmatmul.msk.f32.gmra.mxu2 %vm1495_vm0, %v8544_v30  ;;  %v2818_v27 = vpop.f32.mrf.mxu3 }
 0x4cc   :  { %2914 = vst.msk [vmem:[#allocation2 + $0x140] sm:$0xff] %vm1705_vm1, %v2818_v27  ;;  %v3594_v27 = vld [vmem:[%s10304_s4 + $0x30] sm:$0xff] }
 0x4cd   :  { %2554 = vrot.lane.b32.xlu2 %v2429_v24, %s5497_s17  ;;  %v8912_v8 = vpop.f32.mrf.mxu2  ;;  %v3595_v24 = vld [vmem:[%s10304_s4 + $0x38] sm:$0xff] }
 0x4ce   :  { %3664 = vmatpush.msrb.mxu0 %v3595_v24 }
 0x4d0   :  { %3665 = vmatpush.msrb.mxu0 %v3594_v27  ;;  %v10522_v27 = vld [vmem:[#allocation206_spill] sm:$0xff] }
 0x4d1   :  { %5292 = vmatmul.msk.f32.gmra.mxu3 %vm1495_vm0, %v8534_v41 }
 0x4d2   :  { %2542 = vrot.lane.b32.xlu1 %v2420_v56, %s5499_s20  ;;  %2532 = vrot.lane.b32.xlu0 %v8789_v54, %s5498_s25 }
 0x4d3   :  { %5311 = vmatmul.msk.f32.gmra.mxu2 %vm1495_vm0, %v8574_v46  ;;  %v2821_v53 = vpop.f32.mrf.mxu3 }
 0x4d4   :  { %2915 = vst.msk [vmem:[#allocation2 + $0x160] sm:$0xff] %vm1705_vm1, %v2821_v53  ;;  %v3593_v53 = vld [vmem:[%s10304_s4 + $0x28] sm:$0xff] }
 0x4d5   :  { %v8928_v21 = vpop.f32.mrf.mxu2  ;;  %3666 = vmatpush.msrb.mxu0 %v3593_v53 }
 0x4d9   :  { %5293 = vmatmul.msk.f32.gmra.mxu3 %vm1495_vm0, %v8918_v14 }
 0x4da   :  { %2512 = vrot.lane.b32.xlu1 %v8683_v52, %s5499_s20  ;;  %2502 = vrot.lane.b32.xlu0 %v8649_v17, %s5498_s25  ;;  %v2698_v17 = vpop.permute.xlu2 %2697  ;;  %v2688_v52 = vpop.permute.xlu1 %2687 }
 0x4db   :  { %5312 = vmatmul.msk.f32.gmra.mxu2 %vm1495_vm0, %v8595_v42  ;;  %v2824_v54 = vpop.f32.mrf.mxu3  ;;  %2693 = vst.msk [vmem:[#allocation2 + $0x100] sm:$0xff] %vm1727_vm3, %v2688_v52 }
 0x4dc   :  { %2703 = vst.msk [vmem:[#allocation2 + $0x100] sm:$0xff] %vm1738_vm4, %v2698_v17  ;;  %v3592_v17 = vld [vmem:[%s10304_s4 + $0x20] sm:$0xff] }
 0x4dd   :  { %v8943_v0 = vpop.f32.mrf.mxu2  ;;  %3667 = vmatpush.msrb.mxu0 %v3592_v17 }
 0x4e1   :  { %5294 = vmatmul.msk.f32.gmra.mxu3 %vm1495_vm0, %v8933_v6 }
 0x4e2   :  { %2544 = vrot.lane.b32.xlu1 %v2423_v59, %s5499_s20  ;;  %2534 = vrot.lane.b32.xlu0 %v8821_v58, %s5498_s25  ;;  %v2690_v56 = vpop.permute.xlu1 %2689  ;;  %v2700_v28 = vpop.permute.xlu2 %2699 }
 0x4e3   :  { %5313 = vmatmul.msk.f32.gmra.mxu2 %vm1495_vm0, %v8694_v33  ;;  %v2827_v18 = vpop.f32.mrf.mxu3  ;;  %2694 = vst.msk [vmem:[#allocation2 + $0x120] sm:$0xff] %vm1727_vm3, %v2690_v56  ;;  %v3588_v56 = vld [vmem:[%s10304_s4] sm:$0xff] }
 0x4e4   :  { %2704 = vst.msk [vmem:[#allocation2 + $0x120] sm:$0xff] %vm1738_vm4, %v2700_v28 }
 0x4e5   :  { %v8959_v16 = vpop.f32.mrf.mxu2 }
 0x4e9   :  { %5295 = vmatmul.msk.f32.gmra.mxu3 %vm1495_vm0, %v8950_v31 }
 0x4ea   :  { %2918 = vrot.lane.b32.xlu0 %v2824_v54, %s5498_s25 }
 0x4eb   :  { %5314 = vmatmul.msk.f32.gmra.mxu2 %vm1495_vm0, %v8714_v38  ;;  %v2830_v58 = vpop.f32.mrf.mxu3 }
 0x4ec   :  { %2928 = vrot.lane.b32.xlu1 %v2830_v58, %s5499_s20  ;;  %v3589_v58 = vld [vmem:[%s10304_s4 + $0x8] sm:$0xff] }
 0x4ed   :  { %v8972_v55 = vpop.f32.mrf.mxu2 }
 0x4f1   :  { %5296 = vmatmul.msk.f32.gmra.mxu3 %vm1495_vm0, %v8627_v20 }
 0x4f2   :  { %2920 = vrot.lane.b32.xlu0 %v2827_v18, %s5498_s25  ;;  %v3591_v18 = vld [vmem:[%s10304_s4 + $0x18] sm:$0xff] }
 0x4f3   :  { %5315 = vmatmul.msk.f32.gmra.mxu2 %vm1495_vm0, %v8732_v4  ;;  %v2833_v26 = vpop.f32.mrf.mxu3  ;;  %3668 = vmatpush.msrb.mxu0 %v3591_v18 }
 0x4f4   :  { %2930 = vrot.lane.b32.xlu1 %v2833_v26, %s5499_s20 }
 0x4f5   :  { %v2649_v50 = vpop.f32.mrf.mxu2  ;;  %3669 = vmatpush.msrb.mxu0 %v3590_v5 }
 0x4f6   :  { %2769 = vst.msk [vmem:[#allocation2 + $0x118] sm:$0xff] %vm1705_vm1, %v2649_v50 }
 0x4f7   :  { %v2710_v51 = vpop.permute.xlu0 %2709  ;;  %3670 = vmatpush.msrb.mxu0 %v3589_v58 }
 0x4f8   :  { %2715 = vst.msk [vmem:[#allocation2 + $0x108] sm:$0xff] %vm1716_vm2, %v2710_v51 }
 0x4f9   :  { %5297 = vmatmul.msk.f32.gmra.mxu3 %vm1495_vm0, %v8645_v37  ;;  %3671 = vmatpush.msrb.mxu0 %v3588_v56 }
 0x4fb   :  { %5316 = vmatmul.msk.f32.gmra.mxu2 %vm1495_vm0, %v8753_v48  ;;  %v2836_v13 = vpop.f32.mrf.mxu3 }
 0x4fc   :  { %2938 = vrot.lane.b32.xlu2 %v2836_v13, %s5497_s17  ;;  %v10520_v13 = vld [vmem:[#allocation203_spill] sm:$0xff] }
 0x4fd   :  { %v2652_v22 = vpop.f32.mrf.mxu2 }
 0x4fe   :  { %2770 = vst.msk [vmem:[#allocation2 + $0x138] sm:$0xff] %vm1705_vm1, %v2652_v22 }
 0x4ff   :  { %v2712_v34 = vpop.permute.xlu0 %2711  ;;  %v2730_v62 = vpop.permute.xlu2 %2729 }
 0x500   :  { %2716 = vst.msk [vmem:[#allocation2 + $0x128] sm:$0xff] %vm1716_vm2, %v2712_v34 }
 0x501   :  { %5298 = vmatmul.msk.f32.gmra.mxu3 %vm1495_vm0, %v8663_v2 }
 0x503   :  { %5317 = vmatmul.msk.f32.gmra.mxu2 %vm1495_vm0, %v8774_v32  ;;  %v2839_v59 = vpop.f32.mrf.mxu3 }
 0x504   :  { %2940 = vrot.lane.b32.xlu2 %v2839_v59, %s5497_s17 }
 0x505   :  { %v8998_v63 = vpop.f32.mrf.mxu2 }
 0x507   :  { %v2720_v45 = vpop.permute.xlu1 %2719  ;;  %v2732_v1 = vpop.permute.xlu2 %2731 }
 0x508   :  { %2725 = vst.msk [vmem:[#allocation2 + $0x108] sm:$0xff] %vm1727_vm3, %v2720_v45 }
 0x509   :  { %5299 = vmatmul.msk.f32.gmra.mxu3 %vm1495_vm0, %v8679_v57  ;;  %2735 = vst.msk [vmem:[#allocation2 + $0x108] sm:$0xff] %vm1738_vm4, %v2730_v62 }
 0x50b   :  { %5318 = vmatmul.msk.f32.gmra.mxu2 %vm1495_vm0, %v8805_v60  ;;  %v2842_v25 = vpop.f32.mrf.mxu3 }
 0x50c   :  { %2946 = vst.msk [vmem:[#allocation2 + $0x148] sm:$0xff] %vm1705_vm1, %v2842_v25 }
 0x50d   :  { %v9019_v52 = vpop.f32.mrf.mxu2 }
 0x50f   :  { %v2722_v11 = vpop.permute.xlu1 %2721  ;;  %v2521_v45 = vpop.permute.xlu2 %2520 }
 0x510   :  { %2726 = vst.msk [vmem:[#allocation2 + $0x128] sm:$0xff] %vm1727_vm3, %v2722_v11 }
 0x511   :  { %5300 = vmatmul.msk.f32.gmra.mxu3 %vm1495_vm0, %v8701_v47  ;;  %2736 = vst.msk [vmem:[#allocation2 + $0x128] sm:$0xff] %vm1738_vm4, %v2732_v1 }
 0x513   :  { %5319 = vmatmul.msk.f32.gmra.mxu2 %vm1495_vm0, %v8835_v40  ;;  %v2845_v54 = vpop.f32.mrf.mxu3 }
 0x514   :  { %2947 = vst.msk [vmem:[#allocation2 + $0x168] sm:$0xff] %vm1705_vm1, %v2845_v54 }
 0x515   :  { %v9038_v28 = vpop.f32.mrf.mxu2 }
 0x517   :  { %v2511_v59 = vpop.permute.xlu1 %2510  ;;  %v2553_v53 = vpop.permute.xlu2 %2552 }
 0x519   :  { %5301 = vmatmul.msk.f32.gmra.mxu3 %vm1495_vm0, %v8721_v36 }
 0x51b   :  { %5320 = vmatmul.msk.f32.gmra.mxu2 %vm1495_vm0, %v8857_v15  ;;  %v2848_v7 = vpop.f32.mrf.mxu3 }
 0x51c   :  { %2950 = vrot.lane.b32.xlu0 %v2848_v7, %s5498_s25 }
 0x51d   :  { %v9046_v51 = vpop.f32.mrf.mxu2 }
 0x51f   :  { %v2523_v58 = vpop.permute.xlu2 %2522 }
 0x521   :  { %5302 = vmatmul.msk.f32.gmra.mxu3 %vm1495_vm0, %v8743_v10 }
 0x523   :  { %5321 = vmatmul.msk.f32.gmra.mxu2 %vm1495_vm0, %v8440_v39  ;;  %v2851_v35 = vpop.f32.mrf.mxu3 }
 0x524   :  { %v1711_v26 = vpop.permute.xlu0 %1710  ;;  %2952 = vrot.lane.b32.xlu0 %v2851_v35, %s5498_s25 }
 0x525   :  { %1717 = vst.msk [vmem:[#allocation2] sm:$0xff] %vm1716_vm2, %v1711_v26  ;;  %v9054_v39 = vpop.f32.mrf.mxu2  ;;  %v3532_v26 = vld [vmem:[#allocation2 + $0x40] sm:$0xff] }
 0x529   :  { %5303 = vmatmul.msk.f32.gmra.mxu3 %vm1495_vm0, %v10520_v13 }
 0x52b   :  { %5322 = vmatmul.msk.f32.gmra.mxu2 %vm1495_vm0, %v8467_v44  ;;  %v10521_v44 = vld [vmem:[#allocation207_spill] sm:$0xff] }
 0x52c   :  { %v2854_v50 = vpop.f32.mrf.mxu3  ;;  %v1713_v34 = vpop.permute.xlu0 %1712 }
 0x52d   :  { %1718 = vst.msk [vmem:[#allocation2 + $0x20] sm:$0xff] %vm1716_vm2, %v1713_v34  ;;  %2960 = vrot.lane.b32.xlu1 %v2854_v50, %s5499_s20  ;;  %v9064_v25 = vpop.f32.mrf.mxu2 }
 0x531   :  { %5304 = vmatmul.msk.f32.gmra.mxu3 %vm1495_vm0, %v8783_v49 }
 0x533   :  { %5323 = vmatmul.msk.f32.gmra.mxu2 %vm1495_vm0, %v8500_v19 }
 0x534   :  { %v2857_v22 = vpop.f32.mrf.mxu3  ;;  %v1722_v62 = vpop.permute.xlu0 %1721 }
 0x535   :  { %1728 = vst.msk [vmem:[#allocation2] sm:$0xff] %vm1727_vm3, %v1722_v62  ;;  %2962 = vrot.lane.b32.xlu1 %v2857_v22, %s5499_s20  ;;  %v2555_v22 = vpop.permute.xlu2 %2554  ;;  %v3536_v62 = vld [vmem:[#allocation2 + $0x60] sm:$0xff] }
 0x536   :  { %1739 = vst.msk [vmem:[#allocation2] sm:$0xff] %vm1738_vm4, %v10521_v44  ;;  %v3059_v1 = vpop.f32.mrf.mxu2 }
 0x537   :  { %3155 = vst.msk [vmem:[#allocation2 + $0x180] sm:$0xff] %vm1705_vm1, %v3059_v1 }
 0x539   :  { %5305 = vmatmul.msk.f32.gmra.mxu3 %vm1495_vm0, %v8815_v9 }
 0x53b   :  { %5324 = vmatmul.msk.f32.gmra.mxu2 %vm1495_vm0, %v8534_v41 }
 0x53c   :  { %v1724_v61 = vpop.permute.xlu1 %1723  ;;  %v2860_v19 = vpop.f32.mrf.mxu3 }
 0x53d   :  { %v2501_v24 = vpop.permute.xlu0 %2500  ;;  %1729 = vst.msk [vmem:[#allocation2 + $0x20] sm:$0xff] %vm1727_vm3, %v1724_v61  ;;  %2970 = vrot.lane.b32.xlu2 %v2860_v19, %s5497_s17  ;;  %v3524_v11 = vld [vmem:[#allocation2] sm:$0xff] }
 0x53e   :  { %2506 = vst.msk [vmem:[#allocation2 + $0xd0] sm:$0xff] %vm1716_vm2, %v2501_v24  ;;  %3672 = vmatmul.f32.vlgmr.msrb.gmra.mxu0 %v3524_v11  ;;  %v3062_v5 = vpop.f32.mrf.mxu2  ;;  %v3540_v24 = vld [vmem:[#allocation2 + $0x80] sm:$0xff] }
 0x53f   :  { %2516 = vst.msk [vmem:[#allocation2 + $0xd0] sm:$0xff] %vm1727_vm3, %v2511_v59 }
 0x540   :  { %2526 = vst.msk [vmem:[#allocation2 + $0xd0] sm:$0xff] %vm1738_vm4, %v2521_v45  ;;  %v3557_v45 = vld [vmem:[#allocation2 + $0x108] sm:$0xff] }
 0x541   :  { %1740 = vst.msk [vmem:[#allocation2 + $0x20] sm:$0xff] %vm1738_vm4, %v10522_v27  ;;  %5306 = vmatmul.msk.f32.gmra.mxu3 %vm1495_vm0, %v8845_v23  ;;  %3761 = vmatmul.f32.gmra.mxu1 %v3557_v45  ;;  %v3561_v27 = vld [vmem:[#allocation2 + $0x128] sm:$0xff] }
 0x542   :  { %3156 = vst.msk [vmem:[#allocation2 + $0x1a0] sm:$0xff] %vm1705_vm1, %v3062_v5 }
 0x543   :  { %5325 = vmatmul.msk.f32.gmra.mxu2 %vm1495_vm0, %v8918_v14 }
 0x544   :  { %v2543_v41 = vpop.permute.xlu1 %2542  ;;  %v2863_v54 = vpop.f32.mrf.mxu3 }
 0x545   :  { %v2533_v17 = vpop.permute.xlu0 %2532  ;;  %2972 = vrot.lane.b32.xlu2 %v2863_v54, %s5497_s17 }
 0x546   :  { %2538 = vst.msk [vmem:[#allocation2 + $0xd8] sm:$0xff] %vm1716_vm2, %v2533_v17  ;;  %v3065_v50 = vpop.f32.mrf.mxu2 }
 0x547   :  { %2548 = vst.msk [vmem:[#allocation2 + $0xd8] sm:$0xff] %vm1727_vm3, %v2543_v41  ;;  %3159 = vrot.lane.b32.xlu0 %v3065_v50, %s5498_s25 }
 0x548   :  { %2558 = vst.msk [vmem:[#allocation2 + $0xd8] sm:$0xff] %vm1738_vm4, %v2553_v53  ;;  %v3528_v18 = vld [vmem:[#allocation2 + $0x20] sm:$0xff] }
 0x549   :  { %3675 = vmatmul.f32.gmra.mxu0 %v3528_v18  ;;  %5339 = vmatmul.msk.f32.vlgmr.msrb.gmra.mxu3 %vm1495_vm0, %v8865_v3  ;;  %v3544_v53 = vld [vmem:[#allocation2 + $0xa0] sm:$0xff] }
 0x54a   :  { %3764 = vmatmul.f32.gmra.mxu1 %v3561_v27  ;;  %v3548_v18 = vld [vmem:[#allocation2 + $0xc0] sm:$0xff] }
 0x54b   :  { %5326 = vmatmul.msk.f32.gmra.mxu2 %vm1495_vm0, %v8933_v6 }
 0x54c   :  { %v2513_v7 = vpop.permute.xlu1 %2512  ;;  %v2866_v56 = vpop.f32.mrf.mxu3 }
 0x54d   :  { %v2503_v35 = vpop.permute.xlu0 %2502  ;;  %2978 = vst.msk [vmem:[#allocation2 + $0x150] sm:$0xff] %vm1705_vm1, %v2866_v56 }
 0x54e   :  { %2507 = vst.msk [vmem:[#allocation2 + $0xf0] sm:$0xff] %vm1716_vm2, %v2503_v35  ;;  %v3068_v44 = vpop.f32.mrf.mxu2 }
 0x54f   :  { %2517 = vst.msk [vmem:[#allocation2 + $0xf0] sm:$0xff] %vm1727_vm3, %v2513_v7  ;;  %3161 = vrot.lane.b32.xlu0 %v3068_v44, %s5498_s25 }
 0x550   :  { %2527 = vst.msk [vmem:[#allocation2 + $0xf0] sm:$0xff] %vm1738_vm4, %v2523_v58 }
 0x551   :  { %3678 = vmatmul.f32.gmra.mxu0 %v3532_v26  ;;  %5340 = vmatmul.msk.f32.gmra.mxu3 %vm1495_vm0, %v8877_v12 }
 0x553   :  { %5327 = vmatmul.msk.f32.gmra.mxu2 %vm1495_vm0, %v8950_v31 }
 0x554   :  { %v2545_v3 = vpop.permute.xlu1 %2544  ;;  %v2869_v34 = vpop.f32.mrf.mxu3 }
 0x555   :  { %v2535_v59 = vpop.permute.xlu0 %2534  ;;  %2979 = vst.msk [vmem:[#allocation2 + $0x170] sm:$0xff] %vm1705_vm1, %v2869_v34 }
 0x556   :  { %2539 = vst.msk [vmem:[#allocation2 + $0xf8] sm:$0xff] %vm1716_vm2, %v2535_v59  ;;  %v2939_v19 = vpop.permute.xlu2 %2938  ;;  %v3071_v1 = vpop.f32.mrf.mxu2 }
 0x557   :  { %2549 = vst.msk [vmem:[#allocation2 + $0xf8] sm:$0xff] %vm1727_vm3, %v2545_v3  ;;  %3169 = vrot.lane.b32.xlu1 %v3071_v1, %s5499_s20 }
 0x558   :  { %2559 = vst.msk [vmem:[#allocation2 + $0xf8] sm:$0xff] %vm1738_vm4, %v2555_v22 }
 0x559   :  { %3681 = vmatmul.f32.gmra.mxu0 %v3536_v62  ;;  %5341 = vmatmul.msk.f32.gmra.mxu3 %vm1495_vm0, %v8509_v43 }
 0x55b   :  { %5328 = vmatmul.msk.f32.gmra.mxu2 %vm1495_vm0, %v8627_v20 }
 0x55c   :  { %v9109_v12 = vpop.f32.mrf.mxu3 }
 0x55d   :  { %v2919_v61 = vpop.permute.xlu0 %2918 }
 0x55e   :  { %2924 = vst.msk [vmem:[#allocation2 + $0x140] sm:$0xff] %vm1716_vm2, %v2919_v61  ;;  %v2929_v11 = vpop.permute.xlu1 %2928  ;;  %v2941_v54 = vpop.permute.xlu2 %2940 }
 0x55f   :  { %2934 = vst.msk [vmem:[#allocation2 + $0x140] sm:$0xff] %vm1727_vm3, %v2929_v11  ;;  %v3074_v17 = vpop.f32.mrf.mxu2 }
 0x560   :  { %2944 = vst.msk [vmem:[#allocation2 + $0x140] sm:$0xff] %vm1738_vm4, %v2939_v19  ;;  %3171 = vrot.lane.b32.xlu1 %v3074_v17, %s5499_s20 }
 0x561   :  { %3684 = vmatmul.f32.gmra.mxu0 %v3540_v24  ;;  %5342 = vmatmul.msk.f32.gmra.mxu3 %vm1495_vm0, %v8544_v30 }
 0x563   :  { %5329 = vmatmul.msk.f32.gmra.mxu2 %vm1495_vm0, %v8645_v37 }
 0x564   :  { %v9119_v43 = vpop.f32.mrf.mxu3 }
 0x565   :  { %v2921_v20 = vpop.permute.xlu0 %2920 }
 0x566   :  { %2925 = vst.msk [vmem:[#allocation2 + $0x160] sm:$0xff] %vm1716_vm2, %v2921_v20  ;;  %v2931_v41 = vpop.permute.xlu1 %2930 }
 0x567   :  { %2935 = vst.msk [vmem:[#allocation2 + $0x160] sm:$0xff] %vm1727_vm3, %v2931_v41  ;;  %v3077_v5 = vpop.f32.mrf.mxu2 }
 0x568   :  { %2945 = vst.msk [vmem:[#allocation2 + $0x160] sm:$0xff] %vm1738_vm4, %v2941_v54  ;;  %3179 = vrot.lane.b32.xlu2 %v3077_v5, %s5497_s17  ;;  %v5489_v5 = vld [vmem:[%s10303_s3 + $0x80] sm:$0xff] }
 0x569   :  { %3687 = vmatmul.f32.gmra.mxu0 %v3544_v53  ;;  %5343 = vmatmul.msk.f32.gmra.mxu3 %vm1495_vm0, %v8574_v46  ;;  %v3552_v46 = vld [vmem:[#allocation2 + $0xe0] sm:$0xff] }
 0x56b   :  { %5330 = vmatmul.msk.f32.gmra.mxu2 %vm1495_vm0, %v8663_v2 }
 0x56c   :  { %v9129_v30 = vpop.f32.mrf.mxu3 }
 0x56f   :  { %v3080_v7 = vpop.f32.mrf.mxu2  ;;  %v3568_v22 = vld [vmem:[#allocation2 + $0x160] sm:$0xff] }
 0x570   :  { %3181 = vrot.lane.b32.xlu2 %v3080_v7, %s5497_s17  ;;  %v5490_v7 = vld [vmem:[%s10303_s3 + $0x88] sm:$0xff] }
 0x571   :  { %3690 = vmatmul.f32.gmra.mxu0 %v3548_v18  ;;  %5344 = vmatmul.msk.f32.gmra.mxu3 %vm1495_vm0, %v8595_v42  ;;  %v3556_v42 = vld [vmem:[#allocation2 + $0x100] sm:$0xff] }
 0x573   :  { %5331 = vmatmul.msk.f32.gmra.mxu2 %vm1495_vm0, %v8679_v57 }
 0x574   :  { %v9136_v58 = vpop.f32.mrf.mxu3 }
 0x577   :  { %v3083_v35 = vpop.f32.mrf.mxu2 }
 0x578   :  { %3187 = vst.msk [vmem:[#allocation2 + $0x188] sm:$0xff] %vm1705_vm1, %v3083_v35 }
 0x579   :  { %3693 = vmatmul.f32.gmra.mxu0 %v3552_v46  ;;  %5345 = vmatmul.msk.f32.gmra.mxu3 %vm1495_vm0, %v8694_v33  ;;  %v3560_v33 = vld [vmem:[#allocation2 + $0x120] sm:$0xff] }
 0x57b   :  { %5332 = vmatmul.msk.f32.gmra.mxu2 %vm1495_vm0, %v8701_v47 }
 0x57c   :  { %v9143_v56 = vpop.f32.mrf.mxu3 }
 0x57f   :  { %v3086_v50 = vpop.f32.mrf.mxu2 }
 0x580   :  { %3188 = vst.msk [vmem:[#allocation2 + $0x1a8] sm:$0xff] %vm1705_vm1, %v3086_v50 }
 0x581   :  { %3696 = vmatmul.f32.gmra.mxu0 %v3556_v42  ;;  %5346 = vmatmul.msk.f32.gmra.mxu3 %vm1495_vm0, %v8714_v38  ;;  %v3564_v38 = vld [vmem:[#allocation2 + $0x140] sm:$0xff] }
 0x583   :  { %5333 = vmatmul.msk.f32.gmra.mxu2 %vm1495_vm0, %v8721_v36 }
 0x584   :  { %v9150_v26 = vpop.f32.mrf.mxu3 }
 0x587   :  { %v3089_v59 = vpop.f32.mrf.mxu2 }
 0x588   :  { %3191 = vrot.lane.b32.xlu0 %v3089_v59, %s5498_s25 }
 0x589   :  { %3699 = vmatmul.f32.gmra.mxu0 %v3560_v33  ;;  %5347 = vmatmul.msk.f32.gmra.mxu3 %vm1495_vm0, %v8732_v4 }
 0x58b   :  { %5334 = vmatmul.msk.f32.gmra.mxu2 %vm1495_vm0, %v8743_v10 }
 0x58c   :  { %v2890_v3 = vpop.f32.mrf.mxu3 }
 0x58d   :  { %3010 = vst.msk [vmem:[#allocation2 + $0x158] sm:$0xff] %vm1705_vm1, %v2890_v3  ;;  %v5491_v3 = vld [vmem:[%s10303_s3 + $0xa8] sm:$0xff] }
 0x58e   :  { %v2951_v34 = vpop.permute.xlu0 %2950 }
 0x58f   :  { %2956 = vst.msk [vmem:[#allocation2 + $0x148] sm:$0xff] %vm1716_vm2, %v2951_v34  ;;  %v3092_v44 = vpop.f32.mrf.mxu2 }
 0x590   :  { %3193 = vrot.lane.b32.xlu0 %v3092_v44, %s5498_s25 }
 0x591   :  { %3702 = vmatmul.f32.gmra.mxu0 %v3564_v38  ;;  %5348 = vmatmul.msk.f32.gmra.mxu3 %vm1495_vm0, %v8753_v48 }
 0x593   :  { %5335 = vmatmul.msk.f32.gmra.mxu2 %vm1495_vm0, %v10520_v13 }
 0x594   :  { %v2893_v4 = vpop.f32.mrf.mxu3 }
 0x595   :  { %3011 = vst.msk [vmem:[#allocation2 + $0x178] sm:$0xff] %vm1705_vm1, %v2893_v4 }
 0x596   :  { %v2953_v62 = vpop.permute.xlu0 %2952 }
 0x597   :  { %2957 = vst.msk [vmem:[#allocation2 + $0x168] sm:$0xff] %vm1716_vm2, %v2953_v62  ;;  %v2971_v45 = vpop.permute.xlu2 %2970  ;;  %v3095_v19 = vpop.f32.mrf.mxu2 }
 0x598   :  { %3201 = vrot.lane.b32.xlu1 %v3095_v19, %s5499_s20 }
 0x599   :  { %3705 = vmatmul.f32.gmra.mxu0 %v3568_v22  ;;  %5349 = vmatmul.msk.f32.gmra.mxu3 %vm1495_vm0, %v8774_v32 }
 0x59b   :  { %5336 = vmatmul.msk.f32.gmra.mxu2 %vm1495_vm0, %v8783_v49 }
 0x59c   :  { %v9171_v48 = vpop.f32.mrf.mxu3 }
 0x59f   :  { %v2961_v61 = vpop.permute.xlu1 %2960  ;;  %v2973_v11 = vpop.permute.xlu2 %2972 }
 0x5a0   :  { %2966 = vst.msk [vmem:[#allocation2 + $0x148] sm:$0xff] %vm1727_vm3, %v2961_v61  ;;  %v3098_v27 = vpop.f32.mrf.mxu2 }
 0x5a1   :  { %2976 = vst.msk [vmem:[#allocation2 + $0x148] sm:$0xff] %vm1738_vm4, %v2971_v45  ;;  %5350 = vmatmul.msk.f32.gmra.mxu3 %vm1495_vm0, %v8805_v60  ;;  %3203 = vrot.lane.b32.xlu1 %v3098_v27, %s5499_s20 }
 0x5a3   :  { %5337 = vmatmul.msk.f32.gmra.mxu2 %vm1495_vm0, %v8815_v9 }
 0x5a4   :  { %v9180_v32 = vpop.f32.mrf.mxu3 }
 0x5a7   :  { %v2963_v24 = vpop.permute.xlu1 %2962 }
 0x5a8   :  { %2967 = vst.msk [vmem:[#allocation2 + $0x168] sm:$0xff] %vm1727_vm3, %v2963_v24  ;;  %v3565_v1 = vld [vmem:[#allocation2 + $0x148] sm:$0xff]  ;;  %v3101_v41 = vpop.f32.mrf.mxu2 }
 0x5a9   :  { %2977 = vst.msk [vmem:[#allocation2 + $0x168] sm:$0xff] %vm1738_vm4, %v2973_v11  ;;  %5351 = vmatmul.msk.f32.gmra.mxu3 %vm1495_vm0, %v8835_v40  ;;  %3767 = vmatmul.f32.gmra.mxu1 %v3565_v1  ;;  %v5487_v40 = vld [vmem:[%s10303_s3 + $0x70] sm:$0xff] }
 0x5aa   :  { %3211 = vrot.lane.b32.xlu2 %v3101_v41, %s5497_s17 }
 0x5ab   :  { %5338 = vmatmul.msk.f32.gmra.mxu2 %vm1495_vm0, %v8845_v23 }
 0x5ac   :  { %v9189_v60 = vpop.f32.mrf.mxu3 }
 0x5b0   :  { %v3569_v20 = vld [vmem:[#allocation2 + $0x168] sm:$0xff]  ;;  %v3104_v17 = vpop.f32.mrf.mxu2 }
 0x5b1   :  { %5352 = vmatmul.msk.f32.gmra.mxu3 %vm1495_vm0, %v8857_v15  ;;  %3770 = vmatmul.f32.gmra.mxu1 %v3569_v20  ;;  %v5488_v15 = vld [vmem:[%s10303_s3 + $0x78] sm:$0xff] }
 0x5b2   :  { %3213 = vrot.lane.b32.xlu2 %v3104_v17, %s5497_s17 }
 0x5b4   :  { %v9193_v53 = vpop.f32.mrf.mxu3 }
 0x5b8   :  { %v3107_v59 = vpop.f32.mrf.mxu2 }
 0x5b9   :  { %5353 = vmatmul.msk.f32.gmra.mxu3 %vm1495_vm0, %v5487_v40  ;;  %v3160_v38 = vpop.permute.xlu0 %3159  ;;  %3219 = vst.msk [vmem:[#allocation2 + $0x190] sm:$0xff] %vm1705_vm1, %v3107_v59  ;;  %v3630_v59 = vld [vmem:[%s10304_s4 + $0x150] sm:$0xff] }
 0x5ba   :  { %3165 = vst.msk [vmem:[#allocation2 + $0x180] sm:$0xff] %vm1716_vm2, %v3160_v38 }
 0x5bc   :  { %v9200_v54 = vpop.f32.mrf.mxu3 }
 0x5c1   :  { %5354 = vmatmul.msk.f32.gmra.mxu3 %vm1495_vm0, %v5488_v15  ;;  %v9266_v15 = vpop.f32.mrf.mxu0 }
 0x5c2   :  { %v3180_v34 = vpop.permute.xlu2 %3179 }
 0x5c4   :  { %v9207_v18 = vpop.f32.mrf.mxu3 }
 0x5c9   :  { %5355 = vmatmul.msk.f32.gmra.mxu3 %vm1495_vm0, %v5489_v5 }
 0x5ca   :  { %v3182_v62 = vpop.permute.xlu2 %3181 }
 0x5cc   :  { %v3300_v46 = vpop.f32.mrf.mxu3 }
 0x5cd   :  { %3396 = vst.msk [vmem:[#allocation2 + $0x1c0] sm:$0xff] %vm1705_vm1, %v3300_v46 }
 0x5d1   :  { %5356 = vmatmul.msk.f32.gmra.mxu3 %vm1495_vm0, %v5490_v7 }
 0x5d4   :  { %v3303_v42 = vpop.f32.mrf.mxu3 }
 0x5d5   :  { %3397 = vst.msk [vmem:[#allocation2 + $0x1e0] sm:$0xff] %vm1705_vm1, %v3303_v42  ;;  %v9277_v42 = vpop.f32.mrf.mxu0 }
 0x5d9   :  { %5357 = vmatmul.msk.f32.gmra.mxu3 %vm1495_vm0, %v8918_v14 }
 0x5dc   :  { %v3306_v35 = vpop.f32.mrf.mxu3 }
 0x5dd   :  { %3400 = vrot.lane.b32.xlu0 %v3306_v35, %s5498_s25 }
 0x5e1   :  { %5358 = vmatmul.msk.f32.gmra.mxu3 %vm1495_vm0, %v8933_v6 }
 0x5e4   :  { %v3309_v33 = vpop.f32.mrf.mxu3 }
 0x5e5   :  { %3402 = vrot.lane.b32.xlu0 %v3309_v33, %s5498_s25  ;;  %v9279_v33 = vpop.f32.mrf.mxu1 }
 0x5e9   :  { %5359 = vmatmul.msk.f32.gmra.mxu3 %vm1495_vm0, %v8950_v31  ;;  %v3170_v31 = vpop.permute.xlu1 %3169 }
 0x5ea   :  { %3175 = vst.msk [vmem:[#allocation2 + $0x180] sm:$0xff] %vm1727_vm3, %v3170_v31  ;;  %v3631_v31 = vld [vmem:[%s10304_s4 + $0x158] sm:$0xff] }
 0x5eb   :  { %3185 = vst.msk [vmem:[#allocation2 + $0x180] sm:$0xff] %vm1738_vm4, %v3180_v34 }
 0x5ec   :  { %v3312_v50 = vpop.f32.mrf.mxu3 }
 0x5ed   :  { %3410 = vrot.lane.b32.xlu1 %v3312_v50, %s5499_s20  ;;  %v9288_v50 = vpop.f32.mrf.mxu0 }
 0x5f1   :  { %5360 = vmatmul.msk.f32.gmra.mxu3 %vm1495_vm0, %v5491_v3  ;;  %v3172_v22 = vpop.permute.xlu1 %3171  ;;  %v9293_v3 = vpop.f32.mrf.mxu1 }
 0x5f2   :  { %v3572_v11 = vld [vmem:[#allocation2 + $0x180] sm:$0xff] }
 0x5f3   :  { %3708 = vmatmul.f32.gmra.mxu0 %v3572_v11  ;;  %v3621_v11 = vld [vmem:[%s10304_s4 + $0x108] sm:$0xff] }
 0x5f4   :  { %v3315_v14 = vpop.f32.mrf.mxu3 }
 0x5f5   :  { %3412 = vrot.lane.b32.xlu1 %v3315_v14, %s5499_s20 }
 0x5f9   :  { %5361 = vmatmul.msk.f32.gmra.mxu3 %vm1495_vm0, %v8645_v37  ;;  %v3162_v37 = vpop.permute.xlu0 %3161  ;;  %v9315_v38 = vpop.f32.mrf.mxu1 }
 0x5fa   :  { %3166 = vst.msk [vmem:[#allocation2 + $0x1a0] sm:$0xff] %vm1716_vm2, %v3162_v37  ;;  %v3628_v37 = vld [vmem:[%s10304_s4 + $0x140] sm:$0xff] }
 0x5fb   :  { %3176 = vst.msk [vmem:[#allocation2 + $0x1a0] sm:$0xff] %vm1727_vm3, %v3172_v22  ;;  %v3627_v22 = vld [vmem:[%s10304_s4 + $0x138] sm:$0xff] }
 0x5fc   :  { %v3318_v6 = vpop.f32.mrf.mxu3  ;;  %3186 = vst.msk [vmem:[#allocation2 + $0x1a0] sm:$0xff] %vm1738_vm4, %v3182_v62 }
 0x5fd   :  { %3420 = vrot.lane.b32.xlu2 %v3318_v6, %s5497_s17  ;;  %v3634_v6 = vld [vmem:[%s10304_s4 + $0x170] sm:$0xff] }
 0x601   :  { %5362 = vmatmul.msk.f32.gmra.mxu3 %vm1495_vm0, %v8663_v2  ;;  %v3110_v2 = vpop.f32.mrf.mxu2  ;;  %v3192_v45 = vpop.permute.xlu0 %3191 }
 0x602   :  { %3220 = vst.msk [vmem:[#allocation2 + $0x1b0] sm:$0xff] %vm1705_vm1, %v3110_v2  ;;  %v3626_v2 = vld [vmem:[%s10304_s4 + $0x130] sm:$0xff] }
 0x603   :  { %3197 = vst.msk [vmem:[#allocation2 + $0x188] sm:$0xff] %vm1716_vm2, %v3192_v45  ;;  %v3576_v17 = vld [vmem:[#allocation2 + $0x1a0] sm:$0xff] }
 0x604   :  { %v3321_v4 = vpop.f32.mrf.mxu3  ;;  %v3212_v61 = vpop.permute.xlu2 %3211  ;;  %3711 = vmatmul.f32.gmra.mxu0 %v3576_v17 }
 0x605   :  { %3422 = vrot.lane.b32.xlu2 %v3321_v4, %s5497_s17 }
 0x609   :  { %5363 = vmatmul.msk.f32.gmra.mxu3 %vm1495_vm0, %v8679_v57  ;;  %v9253_v19 = vpop.f32.mrf.mxu2  ;;  %v3194_v1 = vpop.permute.xlu0 %3193 }
 0x60a   :  { %v3202_v57 = vpop.permute.xlu1 %3201  ;;  %3198 = vst.msk [vmem:[#allocation2 + $0x1a8] sm:$0xff] %vm1716_vm2, %v3194_v1 }
 0x60b   :  { %3207 = vst.msk [vmem:[#allocation2 + $0x188] sm:$0xff] %vm1727_vm3, %v3202_v57 }
 0x60c   :  { %v3324_v44 = vpop.f32.mrf.mxu3  ;;  %3217 = vst.msk [vmem:[#allocation2 + $0x188] sm:$0xff] %vm1738_vm4, %v3212_v61  ;;  %v3214_v27 = vpop.permute.xlu2 %3213  ;;  %v3624_v61 = vld [vmem:[%s10304_s4 + $0x120] sm:$0xff] }
 0x60d   :  { %3428 = vst.msk [vmem:[#allocation2 + $0x1c8] sm:$0xff] %vm1705_vm1, %v3324_v44  ;;  %v3625_v44 = vld [vmem:[%s10304_s4 + $0x128] sm:$0xff] }
 0x611   :  { %5364 = vmatmul.msk.f32.gmra.mxu3 %vm1495_vm0, %v8701_v47  ;;  %v9261_v47 = vpop.f32.mrf.mxu2 }
 0x613   :  { %v3204_v41 = vpop.permute.xlu1 %3203  ;;  %v3573_v40 = vld [vmem:[#allocation2 + $0x188] sm:$0xff] }
 0x614   :  { %v3327_v24 = vpop.f32.mrf.mxu3  ;;  %3208 = vst.msk [vmem:[#allocation2 + $0x1a8] sm:$0xff] %vm1727_vm3, %v3204_v41  ;;  %3773 = vmatmul.f32.gmra.mxu1 %v3573_v40 }
 0x615   :  { %3429 = vst.msk [vmem:[#allocation2 + $0x1e8] sm:$0xff] %vm1705_vm1, %v3327_v24  ;;  %v3622_v24 = vld [vmem:[%s10304_s4 + $0x110] sm:$0xff] }
 0x616   :  { %3218 = vst.msk [vmem:[#allocation2 + $0x1a8] sm:$0xff] %vm1738_vm4, %v3214_v27  ;;  %v3620_v27 = vld [vmem:[%s10304_s4 + $0x100] sm:$0xff] }
 0x619   :  { %5365 = vmatmul.msk.f32.gmra.mxu3 %vm1495_vm0, %v8721_v36  ;;  %v9270_v36 = vpop.f32.mrf.mxu2 }
 0x61c   :  { %v3330_v20 = vpop.f32.mrf.mxu3 }
 0x61d   :  { %3432 = vrot.lane.b32.xlu0 %v3330_v20, %s5498_s25  ;;  %v3577_v46 = vld [vmem:[#allocation2 + $0x1a8] sm:$0xff] }
 0x61e   :  { %3776 = vmatmul.f32.gmra.mxu1 %v3577_v46 }
 0x621   :  { %5366 = vmatmul.msk.f32.gmra.mxu3 %vm1495_vm0, %v8743_v10  ;;  %v9275_v7 = vpop.f32.mrf.mxu2 }
 0x624   :  { %v3333_v5 = vpop.f32.mrf.mxu3 }
 0x625   :  { %3434 = vrot.lane.b32.xlu0 %v3333_v5, %s5498_s25 }
 0x629   :  { %5367 = vmatmul.msk.f32.gmra.mxu3 %vm1495_vm0, %v10520_v13  ;;  %v9286_v10 = vpop.f32.mrf.mxu2 }
 0x62c   :  { %v3336_v35 = vpop.f32.mrf.mxu3 }
 0x62d   :  { %2741 = vrot.lane.b32.xlu0 %v8901_v29, %s5498_s25  ;;  %3442 = vrot.lane.b32.xlu1 %v3336_v35, %s5499_s20  ;;  %v3635_v29 = vld [vmem:[%s10304_s4 + $0x178] sm:$0xff] }
 0x62e   :  { %3786 = vmatpush.msra.mxu0 %v3635_v29 }
 0x630   :  { %3787 = vmatpush.msra.mxu0 %v3634_v6 }
 0x631   :  { %5368 = vmatmul.msk.f32.gmra.mxu3 %vm1495_vm0, %v8783_v49  ;;  %v9300_v49 = vpop.f32.mrf.mxu2 }
 0x634   :  { %v3339_v13 = vpop.f32.mrf.mxu3 }
 0x635   :  { %2773 = vrot.lane.b32.xlu0 %v8998_v63, %s5498_s25  ;;  %3444 = vrot.lane.b32.xlu1 %v3339_v13, %s5499_s20  ;;  %v9308_v63 = vpop.f32.mrf.mxu0 }
 0x639   :  { %5369 = vmatmul.msk.f32.gmra.mxu3 %vm1495_vm0, %v8815_v9  ;;  %v3633_v9 = vld [vmem:[%s10304_s4 + $0x168] sm:$0xff] }
 0x63a   :  { %3788 = vmatpush.msra.mxu0 %v3633_v9  ;;  %v3649_v9 = vld [vmem:[%s10304_s4 + $0x1e8] sm:$0xff] }
 0x63c   :  { %v3342_v14 = vpop.f32.mrf.mxu3 }
 0x63d   :  { %3452 = vrot.lane.b32.xlu2 %v3342_v14, %s5497_s17  ;;  %2743 = vrot.lane.b32.xlu0 %v8912_v8, %s5498_s25  ;;  %v3632_v8 = vld [vmem:[%s10304_s4 + $0x160] sm:$0xff]  ;;  %v9337_v4 = vpop.f32.mrf.mxu0 }
 0x63e   :  { %2751 = vrot.lane.b32.xlu1 %v8928_v21, %s5499_s20  ;;  %v3131_v21 = vpop.f32.mrf.mxu2  ;;  %3789 = vmatpush.msra.mxu0 %v3632_v8  ;;  %v3530_v8 = vld [vmem:[#allocation2 + $0x30] sm:$0xff] }
 0x63f   :  { %3251 = vst.msk [vmem:[#allocation2 + $0x198] sm:$0xff] %vm1705_vm1, %v3131_v21 }
 0x640   :  { %3790 = vmatpush.msra.mxu0 %v3631_v31 }
 0x641   :  { %5370 = vmatmul.msk.f32.gmra.mxu3 %vm1495_vm0, %v8845_v23  ;;  %v3629_v23 = vld [vmem:[%s10304_s4 + $0x148] sm:$0xff] }
 0x642   :  { %3791 = vmatpush.msra.mxu0 %v3630_v59  ;;  %v3645_v59 = vld [vmem:[%s10304_s4 + $0x1c8] sm:$0xff] }
 0x644   :  { %v3345_v34 = vpop.f32.mrf.mxu3  ;;  %3792 = vmatpush.msra.mxu0 %v3629_v23  ;;  %v3534_v23 = vld [vmem:[#allocation2 + $0x50] sm:$0xff] }
 0x645   :  { %3454 = vrot.lane.b32.xlu2 %v3345_v34, %s5497_s17  ;;  %2775 = vrot.lane.b32.xlu0 %v9019_v52, %s5498_s25  ;;  %v3646_v34 = vld [vmem:[%s10304_s4 + $0x1d0] sm:$0xff] }
 0x646   :  { %2783 = vrot.lane.b32.xlu1 %v9038_v28, %s5499_s20  ;;  %v3134_v52 = vpop.f32.mrf.mxu2  ;;  %3793 = vmatpush.msra.mxu0 %v3628_v37  ;;  %v9346_v28 = vpop.f32.mrf.mxu1 }
 0x647   :  { %3252 = vst.msk [vmem:[#allocation2 + $0x1b8] sm:$0xff] %vm1705_vm1, %v3134_v52  ;;  %v3644_v52 = vld [vmem:[%s10304_s4 + $0x1c0] sm:$0xff] }
 0x648   :  { %3794 = vmatpush.msra.mxu0 %v3627_v22 }
 0x64a   :  { %3795 = vmatpush.msra.mxu0 %v3626_v2  ;;  %v3642_v2 = vld [vmem:[%s10304_s4 + $0x1b0] sm:$0xff] }
 0x64c   :  { %v3348_v62 = vpop.f32.mrf.mxu3  ;;  %3796 = vmatpush.msra.mxu0 %v3625_v44 }
 0x64d   :  { %3460 = vst.msk [vmem:[#allocation2 + $0x1d0] sm:$0xff] %vm1705_vm1, %v3348_v62  ;;  %2761 = vrot.lane.b32.xlu2 %v8959_v16, %s5497_s17  ;;  %2982 = vrot.lane.b32.xlu0 %v9109_v12, %s5498_s25  ;;  %v3623_v16 = vld [vmem:[%s10304_s4 + $0x118] sm:$0xff]  ;;  %v9368_v12 = vpop.f32.mrf.mxu0 }
 0x64e   :  { %2753 = vrot.lane.b32.xlu1 %v8943_v0, %s5499_s20  ;;  %3797 = vmatpush.msra.mxu0 %v3624_v61  ;;  %v9370_v0 = vpop.f32.mrf.mxu1  ;;  %v3137_v46 = vpop.f32.mrf.mxu2 }
 0x64f   :  { %v3401_v45 = vpop.permute.xlu0 %3400 }
 0x650   :  { %3406 = vst.msk [vmem:[#allocation2 + $0x1c0] sm:$0xff] %vm1716_vm2, %v3401_v45  ;;  %3798 = vmatpush.msra.mxu0 %v3623_v16  ;;  %v3641_v45 = vld [vmem:[%s10304_s4 + $0x1a8] sm:$0xff]  ;;  %v3538_v16 = vld [vmem:[#allocation2 + $0x70] sm:$0xff] }
 0x652   :  { %3799 = vmatpush.msra.mxu0 %v3622_v24 }
 0x654   :  { %v3351_v57 = vpop.f32.mrf.mxu3  ;;  %3800 = vmatpush.msra.mxu0 %v3621_v11 }
 0x655   :  { %3461 = vst.msk [vmem:[#allocation2 + $0x1f0] sm:$0xff] %vm1705_vm1, %v3351_v57  ;;  %2793 = vrot.lane.b32.xlu2 %v9054_v39, %s5497_s17  ;;  %3014 = vrot.lane.b32.xlu0 %v9171_v48, %s5498_s25  ;;  %v9389_v39 = vpop.f32.mrf.mxu0 }
 0x656   :  { %2785 = vrot.lane.b32.xlu1 %v9046_v51, %s5499_s20  ;;  %3801 = vmatpush.msra.mxu0 %v3620_v27  ;;  %v9393_v20 = vpop.f32.mrf.mxu1  ;;  %v3140_v29 = vpop.f32.mrf.mxu2  ;;  %v9521_v27 = vld [vmem:[%s10305_s5] ss:$0 sm:$0xff] }
 0x657   :  { %v3403_v1 = vpop.permute.xlu0 %3402  ;;  %v3421_v51 = vpop.permute.xlu2 %3420 }
 0x658   :  { %3407 = vst.msk [vmem:[#allocation2 + $0x1e0] sm:$0xff] %vm1716_vm2, %v3403_v1  ;;  %v3638_v1 = vld [vmem:[%s10304_s4 + $0x190] sm:$0xff] }
 0x65c   :  { %v9391_v48 = vpop.f32.mrf.mxu3 }
 0x65d   :  { %2763 = vrot.lane.b32.xlu2 %v8972_v55, %s5497_s17  ;;  %2984 = vrot.lane.b32.xlu0 %v9119_v43, %s5498_s25  ;;  %v9411_v55 = vpop.f32.mrf.mxu0 }
 0x65e   :  { %2992 = vrot.lane.b32.xlu1 %v9129_v30, %s5499_s20  ;;  %v9405_v17 = vpop.f32.mrf.mxu1 }
 0x65f   :  { %v3411_v41 = vpop.permute.xlu1 %3410  ;;  %v3423_v30 = vpop.permute.xlu2 %3422 }
 0x660   :  { %3416 = vst.msk [vmem:[#allocation2 + $0x1c0] sm:$0xff] %vm1727_vm3, %v3411_v41 }
 0x661   :  { %3426 = vst.msk [vmem:[#allocation2 + $0x1c0] sm:$0xff] %vm1738_vm4, %v3421_v51  ;;  %v3637_v51 = vld [vmem:[%s10304_s4 + $0x188] sm:$0xff] }
 0x664   :  { %v9403_v40 = vpop.f32.mrf.mxu3 }
 0x665   :  { %2795 = vrot.lane.b32.xlu2 %v9064_v25, %s5497_s17  ;;  %3016 = vrot.lane.b32.xlu0 %v9180_v32, %s5498_s25  ;;  %v9427_v32 = vpop.f32.mrf.mxu0 }
 0x666   :  { %3024 = vrot.lane.b32.xlu1 %v9189_v60, %s5499_s20  ;;  %v9425_v25 = vpop.f32.mrf.mxu1 }
 0x667   :  { %v3413_v43 = vpop.permute.xlu1 %3412 }
 0x668   :  { %3417 = vst.msk [vmem:[#allocation2 + $0x1e0] sm:$0xff] %vm1727_vm3, %v3413_v43  ;;  %v3580_v5 = vld [vmem:[#allocation2 + $0x1c0] sm:$0xff] }
 0x669   :  { %3427 = vst.msk [vmem:[#allocation2 + $0x1e0] sm:$0xff] %vm1738_vm4, %v3423_v30  ;;  %3714 = vmatmul.f32.gmra.mxu0 %v3580_v5  ;;  %v3542_v30 = vld [vmem:[#allocation2 + $0x90] sm:$0xff]  ;;  %v3636_v5 = vld [vmem:[%s10304_s4 + $0x180] sm:$0xff] }
 0x66c   :  { %v9417_v35 = vpop.f32.mrf.mxu3 }
 0x66d   :  { %3002 = vrot.lane.b32.xlu2 %v9143_v56, %s5497_s17  ;;  %3223 = vrot.lane.b32.xlu0 %v9253_v19, %s5498_s25  ;;  %v3651_v19 = vld [vmem:[%s10304_s4 + $0x1f8] sm:$0xff]  ;;  %v9441_v14 = vpop.f32.mrf.mxu0 }
 0x66e   :  { %2994 = vrot.lane.b32.xlu1 %v9136_v58, %s5499_s20  ;;  %v9436_v56 = vpop.f32.mrf.mxu1  ;;  %v3526_v58 = vld [vmem:[#allocation2 + $0x10] sm:$0xff]  ;;  %3851 = vmatpush.msrb.mxu1 %v3651_v19 }
 0x670   :  { %v3584_v60 = vld [vmem:[#allocation2 + $0x1e0] sm:$0xff] }
 0x671   :  { %3717 = vmatmul.f32.gmra.mxu0 %v3584_v60 }
 0x674   :  { %v9429_v13 = vpop.f32.mrf.mxu3 }
 0x675   :  { %3034 = vrot.lane.b32.xlu2 %v9200_v54, %s5497_s17  ;;  %3255 = vrot.lane.b32.xlu0 %v3137_v46, %s5498_s25  ;;  %v3650_v54 = vld [vmem:[%s10304_s4 + $0x1f0] sm:$0xff] }
 0x676   :  { %3026 = vrot.lane.b32.xlu1 %v9193_v53, %s5499_s20  ;;  %v3143_v53 = vpop.f32.mrf.mxu2  ;;  %3852 = vmatpush.msrb.mxu1 %v3650_v54  ;;  %v9457_v31 = vpop.f32.mrf.mxu1 }
 0x678   :  { %3853 = vmatpush.msrb.mxu1 %v3649_v9 }
 0x679   :  { %3802 = vmatmul.f32.vlgmr.msra.gmra.mxu0 %v3526_v58 }
 0x67c   :  { %v9443_v6 = vpop.f32.mrf.mxu3 }
 0x67d   :  { %3004 = vrot.lane.b32.xlu2 %v9150_v26, %s5497_s17  ;;  %3225 = vrot.lane.b32.xlu0 %v9261_v47, %s5498_s25  ;;  %v3648_v26 = vld [vmem:[%s10304_s4 + $0x1e0] sm:$0xff]  ;;  %v3647_v47 = vld [vmem:[%s10304_s4 + $0x1d8] sm:$0xff] }
 0x67e   :  { %3233 = vrot.lane.b32.xlu1 %v9270_v36, %s5499_s20  ;;  %3854 = vmatpush.msrb.mxu1 %v3648_v26  ;;  %v9465_v36 = vpop.f32.mrf.mxu0  ;;  %v3146_v37 = vpop.f32.mrf.mxu2 }
 0x67f   :  { %v9479_v22 = vpop.f32.mrf.mxu1 }
 0x680   :  { %3855 = vmatpush.msrb.mxu1 %v3647_v47  ;;  %v3550_v47 = vld [vmem:[#allocation2 + $0xd0] sm:$0xff] }
 0x681   :  { %3805 = vmatmul.f32.gmra.mxu0 %v3530_v8 }
 0x682   :  { %3856 = vmatpush.msrb.mxu1 %v3646_v34 }
 0x684   :  { %v9467_v21 = vpop.f32.mrf.mxu3  ;;  %3857 = vmatpush.msrb.mxu1 %v3645_v59 }
 0x685   :  { %3036 = vrot.lane.b32.xlu2 %v9207_v18, %s5497_s17  ;;  %3257 = vrot.lane.b32.xlu0 %v3140_v29, %s5498_s25  ;;  %v3643_v18 = vld [vmem:[%s10304_s4 + $0x1b8] sm:$0xff] }
 0x686   :  { %3265 = vrot.lane.b32.xlu1 %v3143_v53, %s5499_s20  ;;  %3858 = vmatpush.msrb.mxu1 %v3644_v52  ;;  %v9495_v44 = vpop.f32.mrf.mxu0  ;;  %v3149_v57 = vpop.f32.mrf.mxu2  ;;  %v3546_v53 = vld [vmem:[#allocation2 + $0xb0] sm:$0xff] }
 0x687   :  { %v9509_v24 = vpop.f32.mrf.mxu1  ;;  %v3554_v52 = vld [vmem:[#allocation2 + $0xf0] sm:$0xff] }
 0x688   :  { %3859 = vmatpush.msrb.mxu1 %v3643_v18 }
 0x689   :  { %3808 = vmatmul.f32.gmra.mxu0 %v3534_v23 }
 0x68a   :  { %3860 = vmatpush.msrb.mxu1 %v3642_v2 }
 0x68c   :  { %v3372_v62 = vpop.f32.mrf.mxu3  ;;  %3861 = vmatpush.msrb.mxu1 %v3641_v45 }
 0x68d   :  { %3492 = vst.msk [vmem:[#allocation2 + $0x1d8] sm:$0xff] %vm1705_vm1, %v3372_v62  ;;  %3243 = vrot.lane.b32.xlu2 %v9286_v10, %s5497_s17  ;;  %3464 = vrot.lane.b32.xlu0 %v9391_v48, %s5498_s25  ;;  %v3640_v10 = vld [vmem:[%s10304_s4 + $0x1a0] sm:$0xff] }
 0x68e   :  { %3235 = vrot.lane.b32.xlu1 %v9275_v7, %s5499_s20  ;;  %3862 = vmatpush.msrb.mxu1 %v3640_v10  ;;  %v3639_v7 = vld [vmem:[%s10304_s4 + $0x198] sm:$0xff]  ;;  %v3709_v48 = vpop.f32.mrf.mxu0  ;;  %v3152_v9 = vpop.f32.mrf.mxu2 }
 0x68f   :  { %v3433_v61 = vpop.permute.xlu0 %3432 }
 0x690   :  { %3438 = vst.msk [vmem:[#allocation2 + $0x1c8] sm:$0xff] %vm1716_vm2, %v3433_v61  ;;  %3863 = vmatpush.msrb.mxu1 %v3639_v7 }
 0x691   :  { %3811 = vmatmul.f32.gmra.mxu0 %v3538_v16  ;;  %v3774_v46 = vpop.f32.mrf.mxu1  ;;  %v3527_v16 = vld [vmem:[#allocation2 + $0x18] sm:$0xff] }
 0x692   :  { %3864 = vmatpush.msrb.mxu1 %v3638_v1 }
 0x694   :  { %v3375_v11 = vpop.f32.mrf.mxu3  ;;  %3865 = vmatpush.msrb.mxu1 %v3637_v51 }
 0x695   :  { %3493 = vst.msk [vmem:[#allocation2 + $0x1f8] sm:$0xff] %vm1705_vm1, %v3375_v11  ;;  %3275 = vrot.lane.b32.xlu2 %v3149_v57, %s5497_s17  ;;  %3466 = vrot.lane.b32.xlu0 %v9403_v40, %s5498_s25  ;;  %v3710_v40 = vadd.f32 %v9521_v27, %v3709_v48  ;;  %v3531_v11 = vld [vmem:[#allocation2 + $0x38] sm:$0xff] }
 0x696   :  { %3267 = vrot.lane.b32.xlu1 %v3146_v37, %s5499_s20  ;;  %3866 = vmatpush.msrb.mxu1 %v3636_v5 }
 0x697   :  { %v3453_v41 = vpop.permute.xlu2 %3452  ;;  %v3435_v43 = vpop.permute.xlu0 %3434  ;;  %v9532_v29 = vadd.f32 %v3774_v46, %v3710_v40 }
 0x698   :  { %3439 = vst.msk [vmem:[#allocation2 + $0x1e8] sm:$0xff] %vm1716_vm2, %v3435_v43 }
 0x699   :  { %3814 = vmatmul.f32.gmra.mxu0 %v3542_v30  ;;  %v3535_v30 = vld [vmem:[#allocation2 + $0x58] sm:$0xff] }
 0x69c   :  { %v3378_v60 = vpop.f32.mrf.mxu3 }
 0x69d   :  { %3245 = vrot.lane.b32.xlu2 %v9300_v49, %s5497_s17  ;;  %3496 = vrot.lane.b32.xlu0 %v3378_v60, %s5498_s25  ;;  %v3539_v60 = vld [vmem:[#allocation2 + $0x78] sm:$0xff] }
 0x69e   :  { %3474 = vrot.lane.b32.xlu1 %v9417_v35, %s5499_s20 }
 0x69f   :  { %v3455_v58 = vpop.permute.xlu2 %3454  ;;  %v2742_v19 = vpop.permute.xlu0 %2741 }
 0x6a0   :  { %2747 = vst.msk [vmem:[#allocation2 + $0x110] sm:$0xff] %vm1716_vm2, %v2742_v19  ;;  %v3443_v54 = vpop.permute.xlu1 %3442 }
 0x6a1   :  { %3448 = vst.msk [vmem:[#allocation2 + $0x1c8] sm:$0xff] %vm1727_vm3, %v3443_v54  ;;  %3817 = vmatmul.f32.gmra.mxu0 %v3546_v53 }
 0x6a2   :  { %3458 = vst.msk [vmem:[#allocation2 + $0x1c8] sm:$0xff] %vm1738_vm4, %v3453_v41 }
 0x6a4   :  { %v3381_v8 = vpop.f32.mrf.mxu3 }
 0x6a5   :  { %3277 = vrot.lane.b32.xlu2 %v3152_v9, %s5497_s17  ;;  %3498 = vrot.lane.b32.xlu0 %v3381_v8, %s5498_s25  ;;  %v3543_v9 = vld [vmem:[#allocation2 + $0x98] sm:$0xff] }
 0x6a6   :  { %3476 = vrot.lane.b32.xlu1 %v9429_v13, %s5499_s20 }
 0x6a7   :  { %v2762_v49 = vpop.permute.xlu2 %2761  ;;  %v2774_v35 = vpop.permute.xlu0 %2773 }
 0x6a8   :  { %2779 = vst.msk [vmem:[#allocation2 + $0x118] sm:$0xff] %vm1716_vm2, %v2774_v35  ;;  %v3445_v26 = vpop.permute.xlu1 %3444 }
 0x6a9   :  { %3449 = vst.msk [vmem:[#allocation2 + $0x1e8] sm:$0xff] %vm1727_vm3, %v3445_v26  ;;  %v3581_v34 = vld [vmem:[#allocation2 + $0x1c8] sm:$0xff]  ;;  %3820 = vmatmul.f32.gmra.mxu0 %v3550_v47  ;;  %v3547_v26 = vld [vmem:[#allocation2 + $0xb8] sm:$0xff] }
 0x6aa   :  { %3459 = vst.msk [vmem:[#allocation2 + $0x1e8] sm:$0xff] %vm1738_vm4, %v3455_v58  ;;  %3779 = vmatmul.f32.gmra.mxu1 %v3581_v34 }
 0x6ac   :  { %v3384_v59 = vpop.f32.mrf.mxu3 }
 0x6ad   :  { %3484 = vrot.lane.b32.xlu2 %v9443_v6, %s5497_s17 }
 0x6ae   :  { %3506 = vrot.lane.b32.xlu1 %v3384_v59, %s5499_s20 }
 0x6af   :  { %v2794_v13 = vpop.permute.xlu2 %2793  ;;  %v2744_v23 = vpop.permute.xlu0 %2743 }
 0x6b0   :  { %2748 = vst.msk [vmem:[#allocation2 + $0x130] sm:$0xff] %vm1716_vm2, %v2744_v23  ;;  %v2752_v37 = vpop.permute.xlu1 %2751  ;;  %v3551_v23 = vld [vmem:[#allocation2 + $0xd8] sm:$0xff] }
 0x6b1   :  { %2757 = vst.msk [vmem:[#allocation2 + $0x110] sm:$0xff] %vm1727_vm3, %v2752_v37  ;;  %v3585_v18 = vld [vmem:[#allocation2 + $0x1e8] sm:$0xff]  ;;  %3823 = vmatmul.f32.gmra.mxu0 %v3554_v52 }
 0x6b2   :  { %2767 = vst.msk [vmem:[#allocation2 + $0x110] sm:$0xff] %vm1738_vm4, %v2762_v49  ;;  %3782 = vmatmul.f32.gmra.mxu1 %v3585_v18 }
 0x6b4   :  { %v3387_v62 = vpop.f32.mrf.mxu3 }
 0x6b5   :  { %3486 = vrot.lane.b32.xlu2 %v9467_v21, %s5497_s17 }
 0x6b6   :  { %3508 = vrot.lane.b32.xlu1 %v3387_v62, %s5499_s20  ;;  %v3555_v62 = vld [vmem:[#allocation2 + $0xf8] sm:$0xff] }
 0x6b7   :  { %v2764_v6 = vpop.permute.xlu2 %2763  ;;  %v2776_v2 = vpop.permute.xlu0 %2775 }
 0x6b8   :  { %2780 = vst.msk [vmem:[#allocation2 + $0x138] sm:$0xff] %vm1716_vm2, %v2776_v2  ;;  %v2784_v45 = vpop.permute.xlu1 %2783 }
 0x6b9   :  { %2789 = vst.msk [vmem:[#allocation2 + $0x118] sm:$0xff] %vm1727_vm3, %v2784_v45  ;;  %v3558_v61 = vld [vmem:[#allocation2 + $0x110] sm:$0xff] }
 0x6ba   :  { %2799 = vst.msk [vmem:[#allocation2 + $0x118] sm:$0xff] %vm1738_vm4, %v2794_v13  ;;  %3826 = vmatmul.f32.gmra.mxu0 %v3558_v61  ;;  %3867 = vmatmul.f32.vlgmr.msrb.gmra.mxu1 %v3527_v16 }
 0x6bc   :  { %v3390_v10 = vpop.f32.mrf.mxu3 }
 0x6bd   :  { %3516 = vrot.lane.b32.xlu2 %v3390_v10, %s5497_s17 }
 0x6bf   :  { %v2796_v57 = vpop.permute.xlu2 %2795  ;;  %v2983_v21 = vpop.permute.xlu0 %2982 }
 0x6c0   :  { %2988 = vst.msk [vmem:[#allocation2 + $0x150] sm:$0xff] %vm1716_vm2, %v2983_v21  ;;  %v2754_v7 = vpop.permute.xlu1 %2753 }
 0x6c1   :  { %2758 = vst.msk [vmem:[#allocation2 + $0x130] sm:$0xff] %vm1727_vm3, %v2754_v7  ;;  %v3559_v16 = vld [vmem:[#allocation2 + $0x118] sm:$0xff] }
 0x6c2   :  { %2768 = vst.msk [vmem:[#allocation2 + $0x130] sm:$0xff] %vm1738_vm4, %v2764_v6  ;;  %3870 = vmatmul.f32.gmra.mxu1 %v3531_v11  ;;  %v9590_v11 = vpop.f32.mrf.mxu0 }
 0x6c4   :  { %v3393_v1 = vpop.f32.mrf.mxu3 }
 0x6c5   :  { %3518 = vrot.lane.b32.xlu2 %v3393_v1, %s5497_s17 }
 0x6c7   :  { %v3003_v48 = vpop.permute.xlu2 %3002  ;;  %v3015_v51 = vpop.permute.xlu0 %3014 }
 0x6c8   :  { %3020 = vst.msk [vmem:[#allocation2 + $0x158] sm:$0xff] %vm1716_vm2, %v3015_v51  ;;  %v2786_v41 = vpop.permute.xlu1 %2785 }
 0x6c9   :  { %2790 = vst.msk [vmem:[#allocation2 + $0x138] sm:$0xff] %vm1727_vm3, %v2786_v41  ;;  %v3562_v43 = vld [vmem:[#allocation2 + $0x130] sm:$0xff] }
 0x6ca   :  { %2800 = vst.msk [vmem:[#allocation2 + $0x138] sm:$0xff] %vm1738_vm4, %v2796_v57  ;;  %3829 = vmatmul.f32.gmra.mxu0 %v3562_v43  ;;  %3873 = vmatmul.f32.gmra.mxu1 %v3535_v30 }
 0x6cf   :  { %v3035_v40 = vpop.permute.xlu2 %3034  ;;  %v2985_v5 = vpop.permute.xlu0 %2984 }
 0x6d0   :  { %2989 = vst.msk [vmem:[#allocation2 + $0x170] sm:$0xff] %vm1716_vm2, %v2985_v5  ;;  %v2993_v46 = vpop.permute.xlu1 %2992 }
 0x6d1   :  { %2998 = vst.msk [vmem:[#allocation2 + $0x150] sm:$0xff] %vm1727_vm3, %v2993_v46  ;;  %v3563_v7 = vld [vmem:[#allocation2 + $0x138] sm:$0xff] }
 0x6d2   :  { %3008 = vst.msk [vmem:[#allocation2 + $0x150] sm:$0xff] %vm1738_vm4, %v3003_v48  ;;  %3876 = vmatmul.f32.gmra.mxu1 %v3539_v60 }
 0x6d7   :  { %v3005_v58 = vpop.permute.xlu2 %3004  ;;  %v3017_v19 = vpop.permute.xlu0 %3016 }
 0x6d8   :  { %3021 = vst.msk [vmem:[#allocation2 + $0x178] sm:$0xff] %vm1716_vm2, %v3017_v19  ;;  %v3025_v54 = vpop.permute.xlu1 %3024 }
 0x6d9   :  { %3030 = vst.msk [vmem:[#allocation2 + $0x158] sm:$0xff] %vm1727_vm3, %v3025_v54  ;;  %v3566_v53 = vld [vmem:[#allocation2 + $0x150] sm:$0xff] }
 0x6da   :  { %3040 = vst.msk [vmem:[#allocation2 + $0x158] sm:$0xff] %vm1738_vm4, %v3035_v40  ;;  %3832 = vmatmul.f32.gmra.mxu0 %v3566_v53  ;;  %3879 = vmatmul.f32.gmra.mxu1 %v3543_v9 }
 0x6df   :  { %v3037_v8 = vpop.permute.xlu2 %3036  ;;  %v3224_v49 = vpop.permute.xlu0 %3223 }
 0x6e0   :  { %3229 = vst.msk [vmem:[#allocation2 + $0x190] sm:$0xff] %vm1716_vm2, %v3224_v49  ;;  %v2995_v35 = vpop.permute.xlu1 %2994  ;;  %v9601_v49 = vpop.f32.mrf.mxu1 }
 0x6e1   :  { %2999 = vst.msk [vmem:[#allocation2 + $0x170] sm:$0xff] %vm1727_vm3, %v2995_v35  ;;  %v3567_v41 = vld [vmem:[#allocation2 + $0x158] sm:$0xff] }
 0x6e2   :  { %3009 = vst.msk [vmem:[#allocation2 + $0x170] sm:$0xff] %vm1738_vm4, %v3005_v58  ;;  %3882 = vmatmul.f32.gmra.mxu1 %v3547_v26 }
 0x6e6   :  { %v3715_v30 = vpop.f32.mrf.mxu0 }
 0x6e7   :  { %v3244_v47 = vpop.permute.xlu2 %3243  ;;  %v3256_v34 = vpop.permute.xlu0 %3255 }
 0x6e8   :  { %3261 = vst.msk [vmem:[#allocation2 + $0x198] sm:$0xff] %vm1716_vm2, %v3256_v34  ;;  %v3027_v59 = vpop.permute.xlu1 %3026 }
 0x6e9   :  { %3031 = vst.msk [vmem:[#allocation2 + $0x178] sm:$0xff] %vm1727_vm3, %v3027_v59  ;;  %v3570_v13 = vld [vmem:[#allocation2 + $0x170] sm:$0xff]  ;;  %v3716_v59 = vadd.f32 %v9521_v27, %v3715_v30 }
 0x6ea   :  { %3041 = vst.msk [vmem:[#allocation2 + $0x178] sm:$0xff] %vm1738_vm4, %v3037_v8  ;;  %3835 = vmatmul.f32.gmra.mxu0 %v3570_v13  ;;  %3885 = vmatmul.f32.gmra.mxu1 %v3551_v23 }
 0x6ee   :  { %v3718_v58 = vpop.f32.mrf.mxu0 }
 0x6ef   :  { %v3276_v37 = vpop.permute.xlu2 %3275  ;;  %v3226_v52 = vpop.permute.xlu0 %3225 }
 0x6f0   :  { %3230 = vst.msk [vmem:[#allocation2 + $0x1b0] sm:$0xff] %vm1716_vm2, %v3226_v52  ;;  %v3234_v18 = vpop.permute.xlu1 %3233 }
 0x6f1   :  { %3239 = vst.msk [vmem:[#allocation2 + $0x190] sm:$0xff] %vm1727_vm3, %v3234_v18  ;;  %v3571_v46 = vld [vmem:[#allocation2 + $0x178] sm:$0xff] }
 0x6f2   :  { %3249 = vst.msk [vmem:[#allocation2 + $0x190] sm:$0xff] %vm1738_vm4, %v3244_v47  ;;  %3888 = vmatmul.f32.gmra.mxu1 %v3555_v62 }
 0x6f6   :  { %v3803_v26 = vpop.f32.mrf.mxu0 }
 0x6f7   :  { %v3246_v6 = vpop.permute.xlu2 %3245  ;;  %v3258_v2 = vpop.permute.xlu0 %3257 }
 0x6f8   :  { %3262 = vst.msk [vmem:[#allocation2 + $0x1b8] sm:$0xff] %vm1716_vm2, %v3258_v2  ;;  %v3266_v45 = vpop.permute.xlu1 %3265 }
 0x6f9   :  { %3271 = vst.msk [vmem:[#allocation2 + $0x198] sm:$0xff] %vm1727_vm3, %v3266_v45  ;;  %v3574_v61 = vld [vmem:[#allocation2 + $0x190] sm:$0xff]  ;;  %v3674_v45 = vadd.f32 %v9521_v27, %v9266_v15  ;;  %v3680_v15 = vadd.f32 %v9521_v27, %v9288_v50 }
 0x6fa   :  { %3281 = vst.msk [vmem:[#allocation2 + $0x198] sm:$0xff] %vm1738_vm4, %v3276_v37  ;;  %3838 = vmatmul.f32.gmra.mxu0 %v3574_v61  ;;  %3891 = vmatmul.f32.gmra.mxu1 %v3559_v16 }
 0x6fe   :  { %v3806_v62 = vpop.f32.mrf.mxu0 }
 0x6ff   :  { %v3465_v10 = vpop.permute.xlu0 %3464  ;;  %v3278_v21 = vpop.permute.xlu2 %3277 }
 0x700   :  { %3470 = vst.msk [vmem:[#allocation2 + $0x1d0] sm:$0xff] %vm1716_vm2, %v3465_v10  ;;  %v3236_v57 = vpop.permute.xlu1 %3235  ;;  %v3739_v10 = vadd.f32 %v9279_v33, %v3674_v45  ;;  %v3745_v33 = vadd.f32 %v9315_v38, %v3680_v15  ;;  %v3698_v45 = vadd.f32 %v9521_v27, %v9427_v32  ;;  %v3713_v32 = vadd.f32 %v9521_v27, %v9590_v11 }
 0x701   :  { %3240 = vst.msk [vmem:[#allocation2 + $0x1b0] sm:$0xff] %vm1727_vm3, %v3236_v57  ;;  %v3575_v9 = vld [vmem:[#allocation2 + $0x198] sm:$0xff]  ;;  %v3704_v11 = vadd.f32 %v9521_v27, %v9465_v36 }
 0x702   :  { %3250 = vst.msk [vmem:[#allocation2 + $0x1b0] sm:$0xff] %vm1738_vm4, %v3246_v6  ;;  %3894 = vmatmul.f32.gmra.mxu1 %v3563_v7  ;;  %v3719_v6 = vadd.f32 %v9521_v27, %v3718_v58 }
 0x706   :  { %v3809_v57 = vpop.f32.mrf.mxu0 }
 0x707   :  { %v3467_v1 = vpop.permute.xlu0 %3466  ;;  %v3485_v43 = vpop.permute.xlu2 %3484 }
 0x708   :  { %3471 = vst.msk [vmem:[#allocation2 + $0x1f0] sm:$0xff] %vm1716_vm2, %v3467_v1  ;;  %v3268_v48 = vpop.permute.xlu1 %3267  ;;  %v3677_v1 = vadd.f32 %v9521_v27, %v9277_v42 }
 0x709   :  { %3272 = vst.msk [vmem:[#allocation2 + $0x1b8] sm:$0xff] %vm1727_vm3, %v3268_v48  ;;  %v3578_v51 = vld [vmem:[#allocation2 + $0x1b0] sm:$0xff] }
 0x70a   :  { %3282 = vst.msk [vmem:[#allocation2 + $0x1b8] sm:$0xff] %vm1738_vm4, %v3278_v21  ;;  %3841 = vmatmul.f32.gmra.mxu0 %v3578_v51  ;;  %3897 = vmatmul.f32.gmra.mxu1 %v3567_v41  ;;  %v3804_v21 = vadd.f32 %v3803_v26, %v3739_v10  ;;  %v3742_v51 = vadd.f32 %v9293_v3, %v3677_v1 }
 0x70b   :  { %v3763_v10 = vadd.f32 %v9436_v56, %v3698_v45  ;;  %v3778_v56 = vadd.f32 %v9601_v49, %v3713_v32  ;;  %v3952_v32 = vld [vmem:[%s10306_s6 + $0xa0] sm:$0xff] }
 0x70c   :  { %v3807_v41 = vadd.f32 %v3806_v62, %v3742_v51 }
 0x70f   :  { %v3497_v40 = vpop.permute.xlu0 %3496  ;;  %v3487_v60 = vpop.permute.xlu2 %3486 }
 0x710   :  { %3502 = vst.msk [vmem:[#allocation2 + $0x1d8] sm:$0xff] %vm1716_vm2, %v3497_v40  ;;  %v3475_v5 = vpop.permute.xlu1 %3474 }
 0x711   :  { %3480 = vst.msk [vmem:[#allocation2 + $0x1d0] sm:$0xff] %vm1727_vm3, %v3475_v5  ;;  %v3579_v34 = vld [vmem:[#allocation2 + $0x1b8] sm:$0xff]  ;;  %v3810_v5 = vadd.f32 %v3809_v57, %v3745_v33 }
 0x712   :  { %3490 = vst.msk [vmem:[#allocation2 + $0x1d0] sm:$0xff] %vm1738_vm4, %v3485_v43  ;;  %3900 = vmatmul.f32.gmra.mxu1 %v3571_v46  ;;  %v3812_v43 = vpop.f32.mrf.mxu0 }
 0x717   :  { %v3499_v19 = vpop.permute.xlu0 %3498  ;;  %v3517_v8 = vpop.permute.xlu2 %3516 }
 0x718   :  { %3503 = vst.msk [vmem:[#allocation2 + $0x1f8] sm:$0xff] %vm1716_vm2, %v3499_v19  ;;  %v3477_v54 = vpop.permute.xlu1 %3476 }
 0x719   :  { %3481 = vst.msk [vmem:[#allocation2 + $0x1f0] sm:$0xff] %vm1727_vm3, %v3477_v54  ;;  %v3582_v53 = vld [vmem:[#allocation2 + $0x1d0] sm:$0xff] }
 0x71a   :  { %3491 = vst.msk [vmem:[#allocation2 + $0x1f0] sm:$0xff] %vm1738_vm4, %v3487_v60  ;;  %3844 = vmatmul.f32.gmra.mxu0 %v3582_v53  ;;  %3903 = vmatmul.f32.gmra.mxu1 %v3575_v9  ;;  %v3683_v60 = vadd.f32 %v9521_v27, %v9308_v63  ;;  %v3815_v58 = vpop.f32.mrf.mxu0  ;;  %v3686_v53 = vadd.f32 %v9521_v27, %v9337_v4 }
 0x71b   :  { %v3689_v63 = vadd.f32 %v9521_v27, %v9368_v12  ;;  %v3692_v4 = vadd.f32 %v9521_v27, %v9389_v39  ;;  %v3695_v12 = vadd.f32 %v9521_v27, %v9411_v55 }
 0x71c   :  { %v3748_v3 = vadd.f32 %v9346_v28, %v3683_v60  ;;  %v3751_v38 = vadd.f32 %v9370_v0, %v3686_v53 }
 0x71e   :  { %v3813_v19 = vadd.f32 %v3812_v43, %v3748_v3 }
 0x71f   :  { %v3519_v23 = vpop.permute.xlu2 %3518 }
 0x720   :  { %v3507_v35 = vpop.permute.xlu1 %3506 }
 0x721   :  { %3512 = vst.msk [vmem:[#allocation2 + $0x1d8] sm:$0xff] %vm1727_vm3, %v3507_v35  ;;  %v3586_v47 = vld [vmem:[#allocation2 + $0x1f0] sm:$0xff] }
 0x722   :  { %3522 = vst.msk [vmem:[#allocation2 + $0x1d8] sm:$0xff] %vm1738_vm4, %v3517_v8  ;;  %3847 = vmatmul.f32.gmra.mxu0 %v3586_v47  ;;  %3906 = vmatmul.f32.gmra.mxu1 %v3579_v34  ;;  %v3818_v9 = vpop.f32.mrf.mxu0  ;;  %v3816_v8 = vadd.f32 %v3815_v58, %v3751_v38  ;;  %v3754_v47 = vadd.f32 %v9393_v20, %v3689_v63 }
 0x723   :  { %v3760_v20 = vadd.f32 %v9425_v25, %v3695_v12 }
 0x724   :  { %v3819_v34 = vadd.f32 %v3818_v9, %v3754_v47 }
 0x727   :  { %v3780_v13 = vpop.f32.mrf.mxu1 }
 0x728   :  { %v9606_v37 = vadd.f32 %v3780_v13, %v3716_v59  ;;  %v3509_v52 = vpop.permute.xlu1 %3508 }
 0x729   :  { %3513 = vst.msk [vmem:[#allocation2 + $0x1f8] sm:$0xff] %vm1727_vm3, %v3509_v52  ;;  %v3583_v18 = vld [vmem:[#allocation2 + $0x1d8] sm:$0xff] }
 0x72a   :  { %3523 = vst.msk [vmem:[#allocation2 + $0x1f8] sm:$0xff] %vm1738_vm4, %v3519_v23  ;;  %3909 = vmatmul.f32.gmra.mxu1 %v3583_v18  ;;  %v3821_v28 = vpop.f32.mrf.mxu0  ;;  %v3757_v23 = vadd.f32 %v9405_v17, %v3692_v4 }
 0x72c   :  { %v3822_v0 = vadd.f32 %v3821_v28, %v3757_v23 }
 0x72f   :  { %v3783_v2 = vpop.f32.mrf.mxu1 }
 0x730   :  { %v9613_v61 = vadd.f32 %v3783_v2, %v3719_v6 }
 0x731   :  { %v3587_v16 = vld [vmem:[#allocation2 + $0x1f8] sm:$0xff] }
 0x732   :  { %3912 = vmatmul.f32.gmra.mxu1 %v3587_v16  ;;  %v3824_v52 = vpop.f32.mrf.mxu0 }
 0x733   :  { %v3825_v6 = vadd.f32 %v3824_v52, %v3760_v20 }
 0x737   :  { %v3868_v7 = vpop.f32.mrf.mxu1 }
 0x738   :  { %v9618_v48 = vadd.f32 %v3868_v7, %v3804_v21 }
 0x73a   :  { %v3827_v16 = vpop.f32.mrf.mxu0 }
 0x73b   :  { %v3828_v17 = vadd.f32 %v3827_v16, %v3763_v10  ;;  %v3939_v16 = vld [vmem:[%s10306_s6 + $0x38] sm:$0xff]  ;;  %v3940_v10 = vld [vmem:[%s10306_s6 + $0x40] sm:$0xff] }
 0x73f   :  { %v3871_v30 = vpop.f32.mrf.mxu1 }
 0x740   :  { %v9623_v40 = vadd.f32 %v3871_v30, %v3807_v41 }
 0x742   :  { %v3917_v45 = vmax.f32 %v9623_v40, 0.0  ;;  %v3936_v40 = vld [vmem:[%s10306_s6 + $0x20] sm:$0xff] }
 0x747   :  { %v3874_v46 = vpop.f32.mrf.mxu1  ;;  %v3830_v7 = vpop.f32.mrf.mxu0 }
 0x748   :  { %v9628_v42 = vadd.f32 %v3874_v46, %v3810_v5 }
 0x74f   :  { %v3877_v54 = vpop.f32.mrf.mxu1 }
 0x750   :  { %v9633_v50 = vadd.f32 %v3877_v54, %v3813_v19  ;;  %v3707_v54 = vadd.f32 %v9521_v27, %v9495_v44 }
 0x757   :  { %v3880_v35 = vpop.f32.mrf.mxu1  ;;  %v3833_v51 = vpop.f32.mrf.mxu0 }
 0x758   :  { %v9638_v26 = vadd.f32 %v3880_v35, %v3816_v8  ;;  %v3701_v8 = vadd.f32 %v9521_v27, %v9441_v14  ;;  %v3772_v35 = vadd.f32 %v9509_v24, %v3707_v54  ;;  %v3955_v54 = vld [vmem:[%s10306_s6 + $0xb8] sm:$0xff] }
 0x75a   :  { %v3920_v20 = vmax.f32 %v9638_v26, 0.0  ;;  %v3937_v26 = vld [vmem:[%s10306_s6 + $0x28] sm:$0xff] }
 0x75f   :  { %v3883_v59 = vpop.f32.mrf.mxu1 }
 0x760   :  { %v9643_v13 = vadd.f32 %v3883_v59, %v3819_v34  ;;  %v3766_v34 = vadd.f32 %v9457_v31, %v3701_v8  ;;  %v3957_v8 = vld [vmem:[%s10306_s6 + $0xc8] sm:$0xff] }
 0x762   :  { %v3831_v23 = vadd.f32 %v3830_v7, %v3766_v34  ;;  %v3921_v12 = vmax.f32 %v9643_v13, 0.0  ;;  %v3932_v13 = vld [vmem:[%s10306_s6] sm:$0xff]  ;;  %v4228_v34 = vld [vmem:[%s10307_s7 + $0x68] sm:$0xff] }
 0x763   :  { %v3944_v7 = vld [vmem:[%s10306_s6 + $0x60] sm:$0xff] }
 0x767   :  { %v3886_v18 = vpop.f32.mrf.mxu1  ;;  %v3836_v41 = vpop.f32.mrf.mxu0 }
 0x768   :  { %v9648_v62 = vadd.f32 %v3886_v18, %v3822_v0  ;;  %v3837_v47 = vadd.f32 %v3836_v41, %v3772_v35  ;;  %v3948_v41 = vld [vmem:[%s10306_s6 + $0x80] sm:$0xff]  ;;  %v3958_v35 = vld [vmem:[%s10306_s6 + $0xd0] sm:$0xff] }
 0x76a   :  { %v3922_v31 = vmax.f32 %v9648_v62, 0.0  ;;  %v3938_v62 = vld [vmem:[%s10306_s6 + $0x30] sm:$0xff] }
 0x76f   :  { %v3889_v2 = vpop.f32.mrf.mxu1 }
 0x770   :  { %v3890_v39 = vadd.f32 %v3889_v2, %v3825_v6  ;;  %v3919_v6 = vmax.f32 %v9633_v50, 0.0  ;;  %v3918_v2 = vmax.f32 %v9628_v42, 0.0  ;;  %v3933_v50 = vld [vmem:[%s10306_s6 + $0x8] sm:$0xff]  ;;  %v3934_v42 = vld [vmem:[%s10306_s6 + $0x10] sm:$0xff] }
 0x772   :  { %v3923_v18 = vmax.f32 %v3890_v39, 0.0  ;;  %v3916_v39 = vmax.f32 %v9618_v48, 0.0  ;;  %v3935_v48 = vld [vmem:[%s10306_s6 + $0x18] sm:$0xff] }
 0x777   :  { %v3892_v57 = vpop.f32.mrf.mxu1  ;;  %v3839_v30 = vpop.f32.mrf.mxu0 }
 0x778   :  { %v3893_v21 = vadd.f32 %v3892_v57, %v3828_v17  ;;  %v3840_v49 = vadd.f32 %v3839_v30, %v9532_v29  ;;  %v3941_v17 = vld [vmem:[%s10306_s6 + $0x48] sm:$0xff]  ;;  %v3942_v57 = vld [vmem:[%s10306_s6 + $0x50] sm:$0xff] }
 0x779   :  { %v3949_v30 = vld [vmem:[%s10306_s6 + $0x88] sm:$0xff] }
 0x77a   :  { %v3924_v52 = vmax.f32 %v3893_v21, 0.0  ;;  %v3943_v21 = vld [vmem:[%s10306_s6 + $0x58] sm:$0xff] }
 0x77f   :  { %v3895_v1 = vpop.f32.mrf.mxu1 }
 0x780   :  { %v3896_v24 = vadd.f32 %v3895_v1, %v3831_v23  ;;  %v3945_v1 = vld [vmem:[%s10306_s6 + $0x68] sm:$0xff]  ;;  %v4225_v23 = vld [vmem:[%s10307_s7 + $0x50] sm:$0xff] }
 0x787   :  { %v3898_v55 = vpop.f32.mrf.mxu1  ;;  %v3842_v15 = vpop.f32.mrf.mxu0 }
 0x788   :  { %v3843_v53 = vadd.f32 %v3842_v15, %v3778_v56  ;;  %v3950_v15 = vld [vmem:[%s10306_s6 + $0x90] sm:$0xff]  ;;  %v3953_v56 = vld [vmem:[%s10306_s6 + $0xa8] sm:$0xff] }
 0x78f   :  { %v3901_v43 = vpop.f32.mrf.mxu1 }
 0x790   :  { %v3902_v4 = vadd.f32 %v3901_v43, %v3837_v47  ;;  %v4230_v47 = vld [vmem:[%s10307_s7 + $0x78] sm:$0xff] }
 0x791   :  { %4303 = vmatpush.msra.mxu3 %v4230_v47  ;;  %v4260_v47 = vld [vmem:[%s10307_s7 + $0x168] sm:$0xff] }
 0x792   :  { %v3927_v29 = vmax.f32 %v3902_v4, 0.0  ;;  %v4227_v4 = vld [vmem:[%s10307_s7 + $0x60] sm:$0xff] }
 0x797   :  { %v3904_v25 = vpop.f32.mrf.mxu1  ;;  %v3845_v5 = vpop.f32.mrf.mxu0 }
 0x798   :  { %v3846_v58 = vadd.f32 %v3845_v5, %v9606_v37  ;;  %v3905_v28 = vadd.f32 %v3904_v25, %v3840_v49  ;;  %v3951_v5 = vld [vmem:[%s10306_s6 + $0x98] sm:$0xff] }
 0x79a   :  { %v3928_v27 = vmax.f32 %v3905_v28, 0.0  ;;  %v4229_v28 = vld [vmem:[%s10307_s7 + $0x70] sm:$0xff] }
 0x79b   :  { %4304 = vmatpush.msra.mxu3 %v4229_v28  ;;  %v4259_v28 = vld [vmem:[%s10307_s7 + $0x160] sm:$0xff] }
 0x79d   :  { %4305 = vmatpush.msra.mxu3 %v4228_v34  ;;  %v4257_v34 = vld [vmem:[%s10307_s7 + $0x150] sm:$0xff] }
 0x79f   :  { %v3907_v33 = vpop.f32.mrf.mxu1  ;;  %v3848_v60 = vpop.f32.mrf.mxu0  ;;  %4306 = vmatpush.msra.mxu3 %v4227_v4  ;;  %v4256_v4 = vld [vmem:[%s10307_s7 + $0x148] sm:$0xff] }
 0x7a0   :  { %v3849_v3 = vadd.f32 %v3848_v60, %v9613_v61  ;;  %v3908_v37 = vadd.f32 %v3907_v33, %v3843_v53  ;;  %v3769_v61 = vadd.f32 %v9479_v22, %v3704_v11  ;;  %v3925_v22 = vmax.f32 %v3896_v24, 0.0  ;;  %v3962_v24 = vld [vmem:[%s10306_s6 + $0xf0] sm:$0xff] }
 0x7a2   :  { %v3834_v59 = vadd.f32 %v3833_v51, %v3769_v61  ;;  %v3929_v14 = vmax.f32 %v3908_v37, 0.0  ;;  %v3946_v51 = vld [vmem:[%s10306_s6 + $0x70] sm:$0xff]  ;;  %v3959_v37 = vld [vmem:[%s10306_s6 + $0xd8] sm:$0xff]  ;;  %v3960_v61 = vld [vmem:[%s10306_s6 + $0xe0] sm:$0xff] }
 0x7a4   :  { %v3899_v36 = vadd.f32 %v3898_v55, %v3834_v59  ;;  %v3947_v55 = vld [vmem:[%s10306_s6 + $0x78] sm:$0xff]  ;;  %v3961_v59 = vld [vmem:[%s10306_s6 + $0xe8] sm:$0xff] }
 0x7a6   :  { %v3926_v0 = vmax.f32 %v3899_v36, 0.0 }
 0x7a7   :  { %v3910_v46 = vpop.f32.mrf.mxu1 }
 0x7a8   :  { %v3911_v9 = vadd.f32 %v3910_v46, %v3846_v58 }
 0x7aa   :  { %v3930_v44 = vmax.f32 %v3911_v9, 0.0  ;;  %v3956_v9 = vld [vmem:[%s10306_s6 + $0xc0] sm:$0xff] }
 0x7af   :  { %v3913_v19 = vpop.f32.mrf.mxu1 }
 0x7b0   :  { %v3914_v38 = vadd.f32 %v3913_v19, %v3849_v3  ;;  %v3954_v3 = vld [vmem:[%s10306_s6 + $0xb0] sm:$0xff] }
 0x7b2   :  { %v3931_v63 = vmax.f32 %v3914_v38, 0.0 }
 0x7b4   :  { %3968 = vmatpush.msra.mxu2 %v3931_v63 }
 0x7b6   :  { %3969 = vmatpush.msra.mxu2 %v3930_v44 }
 0x7b8   :  { %3970 = vmatpush.msra.mxu2 %v3929_v14  ;;  %v4226_v14 = vld [vmem:[%s10307_s7 + $0x58] sm:$0xff] }
 0x7b9   :  { %4307 = vmatpush.msra.mxu3 %v4226_v14 }
 0x7ba   :  { %3971 = vmatpush.msra.mxu2 %v3928_v27  ;;  %v4224_v27 = vld [vmem:[%s10307_s7 + $0x48] sm:$0xff] }
 0x7bb   :  { %4308 = vmatpush.msra.mxu3 %v4225_v23  ;;  %v4255_v23 = vld [vmem:[%s10307_s7 + $0x140] sm:$0xff] }
 0x7bc   :  { %3972 = vmatpush.msra.mxu2 %v3927_v29  ;;  %v4223_v29 = vld [vmem:[%s10307_s7 + $0x40] sm:$0xff] }
 0x7bd   :  { %4309 = vmatpush.msra.mxu3 %v4224_v27  ;;  %v4253_v27 = vld [vmem:[%s10307_s7 + $0x130] sm:$0xff] }
 0x7be   :  { %3973 = vmatpush.msra.mxu2 %v3926_v0  ;;  %v4222_v0 = vld [vmem:[%s10307_s7 + $0x38] sm:$0xff] }
 0x7bf   :  { %4310 = vmatpush.msra.mxu3 %v4223_v29  ;;  %v4252_v29 = vld [vmem:[%s10307_s7 + $0x128] sm:$0xff] }
 0x7c0   :  { %3974 = vmatpush.msra.mxu2 %v3925_v22  ;;  %v4221_v22 = vld [vmem:[%s10307_s7 + $0x30] sm:$0xff] }
 0x7c1   :  { %4311 = vmatpush.msra.mxu3 %v4222_v0  ;;  %v4278_v0 = vld [vmem:[%s10307_s7 + $0x1f8] sm:$0xff] }
 0x7c2   :  { %3975 = vmatpush.msra.mxu2 %v3924_v52  ;;  %4390 = vmatpush.msrb.mxu0 %v4278_v0 }
 0x7c3   :  { %4312 = vmatpush.msra.mxu3 %v4221_v22  ;;  %v4251_v22 = vld [vmem:[%s10307_s7 + $0x120] sm:$0xff] }
 0x7c4   :  { %3976 = vmatpush.msra.mxu2 %v3923_v18  ;;  %v4220_v18 = vld [vmem:[%s10307_s7 + $0x28] sm:$0xff] }
 0x7c5   :  { %4313 = vmatpush.msra.mxu3 %v4220_v18 }
 0x7c6   :  { %3977 = vmatpush.msra.mxu2 %v3922_v31  ;;  %v3963_v31 = vld [vmem:[%s10306_s6 + $0xf8] sm:$0xff] }
 0x7c8   :  { %3978 = vmatpush.msra.mxu2 %v3921_v12  ;;  %v4219_v12 = vld [vmem:[%s10307_s7 + $0x20] sm:$0xff] }
 0x7c9   :  { %4314 = vmatpush.msra.mxu3 %v4219_v12  ;;  %v4276_v12 = vld [vmem:[%s10307_s7 + $0x1e8] sm:$0xff] }
 0x7ca   :  { %3979 = vmatpush.msra.mxu2 %v3920_v20  ;;  %v4218_v20 = vld [vmem:[%s10307_s7 + $0x18] sm:$0xff] }
 0x7cb   :  { %4315 = vmatpush.msra.mxu3 %v4218_v20  ;;  %v4275_v20 = vld [vmem:[%s10307_s7 + $0x1e0] sm:$0xff] }
 0x7cc   :  { %3980 = vmatpush.msra.mxu2 %v3919_v6  ;;  %v4217_v6 = vld [vmem:[%s10307_s7 + $0x10] sm:$0xff] }
 0x7cd   :  { %4316 = vmatpush.msra.mxu3 %v4217_v6  ;;  %v4249_v6 = vld [vmem:[%s10307_s7 + $0x110] sm:$0xff] }
 0x7ce   :  { %3981 = vmatpush.msra.mxu2 %v3918_v2 }
 0x7d0   :  { %3982 = vmatpush.msra.mxu2 %v3917_v45  ;;  %v4216_v45 = vld [vmem:[%s10307_s7 + $0x8] sm:$0xff] }
 0x7d1   :  { %4317 = vmatpush.msra.mxu3 %v4216_v45 }
 0x7d2   :  { %3983 = vmatpush.msra.mxu2 %v3916_v39  ;;  %v4215_v39 = vld [vmem:[%s10307_s7] sm:$0xff] }
 0x7d3   :  { %3984 = vmatmul.f32.vlgmr.msra.gmra.mxu2 %v3932_v13  ;;  %4318 = vmatpush.msra.mxu3 %v4215_v39  ;;  %v4248_v39 = vld [vmem:[%s10307_s7 + $0x108] sm:$0xff] }
 0x7db   :  { %3987 = vmatmul.f32.gmra.mxu2 %v3933_v50 }
 0x7e3   :  { %3990 = vmatmul.f32.gmra.mxu2 %v3934_v42 }
 0x7eb   :  { %3993 = vmatmul.f32.gmra.mxu2 %v3935_v48 }
 0x7f3   :  { %3996 = vmatmul.f32.gmra.mxu2 %v3936_v40 }
 0x7fb   :  { %3999 = vmatmul.f32.gmra.mxu2 %v3937_v26 }
 0x803   :  { %4002 = vmatmul.f32.gmra.mxu2 %v3938_v62  ;;  %v3964_v62 = vld [vmem:[%s10306_s6 + $0x100] sm:$0xff] }
 0x80b   :  { %4005 = vmatmul.f32.gmra.mxu2 %v3939_v16 }
 0x813   :  { %4008 = vmatmul.f32.gmra.mxu2 %v3940_v10 }
 0x81b   :  { %4011 = vmatmul.f32.gmra.mxu2 %v3941_v17  ;;  %v4246_v17 = vld [vmem:[%s10307_s7 + $0xf8] sm:$0xff] }
 0x81c   :  { %4332 = vmatpush.msrb.mxu3 %v4246_v17 }
 0x823   :  { %4014 = vmatmul.f32.gmra.mxu2 %v3942_v57  ;;  %v4245_v57 = vld [vmem:[%s10307_s7 + $0xf0] sm:$0xff] }
 0x824   :  { %4333 = vmatpush.msrb.mxu3 %v4245_v57 }
 0x82b   :  { %4017 = vmatmul.f32.gmra.mxu2 %v3943_v21 }
 0x833   :  { %4020 = vmatmul.f32.gmra.mxu2 %v3944_v7  ;;  %v4244_v7 = vld [vmem:[%s10307_s7 + $0xe8] sm:$0xff] }
 0x834   :  { %4334 = vmatpush.msrb.mxu3 %v4244_v7  ;;  %v4271_v7 = vld [vmem:[%s10307_s7 + $0x1c0] sm:$0xff] }
 0x83b   :  { %4023 = vmatmul.f32.gmra.mxu2 %v3945_v1  ;;  %v4243_v1 = vld [vmem:[%s10307_s7 + $0xe0] sm:$0xff] }
 0x83c   :  { %4335 = vmatpush.msrb.mxu3 %v4243_v1  ;;  %v4270_v1 = vld [vmem:[%s10307_s7 + $0x1b8] sm:$0xff] }
 0x843   :  { %4026 = vmatmul.f32.gmra.mxu2 %v3946_v51 }
 0x84b   :  { %4029 = vmatmul.f32.gmra.mxu2 %v3947_v55  ;;  %v4242_v55 = vld [vmem:[%s10307_s7 + $0xd8] sm:$0xff] }
 0x84c   :  { %4336 = vmatpush.msrb.mxu3 %v4242_v55 }
 0x853   :  { %4032 = vmatmul.f32.gmra.mxu2 %v3948_v41  ;;  %v4241_v41 = vld [vmem:[%s10307_s7 + $0xd0] sm:$0xff] }
 0x854   :  { %4337 = vmatpush.msrb.mxu3 %v4241_v41  ;;  %v4268_v41 = vld [vmem:[%s10307_s7 + $0x1a8] sm:$0xff] }
 0x856   :  { %v3985_v43 = vpop.f32.mrf.mxu2 }
 0x857   :  { %4094 = vst.msk [vmem:[#allocation3] sm:$0xff] %vm4093_vm5, %v3985_v43 }
 0x85b   :  { %4035 = vmatmul.f32.gmra.mxu2 %v3949_v30  ;;  %v4240_v30 = vld [vmem:[%s10307_s7 + $0xc8] sm:$0xff] }
 0x85c   :  { %4338 = vmatpush.msrb.mxu3 %v4240_v30  ;;  %v4286_v30 = vld [vmem:[%s10307_s7 + $0x238] sm:$0xff] }
 0x85d   :  { %4427 = vmatpush.msra.mxu1 %v4286_v30 }
 0x85e   :  { %v3988_v25 = vpop.f32.mrf.mxu2 }
 0x85f   :  { %4095 = vst.msk [vmem:[#allocation3 + $0x28] sm:$0xff] %vm4093_vm5, %v3988_v25  ;;  %v4239_v25 = vld [vmem:[%s10307_s7 + $0xc0] sm:$0xff] }
 0x860   :  { %4339 = vmatpush.msrb.mxu3 %v4239_v25  ;;  %v4285_v25 = vld [vmem:[%s10307_s7 + $0x230] sm:$0xff] }
 0x861   :  { %4428 = vmatpush.msra.mxu1 %v4285_v25 }
 0x863   :  { %4038 = vmatmul.f32.gmra.mxu2 %v3950_v15 }
 0x866   :  { %v3991_v33 = vpop.f32.mrf.mxu2 }
 0x867   :  { %4096 = vst.msk [vmem:[#allocation3 + $0x50] sm:$0xff] %vm4093_vm5, %v3991_v33 }
 0x86b   :  { %4041 = vmatmul.f32.gmra.mxu2 %v3951_v5  ;;  %v4238_v5 = vld [vmem:[%s10307_s7 + $0xb8] sm:$0xff] }
 0x86c   :  { %4340 = vmatpush.msrb.mxu3 %v4238_v5  ;;  %v4266_v5 = vld [vmem:[%s10307_s7 + $0x198] sm:$0xff] }
 0x86e   :  { %v3994_v46 = vpop.f32.mrf.mxu2 }
 0x86f   :  { %4097 = vst.msk [vmem:[#allocation3 + $0x78] sm:$0xff] %vm4093_vm5, %v3994_v46  ;;  %v4237_v46 = vld [vmem:[%s10307_s7 + $0xb0] sm:$0xff] }
 0x870   :  { %4341 = vmatpush.msrb.mxu3 %v4237_v46  ;;  %v4265_v46 = vld [vmem:[%s10307_s7 + $0x190] sm:$0xff] }
 0x873   :  { %4044 = vmatmul.f32.gmra.mxu2 %v3952_v32 }
 0x876   :  { %v3997_v60 = vpop.f32.mrf.mxu2 }
 0x877   :  { %4102 = vrot.lane.b32.xlu0 %v3997_v60, %s5499_s20  ;;  %v3965_v60 = vld [vmem:[%s10306_s6 + $0x108] sm:$0xff] }
 0x87b   :  { %4047 = vmatmul.f32.gmra.mxu2 %v3953_v56  ;;  %v4236_v56 = vld [vmem:[%s10307_s7 + $0xa8] sm:$0xff] }
 0x87c   :  { %4342 = vmatpush.msrb.mxu3 %v4236_v56  ;;  %v4264_v56 = vld [vmem:[%s10307_s7 + $0x188] sm:$0xff] }
 0x87e   :  { %v4000_v58 = vpop.f32.mrf.mxu2 }
 0x87f   :  { %4104 = vrot.lane.b32.xlu1 %v4000_v58, %s5499_s20  ;;  %v4235_v58 = vld [vmem:[%s10307_s7 + $0xa0] sm:$0xff] }
 0x880   :  { %4343 = vmatpush.msrb.mxu3 %v4235_v58  ;;  %v4282_v58 = vld [vmem:[%s10307_s7 + $0x218] sm:$0xff] }
 0x883   :  { %4050 = vmatmul.f32.gmra.mxu2 %v3954_v3 }
 0x886   :  { %v4003_v19 = vpop.f32.mrf.mxu2 }
 0x887   :  { %4106 = vrot.lane.b32.xlu2 %v4003_v19, %s5499_s20  ;;  %v4234_v19 = vld [vmem:[%s10307_s7 + $0x98] sm:$0xff] }
 0x888   :  { %4344 = vmatpush.msrb.mxu3 %v4234_v19  ;;  %v4281_v19 = vld [vmem:[%s10307_s7 + $0x210] sm:$0xff] }
 0x88b   :  { %4053 = vmatmul.f32.gmra.mxu2 %v3955_v54  ;;  %v4233_v54 = vld [vmem:[%s10307_s7 + $0x90] sm:$0xff] }
 0x88c   :  { %4345 = vmatpush.msrb.mxu3 %v4233_v54 }
 0x88e   :  { %v4006_v53 = vpop.f32.mrf.mxu2 }
 0x88f   :  { %4108 = vrot.lane.b32.xlu0 %v4006_v53, %s5499_s20 }
 0x893   :  { %4056 = vmatmul.f32.gmra.mxu2 %v3956_v9  ;;  %v3966_v9 = vld [vmem:[%s10306_s6 + $0x110] sm:$0xff] }
 0x896   :  { %v4009_v38 = vpop.f32.mrf.mxu2 }
 0x897   :  { %4119 = vst.msk [vmem:[#allocation3 + $0x8] sm:$0xff] %vm4093_vm5, %v4009_v38  ;;  %v4232_v38 = vld [vmem:[%s10307_s7 + $0x88] sm:$0xff] }
 0x898   :  { %4346 = vmatpush.msrb.mxu3 %v4232_v38  ;;  %v4279_v38 = vld [vmem:[%s10307_s7 + $0x200] sm:$0xff] }
 0x89b   :  { %4059 = vmatmul.f32.gmra.mxu2 %v3957_v8  ;;  %v4231_v8 = vld [vmem:[%s10307_s7 + $0x80] sm:$0xff] }
 0x89c   :  { %4347 = vmatpush.msrb.mxu3 %v4231_v8 }
 0x89e   :  { %v4012_v11 = vpop.f32.mrf.mxu2 }
 0x89f   :  { %4120 = vst.msk [vmem:[#allocation3 + $0x30] sm:$0xff] %vm4093_vm5, %v4012_v11 }
 0x8a3   :  { %4062 = vmatmul.f32.gmra.mxu2 %v3958_v35 }
 0x8a6   :  { %v4015_v49 = vpop.f32.mrf.mxu2 }
 0x8a7   :  { %4121 = vst.msk [vmem:[#allocation3 + $0x58] sm:$0xff] %vm4093_vm5, %v4015_v49  ;;  %v3967_v49 = vld [vmem:[%s10306_s6 + $0x118] sm:$0xff] }
 0x8ab   :  { %4065 = vmatmul.f32.gmra.mxu2 %v3959_v37  ;;  %v4262_v37 = vld [vmem:[%s10307_s7 + $0x178] sm:$0xff] }
 0x8ae   :  { %v4018_v63 = vpop.f32.mrf.mxu2 }
 0x8af   :  { %4122 = vst.msk [vmem:[#allocation3 + $0x80] sm:$0xff] %vm4093_vm5, %v4018_v63  ;;  %v4261_v63 = vld [vmem:[%s10307_s7 + $0x170] sm:$0xff] }
 0x8b3   :  { %4068 = vmatmul.f32.gmra.mxu2 %v3960_v61 }
 0x8b6   :  { %v4021_v44 = vpop.f32.mrf.mxu2 }
 0x8b7   :  { %4127 = vrot.lane.b32.xlu1 %v4021_v44, %s5499_s20  ;;  %v4258_v44 = vld [vmem:[%s10307_s7 + $0x158] sm:$0xff] }
 0x8bb   :  { %4071 = vmatmul.f32.gmra.mxu2 %v3961_v59 }
 0x8be   :  { %v4024_v36 = vpop.f32.mrf.mxu2 }
 0x8bf   :  { %4129 = vrot.lane.b32.xlu2 %v4024_v36, %s5499_s20  ;;  %v4254_v36 = vld [vmem:[%s10307_s7 + $0x138] sm:$0xff] }
 0x8c3   :  { %4074 = vmatmul.f32.gmra.mxu2 %v3962_v24 }
 0x8c6   :  { %v4027_v52 = vpop.f32.mrf.mxu2 }
 0x8c7   :  { %4131 = vrot.lane.b32.xlu0 %v4027_v52, %s5499_s20  ;;  %v4277_v52 = vld [vmem:[%s10307_s7 + $0x1f0] sm:$0xff] }
 0x8c8   :  { %4391 = vmatpush.msrb.mxu0 %v4277_v52 }
 0x8ca   :  { %4392 = vmatpush.msrb.mxu0 %v4276_v12 }
 0x8cb   :  { %4077 = vmatmul.f32.gmra.mxu2 %v3963_v31  ;;  %v4250_v31 = vld [vmem:[%s10307_s7 + $0x118] sm:$0xff] }
 0x8cc   :  { %4393 = vmatpush.msrb.mxu0 %v4275_v20 }
 0x8ce   :  { %v4030_v2 = vpop.f32.mrf.mxu2 }
 0x8cf   :  { %4133 = vrot.lane.b32.xlu1 %v4030_v2, %s5499_s20  ;;  %v4274_v2 = vld [vmem:[%s10307_s7 + $0x1d8] sm:$0xff] }
 0x8d0   :  { %4394 = vmatpush.msrb.mxu0 %v4274_v2 }
 0x8d3   :  { %4080 = vmatmul.f32.gmra.mxu2 %v3964_v62 }
 0x8d6   :  { %v4033_v13 = vpop.f32.mrf.mxu2 }
 0x8d7   :  { %4143 = vst.msk [vmem:[#allocation3 + $0x10] sm:$0xff] %vm4093_vm5, %v4033_v13  ;;  %v4273_v13 = vld [vmem:[%s10307_s7 + $0x1d0] sm:$0xff] }
 0x8d8   :  { %4395 = vmatpush.msrb.mxu0 %v4273_v13 }
 0x8db   :  { %4083 = vmatmul.f32.gmra.mxu2 %v3965_v60 }
 0x8de   :  { %v4036_v50 = vpop.f32.mrf.mxu2 }
 0x8df   :  { %4144 = vst.msk [vmem:[#allocation3 + $0x38] sm:$0xff] %vm4093_vm5, %v4036_v50  ;;  %v4247_v50 = vld [vmem:[%s10307_s7 + $0x100] sm:$0xff] }
 0x8e1   :  { %v4107_v42 = vpop.permute.xlu2 %4106 }
 0x8e2   :  { %4117 = vst.msk [vmem:[#allocation3 + $0x50] sm:$0xff] %vm4114_vm6, %v4107_v42 }
 0x8e3   :  { %4086 = vmatmul.f32.gmra.mxu2 %v3966_v9  ;;  %v4280_v9 = vld [vmem:[%s10307_s7 + $0x208] sm:$0xff] }
 0x8e6   :  { %v4039_v48 = vpop.f32.mrf.mxu2 }
 0x8e7   :  { %4145 = vst.msk [vmem:[#allocation3 + $0x60] sm:$0xff] %vm4093_vm5, %v4039_v48 }
 0x8e9   :  { %v4103_v40 = vpop.permute.xlu0 %4102  ;;  %v4205_v33 = vld [vmem:[#allocation3 + $0x50] sm:$0xff] }
 0x8ea   :  { %4115 = vst.msk [vmem:[#allocation3] sm:$0xff] %vm4114_vm6, %v4103_v40 }
 0x8eb   :  { %4089 = vmatmul.f32.gmra.mxu2 %v3967_v49 }
 0x8ee   :  { %v4042_v26 = vpop.f32.mrf.mxu2 }
 0x8ef   :  { %4146 = vst.msk [vmem:[#allocation3 + $0x88] sm:$0xff] %vm4093_vm5, %v4042_v26 }
 0x8f1   :  { %v4105_v16 = vpop.permute.xlu1 %4104  ;;  %v4195_v10 = vld [vmem:[#allocation3] sm:$0xff] }
 0x8f2   :  { %4116 = vst.msk [vmem:[#allocation3 + $0x28] sm:$0xff] %vm4114_vm6, %v4105_v16  ;;  %4319 = vmatmul.f32.vlgmr.msra.gmra.mxu3 %v4195_v10 }
 0x8f3   :  { %4361 = vmatpush.msra.mxu3 %v4262_v37 }
 0x8f5   :  { %4362 = vmatpush.msra.mxu3 %v4261_v63 }
 0x8f6   :  { %v4045_v21 = vpop.f32.mrf.mxu2 }
 0x8f7   :  { %4151 = vrot.lane.b32.xlu2 %v4045_v21, %s5499_s20  ;;  %4363 = vmatpush.msra.mxu3 %v4260_v47  ;;  %v4272_v21 = vld [vmem:[%s10307_s7 + $0x1c8] sm:$0xff] }
 0x8f8   :  { %4396 = vmatpush.msrb.mxu0 %v4272_v21 }
 0x8f9   :  { %v4200_v51 = vld [vmem:[#allocation3 + $0x28] sm:$0xff]  ;;  %4364 = vmatpush.msra.mxu3 %v4259_v28 }
 0x8fa   :  { %4322 = vmatmul.f32.gmra.mxu3 %v4200_v51  ;;  %4397 = vmatpush.msrb.mxu0 %v4271_v7  ;;  %v4269_v51 = vld [vmem:[%s10307_s7 + $0x1b0] sm:$0xff] }
 0x8fb   :  { %4365 = vmatpush.msra.mxu3 %v4258_v44 }
 0x8fc   :  { %4398 = vmatpush.msrb.mxu0 %v4270_v1 }
 0x8fd   :  { %4366 = vmatpush.msra.mxu3 %v4257_v34 }
 0x8fe   :  { %v4048_v43 = vpop.f32.mrf.mxu2  ;;  %4399 = vmatpush.msrb.mxu0 %v4269_v51 }
 0x8ff   :  { %4153 = vrot.lane.b32.xlu0 %v4048_v43, %s5499_s20  ;;  %4367 = vmatpush.msra.mxu3 %v4256_v4  ;;  %v4267_v43 = vld [vmem:[%s10307_s7 + $0x1a0] sm:$0xff] }
 0x900   :  { %4400 = vmatpush.msrb.mxu0 %v4268_v41 }
 0x901   :  { %v4109_v15 = vpop.permute.xlu0 %4108  ;;  %4368 = vmatpush.msra.mxu3 %v4255_v23 }
 0x902   :  { %4118 = vst.msk [vmem:[#allocation3 + $0x78] sm:$0xff] %vm4114_vm6, %v4109_v15  ;;  %4325 = vmatmul.f32.gmra.mxu3 %v4205_v33  ;;  %4401 = vmatpush.msrb.mxu0 %v4267_v43  ;;  %v4284_v33 = vld [vmem:[%s10307_s7 + $0x228] sm:$0xff] }
 0x903   :  { %4369 = vmatpush.msra.mxu3 %v4254_v36  ;;  %4429 = vmatpush.msra.mxu1 %v4284_v33 }
 0x904   :  { %4402 = vmatpush.msrb.mxu0 %v4266_v5 }
 0x905   :  { %4370 = vmatpush.msra.mxu3 %v4253_v27 }
 0x906   :  { %v4051_v32 = vpop.f32.mrf.mxu2  ;;  %4403 = vmatpush.msrb.mxu0 %v4265_v46 }
 0x907   :  { %4155 = vrot.lane.b32.xlu1 %v4051_v32, %s5499_s20  ;;  %4371 = vmatpush.msra.mxu3 %v4252_v29  ;;  %v4283_v32 = vld [vmem:[%s10307_s7 + $0x220] sm:$0xff] }
 0x908   :  { %4430 = vmatpush.msra.mxu1 %v4283_v32  ;;  %4404 = vmatpush.msrb.mxu0 %v4264_v56 }
 0x909   :  { %v4210_v3 = vld [vmem:[#allocation3 + $0x78] sm:$0xff]  ;;  %4372 = vmatpush.msra.mxu3 %v4251_v22 }
 0x90a   :  { %4328 = vmatmul.f32.gmra.mxu3 %v4210_v3  ;;  %v4263_v3 = vld [vmem:[%s10307_s7 + $0x180] sm:$0xff]  ;;  %4431 = vmatpush.msra.mxu1 %v4282_v58 }
 0x90b   :  { %4373 = vmatpush.msra.mxu3 %v4250_v31  ;;  %4405 = vmatpush.msrb.mxu0 %v4263_v3 }
 0x90c   :  { %4432 = vmatpush.msra.mxu1 %v4281_v19 }
 0x90d   :  { %4374 = vmatpush.msra.mxu3 %v4249_v6 }
 0x90e   :  { %v4054_v53 = vpop.f32.mrf.mxu2  ;;  %4433 = vmatpush.msra.mxu1 %v4280_v9 }
 0x90f   :  { %4157 = vrot.lane.b32.xlu0 %v4054_v53, %s5499_s20  ;;  %4375 = vmatpush.msra.mxu3 %v4248_v39 }
 0x910   :  { %4434 = vmatpush.msra.mxu1 %v4279_v38 }
 0x911   :  { %4376 = vmatpush.msra.mxu3 %v4247_v50 }
 0x916   :  { %v4057_v11 = vpop.f32.mrf.mxu2 }
 0x917   :  { %4167 = vst.msk [vmem:[#allocation3 + $0x18] sm:$0xff] %vm4093_vm5, %v4057_v11 }
 0x919   :  { %v4130_v35 = vpop.permute.xlu2 %4129 }
 0x91a   :  { %4140 = vst.msk [vmem:[#allocation3 + $0x30] sm:$0xff] %vm4114_vm6, %v4130_v35 }
 0x91e   :  { %v4060_v61 = vpop.f32.mrf.mxu2 }
 0x91f   :  { %4168 = vst.msk [vmem:[#allocation3 + $0x40] sm:$0xff] %vm4093_vm5, %v4060_v61 }
 0x921   :  { %v4201_v48 = vld [vmem:[#allocation3 + $0x30] sm:$0xff] }
 0x926   :  { %v4063_v59 = vpop.f32.mrf.mxu2 }
 0x927   :  { %4169 = vst.msk [vmem:[#allocation3 + $0x68] sm:$0xff] %vm4093_vm5, %v4063_v59 }
 0x929   :  { %v4128_v14 = vpop.permute.xlu1 %4127 }
 0x92a   :  { %4139 = vst.msk [vmem:[#allocation3 + $0x8] sm:$0xff] %vm4114_vm6, %v4128_v14 }
 0x92e   :  { %v4066_v24 = vpop.f32.mrf.mxu2 }
 0x92f   :  { %4170 = vst.msk [vmem:[#allocation3 + $0x90] sm:$0xff] %vm4093_vm5, %v4066_v24  ;;  %v5419_v24 = vld [vmem:[%s10308_s8] ss:$0 sm:$0xff] }
 0x931   :  { %v4196_v18 = vld [vmem:[#allocation3 + $0x8] sm:$0xff] }
 0x932   :  { %4348 = vmatmul.f32.vlgmr.msrb.gmra.mxu3 %v4196_v18 }
 0x933   :  { %5406 = vmatpush.msrb.mxu3 %v4286_v30 }
 0x935   :  { %5407 = vmatpush.msrb.mxu3 %v4285_v25 }
 0x936   :  { %v4069_v45 = vpop.f32.mrf.mxu2 }
 0x937   :  { %4175 = vrot.lane.b32.xlu2 %v4069_v45, %s5499_s20  ;;  %5408 = vmatpush.msrb.mxu3 %v4284_v33 }
 0x939   :  { %v4132_v42 = vpop.permute.xlu0 %4131  ;;  %5409 = vmatpush.msrb.mxu3 %v4283_v32 }
 0x93a   :  { %4141 = vst.msk [vmem:[#allocation3 + $0x58] sm:$0xff] %vm4114_vm6, %v4132_v42  ;;  %4351 = vmatmul.f32.gmra.mxu3 %v4201_v48 }
 0x93b   :  { %5410 = vmatpush.msrb.mxu3 %v4282_v58 }
 0x93d   :  { %5411 = vmatpush.msrb.mxu3 %v4281_v19 }
 0x93e   :  { %v4072_v40 = vpop.f32.mrf.mxu2 }
 0x93f   :  { %4177 = vrot.lane.b32.xlu1 %v4072_v40, %s5499_s20  ;;  %5412 = vmatpush.msrb.mxu3 %v4280_v9 }
 0x941   :  { %v4134_v26 = vpop.permute.xlu1 %4133  ;;  %v4206_v62 = vld [vmem:[#allocation3 + $0x58] sm:$0xff]  ;;  %5413 = vmatpush.msrb.mxu3 %v4279_v38 }
 0x942   :  { %4142 = vst.msk [vmem:[#allocation3 + $0x80] sm:$0xff] %vm4114_vm6, %v4134_v26  ;;  %4354 = vmatmul.f32.gmra.mxu3 %v4206_v62 }
 0x946   :  { %v4075_v16 = vpop.f32.mrf.mxu2 }
 0x947   :  { %4179 = vrot.lane.b32.xlu2 %v4075_v16, %s5499_s20 }
 0x949   :  { %v4211_v10 = vld [vmem:[#allocation3 + $0x80] sm:$0xff] }
 0x94a   :  { %4357 = vmatmul.f32.gmra.mxu3 %v4211_v10 }
 0x94e   :  { %v4078_v17 = vpop.f32.mrf.mxu2 }
 0x94f   :  { %4181 = vrot.lane.b32.xlu0 %v4078_v17, %s5499_s20 }
 0x951   :  { %v4152_v57 = vpop.permute.xlu2 %4151 }
 0x952   :  { %4163 = vst.msk [vmem:[#allocation3 + $0x10] sm:$0xff] %vm4114_vm6, %v4152_v57 }
 0x956   :  { %v4081_v60 = vpop.f32.mrf.mxu2 }
 0x957   :  { %4191 = vst.msk [vmem:[#allocation3 + $0x20] sm:$0xff] %vm4093_vm5, %v4081_v60 }
 0x959   :  { %v4197_v55 = vld [vmem:[#allocation3 + $0x10] sm:$0xff] }
 0x95a   :  { %4377 = vmatmul.f32.vlgmr.msra.gmra.mxu3 %v4197_v55 }
 0x95e   :  { %v4199_v8 = vld [vmem:[#allocation3 + $0x20] sm:$0xff]  ;;  %v4084_v37 = vpop.f32.mrf.mxu2 }
 0x95f   :  { %5371 = vmatmul.msk.f32.vlgmr.msra.gmra.mxu1 %vm4093_vm5, %v4199_v8  ;;  %4192 = vst.msk [vmem:[#allocation3 + $0x48] sm:$0xff] %vm4093_vm5, %v4084_v37 }
 0x966   :  { %v4087_v47 = vpop.f32.mrf.mxu2  ;;  %v4204_v28 = vld [vmem:[#allocation3 + $0x48] sm:$0xff] }
 0x967   :  { %4193 = vst.msk [vmem:[#allocation3 + $0x70] sm:$0xff] %vm4093_vm5, %v4087_v47  ;;  %5372 = vmatmul.msk.f32.gmra.mxu1 %vm4093_vm5, %v4204_v28 }
 0x96e   :  { %v4209_v59 = vld [vmem:[#allocation3 + $0x70] sm:$0xff]  ;;  %v4090_v4 = vpop.f32.mrf.mxu2 }
 0x96f   :  { %4194 = vst.msk [vmem:[#allocation3 + $0x98] sm:$0xff] %vm4093_vm5, %v4090_v4 }
 0x971   :  { %v4154_v15 = vpop.permute.xlu0 %4153 }
 0x972   :  { %4164 = vst.msk [vmem:[#allocation3 + $0x38] sm:$0xff] %vm4114_vm6, %v4154_v15 }
 0x975   :  { %v4320_v63 = vpop.f32.mrf.mxu3 }
 0x976   :  { %v4214_v36 = vld [vmem:[#allocation3 + $0x98] sm:$0xff]  ;;  %v4321_v0 = vadd.f32 %v5419_v24, %v4320_v63 }
 0x979   :  { %v4156_v54 = vpop.permute.xlu1 %4155  ;;  %v4202_v53 = vld [vmem:[#allocation3 + $0x38] sm:$0xff] }
 0x97a   :  { %4165 = vst.msk [vmem:[#allocation3 + $0x60] sm:$0xff] %vm4114_vm6, %v4156_v54  ;;  %4380 = vmatmul.f32.gmra.mxu3 %v4202_v53 }
 0x97d   :  { %v4323_v34 = vpop.f32.mrf.mxu3 }
 0x97e   :  { %v4324_v10 = vadd.f32 %v5419_v24, %v4323_v34 }
 0x981   :  { %v4158_v11 = vpop.permute.xlu0 %4157  ;;  %v4207_v35 = vld [vmem:[#allocation3 + $0x60] sm:$0xff] }
 0x982   :  { %4166 = vst.msk [vmem:[#allocation3 + $0x88] sm:$0xff] %vm4114_vm6, %v4158_v11  ;;  %4383 = vmatmul.f32.gmra.mxu3 %v4207_v35 }
 0x985   :  { %v4326_v23 = vpop.f32.mrf.mxu3 }
 0x986   :  { %v4327_v55 = vadd.f32 %v5419_v24, %v4326_v23 }
 0x989   :  { %v4212_v49 = vld [vmem:[#allocation3 + $0x88] sm:$0xff] }
 0x98a   :  { %4386 = vmatmul.f32.gmra.mxu3 %v4212_v49 }
 0x98d   :  { %v4329_v27 = vpop.f32.mrf.mxu3 }
 0x98e   :  { %v4330_v46 = vadd.f32 %v5419_v24, %v4329_v27 }
 0x991   :  { %v4176_v61 = vpop.permute.xlu2 %4175 }
 0x992   :  { %4187 = vst.msk [vmem:[#allocation3 + $0x18] sm:$0xff] %vm4114_vm6, %v4176_v61  ;;  %5373 = vmatmul.msk.f32.vlgmr.msrb.gmra.mxu3 %vm4093_vm5, %v4209_v59 }
 0x999   :  { %v4198_v44 = vld [vmem:[#allocation3 + $0x18] sm:$0xff] }
 0x99a   :  { %4406 = vmatmul.f32.vlgmr.msrb.gmra.mxu0 %v4198_v44  ;;  %5374 = vmatmul.msk.f32.gmra.mxu3 %vm4093_vm5, %v4214_v36 }
 0x9a1   :  { %v4180_v14 = vpop.permute.xlu2 %4179 }
 0x9a2   :  { %4189 = vst.msk [vmem:[#allocation3 + $0x68] sm:$0xff] %vm4114_vm6, %v4180_v14 }
 0x9a9   :  { %v4208_v31 = vld [vmem:[#allocation3 + $0x68] sm:$0xff] }
 0x9b1   :  { %v4178_v29 = vpop.permute.xlu1 %4177 }
 0x9b2   :  { %4188 = vst.msk [vmem:[#allocation3 + $0x40] sm:$0xff] %vm4114_vm6, %v4178_v29 }
 0x9b5   :  { %v4349_v22 = vpop.f32.mrf.mxu3 }
 0x9b6   :  { %v4350_v52 = vadd.f32 %v4349_v22, %v4321_v0 }
 0x9b9   :  { %v4203_v18 = vld [vmem:[#allocation3 + $0x40] sm:$0xff] }
 0x9ba   :  { %4409 = vmatmul.f32.gmra.mxu0 %v4203_v18 }
 0x9bd   :  { %v4352_v6 = vpop.f32.mrf.mxu3 }
 0x9be   :  { %v4353_v17 = vadd.f32 %v4352_v6, %v4324_v10 }
 0x9c1   :  { %v4182_v12 = vpop.permute.xlu0 %4181 }
 0x9c2   :  { %4412 = vmatmul.f32.gmra.mxu0 %v4208_v31  ;;  %4190 = vst.msk [vmem:[#allocation3 + $0x90] sm:$0xff] %vm4114_vm6, %v4182_v12 }
 0x9c5   :  { %v4355_v2 = vpop.f32.mrf.mxu3 }
 0x9c6   :  { %v4356_v43 = vadd.f32 %v4355_v2, %v4327_v55 }
 0x9c9   :  { %v4213_v20 = vld [vmem:[#allocation3 + $0x90] sm:$0xff] }
 0x9ca   :  { %4415 = vmatmul.f32.gmra.mxu0 %v4213_v20 }
 0x9cd   :  { %v4358_v45 = vpop.f32.mrf.mxu3 }
 0x9ce   :  { %v4359_v60 = vadd.f32 %v4358_v45, %v4330_v46 }
 0x9dc   :  { %v4436_v42 = vpop.f32.mrf.mxu1 }
 0x9dd   :  { %v4378_v39 = vpop.f32.mrf.mxu3 }
 0x9de   :  { %v4379_v13 = vadd.f32 %v4378_v39, %v4350_v52 }
 0x9e4   :  { %v4439_v51 = vpop.f32.mrf.mxu1 }
 0x9fd   :  { %v4381_v62 = vpop.f32.mrf.mxu3 }
 0x9fe   :  { %v4382_v21 = vadd.f32 %v4381_v62, %v4353_v17 }
 0xa05   :  { %v4384_v16 = vpop.f32.mrf.mxu3 }
 0xa06   :  { %v4385_v15 = vadd.f32 %v4384_v16, %v4356_v43 }
 0xa0d   :  { %v4387_v57 = vpop.f32.mrf.mxu3 }
 0xa0e   :  { %v4388_v58 = vadd.f32 %v4387_v57, %v4359_v60 }
 0xa15   :  { %v4442_v25 = vpop.f32.mrf.mxu3 }
 0xa17   :  { %v4407_v50 = vpop.f32.mrf.mxu0 }
 0xa18   :  { %v4408_v48 = vadd.f32 %v4407_v50, %v4379_v13 }
 0xa1a   :  { %v4437_v40 = vadd.f32 %v4436_v42, %v4408_v48 }
 0xa1c   :  { %v10059_v26 = vmax.f32 %v4437_v40, 0.0 }
 0xa1d   :  { %v4445_v19 = vpop.f32.mrf.mxu3 }
 0xa37   :  { %v4410_v7 = vpop.f32.mrf.mxu0 }
 0xa38   :  { %v4411_v1 = vadd.f32 %v4410_v7, %v4382_v21 }
 0xa3a   :  { %v4440_v41 = vadd.f32 %v4439_v51, %v4411_v1 }
 0xa3c   :  { %v10061_v30 = vmax.f32 %v4440_v41, 0.0 }
 0xa3f   :  { %v4413_v33 = vpop.f32.mrf.mxu0 }
 0xa40   :  { %v4414_v5 = vadd.f32 %v4413_v33, %v4385_v15 }
 0xa42   :  { %v4443_v32 = vadd.f32 %v4442_v25, %v4414_v5 }
 0xa44   :  { %v10063_v56 = vmax.f32 %v4443_v32, 0.0 }
 0xa47   :  { %v4416_v3 = vpop.f32.mrf.mxu0 }
 0xa48   :  { %v4417_v54 = vadd.f32 %v4416_v3, %v4388_v58 }
 0xa4a   :  { %v4446_v53 = vadd.f32 %v4445_v19, %v4417_v54 }
 0xa4c   :  { %v10065_v9 = vmax.f32 %v4446_v53, 0.0 }
 0xa4d   :  { %5493 = dma.done.wait [#allocation6], 16384 }
 0xa4e   :  { %5494 = vsyncadd [#allocation6], 4294950912  ;;  %v10523_v38 = vld [vmem:[#allocation71_spill] sm:$0xff]  ;;  %v10524_v8 = vld [vmem:[#allocation72_spill] sm:$0xff] }
 0xa4f   :  { %4662 = vmatpush.msra.mxu3 %v10523_v38  ;;  %4682 = vmatpush.msra.mxu0 %v10524_v8 }
 0xa50   :  { %5495 = dma.done.wait [#allocation6 + $0x1], 8192 }
 0xa51   :  { %5496 = vsyncadd [#allocation6 + $0x1], 4294959104  ;;  %v10525_v11 = vld [vmem:[#allocation73_spill] sm:$0xff]  ;;  %v10526_v35 = vld [vmem:[#allocation67_spill] sm:$0xff] }
 0xa52   :  { %4702 = vmatpush.msrb.mxu1 %v10525_v11  ;;  %4663 = vmatpush.msra.mxu3 %v10526_v35  ;;  %v10527_v49 = vld [vmem:[#allocation68_spill] sm:$0xff]  ;;  %v10528_v37 = vld [vmem:[#allocation69_spill] sm:$0xff]  ;;  %v10529_v63 = vld [vmem:[#allocation63_spill] sm:$0xff] }
 0xa53   :  { %4683 = vmatpush.msra.mxu0 %v10527_v49  ;;  %v10530_v61 = vld [vmem:[#allocation64_spill] sm:$0xff]  ;;  %v10531_v47 = vld [vmem:[#allocation65_spill] sm:$0xff]  ;;  %v10532_v28 = vld [vmem:[#allocation59_spill] sm:$0xff] }
 0xa54   :  { %4703 = vmatpush.msrb.mxu1 %v10528_v37  ;;  %4664 = vmatpush.msra.mxu3 %v10529_v63  ;;  %v10533_v44 = vld [vmem:[#allocation60_spill] sm:$0xff]  ;;  %v10534_v34 = vld [vmem:[#allocation61_spill] sm:$0xff]  ;;  %v10535_v59 = vld [vmem:[#allocation55_spill] sm:$0xff] }
 0xa55   :  { %4684 = vmatpush.msra.mxu0 %v10530_v61  ;;  %v10536_v4 = vld [vmem:[#allocation56_spill] sm:$0xff]  ;;  %v10537_v14 = vld [vmem:[#allocation57_spill] sm:$0xff]  ;;  %v10538_v23 = vld [vmem:[#allocation51_spill] sm:$0xff] }
 0xa56   :  { %4704 = vmatpush.msrb.mxu1 %v10531_v47  ;;  %4665 = vmatpush.msra.mxu3 %v10532_v28  ;;  %v10539_v36 = vld [vmem:[#allocation52_spill] sm:$0xff]  ;;  %v10540_v27 = vld [vmem:[#allocation53_spill] sm:$0xff]  ;;  %v10541_v24 = vld [vmem:[#allocation47_spill] sm:$0xff] }
 0xa57   :  { %4685 = vmatpush.msra.mxu0 %v10533_v44  ;;  %v10542_v29 = vld [vmem:[#allocation48_spill] sm:$0xff]  ;;  %v10543_v0 = vld [vmem:[#allocation49_spill] sm:$0xff]  ;;  %v10544_v22 = vld [vmem:[#allocation43_spill] sm:$0xff] }
 0xa58   :  { %4705 = vmatpush.msrb.mxu1 %v10534_v34  ;;  %4666 = vmatpush.msra.mxu3 %v10535_v59  ;;  %v10545_v52 = vld [vmem:[#allocation44_spill] sm:$0xff]  ;;  %v10546_v18 = vld [vmem:[#allocation45_spill] sm:$0xff]  ;;  %v10547_v31 = vld [vmem:[#allocation74_spill] sm:$0xff] }
 0xa59   :  { %4686 = vmatpush.msra.mxu0 %v10536_v4  ;;  %v10548_v12 = vld [vmem:[#allocation135_spill] sm:$0xff]  ;;  %v10549_v20 = vld [vmem:[#allocation136_spill] sm:$0xff]  ;;  %v10550_v6 = vld [vmem:[#allocation70_spill] sm:$0xff] }
 0xa5a   :  { %4706 = vmatpush.msrb.mxu1 %v10537_v14  ;;  %4667 = vmatpush.msra.mxu3 %v10538_v23  ;;  %v10551_v2 = vld [vmem:[#allocation131_spill] sm:$0xff]  ;;  %v10552_v45 = vld [vmem:[#allocation132_spill] sm:$0xff]  ;;  %v10553_v39 = vld [vmem:[#allocation66_spill] sm:$0xff] }
 0xa5b   :  { %4687 = vmatpush.msra.mxu0 %v10539_v36  ;;  %v10554_v13 = vld [vmem:[#allocation127_spill] sm:$0xff]  ;;  %v10555_v50 = vld [vmem:[#allocation128_spill] sm:$0xff]  ;;  %v10556_v42 = vld [vmem:[#allocation62_spill] sm:$0xff] }
 0xa5c   :  { %4707 = vmatpush.msrb.mxu1 %v10540_v27  ;;  %4668 = vmatpush.msra.mxu3 %v10541_v24  ;;  %v10557_v48 = vld [vmem:[#allocation123_spill] sm:$0xff]  ;;  %v10558_v40 = vld [vmem:[#allocation124_spill] sm:$0xff]  ;;  %v10559_v62 = vld [vmem:[#allocation58_spill] sm:$0xff] }
 0xa5d   :  { %4688 = vmatpush.msra.mxu0 %v10542_v29  ;;  %v10560_v16 = vld [vmem:[#allocation119_spill] sm:$0xff]  ;;  %v10561_v10 = vld [vmem:[#allocation120_spill] sm:$0xff]  ;;  %v10562_v17 = vld [vmem:[#allocation54_spill] sm:$0xff] }
 0xa5e   :  { %4708 = vmatpush.msrb.mxu1 %v10543_v0  ;;  %4669 = vmatpush.msra.mxu3 %v10544_v22  ;;  %v10563_v57 = vld [vmem:[#allocation115_spill] sm:$0xff]  ;;  %v10564_v21 = vld [vmem:[#allocation116_spill] sm:$0xff]  ;;  %v10565_v7 = vld [vmem:[#allocation50_spill] sm:$0xff] }
 0xa5f   :  { %4689 = vmatpush.msra.mxu0 %v10545_v52  ;;  %v10566_v1 = vld [vmem:[#allocation111_spill] sm:$0xff]  ;;  %v10567_v51 = vld [vmem:[#allocation112_spill] sm:$0xff]  ;;  %v10568_v55 = vld [vmem:[#allocation46_spill] sm:$0xff]  ;;  %5375 = vmatmul.msk.f32.vlgmr.msra.gmra.mxu3 %vm4093_vm5, %v10061_v30 }
 0xa60   :  { %4709 = vmatpush.msrb.mxu1 %v10546_v18  ;;  %4722 = vmatpush.msrb.mxu3 %v10547_v31  ;;  %v10569_v41 = vld [vmem:[#allocation107_spill] sm:$0xff]  ;;  %v10570_v43 = vld [vmem:[#allocation108_spill] sm:$0xff]  ;;  %v10571_v25 = vld [vmem:[#allocation138_spill] sm:$0xff] }
 0xa61   :  { %4745 = vmatpush.msrb.mxu0 %v10548_v12  ;;  %5377 = vmatmul.msk.f32.vlgmr.msrb.gmra.mxu1 %vm4093_vm5, %v10061_v30  ;;  %v10572_v15 = vld [vmem:[#allocation137_spill] sm:$0xff]  ;;  %v10573_v33 = vld [vmem:[#allocation39_spill] sm:$0xff]  ;;  %v10574_v5 = vld [vmem:[#allocation134_spill] sm:$0xff] }
 0xa62   :  { %4765 = vmatpush.msra.mxu1 %v10549_v20  ;;  %4723 = vmatpush.msrb.mxu3 %v10550_v6  ;;  %v10575_v46 = vld [vmem:[#allocation133_spill] sm:$0xff]  ;;  %v10576_v32 = vld [vmem:[#allocation35_spill] sm:$0xff]  ;;  %v10577_v60 = vld [vmem:[#allocation130_spill] sm:$0xff] }
 0xa63   :  { %4746 = vmatpush.msrb.mxu0 %v10551_v2  ;;  %v10578_v58 = vld [vmem:[#allocation129_spill] sm:$0xff]  ;;  %v10579_v3 = vld [vmem:[#allocation31_spill] sm:$0xff]  ;;  %v10580_v19 = vld [vmem:[#allocation126_spill] sm:$0xff] }
 0xa64   :  { %4766 = vmatpush.msra.mxu1 %v10552_v45  ;;  %4724 = vmatpush.msrb.mxu3 %v10553_v39  ;;  %v10581_v54 = vld [vmem:[#allocation125_spill] sm:$0xff]  ;;  %v10582_v53 = vld [vmem:[#allocation27_spill] sm:$0xff]  ;;  %v10583_v38 = vld [vmem:[#allocation122_spill] sm:$0xff] }
 0xa65   :  { %5376 = vmatmul.msk.f32.vlgmr.msra.gmra.mxu0 %vm4093_vm5, %v10061_v30  ;;  %v10584_v8 = vld [vmem:[#allocation121_spill] sm:$0xff]  ;;  %v10585_v11 = vld [vmem:[#allocation23_spill] sm:$0xff]  ;;  %v10586_v35 = vld [vmem:[#allocation118_spill] sm:$0xff] }
 0xa66   :  { %4747 = vmatpush.msrb.mxu0 %v10554_v13  ;;  %4767 = vmatpush.msra.mxu1 %v10555_v50  ;;  %v10587_v49 = vld [vmem:[#allocation117_spill] sm:$0xff]  ;;  %v10588_v37 = vld [vmem:[#allocation19_spill] sm:$0xff]  ;;  %v10589_v63 = vld [vmem:[#allocation114_spill] sm:$0xff] }
 0xa67   :  { %4725 = vmatpush.msrb.mxu3 %v10556_v42  ;;  %v10590_v61 = vld [vmem:[#allocation113_spill] sm:$0xff]  ;;  %v10591_v47 = vld [vmem:[#allocation15_spill] sm:$0xff]  ;;  %v10593_v28 = vld [vmem:[#allocation110_spill] sm:$0xff] }
 0xa68   :  { %4748 = vmatpush.msrb.mxu0 %v10557_v48  ;;  %4768 = vmatpush.msra.mxu1 %v10558_v40  ;;  %v10594_v44 = vld [vmem:[#allocation11_spill] sm:$0xff]  ;;  %v10595_v34 = vld [vmem:[#allocation40_spill] sm:$0xff]  ;;  %v10596_v59 = vld [vmem:[#allocation41_spill] sm:$0xff] }
 0xa69   :  { %4726 = vmatpush.msrb.mxu3 %v10559_v62  ;;  %v10597_v4 = vld [vmem:[#allocation42_spill] sm:$0xff]  ;;  %v10598_v14 = vld [vmem:[#allocation36_spill] sm:$0xff]  ;;  %v10599_v23 = vld [vmem:[#allocation37_spill] sm:$0xff] }
 0xa6a   :  { %4749 = vmatpush.msrb.mxu0 %v10560_v16  ;;  %4769 = vmatpush.msra.mxu1 %v10561_v10  ;;  %v10600_v36 = vld [vmem:[#allocation38_spill] sm:$0xff]  ;;  %v10601_v27 = vld [vmem:[#allocation32_spill] sm:$0xff]  ;;  %v10602_v24 = vld [vmem:[#allocation33_spill] sm:$0xff] }
 0xa6b   :  { %4727 = vmatpush.msrb.mxu3 %v10562_v17  ;;  %v10603_v29 = vld [vmem:[#allocation34_spill] sm:$0xff]  ;;  %v10604_v0 = vld [vmem:[#allocation28_spill] sm:$0xff]  ;;  %v10605_v22 = vld [vmem:[#allocation29_spill] sm:$0xff] }
 0xa6c   :  { %4750 = vmatpush.msrb.mxu0 %v10563_v57  ;;  %4770 = vmatpush.msra.mxu1 %v10564_v21  ;;  %v10606_v52 = vld [vmem:[#allocation30_spill] sm:$0xff]  ;;  %v10607_v18 = vld [vmem:[#allocation24_spill] sm:$0xff]  ;;  %v10608_v31 = vld [vmem:[#allocation25_spill] sm:$0xff] }
 0xa6d   :  { %4728 = vmatpush.msrb.mxu3 %v10565_v7  ;;  %v10609_v12 = vld [vmem:[#allocation26_spill] sm:$0xff]  ;;  %v10610_v20 = vld [vmem:[#allocation20_spill] sm:$0xff]  ;;  %v10611_v6 = vld [vmem:[#allocation21_spill] sm:$0xff] }
 0xa6e   :  { %4751 = vmatpush.msrb.mxu0 %v10566_v1  ;;  %4771 = vmatpush.msra.mxu1 %v10567_v51  ;;  %v10612_v2 = vld [vmem:[#allocation22_spill] sm:$0xff]  ;;  %v10613_v45 = vld [vmem:[#allocation16_spill] sm:$0xff]  ;;  %v10614_v39 = vld [vmem:[#allocation17_spill] sm:$0xff] }
 0xa6f   :  { %4729 = vmatpush.msrb.mxu3 %v10568_v55  ;;  %v10615_v13 = vld [vmem:[#allocation18_spill] sm:$0xff]  ;;  %v10616_v50 = vld [vmem:[#allocation12_spill] sm:$0xff]  ;;  %v10619_v48 = vld [vmem:[#allocation103_spill] sm:$0xff] }
 0xa70   :  { %4752 = vmatpush.msrb.mxu0 %v10569_v41  ;;  %4772 = vmatpush.msra.mxu1 %v10570_v43  ;;  %v10618_v42 = vld [vmem:[#allocation14_spill] sm:$0xff]  ;;  %v10620_v40 = vld [vmem:[#allocation104_spill] sm:$0xff]  ;;  %v10621_v62 = vld [vmem:[#allocation105_spill] sm:$0xff] }
 0xa71   :  { %4785 = vmatpush.msra.mxu3 %v10572_v15  ;;  %5380 = vmatmul.msk.f32.vlgmr.msra.gmra.mxu1 %vm4093_vm5, %v10065_v9  ;;  %v10622_v16 = vld [vmem:[#allocation99_spill] sm:$0xff]  ;;  %v10623_v10 = vld [vmem:[#allocation100_spill] sm:$0xff]  ;;  %v10624_v17 = vld [vmem:[#allocation101_spill] sm:$0xff] }
 0xa72   :  { %4805 = vmatpush.msra.mxu0 %v10571_v25  ;;  %4828 = vmatpush.msrb.mxu1 %v10573_v33  ;;  %v10625_v57 = vld [vmem:[#allocation95_spill] sm:$0xff]  ;;  %v10626_v21 = vld [vmem:[#allocation96_spill] sm:$0xff]  ;;  %v10627_v7 = vld [vmem:[#allocation97_spill] sm:$0xff] }
 0xa73   :  { %4786 = vmatpush.msra.mxu3 %v10575_v46  ;;  %5379 = vmatmul.msk.f32.vlgmr.msrb.gmra.mxu0 %vm4093_vm5, %v10065_v9  ;;  %v10628_v1 = vld [vmem:[#allocation91_spill] sm:$0xff]  ;;  %v10630_v51 = vld [vmem:[#allocation93_spill] sm:$0xff]  ;;  %v10632_v41 = vld [vmem:[#allocation88_spill] sm:$0xff] }
 0xa74   :  { %4806 = vmatpush.msra.mxu0 %v10574_v5  ;;  %4829 = vmatpush.msrb.mxu1 %v10576_v32  ;;  %v10631_v55 = vld [vmem:[#allocation87_spill] sm:$0xff]  ;;  %v10633_v43 = vld [vmem:[#allocation89_spill] sm:$0xff]  ;;  %v10635_v15 = vld [vmem:[#allocation84_spill] sm:$0xff] }
 0xa75   :  { %4787 = vmatpush.msra.mxu3 %v10578_v58  ;;  %v10634_v25 = vld [vmem:[#allocation83_spill] sm:$0xff]  ;;  %v10636_v33 = vld [vmem:[#allocation85_spill] sm:$0xff]  ;;  %v10638_v46 = vld [vmem:[#allocation80_spill] sm:$0xff] }
 0xa76   :  { %4807 = vmatpush.msra.mxu0 %v10577_v60  ;;  %4830 = vmatpush.msrb.mxu1 %v10579_v3  ;;  %v10637_v5 = vld [vmem:[#allocation79_spill] sm:$0xff]  ;;  %v10639_v32 = vld [vmem:[#allocation81_spill] sm:$0xff]  ;;  %v10641_v58 = vld [vmem:[#allocation76_spill] sm:$0xff] }
 0xa77   :  { %4788 = vmatpush.msra.mxu3 %v10581_v54  ;;  %v10640_v60 = vld [vmem:[#allocation75_spill] sm:$0xff]  ;;  %v10642_v3 = vld [vmem:[#allocation77_spill] sm:$0xff]  ;;  %v10644_v54 = vld [vmem:[#allocation154_spill] sm:$0xff] }
 0xa78   :  { %4808 = vmatpush.msra.mxu0 %v10580_v19  ;;  %4831 = vmatpush.msrb.mxu1 %v10582_v53  ;;  %v10643_v19 = vld [vmem:[#allocation106_spill] sm:$0xff] }
 0xa79   :  { %5378 = vmatmul.msk.f32.vlgmr.msrb.gmra.mxu3 %vm4093_vm5, %v10061_v30  ;;  %v10592_v30 = vld [vmem:[#allocation109_spill] sm:$0xff]  ;;  %v10645_v53 = vld [vmem:[#allocation170_spill] sm:$0xff] }
 0xa7a   :  { %4809 = vmatpush.msra.mxu0 %v10583_v38  ;;  %4789 = vmatpush.msra.mxu3 %v10584_v8  ;;  %v10646_v38 = vld [vmem:[#allocation102_spill] sm:$0xff]  ;;  %v10647_v8 = vld [vmem:[#allocation153_spill] sm:$0xff] }
 0xa7b   :  { %4832 = vmatpush.msrb.mxu1 %v10585_v11  ;;  %v10648_v11 = vld [vmem:[#allocation169_spill] sm:$0xff] }
 0xa7c   :  { %4810 = vmatpush.msra.mxu0 %v10586_v35  ;;  %4790 = vmatpush.msra.mxu3 %v10587_v49  ;;  %v10649_v35 = vld [vmem:[#allocation98_spill] sm:$0xff]  ;;  %v10650_v49 = vld [vmem:[#allocation152_spill] sm:$0xff] }
 0xa7d   :  { %4833 = vmatpush.msrb.mxu1 %v10588_v37  ;;  %v10651_v37 = vld [vmem:[#allocation168_spill] sm:$0xff] }
 0xa7e   :  { %4811 = vmatpush.msra.mxu0 %v10589_v63  ;;  %4791 = vmatpush.msra.mxu3 %v10590_v61  ;;  %v10652_v63 = vld [vmem:[#allocation94_spill] sm:$0xff]  ;;  %v10653_v61 = vld [vmem:[#allocation151_spill] sm:$0xff] }
 0xa7f   :  { %4834 = vmatpush.msrb.mxu1 %v10591_v47  ;;  %v10654_v47 = vld [vmem:[#allocation167_spill] sm:$0xff] }
 0xa80   :  { %4792 = vmatpush.msra.mxu3 %v10592_v30  ;;  %4812 = vmatpush.msra.mxu0 %v10593_v28  ;;  %v10655_v30 = vld [vmem:[#allocation90_spill] sm:$0xff] }
 0xa81   :  { %4835 = vmatpush.msrb.mxu1 %v10594_v44  ;;  %5381 = vmatmul.msk.f32.vlgmr.msra.gmra.mxu3 %vm4093_vm5, %v10065_v9  ;;  %v10656_v28 = vld [vmem:[#allocation150_spill] sm:$0xff] }
 0xa82   :  { %4848 = vmatpush.msrb.mxu3 %v10595_v34  ;;  %5383 = vmatmul.msk.f32.vlgmr.msrb.gmra.mxu1 %vm4093_vm5, %v10059_v26  ;;  %v10657_v44 = vld [vmem:[#allocation166_spill] sm:$0xff] }
 0xa83   :  { %4868 = vmatpush.msrb.mxu0 %v10596_v59  ;;  %4888 = vmatpush.msra.mxu1 %v10597_v4  ;;  %v10658_v34 = vld [vmem:[#allocation86_spill] sm:$0xff]  ;;  %v10659_v59 = vld [vmem:[#allocation149_spill] sm:$0xff] }
 0xa84   :  { %4849 = vmatpush.msrb.mxu3 %v10598_v14  ;;  %5382 = vmatmul.msk.f32.vlgmr.msra.gmra.mxu0 %vm4093_vm5, %v10065_v9  ;;  %v10617_v9 = vld [vmem:[#allocation13_spill] sm:$0xff]  ;;  %v10661_v14 = vld [vmem:[#allocation82_spill] sm:$0xff] }
 0xa85   :  { %4869 = vmatpush.msrb.mxu0 %v10599_v23  ;;  %4889 = vmatpush.msra.mxu1 %v10600_v36  ;;  %v10660_v4 = vld [vmem:[#allocation165_spill] sm:$0xff]  ;;  %v10662_v23 = vld [vmem:[#allocation148_spill] sm:$0xff] }
 0xa86   :  { %4850 = vmatpush.msrb.mxu3 %v10601_v27  ;;  %v10663_v36 = vld [vmem:[#allocation164_spill] sm:$0xff]  ;;  %v10664_v27 = vld [vmem:[#allocation78_spill] sm:$0xff] }
 0xa87   :  { %4870 = vmatpush.msrb.mxu0 %v10602_v24  ;;  %4890 = vmatpush.msra.mxu1 %v10603_v29  ;;  %v10665_v24 = vld [vmem:[#allocation147_spill] sm:$0xff] }
 0xa88   :  { %4851 = vmatpush.msrb.mxu3 %v10604_v0  ;;  %v10666_v29 = vld [vmem:[#allocation163_spill] sm:$0xff]  ;;  %v10667_v0 = vld [vmem:[#allocation186_spill] sm:$0xff] }
 0xa89   :  { %4871 = vmatpush.msrb.mxu0 %v10605_v22  ;;  %4891 = vmatpush.msra.mxu1 %v10606_v52  ;;  %v10668_v22 = vld [vmem:[#allocation146_spill] sm:$0xff] }
 0xa8a   :  { %4852 = vmatpush.msrb.mxu3 %v10607_v18  ;;  %v10669_v52 = vld [vmem:[#allocation162_spill] sm:$0xff]  ;;  %v10670_v18 = vld [vmem:[#allocation185_spill] sm:$0xff] }
 0xa8b   :  { %4872 = vmatpush.msrb.mxu0 %v10608_v31  ;;  %4892 = vmatpush.msra.mxu1 %v10609_v12  ;;  %v10671_v31 = vld [vmem:[#allocation145_spill] sm:$0xff] }
 0xa8c   :  { %4853 = vmatpush.msrb.mxu3 %v10610_v20  ;;  %v10672_v12 = vld [vmem:[#allocation161_spill] sm:$0xff]  ;;  %v10673_v20 = vld [vmem:[#allocation184_spill] sm:$0xff] }
 0xa8d   :  { %4873 = vmatpush.msrb.mxu0 %v10611_v6  ;;  %4893 = vmatpush.msra.mxu1 %v10612_v2  ;;  %v10674_v6 = vld [vmem:[#allocation144_spill] sm:$0xff] }
 0xa8e   :  { %4854 = vmatpush.msrb.mxu3 %v10613_v45  ;;  %v10675_v2 = vld [vmem:[#allocation160_spill] sm:$0xff]  ;;  %v10677_v45 = vld [vmem:[#allocation143_spill] sm:$0xff] }
 0xa8f   :  { %4874 = vmatpush.msrb.mxu0 %v10614_v39  ;;  %4894 = vmatpush.msra.mxu1 %v10615_v13  ;;  %v10678_v39 = vld [vmem:[#allocation159_spill] sm:$0xff]  ;;  %v10679_v13 = vld [vmem:[#allocation182_spill] sm:$0xff] }
 0xa90   :  { %4855 = vmatpush.msrb.mxu3 %v10616_v50  ;;  %v10680_v50 = vld [vmem:[#allocation142_spill] sm:$0xff] }
 0xa91   :  { %4875 = vmatpush.msrb.mxu0 %v10617_v9  ;;  %4895 = vmatpush.msra.mxu1 %v10618_v42  ;;  %v10681_v9 = vld [vmem:[#allocation158_spill] sm:$0xff]  ;;  %v10682_v42 = vld [vmem:[#allocation181_spill] sm:$0xff] }
 0xa92   :  { %5384 = vmatmul.msk.f32.vlgmr.msrb.gmra.mxu3 %vm4093_vm5, %v10059_v26  ;;  %5385 = vmatmul.msk.f32.vlgmr.msrb.gmra.mxu0 %vm4093_vm5, %v10059_v26 }
 0xa93   :  { %5386 = vmatmul.msk.f32.vlgmr.msra.gmra.mxu1 %vm4093_vm5, %v10059_v26  ;;  %4911 = vmatpush.msra.mxu3 %v10619_v48  ;;  %v10629_v26 = vld [vmem:[#allocation92_spill] sm:$0xff]  ;;  %v10683_v48 = vld [vmem:[#allocation141_spill] sm:$0xff] }
 0xa94   :  { %4931 = vmatpush.msra.mxu0 %v10620_v40  ;;  %4951 = vmatpush.msrb.mxu1 %v10621_v62  ;;  %v10684_v40 = vld [vmem:[#allocation157_spill] sm:$0xff]  ;;  %v10685_v62 = vld [vmem:[#allocation180_spill] sm:$0xff] }
 0xa95   :  { %4912 = vmatpush.msra.mxu3 %v10622_v16  ;;  %v10686_v16 = vld [vmem:[#allocation140_spill] sm:$0xff] }
 0xa96   :  { %4932 = vmatpush.msra.mxu0 %v10623_v10  ;;  %4952 = vmatpush.msrb.mxu1 %v10624_v17  ;;  %v10687_v10 = vld [vmem:[#allocation156_spill] sm:$0xff]  ;;  %v10688_v17 = vld [vmem:[#allocation179_spill] sm:$0xff] }
 0xa97   :  { %4913 = vmatpush.msra.mxu3 %v10625_v57  ;;  %v10689_v57 = vld [vmem:[#allocation139_spill] sm:$0xff] }
 0xa98   :  { %4933 = vmatpush.msra.mxu0 %v10626_v21  ;;  %4953 = vmatpush.msrb.mxu1 %v10627_v7  ;;  %v10690_v21 = vld [vmem:[#allocation202_spill] sm:$0xff]  ;;  %v10691_v7 = vld [vmem:[#allocation155_spill] sm:$0xff] }
 0xa99   :  { %4914 = vmatpush.msra.mxu3 %v10628_v1  ;;  %v10692_v1 = vld [vmem:[#allocation178_spill] sm:$0xff] }
 0xa9a   :  { %4934 = vmatpush.msra.mxu0 %v10629_v26  ;;  %4954 = vmatpush.msrb.mxu1 %v10630_v51  ;;  %v10693_v26 = vld [vmem:[#allocation201_spill] sm:$0xff] }
 0xa9b   :  { %4915 = vmatpush.msra.mxu3 %v10631_v55  ;;  %v10694_v51 = vld [vmem:[#allocation177_spill] sm:$0xff]  ;;  %v10695_v55 = vld [vmem:[#allocation200_spill] sm:$0xff] }
 0xa9c   :  { %4935 = vmatpush.msra.mxu0 %v10632_v41  ;;  %4955 = vmatpush.msrb.mxu1 %v10633_v43  ;;  %v10696_v41 = vld [vmem:[#allocation176_spill] sm:$0xff]  ;;  %v10697_v43 = vld [vmem:[#allocation199_spill] sm:$0xff] }
 0xa9d   :  { %4916 = vmatpush.msra.mxu3 %v10634_v25  ;;  %v10698_v25 = vld [vmem:[#allocation175_spill] sm:$0xff] }
 0xa9e   :  { %4936 = vmatpush.msra.mxu0 %v10635_v15  ;;  %4956 = vmatpush.msrb.mxu1 %v10636_v33  ;;  %v10699_v15 = vld [vmem:[#allocation198_spill] sm:$0xff] }
 0xa9f   :  { %4917 = vmatpush.msra.mxu3 %v10637_v5  ;;  %v10700_v33 = vld [vmem:[#allocation174_spill] sm:$0xff]  ;;  %v10701_v5 = vld [vmem:[#allocation197_spill] sm:$0xff] }
 0xaa0   :  { %4937 = vmatpush.msra.mxu0 %v10638_v46  ;;  %4957 = vmatpush.msrb.mxu1 %v10639_v32  ;;  %v10702_v46 = vld [vmem:[#allocation173_spill] sm:$0xff]  ;;  %v10703_v32 = vld [vmem:[#allocation196_spill] sm:$0xff] }
 0xaa1   :  { %4918 = vmatpush.msra.mxu3 %v10640_v60  ;;  %v10704_v60 = vld [vmem:[#allocation172_spill] sm:$0xff] }
 0xaa2   :  { %4938 = vmatpush.msra.mxu0 %v10641_v58  ;;  %4958 = vmatpush.msrb.mxu1 %v10642_v3  ;;  %v10705_v58 = vld [vmem:[#allocation195_spill] sm:$0xff] }
 0xaa3   :  { %5387 = vmatmul.msk.f32.vlgmr.msra.gmra.mxu3 %vm4093_vm5, %v10063_v56  ;;  %5388 = vmatmul.msk.f32.vlgmr.msra.gmra.mxu0 %vm4093_vm5, %v10063_v56  ;;  %v10706_v3 = vld [vmem:[#allocation171_spill] sm:$0xff] }
 0xaa4   :  { %5389 = vmatmul.msk.f32.vlgmr.msrb.gmra.mxu1 %vm4093_vm5, %v10063_v56  ;;  %4971 = vmatpush.msrb.mxu3 %v10643_v19  ;;  %v10707_v19 = vld [vmem:[#allocation194_spill] sm:$0xff] }
 0xaa5   :  { %5009 = vmatpush.msrb.mxu0 %v10644_v54  ;;  %5029 = vmatpush.msra.mxu1 %v10645_v53  ;;  %v10708_v54 = vld [vmem:[#allocation193_spill] sm:$0xff]  ;;  %v10709_v53 = vld [vmem:[#allocation192_spill] sm:$0xff] }
 0xaa6   :  { %4972 = vmatpush.msrb.mxu3 %v10646_v38  ;;  %v10710_v38 = vld [vmem:[#allocation191_spill] sm:$0xff] }
 0xaa7   :  { %5010 = vmatpush.msrb.mxu0 %v10647_v8  ;;  %5030 = vmatpush.msra.mxu1 %v10648_v11  ;;  %v10711_v8 = vld [vmem:[#allocation190_spill] sm:$0xff]  ;;  %v10712_v11 = vld [vmem:[#allocation189_spill] sm:$0xff] }
 0xaa8   :  { %4973 = vmatpush.msrb.mxu3 %v10649_v35  ;;  %v10713_v35 = vld [vmem:[#allocation188_spill] sm:$0xff] }
 0xaa9   :  { %5011 = vmatpush.msrb.mxu0 %v10650_v49  ;;  %5031 = vmatpush.msra.mxu1 %v10651_v37  ;;  %v10714_v49 = vld [vmem:[#allocation187_spill] sm:$0xff] }
 0xaaa   :  { %4974 = vmatpush.msrb.mxu3 %v10652_v63 }
 0xaab   :  { %5012 = vmatpush.msrb.mxu0 %v10653_v61  ;;  %5032 = vmatpush.msra.mxu1 %v10654_v47 }
 0xaac   :  { %4975 = vmatpush.msrb.mxu3 %v10655_v30 }
 0xaad   :  { %5013 = vmatpush.msrb.mxu0 %v10656_v28  ;;  %5033 = vmatpush.msra.mxu1 %v10657_v44 }
 0xaae   :  { %4976 = vmatpush.msrb.mxu3 %v10658_v34 }
 0xaaf   :  { %5014 = vmatpush.msrb.mxu0 %v10659_v59  ;;  %5034 = vmatpush.msra.mxu1 %v10660_v4 }
 0xab0   :  { %4977 = vmatpush.msrb.mxu3 %v10661_v14 }
 0xab1   :  { %5015 = vmatpush.msrb.mxu0 %v10662_v23  ;;  %5035 = vmatpush.msra.mxu1 %v10663_v36  ;;  %v4987_v36 = vld [vmem:[%s10310_s10] sm:$0xf] }
 0xab2   :  { %4978 = vmatpush.msrb.mxu3 %v10664_v27 }
 0xab3   :  { %5016 = vmatpush.msrb.mxu0 %v10665_v24  ;;  %5390 = vmatmul.msk.f32.vlgmr.msrb.gmra.mxu3 %vm4093_vm5, %v10063_v56  ;;  %v10676_v56 = vld [vmem:[#allocation183_spill] sm:$0xff]  ;;  %v4990_v24 = vperm.slane %v4987_v36, 1 }
 0xab4   :  { %5036 = vmatpush.msra.mxu1 %v10666_v29  ;;  %5049 = vmatpush.msra.mxu3 %v10667_v0  ;;  %v4991_v0 = vperm.slane %v4987_v36, 2 }
 0xab5   :  { %5017 = vmatpush.msrb.mxu0 %v10668_v22 }
 0xab6   :  { %5037 = vmatpush.msra.mxu1 %v10669_v52  ;;  %5050 = vmatpush.msra.mxu3 %v10670_v18 }
 0xab7   :  { %5018 = vmatpush.msrb.mxu0 %v10671_v31 }
 0xab8   :  { %5038 = vmatpush.msra.mxu1 %v10672_v12  ;;  %5051 = vmatpush.msra.mxu3 %v10673_v20 }
 0xab9   :  { %5019 = vmatpush.msrb.mxu0 %v10674_v6 }
 0xaba   :  { %5039 = vmatpush.msra.mxu1 %v10675_v2  ;;  %5052 = vmatpush.msra.mxu3 %v10676_v56 }
 0xabb   :  { %5020 = vmatpush.msrb.mxu0 %v10677_v45 }
 0xabc   :  { %5040 = vmatpush.msra.mxu1 %v10678_v39  ;;  %5053 = vmatpush.msra.mxu3 %v10679_v13  ;;  %v4989_v13 = vperm.slane %v4987_v36, 0 }
 0xabd   :  { %5021 = vmatpush.msrb.mxu0 %v10680_v50 }
 0xabe   :  { %5041 = vmatpush.msra.mxu1 %v10681_v9  ;;  %5054 = vmatpush.msra.mxu3 %v10682_v42 }
 0xabf   :  { %5022 = vmatpush.msrb.mxu0 %v10683_v48 }
 0xac0   :  { %5042 = vmatpush.msra.mxu1 %v10684_v40  ;;  %5055 = vmatpush.msra.mxu3 %v10685_v62 }
 0xac1   :  { %5023 = vmatpush.msrb.mxu0 %v10686_v16 }
 0xac2   :  { %5043 = vmatpush.msra.mxu1 %v10687_v10  ;;  %5056 = vmatpush.msra.mxu3 %v10688_v17  ;;  %v4992_v17 = vperm.slane %v4987_v36, 3 }
 0xac3   :  { %5024 = vmatpush.msrb.mxu0 %v10689_v57 }
 0xac4   :  { %5044 = vmatpush.msra.mxu1 %v10691_v7  ;;  %5057 = vmatpush.msra.mxu3 %v10692_v1  ;;  %v5492_v1 = vld [vmem:[%s10312_s12] ss:$0 sm:$0xff] }
 0xac5   :  { %5069 = vmatpush.msra.mxu0 %v10690_v21 }
 0xac6   :  { %5058 = vmatpush.msra.mxu3 %v10694_v51 }
 0xac7   :  { %5070 = vmatpush.msra.mxu0 %v10693_v26 }
 0xac8   :  { %5059 = vmatpush.msra.mxu3 %v10696_v41 }
 0xac9   :  { %5071 = vmatpush.msra.mxu0 %v10695_v55 }
 0xaca   :  { %5060 = vmatpush.msra.mxu3 %v10698_v25 }
 0xacb   :  { %5072 = vmatpush.msra.mxu0 %v10697_v43 }
 0xacc   :  { %5061 = vmatpush.msra.mxu3 %v10700_v33 }
 0xacd   :  { %5073 = vmatpush.msra.mxu0 %v10699_v15 }
 0xace   :  { %5062 = vmatpush.msra.mxu3 %v10702_v46 }
 0xacf   :  { %5074 = vmatpush.msra.mxu0 %v10701_v5 }
 0xad0   :  { %5063 = vmatpush.msra.mxu3 %v10704_v60 }
 0xad1   :  { %5075 = vmatpush.msra.mxu0 %v10703_v32 }
 0xad2   :  { %5064 = vmatpush.msra.mxu3 %v10706_v3 }
 0xad3   :  { %5076 = vmatpush.msra.mxu0 %v10705_v58 }
 0xad5   :  { %5077 = vmatpush.msra.mxu0 %v10707_v19 }
 0xad7   :  { %5078 = vmatpush.msra.mxu0 %v10708_v54 }
 0xad9   :  { %5079 = vmatpush.msra.mxu0 %v10709_v53 }
 0xadb   :  { %5080 = vmatpush.msra.mxu0 %v10710_v38 }
 0xadd   :  { %5081 = vmatpush.msra.mxu0 %v10711_v8 }
 0xade   :  { %v4711_v63 = vpop.f32.mrf.mxu1 }
 0xadf   :  { %5082 = vmatpush.msra.mxu0 %v10712_v11 }
 0xae1   :  { %5083 = vmatpush.msra.mxu0 %v10713_v35 }
 0xae2   :  { %v4691_v37 = vpop.f32.mrf.mxu0  ;;  %v4671_v61 = vpop.f32.mrf.mxu3 }
 0xae3   :  { %5084 = vmatpush.msra.mxu0 %v10714_v49 }
 0xaee   :  { %v4774_v30 = vpop.f32.mrf.mxu1 }
 0xaf0   :  { %v4754_v47 = vpop.f32.mrf.mxu0 }
 0xafc   :  { %v4731_v28 = vpop.f32.mrf.mxu3 }
 0xaff   :  { %v4837_v34 = vpop.f32.mrf.mxu1 }
 0xb00   :  { %v4838_v45 = vadd.f32 %v4837_v34, %v4671_v61 }
 0xb01   :  { %v4814_v44 = vpop.f32.mrf.mxu0 }
 0xb04   :  { %v4794_v59 = vpop.f32.mrf.mxu3 }
 0xb0f   :  { %v4877_v4 = vpop.f32.mrf.mxu0 }
 0xb10   :  { %v4897_v14 = vpop.f32.mrf.mxu1  ;;  %v4878_v22 = vadd.f32 %v4877_v4, %v4711_v63 }
 0xb11   :  { %v4898_v16 = vadd.f32 %v4897_v14, %v4731_v28 }
 0xb15   :  { %v4857_v23 = vpop.f32.mrf.mxu3 }
 0xb16   :  { %v4858_v52 = vadd.f32 %v4857_v23, %v4691_v37 }
 0xb20   :  { %v4940_v27 = vpop.f32.mrf.mxu0 }
 0xb21   :  { %v4960_v29 = vpop.f32.mrf.mxu1  ;;  %v4941_v18 = vadd.f32 %v4940_v27, %v4774_v30 }
 0xb22   :  { %v4961_v31 = vadd.f32 %v4960_v29, %v4794_v59 }
 0xb23   :  { %v4984_v12 = vadd.f32 %v4941_v18, %v4858_v52 }
 0xb24   :  { %v4985_v20 = vadd.f32 %v4961_v31, %v4878_v22 }
 0xb25   :  { %v4998_v6 = vadd.f32 %v4990_v24, %v4984_v12 }
 0xb26   :  { %v4999_v2 = vadd.f32 %v4991_v0, %v4985_v20  ;;  %v4920_v56 = vpop.f32.mrf.mxu3 }
 0xb27   :  { %v4921_v39 = vadd.f32 %v4920_v56, %v4754_v47  ;;  %v5002_v50 = vmax.f32 %v4998_v6, 0.0 }
 0xb28   :  { %v5003_v9 = vmax.f32 %v4999_v2, 0.0 }
 0xb29   :  { %v4983_v42 = vadd.f32 %v4921_v39, %v4838_v45  ;;  %5045 = vmatmul.f32.vlgmr.msra.gmra.mxu1 %v5002_v50 }
 0xb2a   :  { %5065 = vmatmul.f32.vlgmr.msra.gmra.mxu3 %v5003_v9 }
 0xb2b   :  { %v4997_v48 = vadd.f32 %v4989_v13, %v4983_v42 }
 0xb2d   :  { %v5001_v40 = vmax.f32 %v4997_v48, 0.0 }
 0xb2f   :  { %5025 = vmatmul.f32.vlgmr.msrb.gmra.mxu0 %v5001_v40 }
 0xb36   :  { %v4980_v62 = vpop.f32.mrf.mxu3 }
 0xb37   :  { %v4981_v10 = vadd.f32 %v4980_v62, %v4814_v44 }
 0xb39   :  { %v4986_v57 = vadd.f32 %v4981_v10, %v4898_v16 }
 0xb3b   :  { %v5000_v21 = vadd.f32 %v4992_v17, %v4986_v57 }
 0xb3d   :  { %v5004_v7 = vmax.f32 %v5000_v21, 0.0 }
 0xb3f   :  { %5085 = vmatmul.f32.vlgmr.msra.gmra.mxu0 %v5004_v7 }
 0xba6   :  { %v5046_v55 = vpop.f32.mrf.mxu1 }
 0xbac   :  { %v5026_v26 = vpop.f32.mrf.mxu0 }
 0xbad   :  { %v5027_v51 = vadd.f32 %v5492_v1, %v5026_v26  ;;  %v5066_v43 = vpop.f32.mrf.mxu3 }
 0xbaf   :  { %v5047_v41 = vadd.f32 %v5046_v55, %v5027_v51 }
 0xbb1   :  { %v5067_v25 = vadd.f32 %v5066_v43, %v5047_v41 }
 0xbbc   :  { %v5086_v15 = vpop.f32.mrf.mxu0 }
 0xbbd   :  { %v5087_v33 = vadd.f32 %v5086_v15, %v5067_v25 }
 0xbbf   :  { %5089 = vst [vmem:[%s10313_s13] sm:$0xff] %v5087_v33 }
 0xbc0   :  { %5094 = vsyncmov [#allocation6] }
 0xbc3   :  { %s5095_s5 = vpop.sfrf %5094 }
 0xbc4   :  { %p5391_p0 = scmp.ne.s32.totalorder %s5095_s5, 0 }
 0xbc6   :  { %5099 = shalt.err (%p5391_p0)  }
 0xbc7   :  { %5101 = vsyncmov [#allocation6 + $0x1] }
 0xbca   :  { %s5102_s4 = vpop.sfrf %5101 }
 0xbcb   :  { %p5392_p1 = scmp.ne.s32.totalorder %s5102_s4, 0 }
 0xbcd   :  { %5106 = shalt.err (%p5392_p1)  }

</bundles_post_ra>
